<compile_context>
chip_gen: v6e
topology: v6e:2x2x1
jax: 0.10.0
libtpu: 0.0.40
codegen_flags: <defaults>
</compile_context>

<pallas_src>
import numpy as np

import jax
import jax.numpy as jnp
from jax.experimental import pallas as pl
from jax.experimental.pallas import tpu as pltpu


# ----------------------------- Fused Pallas kernel -------------------------

def _fused_a2c_kernel(x_ref, h_ref, c_ref, *rest):
    """Whole A2CModel forward in one kernel.

    rest = [G1, W1, b1, ..., G4, W4, b4, w_x, w_h, b_lstm, w_head, b_head,
            head_out, h_out, c_out]

    Gl : (9, B*OHl*OWl, B*Hl*Wl) bf16  0/1 im2col gather operator (tap-major)
    Wl : (9, Cin_l, Cout_l)      bf16  per-tap conv weights (weight[:, :, kh, kw].T)
    bl : (1, Cout_l)             f32   conv bias (zero-init in the module)
    """
    n_conv = 4
    conv_refs = rest[:3 * n_conv]
    wx_ref, wh_ref, bl_ref, whd_ref, bhd_ref = rest[3 * n_conv:3 * n_conv + 5]
    head_ref, h_out_ref, c_out_ref = rest[3 * n_conv + 5:]

    # --- conv stack (NHWC rows, channels on lanes), fully VMEM-resident -----
    x = x_ref[...].astype(jnp.bfloat16)                      # (B*H*W, Cin)
    for l in range(n_conv):
        g_ref = conv_refs[3 * l]
        w_ref = conv_refs[3 * l + 1]
        b_ref = conv_refs[3 * l + 2]
        rows_out = g_ref.shape[1]
        c_out = w_ref.shape[2]
        acc = jnp.zeros((rows_out, c_out), jnp.float32)
        for t in range(9):                                   # 3x3 taps, unrolled
            p_t = jnp.dot(g_ref[t], x, preferred_element_type=jnp.float32)
            acc = acc + jnp.dot(p_t.astype(jnp.bfloat16), w_ref[t],
                                preferred_element_type=jnp.float32)
        x = jnp.maximum(acc + b_ref[...], 0.0).astype(jnp.bfloat16)
    feat = x                                                 # (B, 96) bf16

    # --- LSTMCell (PyTorch gate order i, f, g, o; biases zero-initialized) --
    hidden = c_ref.shape[1]
    gates = (jnp.dot(feat, wx_ref[...], preferred_element_type=jnp.float32)
             + jnp.dot(h_ref[...].astype(jnp.bfloat16), wh_ref[...],
                       preferred_element_type=jnp.float32)
             + bl_ref[...])                                  # f32 gates
    i_g = jax.nn.sigmoid(gates[:, 0:hidden])
    f_g = jax.nn.sigmoid(gates[:, hidden:2 * hidden])
    g_g = jnp.tanh(gates[:, 2 * hidden:3 * hidden])
    o_g = jax.nn.sigmoid(gates[:, 3 * hidden:4 * hidden])
    c_new = f_g * c_ref[...] + i_g * g_g                     # f32 cell state
    h_new = o_g * jnp.tanh(c_new)
    h_out_ref[...] = h_new.astype(h_out_ref.dtype)
    c_out_ref[...] = c_new.astype(c_out_ref.dtype)

    # --- fused policy + critic head (lane-padded to 128 columns) ------------
    head = (jnp.dot(h_new.astype(jnp.bfloat16), whd_ref[...],
                    preferred_element_type=jnp.float32) + bhd_ref[...])
    head_ref[...] = head.astype(head_ref.dtype)


# ----------------------------- Wrapper --------------------------------------

def a2c_forward(params, states, hidden_state, cell_state, n_action=7):
    """states: (B, C, H, W) NCHW (PyTorch convention); h/c: (B, 512)."""
    B, C, H, W = states.shape
    hidden = hidden_state.shape[1]
    head_n = params["w_head"].shape[1]
    # Single cheap layout op outside the kernel: NCHW -> (B*H*W, C) NHWC rows.
    x = jnp.transpose(states, (0, 2, 3, 1)).reshape(B * H * W, C)

    inputs = [x, hidden_state, cell_state]
    for (g, w, b) in params["convs"]:
        inputs += [g, w, b]
    inputs += [params["w_x"], params["w_h"], params["b_lstm"],
               params["w_head"], params["b_head"]]

    vmem = pl.BlockSpec(memory_space=pltpu.MemorySpace.VMEM)
    head, h_new, c_new = pl.pallas_call(
        _fused_a2c_kernel,
        out_shape=(jax.ShapeDtypeStruct((B, head_n), jnp.float32),
                   jax.ShapeDtypeStruct((B, hidden), jnp.float32),
                   jax.ShapeDtypeStruct((B, hidden), jnp.float32)),
        in_specs=[vmem] * len(inputs),
        out_specs=(vmem, vmem, vmem),
        compiler_params=pltpu.CompilerParams(
            vmem_limit_bytes=32 * 1024 * 1024),   # conservative; fits v5e & v7x
    )(*inputs)

    logits = head[:, :n_action]
    value = head[:, n_action:n_action + 1]
    return logits, value, h_new, c_new


# ----------------------------- Host-side packing -----------------------------

def _xavier_uniform(key, shape, fan_in, fan_out):
    bound = (6.0 / (fan_in + fan_out)) ** 0.5
    return jax.random.uniform(key, shape, jnp.float32, -bound, bound)


def _build_gather_operator(batch, h, w, k=3, stride=2, pad=1):
    """0/1 operator G (9, B*OH*OW, B*H*W): (G[t] @ X)[b*OH*OW + q] is the input
    pixel feeding kernel tap t of output position q (all-zero row = padding)."""
    oh = (h + 2 * pad - k) // stride + 1
    ow = (w + 2 * pad - k) // stride + 1
    g = np.zeros((k * k, batch * oh * ow, batch * h * w), np.float32)
    for kh in range(k):
        for kw in range(k):
            t = kh * k + kw
            for b in range(batch):
                for r in range(oh):
                    ih = stride * r + kh - pad
                    if not 0 <= ih < h:
                        continue
                    for c in range(ow):
                        iw = stride * c + kw - pad
                        if not 0 <= iw < w:
                            continue
                        g[t, b * oh * ow + r * ow + c,
                          b * h * w + ih * w + iw] = 1.0
    return jnp.asarray(g, jnp.bfloat16), oh, ow


def init_params(key, batch, n_history=4, n_action=7, hidden=512,
                input_hw=(16, 16)):
    """Kernel-packed (bf16 MXU operand) params + f32 PyTorch-layout reference
    params.  Matches A2CModel init: xavier_uniform conv/linear weights, zero
    conv/linear biases, U(-1/sqrt(H), 1/sqrt(H)) LSTM weights, zero LSTM biases."""
    keys = jax.random.split(key, 8)
    chans = [(n_history, 32), (32, 64), (64, 96), (96, 96)]
    convs, convs_ref = [], []
    h, w = input_hw
    for i, (cin, cout) in enumerate(chans):
        wt = _xavier_uniform(keys[i], (cout, cin, 3, 3), cin * 9, cout * 9)
        bias = jnp.zeros((1, cout), jnp.float32)
        # (Cout, Cin, kh, kw) -> (kh, kw, Cin, Cout) -> (9, Cin, Cout)
        w_taps = jnp.transpose(wt, (2, 3, 1, 0)).reshape(9, cin, cout)
        g, oh, ow = _build_gather_operator(batch, h, w)
        convs.append((g, w_taps.astype(jnp.bfloat16), bias))
        convs_ref.append((wt, bias))
        h, w = oh, ow
    conv_out = chans[-1][1] * h * w                          # 96 * 1 * 1

    bd = 1.0 / (hidden ** 0.5)
    w_ih = jax.random.uniform(keys[4], (4 * hidden, conv_out), jnp.float32, -bd, bd)
    w_hh = jax.random.uniform(keys[5], (4 * hidden, hidden), jnp.float32, -bd, bd)

    w_pol = _xavier_uniform(keys[6], (n_action, hidden), hidden, n_action)
    w_val = _xavier_uniform(keys[7], (1, hidden), hidden, 1)
    head_n = ((n_action + 1 + 127) // 128) * 128
    w_head = jnp.zeros((hidden, head_n), jnp.float32)
    w_head = w_head.at[:, :n_action].set(w_pol.T)
    w_head = w_head.at[:, n_action:n_action + 1].set(w_val.T)

    params = {
        "convs": convs,
        "w_x": w_ih.T.astype(jnp.bfloat16),                  # (conv_out, 4H)
        "w_h": w_hh.T.astype(jnp.bfloat16),                  # (H, 4H)
        "b_lstm": jnp.zeros((1, 4 * hidden), jnp.float32),   # b_ih + b_hh == 0
        "w_head": w_head.astype(jnp.bfloat16),               # (H, 128) padded
        "b_head": jnp.zeros((1, head_n), jnp.float32),
    }
    ref_params = {
        "convs": convs_ref, "w_ih": w_ih, "w_hh": w_hh,
        "w_pol": w_pol, "w_val": w_val,
    }
    return params, ref_params


# ----------------------------- Pure-JAX f32 reference ------------------------

def a2c_forward_ref(ref_params, states, hidden_state, cell_state, n_action=7):
    x = states
    for (wt, b) in ref_params["convs"]:
        x = jax.lax.conv_general_dilated(
            x, wt, window_strides=(2, 2), padding=((1, 1), (1, 1)),
            dimension_numbers=("NCHW", "OIHW", "NCHW"))
        x = jnp.maximum(x + b.reshape(1, -1, 1, 1), 0.0)
    feat = x.reshape(x.shape[0], -1)
    hid = hidden_state.shape[1]
    gates = feat @ ref_params["w_ih"].T + hidden_state @ ref_params["w_hh"].T
    i = jax.nn.sigmoid(gates[:, :hid])
    f = jax.nn.sigmoid(gates[:, hid:2 * hid])
    g = jnp.tanh(gates[:, 2 * hid:3 * hid])
    o = jax.nn.sigmoid(gates[:, 3 * hid:])
    c_new = f * cell_state + i * g
    h_new = o * jnp.tanh(c_new)
    logits = h_new @ ref_params["w_pol"].T
    value = h_new @ ref_params["w_val"].T
    return logits, value, h_new, c_new


# ----------------------------- Demo ------------------------------------------

if __name__ == "__main__":
    B, C, H, W = 2, 4, 16, 16            # spatial 16 -> 8 -> 4 -> 2 -> 1
    HIDDEN, N_ACTION = 512, 7

    key = jax.random.PRNGKey(0)
    k_params, k_states, k_h, k_c = jax.random.split(key, 4)
    params, ref_params = init_params(k_params, batch=B, n_history=C,
                                     n_action=N_ACTION, hidden=HIDDEN,
                                     input_hw=(H, W))
    states = jax.random.normal(k_states, (B, C, H, W), jnp.float32)
    hidden_state = jax.random.normal(k_h, (B, HIDDEN), jnp.float32)
    cell_state = jax.random.normal(k_c, (B, HIDDEN), jnp.float32)

    fwd = jax.jit(a2c_forward, static_argnames=("n_action",))
    logits, value, next_h, next_c = fwd(params, states, hidden_state,
                                        cell_state, n_action=N_ACTION)
    jax.block_until_ready((logits, value, next_h, next_c))

    assert logits.shape == (B, N_ACTION)
    assert value.shape == (B, 1)
    assert next_h.shape == (B, HIDDEN)
    assert next_c.shape == (B, HIDDEN)

    # Correctness vs the f32 PyTorch-layout reference (bf16 MXU operands give a
    # small, bounded drift; accumulation and all elementwise math are f32).
    r_logits, r_value, r_h, r_c = a2c_forward_ref(
        ref_params, states, hidden_state, cell_state, n_action=N_ACTION)
    for got, ref in ((logits, r_logits), (value, r_value),
                     (next_h, r_h), (next_c, r_c)):
        assert jnp.allclose(got, ref, atol=7e-2, rtol=7e-2), \
            float(jnp.max(jnp.abs(got - ref)))

    print("KERNEL_OK")
</pallas_src>

<mosaic_0001>
module attributes {stable_mosaic.version = 11 : i64} {
  func.func @_fused_a2c_kernel(%arg0: memref<512x4xf32, #tpu.memory_space<vmem>>, %arg1: memref<2x512xf32, #tpu.memory_space<vmem>>, %arg2: memref<2x512xf32, #tpu.memory_space<vmem>>, %arg3: memref<9x128x512xbf16, #tpu.memory_space<vmem>>, %arg4: memref<9x4x32xbf16, #tpu.memory_space<vmem>>, %arg5: memref<1x32xf32, #tpu.memory_space<vmem>>, %arg6: memref<9x32x128xbf16, #tpu.memory_space<vmem>>, %arg7: memref<9x32x64xbf16, #tpu.memory_space<vmem>>, %arg8: memref<1x64xf32, #tpu.memory_space<vmem>>, %arg9: memref<9x8x32xbf16, #tpu.memory_space<vmem>>, %arg10: memref<9x64x96xbf16, #tpu.memory_space<vmem>>, %arg11: memref<1x96xf32, #tpu.memory_space<vmem>>, %arg12: memref<9x2x8xbf16, #tpu.memory_space<vmem>>, %arg13: memref<9x96x96xbf16, #tpu.memory_space<vmem>>, %arg14: memref<1x96xf32, #tpu.memory_space<vmem>>, %arg15: memref<96x2048xbf16, #tpu.memory_space<vmem>>, %arg16: memref<512x2048xbf16, #tpu.memory_space<vmem>>, %arg17: memref<1x2048xf32, #tpu.memory_space<vmem>>, %arg18: memref<512x128xbf16, #tpu.memory_space<vmem>>, %arg19: memref<1x128xf32, #tpu.memory_space<vmem>>, %arg20: memref<2x128xf32, #tpu.memory_space<vmem>>, %arg21: memref<2x512xf32, #tpu.memory_space<vmem>>, %arg22: memref<2x512xf32, #tpu.memory_space<vmem>>) attributes {dimension_semantics = [], scalar_prefetch = 0 : i64, scratch_operands = 0 : i64, tpu.core_type = #tpu.core_type<tc>} {
    %c0 = arith.constant 0 : index
    %c0_0 = arith.constant 0 : index
    %0 = vector.load %arg0[%c0, %c0_0] : memref<512x4xf32, #tpu.memory_space<vmem>>, vector<512x4xf32>
    %1 = arith.truncf %0 : vector<512x4xf32> to vector<512x4xbf16>
    %cst = arith.constant 0.000000e+00 : f32
    %2 = vector.broadcast %cst : f32 to vector<128x32xf32>
    %c0_1 = arith.constant 0 : index
    %c0_2 = arith.constant 0 : index
    %c0_3 = arith.constant 0 : index
    %3 = vector.load %arg3[%c0_1, %c0_2, %c0_3] : memref<9x128x512xbf16, #tpu.memory_space<vmem>>, vector<1x128x512xbf16>
    %4 = vector.shape_cast %3 : vector<1x128x512xbf16> to vector<128x512xbf16>
    %cst_4 = arith.constant dense<0.000000e+00> : vector<128x4xf32>
    %5 = tpu.matmul %4, %1, %cst_4 {dimension_numbers = #tpu.dot_dimension_numbers<[1], [0], [0], [1], [0, 0, 1, 1], [], []>} : vector<128x512xbf16>, vector<512x4xbf16>, vector<128x4xf32> -> vector<128x4xf32>
    %6 = arith.truncf %5 : vector<128x4xf32> to vector<128x4xbf16>
    %c0_5 = arith.constant 0 : index
    %c0_6 = arith.constant 0 : index
    %c0_7 = arith.constant 0 : index
    %7 = vector.load %arg4[%c0_5, %c0_6, %c0_7] : memref<9x4x32xbf16, #tpu.memory_space<vmem>>, vector<1x4x32xbf16>
    %8 = vector.shape_cast %7 : vector<1x4x32xbf16> to vector<4x32xbf16>
    %cst_8 = arith.constant dense<0.000000e+00> : vector<128x32xf32>
    %9 = tpu.matmul %6, %8, %cst_8 {dimension_numbers = #tpu.dot_dimension_numbers<[1], [0], [0], [1], [0, 0, 1, 1], [], []>} : vector<128x4xbf16>, vector<4x32xbf16>, vector<128x32xf32> -> vector<128x32xf32>
    %10 = arith.addf %2, %9 : vector<128x32xf32>
    %c1 = arith.constant 1 : index
    %c0_9 = arith.constant 0 : index
    %c0_10 = arith.constant 0 : index
    %11 = vector.load %arg3[%c1, %c0_9, %c0_10] : memref<9x128x512xbf16, #tpu.memory_space<vmem>>, vector<1x128x512xbf16>
    %12 = vector.shape_cast %11 : vector<1x128x512xbf16> to vector<128x512xbf16>
    %cst_11 = arith.constant dense<0.000000e+00> : vector<128x4xf32>
    %13 = tpu.matmul %12, %1, %cst_11 {dimension_numbers = #tpu.dot_dimension_numbers<[1], [0], [0], [1], [0, 0, 1, 1], [], []>} : vector<128x512xbf16>, vector<512x4xbf16>, vector<128x4xf32> -> vector<128x4xf32>
    %14 = arith.truncf %13 : vector<128x4xf32> to vector<128x4xbf16>
    %c1_12 = arith.constant 1 : index
    %c0_13 = arith.constant 0 : index
    %c0_14 = arith.constant 0 : index
    %15 = vector.load %arg4[%c1_12, %c0_13, %c0_14] : memref<9x4x32xbf16, #tpu.memory_space<vmem>>, vector<1x4x32xbf16>
    %16 = vector.shape_cast %15 : vector<1x4x32xbf16> to vector<4x32xbf16>
    %cst_15 = arith.constant dense<0.000000e+00> : vector<128x32xf32>
    %17 = tpu.matmul %14, %16, %cst_15 {dimension_numbers = #tpu.dot_dimension_numbers<[1], [0], [0], [1], [0, 0, 1, 1], [], []>} : vector<128x4xbf16>, vector<4x32xbf16>, vector<128x32xf32> -> vector<128x32xf32>
    %18 = arith.addf %10, %17 : vector<128x32xf32>
    %c2 = arith.constant 2 : index
    %c0_16 = arith.constant 0 : index
    %c0_17 = arith.constant 0 : index
    %19 = vector.load %arg3[%c2, %c0_16, %c0_17] : memref<9x128x512xbf16, #tpu.memory_space<vmem>>, vector<1x128x512xbf16>
    %20 = vector.shape_cast %19 : vector<1x128x512xbf16> to vector<128x512xbf16>
    %cst_18 = arith.constant dense<0.000000e+00> : vector<128x4xf32>
    %21 = tpu.matmul %20, %1, %cst_18 {dimension_numbers = #tpu.dot_dimension_numbers<[1], [0], [0], [1], [0, 0, 1, 1], [], []>} : vector<128x512xbf16>, vector<512x4xbf16>, vector<128x4xf32> -> vector<128x4xf32>
    %22 = arith.truncf %21 : vector<128x4xf32> to vector<128x4xbf16>
    %c2_19 = arith.constant 2 : index
    %c0_20 = arith.constant 0 : index
    %c0_21 = arith.constant 0 : index
    %23 = vector.load %arg4[%c2_19, %c0_20, %c0_21] : memref<9x4x32xbf16, #tpu.memory_space<vmem>>, vector<1x4x32xbf16>
    %24 = vector.shape_cast %23 : vector<1x4x32xbf16> to vector<4x32xbf16>
    %cst_22 = arith.constant dense<0.000000e+00> : vector<128x32xf32>
    %25 = tpu.matmul %22, %24, %cst_22 {dimension_numbers = #tpu.dot_dimension_numbers<[1], [0], [0], [1], [0, 0, 1, 1], [], []>} : vector<128x4xbf16>, vector<4x32xbf16>, vector<128x32xf32> -> vector<128x32xf32>
    %26 = arith.addf %18, %25 : vector<128x32xf32>
    %c3 = arith.constant 3 : index
    %c0_23 = arith.constant 0 : index
    %c0_24 = arith.constant 0 : index
    %27 = vector.load %arg3[%c3, %c0_23, %c0_24] : memref<9x128x512xbf16, #tpu.memory_space<vmem>>, vector<1x128x512xbf16>
    %28 = vector.shape_cast %27 : vector<1x128x512xbf16> to vector<128x512xbf16>
    %cst_25 = arith.constant dense<0.000000e+00> : vector<128x4xf32>
    %29 = tpu.matmul %28, %1, %cst_25 {dimension_numbers = #tpu.dot_dimension_numbers<[1], [0], [0], [1], [0, 0, 1, 1], [], []>} : vector<128x512xbf16>, vector<512x4xbf16>, vector<128x4xf32> -> vector<128x4xf32>
    %30 = arith.truncf %29 : vector<128x4xf32> to vector<128x4xbf16>
    %c3_26 = arith.constant 3 : index
    %c0_27 = arith.constant 0 : index
    %c0_28 = arith.constant 0 : index
    %31 = vector.load %arg4[%c3_26, %c0_27, %c0_28] : memref<9x4x32xbf16, #tpu.memory_space<vmem>>, vector<1x4x32xbf16>
    %32 = vector.shape_cast %31 : vector<1x4x32xbf16> to vector<4x32xbf16>
    %cst_29 = arith.constant dense<0.000000e+00> : vector<128x32xf32>
    %33 = tpu.matmul %30, %32, %cst_29 {dimension_numbers = #tpu.dot_dimension_numbers<[1], [0], [0], [1], [0, 0, 1, 1], [], []>} : vector<128x4xbf16>, vector<4x32xbf16>, vector<128x32xf32> -> vector<128x32xf32>
    %34 = arith.addf %26, %33 : vector<128x32xf32>
    %c4 = arith.constant 4 : index
    %c0_30 = arith.constant 0 : index
    %c0_31 = arith.constant 0 : index
    %35 = vector.load %arg3[%c4, %c0_30, %c0_31] : memref<9x128x512xbf16, #tpu.memory_space<vmem>>, vector<1x128x512xbf16>
    %36 = vector.shape_cast %35 : vector<1x128x512xbf16> to vector<128x512xbf16>
    %cst_32 = arith.constant dense<0.000000e+00> : vector<128x4xf32>
    %37 = tpu.matmul %36, %1, %cst_32 {dimension_numbers = #tpu.dot_dimension_numbers<[1], [0], [0], [1], [0, 0, 1, 1], [], []>} : vector<128x512xbf16>, vector<512x4xbf16>, vector<128x4xf32> -> vector<128x4xf32>
    %38 = arith.truncf %37 : vector<128x4xf32> to vector<128x4xbf16>
    %c4_33 = arith.constant 4 : index
    %c0_34 = arith.constant 0 : index
    %c0_35 = arith.constant 0 : index
    %39 = vector.load %arg4[%c4_33, %c0_34, %c0_35] : memref<9x4x32xbf16, #tpu.memory_space<vmem>>, vector<1x4x32xbf16>
    %40 = vector.shape_cast %39 : vector<1x4x32xbf16> to vector<4x32xbf16>
    %cst_36 = arith.constant dense<0.000000e+00> : vector<128x32xf32>
    %41 = tpu.matmul %38, %40, %cst_36 {dimension_numbers = #tpu.dot_dimension_numbers<[1], [0], [0], [1], [0, 0, 1, 1], [], []>} : vector<128x4xbf16>, vector<4x32xbf16>, vector<128x32xf32> -> vector<128x32xf32>
    %42 = arith.addf %34, %41 : vector<128x32xf32>
    %c5 = arith.constant 5 : index
    %c0_37 = arith.constant 0 : index
    %c0_38 = arith.constant 0 : index
    %43 = vector.load %arg3[%c5, %c0_37, %c0_38] : memref<9x128x512xbf16, #tpu.memory_space<vmem>>, vector<1x128x512xbf16>
    %44 = vector.shape_cast %43 : vector<1x128x512xbf16> to vector<128x512xbf16>
    %cst_39 = arith.constant dense<0.000000e+00> : vector<128x4xf32>
    %45 = tpu.matmul %44, %1, %cst_39 {dimension_numbers = #tpu.dot_dimension_numbers<[1], [0], [0], [1], [0, 0, 1, 1], [], []>} : vector<128x512xbf16>, vector<512x4xbf16>, vector<128x4xf32> -> vector<128x4xf32>
    %46 = arith.truncf %45 : vector<128x4xf32> to vector<128x4xbf16>
    %c5_40 = arith.constant 5 : index
    %c0_41 = arith.constant 0 : index
    %c0_42 = arith.constant 0 : index
    %47 = vector.load %arg4[%c5_40, %c0_41, %c0_42] : memref<9x4x32xbf16, #tpu.memory_space<vmem>>, vector<1x4x32xbf16>
    %48 = vector.shape_cast %47 : vector<1x4x32xbf16> to vector<4x32xbf16>
    %cst_43 = arith.constant dense<0.000000e+00> : vector<128x32xf32>
    %49 = tpu.matmul %46, %48, %cst_43 {dimension_numbers = #tpu.dot_dimension_numbers<[1], [0], [0], [1], [0, 0, 1, 1], [], []>} : vector<128x4xbf16>, vector<4x32xbf16>, vector<128x32xf32> -> vector<128x32xf32>
    %50 = arith.addf %42, %49 : vector<128x32xf32>
    %c6 = arith.constant 6 : index
    %c0_44 = arith.constant 0 : index
    %c0_45 = arith.constant 0 : index
    %51 = vector.load %arg3[%c6, %c0_44, %c0_45] : memref<9x128x512xbf16, #tpu.memory_space<vmem>>, vector<1x128x512xbf16>
    %52 = vector.shape_cast %51 : vector<1x128x512xbf16> to vector<128x512xbf16>
    %cst_46 = arith.constant dense<0.000000e+00> : vector<128x4xf32>
    %53 = tpu.matmul %52, %1, %cst_46 {dimension_numbers = #tpu.dot_dimension_numbers<[1], [0], [0], [1], [0, 0, 1, 1], [], []>} : vector<128x512xbf16>, vector<512x4xbf16>, vector<128x4xf32> -> vector<128x4xf32>
    %54 = arith.truncf %53 : vector<128x4xf32> to vector<128x4xbf16>
    %c6_47 = arith.constant 6 : index
    %c0_48 = arith.constant 0 : index
    %c0_49 = arith.constant 0 : index
    %55 = vector.load %arg4[%c6_47, %c0_48, %c0_49] : memref<9x4x32xbf16, #tpu.memory_space<vmem>>, vector<1x4x32xbf16>
    %56 = vector.shape_cast %55 : vector<1x4x32xbf16> to vector<4x32xbf16>
    %cst_50 = arith.constant dense<0.000000e+00> : vector<128x32xf32>
    %57 = tpu.matmul %54, %56, %cst_50 {dimension_numbers = #tpu.dot_dimension_numbers<[1], [0], [0], [1], [0, 0, 1, 1], [], []>} : vector<128x4xbf16>, vector<4x32xbf16>, vector<128x32xf32> -> vector<128x32xf32>
    %58 = arith.addf %50, %57 : vector<128x32xf32>
    %c7 = arith.constant 7 : index
    %c0_51 = arith.constant 0 : index
    %c0_52 = arith.constant 0 : index
    %59 = vector.load %arg3[%c7, %c0_51, %c0_52] : memref<9x128x512xbf16, #tpu.memory_space<vmem>>, vector<1x128x512xbf16>
    %60 = vector.shape_cast %59 : vector<1x128x512xbf16> to vector<128x512xbf16>
    %cst_53 = arith.constant dense<0.000000e+00> : vector<128x4xf32>
    %61 = tpu.matmul %60, %1, %cst_53 {dimension_numbers = #tpu.dot_dimension_numbers<[1], [0], [0], [1], [0, 0, 1, 1], [], []>} : vector<128x512xbf16>, vector<512x4xbf16>, vector<128x4xf32> -> vector<128x4xf32>
    %62 = arith.truncf %61 : vector<128x4xf32> to vector<128x4xbf16>
    %c7_54 = arith.constant 7 : index
    %c0_55 = arith.constant 0 : index
    %c0_56 = arith.constant 0 : index
    %63 = vector.load %arg4[%c7_54, %c0_55, %c0_56] : memref<9x4x32xbf16, #tpu.memory_space<vmem>>, vector<1x4x32xbf16>
    %64 = vector.shape_cast %63 : vector<1x4x32xbf16> to vector<4x32xbf16>
    %cst_57 = arith.constant dense<0.000000e+00> : vector<128x32xf32>
    %65 = tpu.matmul %62, %64, %cst_57 {dimension_numbers = #tpu.dot_dimension_numbers<[1], [0], [0], [1], [0, 0, 1, 1], [], []>} : vector<128x4xbf16>, vector<4x32xbf16>, vector<128x32xf32> -> vector<128x32xf32>
    %66 = arith.addf %58, %65 : vector<128x32xf32>
    %c8 = arith.constant 8 : index
    %c0_58 = arith.constant 0 : index
    %c0_59 = arith.constant 0 : index
    %67 = vector.load %arg3[%c8, %c0_58, %c0_59] : memref<9x128x512xbf16, #tpu.memory_space<vmem>>, vector<1x128x512xbf16>
    %68 = vector.shape_cast %67 : vector<1x128x512xbf16> to vector<128x512xbf16>
    %cst_60 = arith.constant dense<0.000000e+00> : vector<128x4xf32>
    %69 = tpu.matmul %68, %1, %cst_60 {dimension_numbers = #tpu.dot_dimension_numbers<[1], [0], [0], [1], [0, 0, 1, 1], [], []>} : vector<128x512xbf16>, vector<512x4xbf16>, vector<128x4xf32> -> vector<128x4xf32>
    %70 = arith.truncf %69 : vector<128x4xf32> to vector<128x4xbf16>
    %c8_61 = arith.constant 8 : index
    %c0_62 = arith.constant 0 : index
    %c0_63 = arith.constant 0 : index
    %71 = vector.load %arg4[%c8_61, %c0_62, %c0_63] : memref<9x4x32xbf16, #tpu.memory_space<vmem>>, vector<1x4x32xbf16>
    %72 = vector.shape_cast %71 : vector<1x4x32xbf16> to vector<4x32xbf16>
    %cst_64 = arith.constant dense<0.000000e+00> : vector<128x32xf32>
    %73 = tpu.matmul %70, %72, %cst_64 {dimension_numbers = #tpu.dot_dimension_numbers<[1], [0], [0], [1], [0, 0, 1, 1], [], []>} : vector<128x4xbf16>, vector<4x32xbf16>, vector<128x32xf32> -> vector<128x32xf32>
    %74 = arith.addf %66, %73 : vector<128x32xf32>
    %c0_65 = arith.constant 0 : index
    %c0_66 = arith.constant 0 : index
    %75 = vector.load %arg5[%c0_65, %c0_66] : memref<1x32xf32, #tpu.memory_space<vmem>>, vector<1x32xf32>
    %76 = vector.broadcast %75 : vector<1x32xf32> to vector<128x32xf32>
    %77 = arith.addf %74, %76 : vector<128x32xf32>
    %cst_67 = arith.constant 0.000000e+00 : f32
    %78 = vector.broadcast %cst_67 : f32 to vector<128x32xf32>
    %79 = arith.maximumf %77, %78 : vector<128x32xf32>
    %80 = arith.truncf %79 : vector<128x32xf32> to vector<128x32xbf16>
    %cst_68 = arith.constant 0.000000e+00 : f32
    %81 = vector.broadcast %cst_68 : f32 to vector<32x64xf32>
    %c0_69 = arith.constant 0 : index
    %c0_70 = arith.constant 0 : index
    %c0_71 = arith.constant 0 : index
    %82 = vector.load %arg6[%c0_69, %c0_70, %c0_71] : memref<9x32x128xbf16, #tpu.memory_space<vmem>>, vector<1x32x128xbf16>
    %83 = vector.shape_cast %82 : vector<1x32x128xbf16> to vector<32x128xbf16>
    %cst_72 = arith.constant dense<0.000000e+00> : vector<32x32xf32>
    %84 = tpu.matmul %83, %80, %cst_72 {dimension_numbers = #tpu.dot_dimension_numbers<[1], [0], [0], [1], [0, 0, 1, 1], [], []>} : vector<32x128xbf16>, vector<128x32xbf16>, vector<32x32xf32> -> vector<32x32xf32>
    %85 = arith.truncf %84 : vector<32x32xf32> to vector<32x32xbf16>
    %c0_73 = arith.constant 0 : index
    %c0_74 = arith.constant 0 : index
    %c0_75 = arith.constant 0 : index
    %86 = vector.load %arg7[%c0_73, %c0_74, %c0_75] : memref<9x32x64xbf16, #tpu.memory_space<vmem>>, vector<1x32x64xbf16>
    %87 = vector.shape_cast %86 : vector<1x32x64xbf16> to vector<32x64xbf16>
    %cst_76 = arith.constant dense<0.000000e+00> : vector<32x64xf32>
    %88 = tpu.matmul %85, %87, %cst_76 {dimension_numbers = #tpu.dot_dimension_numbers<[1], [0], [0], [1], [0, 0, 1, 1], [], []>} : vector<32x32xbf16>, vector<32x64xbf16>, vector<32x64xf32> -> vector<32x64xf32>
    %89 = arith.addf %81, %88 : vector<32x64xf32>
    %c1_77 = arith.constant 1 : index
    %c0_78 = arith.constant 0 : index
    %c0_79 = arith.constant 0 : index
    %90 = vector.load %arg6[%c1_77, %c0_78, %c0_79] : memref<9x32x128xbf16, #tpu.memory_space<vmem>>, vector<1x32x128xbf16>
    %91 = vector.shape_cast %90 : vector<1x32x128xbf16> to vector<32x128xbf16>
    %cst_80 = arith.constant dense<0.000000e+00> : vector<32x32xf32>
    %92 = tpu.matmul %91, %80, %cst_80 {dimension_numbers = #tpu.dot_dimension_numbers<[1], [0], [0], [1], [0, 0, 1, 1], [], []>} : vector<32x128xbf16>, vector<128x32xbf16>, vector<32x32xf32> -> vector<32x32xf32>
    %93 = arith.truncf %92 : vector<32x32xf32> to vector<32x32xbf16>
    %c1_81 = arith.constant 1 : index
    %c0_82 = arith.constant 0 : index
    %c0_83 = arith.constant 0 : index
    %94 = vector.load %arg7[%c1_81, %c0_82, %c0_83] : memref<9x32x64xbf16, #tpu.memory_space<vmem>>, vector<1x32x64xbf16>
    %95 = vector.shape_cast %94 : vector<1x32x64xbf16> to vector<32x64xbf16>
    %cst_84 = arith.constant dense<0.000000e+00> : vector<32x64xf32>
    %96 = tpu.matmul %93, %95, %cst_84 {dimension_numbers = #tpu.dot_dimension_numbers<[1], [0], [0], [1], [0, 0, 1, 1], [], []>} : vector<32x32xbf16>, vector<32x64xbf16>, vector<32x64xf32> -> vector<32x64xf32>
    %97 = arith.addf %89, %96 : vector<32x64xf32>
    %c2_85 = arith.constant 2 : index
    %c0_86 = arith.constant 0 : index
    %c0_87 = arith.constant 0 : index
    %98 = vector.load %arg6[%c2_85, %c0_86, %c0_87] : memref<9x32x128xbf16, #tpu.memory_space<vmem>>, vector<1x32x128xbf16>
    %99 = vector.shape_cast %98 : vector<1x32x128xbf16> to vector<32x128xbf16>
    %cst_88 = arith.constant dense<0.000000e+00> : vector<32x32xf32>
    %100 = tpu.matmul %99, %80, %cst_88 {dimension_numbers = #tpu.dot_dimension_numbers<[1], [0], [0], [1], [0, 0, 1, 1], [], []>} : vector<32x128xbf16>, vector<128x32xbf16>, vector<32x32xf32> -> vector<32x32xf32>
    %101 = arith.truncf %100 : vector<32x32xf32> to vector<32x32xbf16>
    %c2_89 = arith.constant 2 : index
    %c0_90 = arith.constant 0 : index
    %c0_91 = arith.constant 0 : index
    %102 = vector.load %arg7[%c2_89, %c0_90, %c0_91] : memref<9x32x64xbf16, #tpu.memory_space<vmem>>, vector<1x32x64xbf16>
    %103 = vector.shape_cast %102 : vector<1x32x64xbf16> to vector<32x64xbf16>
    %cst_92 = arith.constant dense<0.000000e+00> : vector<32x64xf32>
    %104 = tpu.matmul %101, %103, %cst_92 {dimension_numbers = #tpu.dot_dimension_numbers<[1], [0], [0], [1], [0, 0, 1, 1], [], []>} : vector<32x32xbf16>, vector<32x64xbf16>, vector<32x64xf32> -> vector<32x64xf32>
    %105 = arith.addf %97, %104 : vector<32x64xf32>
    %c3_93 = arith.constant 3 : index
    %c0_94 = arith.constant 0 : index
    %c0_95 = arith.constant 0 : index
    %106 = vector.load %arg6[%c3_93, %c0_94, %c0_95] : memref<9x32x128xbf16, #tpu.memory_space<vmem>>, vector<1x32x128xbf16>
    %107 = vector.shape_cast %106 : vector<1x32x128xbf16> to vector<32x128xbf16>
    %cst_96 = arith.constant dense<0.000000e+00> : vector<32x32xf32>
    %108 = tpu.matmul %107, %80, %cst_96 {dimension_numbers = #tpu.dot_dimension_numbers<[1], [0], [0], [1], [0, 0, 1, 1], [], []>} : vector<32x128xbf16>, vector<128x32xbf16>, vector<32x32xf32> -> vector<32x32xf32>
    %109 = arith.truncf %108 : vector<32x32xf32> to vector<32x32xbf16>
    %c3_97 = arith.constant 3 : index
    %c0_98 = arith.constant 0 : index
    %c0_99 = arith.constant 0 : index
    %110 = vector.load %arg7[%c3_97, %c0_98, %c0_99] : memref<9x32x64xbf16, #tpu.memory_space<vmem>>, vector<1x32x64xbf16>
    %111 = vector.shape_cast %110 : vector<1x32x64xbf16> to vector<32x64xbf16>
    %cst_100 = arith.constant dense<0.000000e+00> : vector<32x64xf32>
    %112 = tpu.matmul %109, %111, %cst_100 {dimension_numbers = #tpu.dot_dimension_numbers<[1], [0], [0], [1], [0, 0, 1, 1], [], []>} : vector<32x32xbf16>, vector<32x64xbf16>, vector<32x64xf32> -> vector<32x64xf32>
    %113 = arith.addf %105, %112 : vector<32x64xf32>
    %c4_101 = arith.constant 4 : index
    %c0_102 = arith.constant 0 : index
    %c0_103 = arith.constant 0 : index
    %114 = vector.load %arg6[%c4_101, %c0_102, %c0_103] : memref<9x32x128xbf16, #tpu.memory_space<vmem>>, vector<1x32x128xbf16>
    %115 = vector.shape_cast %114 : vector<1x32x128xbf16> to vector<32x128xbf16>
    %cst_104 = arith.constant dense<0.000000e+00> : vector<32x32xf32>
    %116 = tpu.matmul %115, %80, %cst_104 {dimension_numbers = #tpu.dot_dimension_numbers<[1], [0], [0], [1], [0, 0, 1, 1], [], []>} : vector<32x128xbf16>, vector<128x32xbf16>, vector<32x32xf32> -> vector<32x32xf32>
    %117 = arith.truncf %116 : vector<32x32xf32> to vector<32x32xbf16>
    %c4_105 = arith.constant 4 : index
    %c0_106 = arith.constant 0 : index
    %c0_107 = arith.constant 0 : index
    %118 = vector.load %arg7[%c4_105, %c0_106, %c0_107] : memref<9x32x64xbf16, #tpu.memory_space<vmem>>, vector<1x32x64xbf16>
    %119 = vector.shape_cast %118 : vector<1x32x64xbf16> to vector<32x64xbf16>
    %cst_108 = arith.constant dense<0.000000e+00> : vector<32x64xf32>
    %120 = tpu.matmul %117, %119, %cst_108 {dimension_numbers = #tpu.dot_dimension_numbers<[1], [0], [0], [1], [0, 0, 1, 1], [], []>} : vector<32x32xbf16>, vector<32x64xbf16>, vector<32x64xf32> -> vector<32x64xf32>
    %121 = arith.addf %113, %120 : vector<32x64xf32>
    %c5_109 = arith.constant 5 : index
    %c0_110 = arith.constant 0 : index
    %c0_111 = arith.constant 0 : index
    %122 = vector.load %arg6[%c5_109, %c0_110, %c0_111] : memref<9x32x128xbf16, #tpu.memory_space<vmem>>, vector<1x32x128xbf16>
    %123 = vector.shape_cast %122 : vector<1x32x128xbf16> to vector<32x128xbf16>
    %cst_112 = arith.constant dense<0.000000e+00> : vector<32x32xf32>
    %124 = tpu.matmul %123, %80, %cst_112 {dimension_numbers = #tpu.dot_dimension_numbers<[1], [0], [0], [1], [0, 0, 1, 1], [], []>} : vector<32x128xbf16>, vector<128x32xbf16>, vector<32x32xf32> -> vector<32x32xf32>
    %125 = arith.truncf %124 : vector<32x32xf32> to vector<32x32xbf16>
    %c5_113 = arith.constant 5 : index
    %c0_114 = arith.constant 0 : index
    %c0_115 = arith.constant 0 : index
    %126 = vector.load %arg7[%c5_113, %c0_114, %c0_115] : memref<9x32x64xbf16, #tpu.memory_space<vmem>>, vector<1x32x64xbf16>
    %127 = vector.shape_cast %126 : vector<1x32x64xbf16> to vector<32x64xbf16>
    %cst_116 = arith.constant dense<0.000000e+00> : vector<32x64xf32>
    %128 = tpu.matmul %125, %127, %cst_116 {dimension_numbers = #tpu.dot_dimension_numbers<[1], [0], [0], [1], [0, 0, 1, 1], [], []>} : vector<32x32xbf16>, vector<32x64xbf16>, vector<32x64xf32> -> vector<32x64xf32>
    %129 = arith.addf %121, %128 : vector<32x64xf32>
    %c6_117 = arith.constant 6 : index
    %c0_118 = arith.constant 0 : index
    %c0_119 = arith.constant 0 : index
    %130 = vector.load %arg6[%c6_117, %c0_118, %c0_119] : memref<9x32x128xbf16, #tpu.memory_space<vmem>>, vector<1x32x128xbf16>
    %131 = vector.shape_cast %130 : vector<1x32x128xbf16> to vector<32x128xbf16>
    %cst_120 = arith.constant dense<0.000000e+00> : vector<32x32xf32>
    %132 = tpu.matmul %131, %80, %cst_120 {dimension_numbers = #tpu.dot_dimension_numbers<[1], [0], [0], [1], [0, 0, 1, 1], [], []>} : vector<32x128xbf16>, vector<128x32xbf16>, vector<32x32xf32> -> vector<32x32xf32>
    %133 = arith.truncf %132 : vector<32x32xf32> to vector<32x32xbf16>
    %c6_121 = arith.constant 6 : index
    %c0_122 = arith.constant 0 : index
    %c0_123 = arith.constant 0 : index
    %134 = vector.load %arg7[%c6_121, %c0_122, %c0_123] : memref<9x32x64xbf16, #tpu.memory_space<vmem>>, vector<1x32x64xbf16>
    %135 = vector.shape_cast %134 : vector<1x32x64xbf16> to vector<32x64xbf16>
    %cst_124 = arith.constant dense<0.000000e+00> : vector<32x64xf32>
    %136 = tpu.matmul %133, %135, %cst_124 {dimension_numbers = #tpu.dot_dimension_numbers<[1], [0], [0], [1], [0, 0, 1, 1], [], []>} : vector<32x32xbf16>, vector<32x64xbf16>, vector<32x64xf32> -> vector<32x64xf32>
    %137 = arith.addf %129, %136 : vector<32x64xf32>
    %c7_125 = arith.constant 7 : index
    %c0_126 = arith.constant 0 : index
    %c0_127 = arith.constant 0 : index
    %138 = vector.load %arg6[%c7_125, %c0_126, %c0_127] : memref<9x32x128xbf16, #tpu.memory_space<vmem>>, vector<1x32x128xbf16>
    %139 = vector.shape_cast %138 : vector<1x32x128xbf16> to vector<32x128xbf16>
    %cst_128 = arith.constant dense<0.000000e+00> : vector<32x32xf32>
    %140 = tpu.matmul %139, %80, %cst_128 {dimension_numbers = #tpu.dot_dimension_numbers<[1], [0], [0], [1], [0, 0, 1, 1], [], []>} : vector<32x128xbf16>, vector<128x32xbf16>, vector<32x32xf32> -> vector<32x32xf32>
    %141 = arith.truncf %140 : vector<32x32xf32> to vector<32x32xbf16>
    %c7_129 = arith.constant 7 : index
    %c0_130 = arith.constant 0 : index
    %c0_131 = arith.constant 0 : index
    %142 = vector.load %arg7[%c7_129, %c0_130, %c0_131] : memref<9x32x64xbf16, #tpu.memory_space<vmem>>, vector<1x32x64xbf16>
    %143 = vector.shape_cast %142 : vector<1x32x64xbf16> to vector<32x64xbf16>
    %cst_132 = arith.constant dense<0.000000e+00> : vector<32x64xf32>
    %144 = tpu.matmul %141, %143, %cst_132 {dimension_numbers = #tpu.dot_dimension_numbers<[1], [0], [0], [1], [0, 0, 1, 1], [], []>} : vector<32x32xbf16>, vector<32x64xbf16>, vector<32x64xf32> -> vector<32x64xf32>
    %145 = arith.addf %137, %144 : vector<32x64xf32>
    %c8_133 = arith.constant 8 : index
    %c0_134 = arith.constant 0 : index
    %c0_135 = arith.constant 0 : index
    %146 = vector.load %arg6[%c8_133, %c0_134, %c0_135] : memref<9x32x128xbf16, #tpu.memory_space<vmem>>, vector<1x32x128xbf16>
    %147 = vector.shape_cast %146 : vector<1x32x128xbf16> to vector<32x128xbf16>
    %cst_136 = arith.constant dense<0.000000e+00> : vector<32x32xf32>
    %148 = tpu.matmul %147, %80, %cst_136 {dimension_numbers = #tpu.dot_dimension_numbers<[1], [0], [0], [1], [0, 0, 1, 1], [], []>} : vector<32x128xbf16>, vector<128x32xbf16>, vector<32x32xf32> -> vector<32x32xf32>
    %149 = arith.truncf %148 : vector<32x32xf32> to vector<32x32xbf16>
    %c8_137 = arith.constant 8 : index
    %c0_138 = arith.constant 0 : index
    %c0_139 = arith.constant 0 : index
    %150 = vector.load %arg7[%c8_137, %c0_138, %c0_139] : memref<9x32x64xbf16, #tpu.memory_space<vmem>>, vector<1x32x64xbf16>
    %151 = vector.shape_cast %150 : vector<1x32x64xbf16> to vector<32x64xbf16>
    %cst_140 = arith.constant dense<0.000000e+00> : vector<32x64xf32>
    %152 = tpu.matmul %149, %151, %cst_140 {dimension_numbers = #tpu.dot_dimension_numbers<[1], [0], [0], [1], [0, 0, 1, 1], [], []>} : vector<32x32xbf16>, vector<32x64xbf16>, vector<32x64xf32> -> vector<32x64xf32>
    %153 = arith.addf %145, %152 : vector<32x64xf32>
    %c0_141 = arith.constant 0 : index
    %c0_142 = arith.constant 0 : index
    %154 = vector.load %arg8[%c0_141, %c0_142] : memref<1x64xf32, #tpu.memory_space<vmem>>, vector<1x64xf32>
    %155 = vector.broadcast %154 : vector<1x64xf32> to vector<32x64xf32>
    %156 = arith.addf %153, %155 : vector<32x64xf32>
    %cst_143 = arith.constant 0.000000e+00 : f32
    %157 = vector.broadcast %cst_143 : f32 to vector<32x64xf32>
    %158 = arith.maximumf %156, %157 : vector<32x64xf32>
    %159 = arith.truncf %158 : vector<32x64xf32> to vector<32x64xbf16>
    %cst_144 = arith.constant 0.000000e+00 : f32
    %160 = vector.broadcast %cst_144 : f32 to vector<8x96xf32>
    %c0_145 = arith.constant 0 : index
    %c0_146 = arith.constant 0 : index
    %c0_147 = arith.constant 0 : index
    %161 = vector.load %arg9[%c0_145, %c0_146, %c0_147] : memref<9x8x32xbf16, #tpu.memory_space<vmem>>, vector<1x8x32xbf16>
    %162 = vector.shape_cast %161 : vector<1x8x32xbf16> to vector<8x32xbf16>
    %cst_148 = arith.constant dense<0.000000e+00> : vector<8x64xf32>
    %163 = tpu.matmul %162, %159, %cst_148 {dimension_numbers = #tpu.dot_dimension_numbers<[1], [0], [0], [1], [0, 0, 1, 1], [], []>} : vector<8x32xbf16>, vector<32x64xbf16>, vector<8x64xf32> -> vector<8x64xf32>
    %164 = arith.truncf %163 : vector<8x64xf32> to vector<8x64xbf16>
    %c0_149 = arith.constant 0 : index
    %c0_150 = arith.constant 0 : index
    %c0_151 = arith.constant 0 : index
    %165 = vector.load %arg10[%c0_149, %c0_150, %c0_151] : memref<9x64x96xbf16, #tpu.memory_space<vmem>>, vector<1x64x96xbf16>
    %166 = vector.shape_cast %165 : vector<1x64x96xbf16> to vector<64x96xbf16>
    %cst_152 = arith.constant dense<0.000000e+00> : vector<8x96xf32>
    %167 = tpu.matmul %164, %166, %cst_152 {dimension_numbers = #tpu.dot_dimension_numbers<[1], [0], [0], [1], [0, 0, 1, 1], [], []>} : vector<8x64xbf16>, vector<64x96xbf16>, vector<8x96xf32> -> vector<8x96xf32>
    %168 = arith.addf %160, %167 : vector<8x96xf32>
    %c1_153 = arith.constant 1 : index
    %c0_154 = arith.constant 0 : index
    %c0_155 = arith.constant 0 : index
    %169 = vector.load %arg9[%c1_153, %c0_154, %c0_155] : memref<9x8x32xbf16, #tpu.memory_space<vmem>>, vector<1x8x32xbf16>
    %170 = vector.shape_cast %169 : vector<1x8x32xbf16> to vector<8x32xbf16>
    %cst_156 = arith.constant dense<0.000000e+00> : vector<8x64xf32>
    %171 = tpu.matmul %170, %159, %cst_156 {dimension_numbers = #tpu.dot_dimension_numbers<[1], [0], [0], [1], [0, 0, 1, 1], [], []>} : vector<8x32xbf16>, vector<32x64xbf16>, vector<8x64xf32> -> vector<8x64xf32>
    %172 = arith.truncf %171 : vector<8x64xf32> to vector<8x64xbf16>
    %c1_157 = arith.constant 1 : index
    %c0_158 = arith.constant 0 : index
    %c0_159 = arith.constant 0 : index
    %173 = vector.load %arg10[%c1_157, %c0_158, %c0_159] : memref<9x64x96xbf16, #tpu.memory_space<vmem>>, vector<1x64x96xbf16>
    %174 = vector.shape_cast %173 : vector<1x64x96xbf16> to vector<64x96xbf16>
    %cst_160 = arith.constant dense<0.000000e+00> : vector<8x96xf32>
    %175 = tpu.matmul %172, %174, %cst_160 {dimension_numbers = #tpu.dot_dimension_numbers<[1], [0], [0], [1], [0, 0, 1, 1], [], []>} : vector<8x64xbf16>, vector<64x96xbf16>, vector<8x96xf32> -> vector<8x96xf32>
    %176 = arith.addf %168, %175 : vector<8x96xf32>
    %c2_161 = arith.constant 2 : index
    %c0_162 = arith.constant 0 : index
    %c0_163 = arith.constant 0 : index
    %177 = vector.load %arg9[%c2_161, %c0_162, %c0_163] : memref<9x8x32xbf16, #tpu.memory_space<vmem>>, vector<1x8x32xbf16>
    %178 = vector.shape_cast %177 : vector<1x8x32xbf16> to vector<8x32xbf16>
    %cst_164 = arith.constant dense<0.000000e+00> : vector<8x64xf32>
    %179 = tpu.matmul %178, %159, %cst_164 {dimension_numbers = #tpu.dot_dimension_numbers<[1], [0], [0], [1], [0, 0, 1, 1], [], []>} : vector<8x32xbf16>, vector<32x64xbf16>, vector<8x64xf32> -> vector<8x64xf32>
    %180 = arith.truncf %179 : vector<8x64xf32> to vector<8x64xbf16>
    %c2_165 = arith.constant 2 : index
    %c0_166 = arith.constant 0 : index
    %c0_167 = arith.constant 0 : index
    %181 = vector.load %arg10[%c2_165, %c0_166, %c0_167] : memref<9x64x96xbf16, #tpu.memory_space<vmem>>, vector<1x64x96xbf16>
    %182 = vector.shape_cast %181 : vector<1x64x96xbf16> to vector<64x96xbf16>
    %cst_168 = arith.constant dense<0.000000e+00> : vector<8x96xf32>
    %183 = tpu.matmul %180, %182, %cst_168 {dimension_numbers = #tpu.dot_dimension_numbers<[1], [0], [0], [1], [0, 0, 1, 1], [], []>} : vector<8x64xbf16>, vector<64x96xbf16>, vector<8x96xf32> -> vector<8x96xf32>
    %184 = arith.addf %176, %183 : vector<8x96xf32>
    %c3_169 = arith.constant 3 : index
    %c0_170 = arith.constant 0 : index
    %c0_171 = arith.constant 0 : index
    %185 = vector.load %arg9[%c3_169, %c0_170, %c0_171] : memref<9x8x32xbf16, #tpu.memory_space<vmem>>, vector<1x8x32xbf16>
    %186 = vector.shape_cast %185 : vector<1x8x32xbf16> to vector<8x32xbf16>
    %cst_172 = arith.constant dense<0.000000e+00> : vector<8x64xf32>
    %187 = tpu.matmul %186, %159, %cst_172 {dimension_numbers = #tpu.dot_dimension_numbers<[1], [0], [0], [1], [0, 0, 1, 1], [], []>} : vector<8x32xbf16>, vector<32x64xbf16>, vector<8x64xf32> -> vector<8x64xf32>
    %188 = arith.truncf %187 : vector<8x64xf32> to vector<8x64xbf16>
    %c3_173 = arith.constant 3 : index
    %c0_174 = arith.constant 0 : index
    %c0_175 = arith.constant 0 : index
    %189 = vector.load %arg10[%c3_173, %c0_174, %c0_175] : memref<9x64x96xbf16, #tpu.memory_space<vmem>>, vector<1x64x96xbf16>
    %190 = vector.shape_cast %189 : vector<1x64x96xbf16> to vector<64x96xbf16>
    %cst_176 = arith.constant dense<0.000000e+00> : vector<8x96xf32>
    %191 = tpu.matmul %188, %190, %cst_176 {dimension_numbers = #tpu.dot_dimension_numbers<[1], [0], [0], [1], [0, 0, 1, 1], [], []>} : vector<8x64xbf16>, vector<64x96xbf16>, vector<8x96xf32> -> vector<8x96xf32>
    %192 = arith.addf %184, %191 : vector<8x96xf32>
    %c4_177 = arith.constant 4 : index
    %c0_178 = arith.constant 0 : index
    %c0_179 = arith.constant 0 : index
    %193 = vector.load %arg9[%c4_177, %c0_178, %c0_179] : memref<9x8x32xbf16, #tpu.memory_space<vmem>>, vector<1x8x32xbf16>
    %194 = vector.shape_cast %193 : vector<1x8x32xbf16> to vector<8x32xbf16>
    %cst_180 = arith.constant dense<0.000000e+00> : vector<8x64xf32>
    %195 = tpu.matmul %194, %159, %cst_180 {dimension_numbers = #tpu.dot_dimension_numbers<[1], [0], [0], [1], [0, 0, 1, 1], [], []>} : vector<8x32xbf16>, vector<32x64xbf16>, vector<8x64xf32> -> vector<8x64xf32>
    %196 = arith.truncf %195 : vector<8x64xf32> to vector<8x64xbf16>
    %c4_181 = arith.constant 4 : index
    %c0_182 = arith.constant 0 : index
    %c0_183 = arith.constant 0 : index
    %197 = vector.load %arg10[%c4_181, %c0_182, %c0_183] : memref<9x64x96xbf16, #tpu.memory_space<vmem>>, vector<1x64x96xbf16>
    %198 = vector.shape_cast %197 : vector<1x64x96xbf16> to vector<64x96xbf16>
    %cst_184 = arith.constant dense<0.000000e+00> : vector<8x96xf32>
    %199 = tpu.matmul %196, %198, %cst_184 {dimension_numbers = #tpu.dot_dimension_numbers<[1], [0], [0], [1], [0, 0, 1, 1], [], []>} : vector<8x64xbf16>, vector<64x96xbf16>, vector<8x96xf32> -> vector<8x96xf32>
    %200 = arith.addf %192, %199 : vector<8x96xf32>
    %c5_185 = arith.constant 5 : index
    %c0_186 = arith.constant 0 : index
    %c0_187 = arith.constant 0 : index
    %201 = vector.load %arg9[%c5_185, %c0_186, %c0_187] : memref<9x8x32xbf16, #tpu.memory_space<vmem>>, vector<1x8x32xbf16>
    %202 = vector.shape_cast %201 : vector<1x8x32xbf16> to vector<8x32xbf16>
    %cst_188 = arith.constant dense<0.000000e+00> : vector<8x64xf32>
    %203 = tpu.matmul %202, %159, %cst_188 {dimension_numbers = #tpu.dot_dimension_numbers<[1], [0], [0], [1], [0, 0, 1, 1], [], []>} : vector<8x32xbf16>, vector<32x64xbf16>, vector<8x64xf32> -> vector<8x64xf32>
    %204 = arith.truncf %203 : vector<8x64xf32> to vector<8x64xbf16>
    %c5_189 = arith.constant 5 : index
    %c0_190 = arith.constant 0 : index
    %c0_191 = arith.constant 0 : index
    %205 = vector.load %arg10[%c5_189, %c0_190, %c0_191] : memref<9x64x96xbf16, #tpu.memory_space<vmem>>, vector<1x64x96xbf16>
    %206 = vector.shape_cast %205 : vector<1x64x96xbf16> to vector<64x96xbf16>
    %cst_192 = arith.constant dense<0.000000e+00> : vector<8x96xf32>
    %207 = tpu.matmul %204, %206, %cst_192 {dimension_numbers = #tpu.dot_dimension_numbers<[1], [0], [0], [1], [0, 0, 1, 1], [], []>} : vector<8x64xbf16>, vector<64x96xbf16>, vector<8x96xf32> -> vector<8x96xf32>
    %208 = arith.addf %200, %207 : vector<8x96xf32>
    %c6_193 = arith.constant 6 : index
    %c0_194 = arith.constant 0 : index
    %c0_195 = arith.constant 0 : index
    %209 = vector.load %arg9[%c6_193, %c0_194, %c0_195] : memref<9x8x32xbf16, #tpu.memory_space<vmem>>, vector<1x8x32xbf16>
    %210 = vector.shape_cast %209 : vector<1x8x32xbf16> to vector<8x32xbf16>
    %cst_196 = arith.constant dense<0.000000e+00> : vector<8x64xf32>
    %211 = tpu.matmul %210, %159, %cst_196 {dimension_numbers = #tpu.dot_dimension_numbers<[1], [0], [0], [1], [0, 0, 1, 1], [], []>} : vector<8x32xbf16>, vector<32x64xbf16>, vector<8x64xf32> -> vector<8x64xf32>
    %212 = arith.truncf %211 : vector<8x64xf32> to vector<8x64xbf16>
    %c6_197 = arith.constant 6 : index
    %c0_198 = arith.constant 0 : index
    %c0_199 = arith.constant 0 : index
    %213 = vector.load %arg10[%c6_197, %c0_198, %c0_199] : memref<9x64x96xbf16, #tpu.memory_space<vmem>>, vector<1x64x96xbf16>
    %214 = vector.shape_cast %213 : vector<1x64x96xbf16> to vector<64x96xbf16>
    %cst_200 = arith.constant dense<0.000000e+00> : vector<8x96xf32>
    %215 = tpu.matmul %212, %214, %cst_200 {dimension_numbers = #tpu.dot_dimension_numbers<[1], [0], [0], [1], [0, 0, 1, 1], [], []>} : vector<8x64xbf16>, vector<64x96xbf16>, vector<8x96xf32> -> vector<8x96xf32>
    %216 = arith.addf %208, %215 : vector<8x96xf32>
    %c7_201 = arith.constant 7 : index
    %c0_202 = arith.constant 0 : index
    %c0_203 = arith.constant 0 : index
    %217 = vector.load %arg9[%c7_201, %c0_202, %c0_203] : memref<9x8x32xbf16, #tpu.memory_space<vmem>>, vector<1x8x32xbf16>
    %218 = vector.shape_cast %217 : vector<1x8x32xbf16> to vector<8x32xbf16>
    %cst_204 = arith.constant dense<0.000000e+00> : vector<8x64xf32>
    %219 = tpu.matmul %218, %159, %cst_204 {dimension_numbers = #tpu.dot_dimension_numbers<[1], [0], [0], [1], [0, 0, 1, 1], [], []>} : vector<8x32xbf16>, vector<32x64xbf16>, vector<8x64xf32> -> vector<8x64xf32>
    %220 = arith.truncf %219 : vector<8x64xf32> to vector<8x64xbf16>
    %c7_205 = arith.constant 7 : index
    %c0_206 = arith.constant 0 : index
    %c0_207 = arith.constant 0 : index
    %221 = vector.load %arg10[%c7_205, %c0_206, %c0_207] : memref<9x64x96xbf16, #tpu.memory_space<vmem>>, vector<1x64x96xbf16>
    %222 = vector.shape_cast %221 : vector<1x64x96xbf16> to vector<64x96xbf16>
    %cst_208 = arith.constant dense<0.000000e+00> : vector<8x96xf32>
    %223 = tpu.matmul %220, %222, %cst_208 {dimension_numbers = #tpu.dot_dimension_numbers<[1], [0], [0], [1], [0, 0, 1, 1], [], []>} : vector<8x64xbf16>, vector<64x96xbf16>, vector<8x96xf32> -> vector<8x96xf32>
    %224 = arith.addf %216, %223 : vector<8x96xf32>
    %c8_209 = arith.constant 8 : index
    %c0_210 = arith.constant 0 : index
    %c0_211 = arith.constant 0 : index
    %225 = vector.load %arg9[%c8_209, %c0_210, %c0_211] : memref<9x8x32xbf16, #tpu.memory_space<vmem>>, vector<1x8x32xbf16>
    %226 = vector.shape_cast %225 : vector<1x8x32xbf16> to vector<8x32xbf16>
    %cst_212 = arith.constant dense<0.000000e+00> : vector<8x64xf32>
    %227 = tpu.matmul %226, %159, %cst_212 {dimension_numbers = #tpu.dot_dimension_numbers<[1], [0], [0], [1], [0, 0, 1, 1], [], []>} : vector<8x32xbf16>, vector<32x64xbf16>, vector<8x64xf32> -> vector<8x64xf32>
    %228 = arith.truncf %227 : vector<8x64xf32> to vector<8x64xbf16>
    %c8_213 = arith.constant 8 : index
    %c0_214 = arith.constant 0 : index
    %c0_215 = arith.constant 0 : index
    %229 = vector.load %arg10[%c8_213, %c0_214, %c0_215] : memref<9x64x96xbf16, #tpu.memory_space<vmem>>, vector<1x64x96xbf16>
    %230 = vector.shape_cast %229 : vector<1x64x96xbf16> to vector<64x96xbf16>
    %cst_216 = arith.constant dense<0.000000e+00> : vector<8x96xf32>
    %231 = tpu.matmul %228, %230, %cst_216 {dimension_numbers = #tpu.dot_dimension_numbers<[1], [0], [0], [1], [0, 0, 1, 1], [], []>} : vector<8x64xbf16>, vector<64x96xbf16>, vector<8x96xf32> -> vector<8x96xf32>
    %232 = arith.addf %224, %231 : vector<8x96xf32>
    %c0_217 = arith.constant 0 : index
    %c0_218 = arith.constant 0 : index
    %233 = vector.load %arg11[%c0_217, %c0_218] : memref<1x96xf32, #tpu.memory_space<vmem>>, vector<1x96xf32>
    %234 = vector.broadcast %233 : vector<1x96xf32> to vector<8x96xf32>
    %235 = arith.addf %232, %234 : vector<8x96xf32>
    %cst_219 = arith.constant 0.000000e+00 : f32
    %236 = vector.broadcast %cst_219 : f32 to vector<8x96xf32>
    %237 = arith.maximumf %235, %236 : vector<8x96xf32>
    %238 = arith.truncf %237 : vector<8x96xf32> to vector<8x96xbf16>
    %cst_220 = arith.constant 0.000000e+00 : f32
    %239 = vector.broadcast %cst_220 : f32 to vector<2x96xf32>
    %c0_221 = arith.constant 0 : index
    %c0_222 = arith.constant 0 : index
    %c0_223 = arith.constant 0 : index
    %240 = vector.load %arg12[%c0_221, %c0_222, %c0_223] : memref<9x2x8xbf16, #tpu.memory_space<vmem>>, vector<1x2x8xbf16>
    %241 = vector.shape_cast %240 : vector<1x2x8xbf16> to vector<2x8xbf16>
    %cst_224 = arith.constant dense<0.000000e+00> : vector<2x96xf32>
    %242 = tpu.matmul %241, %238, %cst_224 {dimension_numbers = #tpu.dot_dimension_numbers<[1], [0], [0], [1], [0, 0, 1, 1], [], []>} : vector<2x8xbf16>, vector<8x96xbf16>, vector<2x96xf32> -> vector<2x96xf32>
    %243 = arith.truncf %242 : vector<2x96xf32> to vector<2x96xbf16>
    %c0_225 = arith.constant 0 : index
    %c0_226 = arith.constant 0 : index
    %c0_227 = arith.constant 0 : index
    %244 = vector.load %arg13[%c0_225, %c0_226, %c0_227] : memref<9x96x96xbf16, #tpu.memory_space<vmem>>, vector<1x96x96xbf16>
    %245 = vector.shape_cast %244 : vector<1x96x96xbf16> to vector<96x96xbf16>
    %cst_228 = arith.constant dense<0.000000e+00> : vector<2x96xf32>
    %246 = tpu.matmul %243, %245, %cst_228 {dimension_numbers = #tpu.dot_dimension_numbers<[1], [0], [0], [1], [0, 0, 1, 1], [], []>} : vector<2x96xbf16>, vector<96x96xbf16>, vector<2x96xf32> -> vector<2x96xf32>
    %247 = arith.addf %239, %246 : vector<2x96xf32>
    %c1_229 = arith.constant 1 : index
    %c0_230 = arith.constant 0 : index
    %c0_231 = arith.constant 0 : index
    %248 = vector.load %arg12[%c1_229, %c0_230, %c0_231] : memref<9x2x8xbf16, #tpu.memory_space<vmem>>, vector<1x2x8xbf16>
    %249 = vector.shape_cast %248 : vector<1x2x8xbf16> to vector<2x8xbf16>
    %cst_232 = arith.constant dense<0.000000e+00> : vector<2x96xf32>
    %250 = tpu.matmul %249, %238, %cst_232 {dimension_numbers = #tpu.dot_dimension_numbers<[1], [0], [0], [1], [0, 0, 1, 1], [], []>} : vector<2x8xbf16>, vector<8x96xbf16>, vector<2x96xf32> -> vector<2x96xf32>
    %251 = arith.truncf %250 : vector<2x96xf32> to vector<2x96xbf16>
    %c1_233 = arith.constant 1 : index
    %c0_234 = arith.constant 0 : index
    %c0_235 = arith.constant 0 : index
    %252 = vector.load %arg13[%c1_233, %c0_234, %c0_235] : memref<9x96x96xbf16, #tpu.memory_space<vmem>>, vector<1x96x96xbf16>
    %253 = vector.shape_cast %252 : vector<1x96x96xbf16> to vector<96x96xbf16>
    %cst_236 = arith.constant dense<0.000000e+00> : vector<2x96xf32>
    %254 = tpu.matmul %251, %253, %cst_236 {dimension_numbers = #tpu.dot_dimension_numbers<[1], [0], [0], [1], [0, 0, 1, 1], [], []>} : vector<2x96xbf16>, vector<96x96xbf16>, vector<2x96xf32> -> vector<2x96xf32>
    %255 = arith.addf %247, %254 : vector<2x96xf32>
    %c2_237 = arith.constant 2 : index
    %c0_238 = arith.constant 0 : index
    %c0_239 = arith.constant 0 : index
    %256 = vector.load %arg12[%c2_237, %c0_238, %c0_239] : memref<9x2x8xbf16, #tpu.memory_space<vmem>>, vector<1x2x8xbf16>
    %257 = vector.shape_cast %256 : vector<1x2x8xbf16> to vector<2x8xbf16>
    %cst_240 = arith.constant dense<0.000000e+00> : vector<2x96xf32>
    %258 = tpu.matmul %257, %238, %cst_240 {dimension_numbers = #tpu.dot_dimension_numbers<[1], [0], [0], [1], [0, 0, 1, 1], [], []>} : vector<2x8xbf16>, vector<8x96xbf16>, vector<2x96xf32> -> vector<2x96xf32>
    %259 = arith.truncf %258 : vector<2x96xf32> to vector<2x96xbf16>
    %c2_241 = arith.constant 2 : index
    %c0_242 = arith.constant 0 : index
    %c0_243 = arith.constant 0 : index
    %260 = vector.load %arg13[%c2_241, %c0_242, %c0_243] : memref<9x96x96xbf16, #tpu.memory_space<vmem>>, vector<1x96x96xbf16>
    %261 = vector.shape_cast %260 : vector<1x96x96xbf16> to vector<96x96xbf16>
    %cst_244 = arith.constant dense<0.000000e+00> : vector<2x96xf32>
    %262 = tpu.matmul %259, %261, %cst_244 {dimension_numbers = #tpu.dot_dimension_numbers<[1], [0], [0], [1], [0, 0, 1, 1], [], []>} : vector<2x96xbf16>, vector<96x96xbf16>, vector<2x96xf32> -> vector<2x96xf32>
    %263 = arith.addf %255, %262 : vector<2x96xf32>
    %c3_245 = arith.constant 3 : index
    %c0_246 = arith.constant 0 : index
    %c0_247 = arith.constant 0 : index
    %264 = vector.load %arg12[%c3_245, %c0_246, %c0_247] : memref<9x2x8xbf16, #tpu.memory_space<vmem>>, vector<1x2x8xbf16>
    %265 = vector.shape_cast %264 : vector<1x2x8xbf16> to vector<2x8xbf16>
    %cst_248 = arith.constant dense<0.000000e+00> : vector<2x96xf32>
    %266 = tpu.matmul %265, %238, %cst_248 {dimension_numbers = #tpu.dot_dimension_numbers<[1], [0], [0], [1], [0, 0, 1, 1], [], []>} : vector<2x8xbf16>, vector<8x96xbf16>, vector<2x96xf32> -> vector<2x96xf32>
    %267 = arith.truncf %266 : vector<2x96xf32> to vector<2x96xbf16>
    %c3_249 = arith.constant 3 : index
    %c0_250 = arith.constant 0 : index
    %c0_251 = arith.constant 0 : index
    %268 = vector.load %arg13[%c3_249, %c0_250, %c0_251] : memref<9x96x96xbf16, #tpu.memory_space<vmem>>, vector<1x96x96xbf16>
    %269 = vector.shape_cast %268 : vector<1x96x96xbf16> to vector<96x96xbf16>
    %cst_252 = arith.constant dense<0.000000e+00> : vector<2x96xf32>
    %270 = tpu.matmul %267, %269, %cst_252 {dimension_numbers = #tpu.dot_dimension_numbers<[1], [0], [0], [1], [0, 0, 1, 1], [], []>} : vector<2x96xbf16>, vector<96x96xbf16>, vector<2x96xf32> -> vector<2x96xf32>
    %271 = arith.addf %263, %270 : vector<2x96xf32>
    %c4_253 = arith.constant 4 : index
    %c0_254 = arith.constant 0 : index
    %c0_255 = arith.constant 0 : index
    %272 = vector.load %arg12[%c4_253, %c0_254, %c0_255] : memref<9x2x8xbf16, #tpu.memory_space<vmem>>, vector<1x2x8xbf16>
    %273 = vector.shape_cast %272 : vector<1x2x8xbf16> to vector<2x8xbf16>
    %cst_256 = arith.constant dense<0.000000e+00> : vector<2x96xf32>
    %274 = tpu.matmul %273, %238, %cst_256 {dimension_numbers = #tpu.dot_dimension_numbers<[1], [0], [0], [1], [0, 0, 1, 1], [], []>} : vector<2x8xbf16>, vector<8x96xbf16>, vector<2x96xf32> -> vector<2x96xf32>
    %275 = arith.truncf %274 : vector<2x96xf32> to vector<2x96xbf16>
    %c4_257 = arith.constant 4 : index
    %c0_258 = arith.constant 0 : index
    %c0_259 = arith.constant 0 : index
    %276 = vector.load %arg13[%c4_257, %c0_258, %c0_259] : memref<9x96x96xbf16, #tpu.memory_space<vmem>>, vector<1x96x96xbf16>
    %277 = vector.shape_cast %276 : vector<1x96x96xbf16> to vector<96x96xbf16>
    %cst_260 = arith.constant dense<0.000000e+00> : vector<2x96xf32>
    %278 = tpu.matmul %275, %277, %cst_260 {dimension_numbers = #tpu.dot_dimension_numbers<[1], [0], [0], [1], [0, 0, 1, 1], [], []>} : vector<2x96xbf16>, vector<96x96xbf16>, vector<2x96xf32> -> vector<2x96xf32>
    %279 = arith.addf %271, %278 : vector<2x96xf32>
    %c5_261 = arith.constant 5 : index
    %c0_262 = arith.constant 0 : index
    %c0_263 = arith.constant 0 : index
    %280 = vector.load %arg12[%c5_261, %c0_262, %c0_263] : memref<9x2x8xbf16, #tpu.memory_space<vmem>>, vector<1x2x8xbf16>
    %281 = vector.shape_cast %280 : vector<1x2x8xbf16> to vector<2x8xbf16>
    %cst_264 = arith.constant dense<0.000000e+00> : vector<2x96xf32>
    %282 = tpu.matmul %281, %238, %cst_264 {dimension_numbers = #tpu.dot_dimension_numbers<[1], [0], [0], [1], [0, 0, 1, 1], [], []>} : vector<2x8xbf16>, vector<8x96xbf16>, vector<2x96xf32> -> vector<2x96xf32>
    %283 = arith.truncf %282 : vector<2x96xf32> to vector<2x96xbf16>
    %c5_265 = arith.constant 5 : index
    %c0_266 = arith.constant 0 : index
    %c0_267 = arith.constant 0 : index
    %284 = vector.load %arg13[%c5_265, %c0_266, %c0_267] : memref<9x96x96xbf16, #tpu.memory_space<vmem>>, vector<1x96x96xbf16>
    %285 = vector.shape_cast %284 : vector<1x96x96xbf16> to vector<96x96xbf16>
    %cst_268 = arith.constant dense<0.000000e+00> : vector<2x96xf32>
    %286 = tpu.matmul %283, %285, %cst_268 {dimension_numbers = #tpu.dot_dimension_numbers<[1], [0], [0], [1], [0, 0, 1, 1], [], []>} : vector<2x96xbf16>, vector<96x96xbf16>, vector<2x96xf32> -> vector<2x96xf32>
    %287 = arith.addf %279, %286 : vector<2x96xf32>
    %c6_269 = arith.constant 6 : index
    %c0_270 = arith.constant 0 : index
    %c0_271 = arith.constant 0 : index
    %288 = vector.load %arg12[%c6_269, %c0_270, %c0_271] : memref<9x2x8xbf16, #tpu.memory_space<vmem>>, vector<1x2x8xbf16>
    %289 = vector.shape_cast %288 : vector<1x2x8xbf16> to vector<2x8xbf16>
    %cst_272 = arith.constant dense<0.000000e+00> : vector<2x96xf32>
    %290 = tpu.matmul %289, %238, %cst_272 {dimension_numbers = #tpu.dot_dimension_numbers<[1], [0], [0], [1], [0, 0, 1, 1], [], []>} : vector<2x8xbf16>, vector<8x96xbf16>, vector<2x96xf32> -> vector<2x96xf32>
    %291 = arith.truncf %290 : vector<2x96xf32> to vector<2x96xbf16>
    %c6_273 = arith.constant 6 : index
    %c0_274 = arith.constant 0 : index
    %c0_275 = arith.constant 0 : index
    %292 = vector.load %arg13[%c6_273, %c0_274, %c0_275] : memref<9x96x96xbf16, #tpu.memory_space<vmem>>, vector<1x96x96xbf16>
    %293 = vector.shape_cast %292 : vector<1x96x96xbf16> to vector<96x96xbf16>
    %cst_276 = arith.constant dense<0.000000e+00> : vector<2x96xf32>
    %294 = tpu.matmul %291, %293, %cst_276 {dimension_numbers = #tpu.dot_dimension_numbers<[1], [0], [0], [1], [0, 0, 1, 1], [], []>} : vector<2x96xbf16>, vector<96x96xbf16>, vector<2x96xf32> -> vector<2x96xf32>
    %295 = arith.addf %287, %294 : vector<2x96xf32>
    %c7_277 = arith.constant 7 : index
    %c0_278 = arith.constant 0 : index
    %c0_279 = arith.constant 0 : index
    %296 = vector.load %arg12[%c7_277, %c0_278, %c0_279] : memref<9x2x8xbf16, #tpu.memory_space<vmem>>, vector<1x2x8xbf16>
    %297 = vector.shape_cast %296 : vector<1x2x8xbf16> to vector<2x8xbf16>
    %cst_280 = arith.constant dense<0.000000e+00> : vector<2x96xf32>
    %298 = tpu.matmul %297, %238, %cst_280 {dimension_numbers = #tpu.dot_dimension_numbers<[1], [0], [0], [1], [0, 0, 1, 1], [], []>} : vector<2x8xbf16>, vector<8x96xbf16>, vector<2x96xf32> -> vector<2x96xf32>
    %299 = arith.truncf %298 : vector<2x96xf32> to vector<2x96xbf16>
    %c7_281 = arith.constant 7 : index
    %c0_282 = arith.constant 0 : index
    %c0_283 = arith.constant 0 : index
    %300 = vector.load %arg13[%c7_281, %c0_282, %c0_283] : memref<9x96x96xbf16, #tpu.memory_space<vmem>>, vector<1x96x96xbf16>
    %301 = vector.shape_cast %300 : vector<1x96x96xbf16> to vector<96x96xbf16>
    %cst_284 = arith.constant dense<0.000000e+00> : vector<2x96xf32>
    %302 = tpu.matmul %299, %301, %cst_284 {dimension_numbers = #tpu.dot_dimension_numbers<[1], [0], [0], [1], [0, 0, 1, 1], [], []>} : vector<2x96xbf16>, vector<96x96xbf16>, vector<2x96xf32> -> vector<2x96xf32>
    %303 = arith.addf %295, %302 : vector<2x96xf32>
    %c8_285 = arith.constant 8 : index
    %c0_286 = arith.constant 0 : index
    %c0_287 = arith.constant 0 : index
    %304 = vector.load %arg12[%c8_285, %c0_286, %c0_287] : memref<9x2x8xbf16, #tpu.memory_space<vmem>>, vector<1x2x8xbf16>
    %305 = vector.shape_cast %304 : vector<1x2x8xbf16> to vector<2x8xbf16>
    %cst_288 = arith.constant dense<0.000000e+00> : vector<2x96xf32>
    %306 = tpu.matmul %305, %238, %cst_288 {dimension_numbers = #tpu.dot_dimension_numbers<[1], [0], [0], [1], [0, 0, 1, 1], [], []>} : vector<2x8xbf16>, vector<8x96xbf16>, vector<2x96xf32> -> vector<2x96xf32>
    %307 = arith.truncf %306 : vector<2x96xf32> to vector<2x96xbf16>
    %c8_289 = arith.constant 8 : index
    %c0_290 = arith.constant 0 : index
    %c0_291 = arith.constant 0 : index
    %308 = vector.load %arg13[%c8_289, %c0_290, %c0_291] : memref<9x96x96xbf16, #tpu.memory_space<vmem>>, vector<1x96x96xbf16>
    %309 = vector.shape_cast %308 : vector<1x96x96xbf16> to vector<96x96xbf16>
    %cst_292 = arith.constant dense<0.000000e+00> : vector<2x96xf32>
    %310 = tpu.matmul %307, %309, %cst_292 {dimension_numbers = #tpu.dot_dimension_numbers<[1], [0], [0], [1], [0, 0, 1, 1], [], []>} : vector<2x96xbf16>, vector<96x96xbf16>, vector<2x96xf32> -> vector<2x96xf32>
    %311 = arith.addf %303, %310 : vector<2x96xf32>
    %c0_293 = arith.constant 0 : index
    %c0_294 = arith.constant 0 : index
    %312 = vector.load %arg14[%c0_293, %c0_294] : memref<1x96xf32, #tpu.memory_space<vmem>>, vector<1x96xf32>
    %313 = vector.broadcast %312 : vector<1x96xf32> to vector<2x96xf32>
    %314 = arith.addf %311, %313 : vector<2x96xf32>
    %cst_295 = arith.constant 0.000000e+00 : f32
    %315 = vector.broadcast %cst_295 : f32 to vector<2x96xf32>
    %316 = arith.maximumf %314, %315 : vector<2x96xf32>
    %317 = arith.truncf %316 : vector<2x96xf32> to vector<2x96xbf16>
    %c0_296 = arith.constant 0 : index
    %c0_297 = arith.constant 0 : index
    %318 = vector.load %arg15[%c0_296, %c0_297] : memref<96x2048xbf16, #tpu.memory_space<vmem>>, vector<96x2048xbf16>
    %cst_298 = arith.constant dense<0.000000e+00> : vector<2x2048xf32>
    %319 = tpu.matmul %317, %318, %cst_298 {dimension_numbers = #tpu.dot_dimension_numbers<[1], [0], [0], [1], [0, 0, 1, 1], [], []>} : vector<2x96xbf16>, vector<96x2048xbf16>, vector<2x2048xf32> -> vector<2x2048xf32>
    %c0_299 = arith.constant 0 : index
    %c0_300 = arith.constant 0 : index
    %320 = vector.load %arg1[%c0_299, %c0_300] : memref<2x512xf32, #tpu.memory_space<vmem>>, vector<2x512xf32>
    %321 = arith.truncf %320 : vector<2x512xf32> to vector<2x512xbf16>
    %c0_301 = arith.constant 0 : index
    %c0_302 = arith.constant 0 : index
    %322 = vector.load %arg16[%c0_301, %c0_302] : memref<512x2048xbf16, #tpu.memory_space<vmem>>, vector<512x2048xbf16>
    %cst_303 = arith.constant dense<0.000000e+00> : vector<2x2048xf32>
    %323 = tpu.matmul %321, %322, %cst_303 {dimension_numbers = #tpu.dot_dimension_numbers<[1], [0], [0], [1], [0, 0, 1, 1], [], []>} : vector<2x512xbf16>, vector<512x2048xbf16>, vector<2x2048xf32> -> vector<2x2048xf32>
    %324 = arith.addf %319, %323 : vector<2x2048xf32>
    %c0_304 = arith.constant 0 : index
    %c0_305 = arith.constant 0 : index
    %325 = vector.load %arg17[%c0_304, %c0_305] : memref<1x2048xf32, #tpu.memory_space<vmem>>, vector<1x2048xf32>
    %326 = vector.broadcast %325 : vector<1x2048xf32> to vector<2x2048xf32>
    %327 = arith.addf %324, %326 : vector<2x2048xf32>
    %328 = vector.extract_strided_slice %327 {offsets = [0, 0], sizes = [2, 512], strides = [1, 1]} : vector<2x2048xf32> to vector<2x512xf32>
    %329 = arith.negf %328 : vector<2x512xf32>
    %330 = math.exp %329 : vector<2x512xf32>
    %cst_306 = arith.constant 1.000000e+00 : f32
    %331 = vector.broadcast %cst_306 : f32 to vector<2x512xf32>
    %332 = arith.addf %331, %330 : vector<2x512xf32>
    %333 = arith.divf %331, %332 : vector<2x512xf32>
    %334 = vector.extract_strided_slice %327 {offsets = [0, 512], sizes = [2, 512], strides = [1, 1]} : vector<2x2048xf32> to vector<2x512xf32>
    %335 = arith.negf %334 : vector<2x512xf32>
    %336 = math.exp %335 : vector<2x512xf32>
    %cst_307 = arith.constant 1.000000e+00 : f32
    %337 = vector.broadcast %cst_307 : f32 to vector<2x512xf32>
    %338 = arith.addf %337, %336 : vector<2x512xf32>
    %339 = arith.divf %337, %338 : vector<2x512xf32>
    %340 = vector.extract_strided_slice %327 {offsets = [0, 1024], sizes = [2, 512], strides = [1, 1]} : vector<2x2048xf32> to vector<2x512xf32>
    %341 = math.tanh %340 : vector<2x512xf32>
    %342 = vector.extract_strided_slice %327 {offsets = [0, 1536], sizes = [2, 512], strides = [1, 1]} : vector<2x2048xf32> to vector<2x512xf32>
    %343 = arith.negf %342 : vector<2x512xf32>
    %344 = math.exp %343 : vector<2x512xf32>
    %cst_308 = arith.constant 1.000000e+00 : f32
    %345 = vector.broadcast %cst_308 : f32 to vector<2x512xf32>
    %346 = arith.addf %345, %344 : vector<2x512xf32>
    %347 = arith.divf %345, %346 : vector<2x512xf32>
    %c0_309 = arith.constant 0 : index
    %c0_310 = arith.constant 0 : index
    %348 = vector.load %arg2[%c0_309, %c0_310] : memref<2x512xf32, #tpu.memory_space<vmem>>, vector<2x512xf32>
    %349 = arith.mulf %339, %348 : vector<2x512xf32>
    %350 = arith.mulf %333, %341 : vector<2x512xf32>
    %351 = arith.addf %349, %350 : vector<2x512xf32>
    %352 = math.tanh %351 : vector<2x512xf32>
    %353 = arith.mulf %347, %352 : vector<2x512xf32>
    %c0_311 = arith.constant 0 : index
    %c0_312 = arith.constant 0 : index
    %354 = vector.load %arg21[%c0_311, %c0_312] : memref<2x512xf32, #tpu.memory_space<vmem>>, vector<2x512xf32>
    tpu.vector_store %arg21[%c0_311, %c0_312], %353 {strides = array<i32>} : memref<2x512xf32, #tpu.memory_space<vmem>>, vector<2x512xf32>,
    %c0_313 = arith.constant 0 : index
    %c0_314 = arith.constant 0 : index
    %355 = vector.load %arg22[%c0_313, %c0_314] : memref<2x512xf32, #tpu.memory_space<vmem>>, vector<2x512xf32>
    tpu.vector_store %arg22[%c0_313, %c0_314], %351 {strides = array<i32>} : memref<2x512xf32, #tpu.memory_space<vmem>>, vector<2x512xf32>,
    %356 = arith.truncf %353 : vector<2x512xf32> to vector<2x512xbf16>
    %c0_315 = arith.constant 0 : index
    %c0_316 = arith.constant 0 : index
    %357 = vector.load %arg18[%c0_315, %c0_316] : memref<512x128xbf16, #tpu.memory_space<vmem>>, vector<512x128xbf16>
    %cst_317 = arith.constant dense<0.000000e+00> : vector<2x128xf32>
    %358 = tpu.matmul %356, %357, %cst_317 {dimension_numbers = #tpu.dot_dimension_numbers<[1], [0], [0], [1], [0, 0, 1, 1], [], []>} : vector<2x512xbf16>, vector<512x128xbf16>, vector<2x128xf32> -> vector<2x128xf32>
    %c0_318 = arith.constant 0 : index
    %c0_319 = arith.constant 0 : index
    %359 = vector.load %arg19[%c0_318, %c0_319] : memref<1x128xf32, #tpu.memory_space<vmem>>, vector<1x128xf32>
    %360 = vector.broadcast %359 : vector<1x128xf32> to vector<2x128xf32>
    %361 = arith.addf %358, %360 : vector<2x128xf32>
    %c0_320 = arith.constant 0 : index
    %c0_321 = arith.constant 0 : index
    %362 = vector.load %arg20[%c0_320, %c0_321] : memref<2x128xf32, #tpu.memory_space<vmem>>, vector<2x128xf32>
    tpu.vector_store %arg20[%c0_320, %c0_321], %361 {strides = array<i32>} : memref<2x128xf32, #tpu.memory_space<vmem>>, vector<2x128xf32>,
    return
  }
}

</mosaic_0001>

<bundles_post_ra>
// kernel: a2c_forward.1
= control target key start
LH: loop header
LB: loop body
LE: loop exit
PB: predicated region body
PF: predicated region fallthrough
CT: control target
= control target key end

     0   :  { %s21492_s0 = inlined_call_operand.vmem [shape: f32[512,4], index: 0, kind: input, shape index: {}]   ;;  %s21493_s1 = inlined_call_operand.hbm [shape: f32[2,512], index: 1, kind: input, shape index: {}]   ;;  %s21494_s2 = inlined_call_operand.hbm [shape: f32[2,512], index: 2, kind: input, shape index: {}]   ;;  %s21495_s3 = inlined_call_operand.hbm [shape: bf16[9,128,512], index: 3, kind: input, shape index: {}]   ;;  %s21496_s4 = inlined_call_operand.hbm [shape: bf16[9,4,32], index: 4, kind: input, shape index: {}]   ;;  %s21497_s5 = inlined_call_operand.hbm [shape: f32[1,32], index: 5, kind: input, shape index: {}]   ;;  %s21498_s6 = inlined_call_operand.hbm [shape: bf16[9,32,128], index: 6, kind: input, shape index: {}]   ;;  %s21499_s7 = inlined_call_operand.hbm [shape: bf16[9,32,64], index: 7, kind: input, shape index: {}]   ;;  %s21500_s8 = inlined_call_operand.hbm [shape: f32[1,64], index: 8, kind: input, shape index: {}]   ;;  %s21501_s9 = inlined_call_operand.hbm [shape: bf16[9,8,32], index: 9, kind: input, shape index: {}]   ;;  %s21502_s10 = inlined_call_operand.hbm [shape: bf16[9,64,96], index: 10, kind: input, shape index: {}]   ;;  %s21503_s11 = inlined_call_operand.hbm [shape: f32[1,96], index: 11, kind: input, shape index: {}]   ;;  %s21504_s12 = inlined_call_operand.vmem [shape: bf16[9,2,8], index: 12, kind: input, shape index: {}]   ;;  %s21505_s13 = inlined_call_operand.hbm [shape: bf16[9,96,96], index: 13, kind: input, shape index: {}]   ;;  %s21506_s14 = inlined_call_operand.hbm [shape: f32[1,96], index: 14, kind: input, shape index: {}]   ;;  %s21507_s15 = inlined_call_operand.hbm [shape: bf16[96,2048], index: 15, kind: input, shape index: {}]   ;;  %s21508_s16 = inlined_call_operand.hbm [shape: bf16[512,2048], index: 16, kind: input, shape index: {}]   ;;  %s21509_s17 = inlined_call_operand.hbm [shape: f32[1,2048], index: 17, kind: input, shape index: {}]   ;;  %s21510_s18 = inlined_call_operand.hbm [shape: bf16[512,128], index: 18, kind: input, shape index: {}]   ;;  %s21511_s19 = inlined_call_operand.hbm [shape: f32[1,128], index: 19, kind: input, shape index: {}]   ;;  %s21512_s20 = inlined_call_operand.vmem [shape: f32[2,128], index: 20, kind: output, shape index: {0}]   ;;  %s21513_s21 = inlined_call_operand.hbm [shape: f32[2,512], index: 21, kind: output, shape index: {1}]   ;;  %s21514_s22 = inlined_call_operand.hbm [shape: f32[2,512], index: 22, kind: output, shape index: {2}]  }
   0x1   :  { %21575 = sst [smem:[#allocation85_spill]] %s21492_s0 }
   0x2   :  { %21576 = sst [smem:[#allocation86_spill]] %s21493_s1 }
   0x3   :  { %21577 = sst [smem:[#allocation87_spill]] %s21494_s2 }
   0x4   :  { %21578 = sst [smem:[#allocation88_spill]] %s21495_s3 }
   0x5   :  { %21579 = sst [smem:[#allocation89_spill]] %s21496_s4 }
   0x6   :  { %21580 = sst [smem:[#allocation90_spill]] %s21497_s5 }
   0x7   :  { %21581 = sst [smem:[#allocation91_spill]] %s21498_s6 }
   0x8   :  { %28 = vsyncpa [#allocation3], 0 }
   0x9   :  { %29 = vsyncpa [#allocation6], 0 }
   0xa   :  { %30 = vsyncpa [#allocation9], 0 }
   0xb   :  { %31 = vsyncpa [#allocation12], 0 }
   0xc   :  { %32 = vsyncpa [#allocation15], 0 }
   0xd   :  { %33 = vsyncpa [#allocation18], 0 }
   0xe   :  { %34 = vsyncpa [#allocation21], 0 }
   0xf   :  { %35 = vsyncpa [#allocation24], 0 }
  0x10   :  { %36 = vsyncpa [#allocation27], 0 }
  0x11   :  { %37 = vsyncpa [#allocation30], 0 }
  0x12   :  { %38 = vsyncpa [#allocation4], 0 }
  0x13   :  { %39 = vsyncpa [#allocation33], 0  ;;  %s18938_s3 = smov [#allocation5]   ;;  %s18939_s29 = smov [#allocation8]  }
  0x14   :  { %s58_s28 = sshll.u32 %s18938_s3, 4  ;;  %s79_s30 = sshll.u32 %s18939_s29, 4  ;;  %s59_s28 = int_to_ptr.vmem [resolvable:$true] %s58_s28  ;;  %s80_s30 = int_to_ptr.vmem [resolvable:$true] %s79_s30 }
  0x15   :  { %s18522_s4 = scalar_lea.vmem %s59_s28, 128  ;;  %p18527_p1 = scmp.lt.s32.totalorder %s59_s28, %s59_s28 }
  0x16   :  { %p18523_p0 = scmp.ne.s32.totalorder %s59_s28, %s18522_s4  ;;  %p18528_p2 = scmp.lt.s32.totalorder %s18522_s4, %s18522_s4 }
  0x18   :  { %p18529_p3 = por %p18528_p2, %p18527_p1 }
  0x1a   :  { %p18530_p4 = pnand %p18529_p3, %p18523_p0 }
  0x1c   :  { %18533 = shalt.err (!%p18530_p4)
}
  0x1d   :  { %s21582_s1 = sld [smem:[#allocation87_spill]]  ;;  %s18542_s5 = scalar_lea.vmem %s80_s30, 288 }
  0x1e   :  { %p18543_p5 = scmp.ne.s32.totalorder %s80_s30, %s18542_s5  ;;  %p18547_p6 = scmp.lt.s32.totalorder %s80_s30, %s80_s30 }
  0x1f   :  { %p18548_p7 = scmp.lt.s32.totalorder %s18542_s5, %s18542_s5 }
  0x21   :  { %p18549_p8 = por %p18548_p7, %p18547_p6 }
  0x23   :  { %61 = dma.hbm_to_vmem [thread:$0]  %s21582_s1, 128, %s59_s28, [#allocation6]  }
  0x24   :  { %p18550_p9 = pnand %p18549_p8, %p18543_p5 }
  0x26   :  { %18553 = shalt.err (!%p18550_p9)
}
  0x27   :  { %s18940_s24 = smov 32   ;;  %s18941_s6 = smov 2  }
  0x28   :  { %s21583_s2 = sld [smem:[#allocation89_spill]]  ;;  %s18942_s27 = smov [#allocation11]  }
  0x29   :  { %s101_s3 = sshll.u32 %s18942_s27, 4  ;;  %s102_s3 = int_to_ptr.vmem [resolvable:$true] %s101_s3 }
  0x2a   :  { %s18562_s29 = scalar_lea.vmem %s102_s3, 2304  ;;  %p18567_p11 = scmp.lt.s32.totalorder %s102_s3, %s102_s3 }
  0x2b   :  { %p18563_p10 = scmp.ne.s32.totalorder %s102_s3, %s18562_s29  ;;  %p18568_p12 = scmp.lt.s32.totalorder %s18562_s29, %s18562_s29 }
  0x2d   :  { %p18569_p13 = por %p18568_p12, %p18567_p11 }
  0x2e   :  { %85 = dma.hbm_to_vmem [thread:$0]  %s21583_s2, 288, %s80_s30, [#allocation9], %s18940_s24, %s18940_s24, %s18941_s6  }
  0x2f   :  { %p18570_p0 = pnand %p18569_p13, %p18563_p10 }
  0x31   :  { %18573 = shalt.err (!%p18570_p0)
}
  0x32   :  { %s18943_s28 = smov 64   ;;  %s18944_s4 = smov 4  }
  0x33   :  { %s21584_s1 = sld [smem:[#allocation91_spill]]  ;;  %s18945_s30 = smov [#allocation14]  }
  0x34   :  { %s126_s5 = sshll.u32 %s18945_s30, 4  ;;  %s18946_s24 = smov [#allocation17]   ;;  %s127_s5 = int_to_ptr.vmem [resolvable:$true] %s126_s5 }
  0x35   :  { %s147_s6 = sshll.u32 %s18946_s24, 4  ;;  %s18582_s25 = scalar_lea.vmem %s127_s5, 16  ;;  %s148_s6 = int_to_ptr.vmem [resolvable:$true] %s147_s6 }
  0x36   :  { %p18583_p1 = scmp.ne.s32.totalorder %s127_s5, %s18582_s25  ;;  %s18586_s26 = scalar_lea.vmem %s127_s5, 32 }
  0x37   :  { %p18587_p2 = scmp.lt.s32.totalorder %s127_s5, %s127_s5  ;;  %p18588_p3 = scmp.lt.s32.totalorder %s18586_s26, %s18582_s25 }
  0x39   :  { %107 = dma.hbm_to_vmem [thread:$0]  %s21584_s1, 2304, %s102_s3, [#allocation12], %s18943_s28, %s18943_s28, %s18944_s4  }
  0x3a   :  { %p18589_p4 = por %p18588_p3, %p18587_p2 }
  0x3c   :  { %p18590_p5 = pnand %p18589_p4, %p18583_p1 }
  0x3e   :  { %18593 = shalt.err (!%p18590_p5)
}
  0x3f   :  { %129 = dma.hbm_to_vmem [thread:$0]  %s21500_s8, 16, %s127_s5, [#allocation15]  }
  0x40   :  { %s18602_s29 = scalar_lea.vmem %s148_s6, 4608  ;;  %p18607_p7 = scmp.lt.s32.totalorder %s148_s6, %s148_s6 }
  0x41   :  { %p18603_p6 = scmp.ne.s32.totalorder %s148_s6, %s18602_s29  ;;  %p18608_p8 = scmp.lt.s32.totalorder %s18602_s29, %s18602_s29 }
  0x43   :  { %p18609_p9 = por %p18608_p8, %p18607_p7 }
  0x45   :  { %p18610_p10 = pnand %p18609_p9, %p18603_p6 }
  0x47   :  { %18613 = shalt.err (!%p18610_p10)
}
  0x48   :  { %153 = dma.hbm_to_vmem [thread:$0]  %s21502_s10, 4608, %s148_s6, [#allocation18], %s18943_s28, %s18943_s28, %s18944_s4  }
  0x49   :  { %s18947_s23 = smov [#allocation20]   ;;  %s18948_s30 = smov [#allocation23]  }
  0x4a   :  { %s171_s1 = sshll.u32 %s18947_s23, 4  ;;  %s193_s8 = sshll.u32 %s18948_s30, 4  ;;  %s172_s1 = int_to_ptr.vmem [resolvable:$true] %s171_s1  ;;  %s194_s8 = int_to_ptr.vmem [resolvable:$true] %s193_s8 }
  0x4b   :  { %s18622_s5 = scalar_lea.vmem %s172_s1, 6912  ;;  %p18627_p12 = scmp.lt.s32.totalorder %s172_s1, %s172_s1 }
  0x4c   :  { %p18623_p11 = scmp.ne.s32.totalorder %s172_s1, %s18622_s5  ;;  %p18628_p13 = scmp.lt.s32.totalorder %s18622_s5, %s18622_s5 }
  0x4e   :  { %p18629_p0 = por %p18628_p13, %p18627_p12 }
  0x50   :  { %p18630_p1 = pnand %p18629_p0, %p18623_p11 }
  0x52   :  { %18633 = shalt.err (!%p18630_p1)
}
  0x53   :  { %177 = dma.hbm_to_vmem [thread:$0]  %s21505_s13, 6912, %s172_s1, [#allocation21], %s18943_s28, %s18943_s28, %s18944_s4  }
  0x54   :  { %s18642_s10 = scalar_lea.vmem %s194_s8, 12288  ;;  %p18647_p3 = scmp.lt.s32.totalorder %s194_s8, %s194_s8 }
  0x55   :  { %p18643_p2 = scmp.ne.s32.totalorder %s194_s8, %s18642_s10  ;;  %p18648_p4 = scmp.lt.s32.totalorder %s18642_s10, %s18642_s10 }
  0x57   :  { %p18649_p5 = por %p18648_p4, %p18647_p3 }
  0x59   :  { %p18650_p6 = pnand %p18649_p5, %p18643_p2 }
  0x5b   :  { %18653 = shalt.err (!%p18650_p6)
}
  0x5c   :  { %s18949_s6 = smov 1024   ;;  %s18950_s27 = smov [#allocation26]  }
  0x5d   :  { %199 = dma.hbm_to_vmem [thread:$0]  %s21507_s15, 12288, %s194_s8, [#allocation24], %s18949_s6, %s18949_s6, %s18943_s28  }
  0x5e   :  { %s218_s29 = sshll.u32 %s18950_s27, 4  ;;  %s18951_s3 = smov [#allocation2]   ;;  %s219_s29 = int_to_ptr.vmem [resolvable:$true] %s218_s29 }
  0x5f   :  { %s48_s13 = sshll.u32 %s18951_s3, 4  ;;  %s18662_s0 = scalar_lea.vmem %s219_s29, 256  ;;  %s49_s13 = int_to_ptr.vmem [resolvable:$true] %s48_s13 }
  0x60   :  { %p18663_p7 = scmp.ne.s32.totalorder %s219_s29, %s18662_s0  ;;  %p18667_p8 = scmp.lt.s32.totalorder %s219_s29, %s219_s29 }
  0x61   :  { %p18668_p9 = scmp.lt.s32.totalorder %s18662_s0, %s18662_s0 }
  0x63   :  { %p18669_p10 = por %p18668_p9, %p18667_p8 }
  0x65   :  { %p18670_p11 = pnand %p18669_p10, %p18663_p7 }
  0x67   :  { %18673 = shalt.err (!%p18670_p11)
}
  0x68   :  { %221 = dma.hbm_to_vmem [thread:$0]  %s21509_s17, 256, %s219_s29, [#allocation27]  }
  0x69   :  { %s18682_s30 = scalar_lea.vmem %s49_s13, 128  ;;  %p18687_p13 = scmp.lt.s32.totalorder %s49_s13, %s49_s13 }
  0x6a   :  { %p18683_p12 = scmp.ne.s32.totalorder %s49_s13, %s18682_s30  ;;  %p18688_p0 = scmp.lt.s32.totalorder %s18682_s30, %s18682_s30 }
  0x6c   :  { %p18689_p1 = por %p18688_p0, %p18687_p13 }
  0x6e   :  { %p18690_p2 = pnand %p18689_p1, %p18683_p12 }
  0x70   :  { %18693 = shalt.err (!%p18690_p2)
}
  0x71   :  { %s21585_s5 = sld [smem:[#allocation86_spill]]  ;;  %s18952_s24 = smov [#allocation7]  }
  0x72   :  { %s67_s25 = sshll.u32 %s18952_s24, 4  ;;  %s68_s25 = int_to_ptr.vmem [resolvable:$true] %s67_s25 }
  0x73   :  { %s18702_s10 = scalar_lea.vmem %s68_s25, 36864  ;;  %p18707_p4 = scmp.lt.s32.totalorder %s68_s25, %s68_s25 }
  0x74   :  { %p18703_p3 = scmp.ne.s32.totalorder %s68_s25, %s18702_s10  ;;  %p18708_p5 = scmp.lt.s32.totalorder %s18702_s10, %s18702_s10 }
  0x76   :  { %p18709_p6 = por %p18708_p5, %p18707_p4 }
  0x77   :  { %51 = dma.hbm_to_vmem [thread:$0]  %s21585_s5, 128, %s49_s13, [#allocation3]  }
  0x78   :  { %p18710_p7 = pnand %p18709_p6, %p18703_p3 }
  0x7a   :  { %18713 = shalt.err (!%p18710_p7)
}
  0x7b   :  { %s18953_s17 = smov 256   ;;  %s18954_s26 = smov 16  }
  0x7c   :  { %s21586_s29 = sld [smem:[#allocation88_spill]]  ;;  %s18955_s3 = smov [#allocation10]  }
  0x7d   :  { %s92_s0 = sshll.u32 %s18955_s3, 4  ;;  %s18956_s13 = smov [#allocation13]   ;;  %s93_s0 = int_to_ptr.vmem [resolvable:$true] %s92_s0 }
  0x7e   :  { %s113_s23 = sshll.u32 %s18956_s13, 4  ;;  %s18722_s1 = scalar_lea.vmem %s93_s0, 16  ;;  %s114_s23 = int_to_ptr.vmem [resolvable:$true] %s113_s23 }
  0x7f   :  { %p18723_p8 = scmp.ne.s32.totalorder %s93_s0, %s18722_s1  ;;  %s18726_s30 = scalar_lea.vmem %s93_s0, 32 }
  0x80   :  { %p18727_p9 = scmp.lt.s32.totalorder %s93_s0, %s93_s0  ;;  %p18728_p10 = scmp.lt.s32.totalorder %s18726_s30, %s18722_s1 }
  0x82   :  { %73 = dma.hbm_to_vmem [thread:$0]  %s21586_s29, 36864, %s68_s25, [#allocation6], %s18953_s17, %s18953_s17, %s18954_s26  }
  0x83   :  { %p18729_p11 = por %p18728_p10, %p18727_p9 }
  0x85   :  { %p18730_p12 = pnand %p18729_p11, %p18723_p8 }
  0x87   :  { %18733 = shalt.err (!%p18730_p12)
}
  0x88   :  { %s21587_s5 = sld [smem:[#allocation90_spill]]  ;;  %s18742_s24 = scalar_lea.vmem %s114_s23, 2304 }
  0x89   :  { %p18743_p13 = scmp.ne.s32.totalorder %s114_s23, %s18742_s24  ;;  %p18747_p0 = scmp.lt.s32.totalorder %s114_s23, %s114_s23 }
  0x8a   :  { %p18748_p1 = scmp.lt.s32.totalorder %s18742_s24, %s18742_s24 }
  0x8c   :  { %p18749_p2 = por %p18748_p1, %p18747_p0 }
  0x8e   :  { %95 = dma.hbm_to_vmem [thread:$0]  %s21587_s5, 16, %s93_s0, [#allocation9]  }
  0x8f   :  { %p18750_p3 = pnand %p18749_p2, %p18743_p13 }
  0x91   :  { %18753 = shalt.err (!%p18750_p3)
}
  0x92   :  { %119 = dma.hbm_to_vmem [thread:$0]  %s21499_s7, 2304, %s114_s23, [#allocation12], %s18943_s28, %s18943_s28, %s18944_s4  }
  0x93   :  { %s18957_s17 = smov [#allocation16]   ;;  %s18958_s2 = smov [#allocation19]  }
  0x94   :  { %s135_s26 = sshll.u32 %s18957_s17, 4  ;;  %s160_s27 = sshll.u32 %s18958_s2, 4  ;;  %s136_s26 = int_to_ptr.vmem [resolvable:$true] %s135_s26  ;;  %s161_s27 = int_to_ptr.vmem [resolvable:$true] %s160_s27 }
  0x95   :  { %s18762_s29 = scalar_lea.vmem %s136_s26, 576  ;;  %p18767_p5 = scmp.lt.s32.totalorder %s136_s26, %s136_s26 }
  0x96   :  { %p18763_p4 = scmp.ne.s32.totalorder %s136_s26, %s18762_s29  ;;  %p18768_p6 = scmp.lt.s32.totalorder %s18762_s29, %s18762_s29 }
  0x98   :  { %p18769_p7 = por %p18768_p6, %p18767_p5 }
  0x9a   :  { %p18770_p8 = pnand %p18769_p7, %p18763_p4 }
  0x9c   :  { %18773 = shalt.err (!%p18770_p8)
}
  0x9d   :  { %141 = dma.hbm_to_vmem [thread:$0]  %s21501_s9, 576, %s136_s26, [#allocation15], %s18943_s28, %s18943_s28, %s18944_s4  }
  0x9e   :  { %s18782_s7 = scalar_lea.vmem %s161_s27, 16  ;;  %s18786_s13 = scalar_lea.vmem %s161_s27, 32 }
  0x9f   :  { %p18783_p9 = scmp.ne.s32.totalorder %s161_s27, %s18782_s7  ;;  %p18787_p10 = scmp.lt.s32.totalorder %s161_s27, %s161_s27 }
  0xa0   :  { %p18788_p11 = scmp.lt.s32.totalorder %s18786_s13, %s18782_s7 }
  0xa2   :  { %p18789_p12 = por %p18788_p11, %p18787_p10 }
  0xa4   :  { %p18790_p13 = pnand %p18789_p12, %p18783_p9 }
  0xa6   :  { %18793 = shalt.err (!%p18790_p13)
}
  0xa7   :  { %163 = dma.hbm_to_vmem [thread:$0]  %s21503_s11, 16, %s161_s27, [#allocation18]  }
  0xa8   :  { %s18959_s30 = smov [#allocation22]   ;;  %s18960_s8 = smov [#allocation25]  }
  0xa9   :  { %s184_s15 = sshll.u32 %s18959_s30, 4  ;;  %s205_s5 = sshll.u32 %s18960_s8, 4  ;;  %s185_s15 = int_to_ptr.vmem [resolvable:$true] %s184_s15  ;;  %s206_s5 = int_to_ptr.vmem [resolvable:$true] %s205_s5 }
  0xaa   :  { %s18802_s24 = scalar_lea.vmem %s185_s15, 16  ;;  %s18806_s9 = scalar_lea.vmem %s185_s15, 32 }
  0xab   :  { %p18803_p0 = scmp.ne.s32.totalorder %s185_s15, %s18802_s24  ;;  %p18807_p1 = scmp.lt.s32.totalorder %s185_s15, %s185_s15 }
  0xac   :  { %p18808_p2 = scmp.lt.s32.totalorder %s18806_s9, %s18802_s24 }
  0xae   :  { %p18809_p3 = por %p18808_p2, %p18807_p1 }
  0xb0   :  { %p18810_p4 = pnand %p18809_p3, %p18803_p0 }
  0xb2   :  { %18813 = shalt.err (!%p18810_p4)
}
  0xb3   :  { %187 = dma.hbm_to_vmem [thread:$0]  %s21506_s14, 16, %s185_s15, [#allocation21]  }
  0xb4   :  { %s18822_s17 = scalar_lea.vmem %s206_s5, 65536  ;;  %p18827_p6 = scmp.lt.s32.totalorder %s206_s5, %s206_s5 }
  0xb5   :  { %p18823_p5 = scmp.ne.s32.totalorder %s206_s5, %s18822_s17  ;;  %p18828_p7 = scmp.lt.s32.totalorder %s18822_s17, %s18822_s17 }
  0xb7   :  { %p18829_p8 = por %p18828_p7, %p18827_p6 }
  0xb9   :  { %p18830_p9 = pnand %p18829_p8, %p18823_p5 }
  0xbb   :  { %18833 = shalt.err (!%p18830_p9)
}
  0xbc   :  { %211 = dma.hbm_to_vmem [thread:$0]  %s21508_s16, 65536, %s206_s5, [#allocation24], %s18949_s6, %s18949_s6, %s18943_s28  }
  0xbd   :  { %s18961_s2 = smov [#allocation28]   ;;  %s18962_s29 = smov [#allocation29]  }
  0xbe   :  { %s227_s27 = sshll.u32 %s18961_s2, 4  ;;  %s240_s14 = sshll.u32 %s18962_s29, 4  ;;  %s228_s27 = int_to_ptr.vmem [resolvable:$true] %s227_s27  ;;  %s241_s14 = int_to_ptr.vmem [resolvable:$true] %s240_s14 }
  0xbf   :  { %s18842_s3 = scalar_lea.vmem %s228_s27, 4096  ;;  %p18847_p11 = scmp.lt.s32.totalorder %s228_s27, %s228_s27 }
  0xc0   :  { %p18843_p10 = scmp.ne.s32.totalorder %s228_s27, %s18842_s3  ;;  %p18848_p12 = scmp.lt.s32.totalorder %s18842_s3, %s18842_s3 }
  0xc2   :  { %p18849_p13 = por %p18848_p12, %p18847_p11 }
  0xc4   :  { %p18850_p0 = pnand %p18849_p13, %p18843_p10 }
  0xc6   :  { %18853 = shalt.err (!%p18850_p0)
}
  0xc7   :  { %233 = dma.hbm_to_vmem [thread:$0]  %s21510_s18, 4096, %s228_s27, [#allocation27], %s18943_s28, %s18943_s28, %s18944_s4  }
  0xc8   :  { %s18862_s16 = scalar_lea.vmem %s241_s14, 16  ;;  %s18866_s6 = scalar_lea.vmem %s241_s14, 32 }
  0xc9   :  { %p18863_p1 = scmp.ne.s32.totalorder %s241_s14, %s18862_s16  ;;  %p18867_p2 = scmp.lt.s32.totalorder %s241_s14, %s241_s14 }
  0xca   :  { %p18868_p3 = scmp.lt.s32.totalorder %s18866_s6, %s18862_s16 }
  0xcc   :  { %p18869_p4 = por %p18868_p3, %p18867_p2 }
  0xce   :  { %p18870_p5 = pnand %p18869_p4, %p18863_p1 }
  0xd0   :  { %18873 = shalt.err (!%p18870_p5)
}
  0xd1   :  { %243 = dma.hbm_to_vmem [thread:$0]  %s21511_s19, 16, %s241_s14, [#allocation30]  }
  0xd2   :  { %18914 = dma.done.wait [#allocation3], 128  }
  0xd3   :  { %18915 = vsyncadd [#allocation3], 4294967168 }
  0xd4   :  { %18916 = dma.done.wait [#allocation6], 36992  }
  0xd5   :  { %18917 = vsyncadd [#allocation6], 4294930304 }
  0xd6   :  { %18918 = dma.done.wait [#allocation9], 304  }
  0xd7   :  { %18919 = vsyncadd [#allocation9], 4294966992 }
  0xd8   :  { %18920 = dma.done.wait [#allocation12], 4608  }
  0xd9   :  { %18921 = vsyncadd [#allocation12], 4294962688 }
  0xda   :  { %18922 = dma.done.wait [#allocation15], 592  }
  0xdb   :  { %18923 = vsyncadd [#allocation15], 4294966704 }
  0xdc   :  { %18924 = dma.done.wait [#allocation18], 4624  }
  0xdd   :  { %18925 = vsyncadd [#allocation18], 4294962672 }
  0xde   :  { %18926 = dma.done.wait [#allocation21], 6928  }
  0xdf   :  { %18927 = vsyncadd [#allocation21], 4294960368 }
  0xe0   :  { %18928 = dma.done.wait [#allocation24], 77824  }
  0xe1   :  { %18929 = vsyncadd [#allocation24], 4294889472 }
  0xe2   :  { %18930 = dma.done.wait [#allocation27], 4352  }
  0xe3   :  { %18931 = vsyncadd [#allocation27], 4294962944 }
  0xe4   :  { %18932 = dma.done.wait [#allocation30], 16  }
  0xe5   :  { %18933 = vsyncadd [#allocation30], 4294967280  ;;  %s21588_s28 = sld [smem:[#allocation85_spill]]  ;;  %vm1212_vm0 = vcmask 1041408   ;;  %vm1187_vm1 = vcmask 31744   ;;  %vm5399_vm2 = vcmask 261120  }
  0xe6   :  { %vm18964_vm3 = vmmov 0   ;;  %vm6679_vm4 = vcmask 523264   ;;  %vm7666_vm5 = vcmask 1043456   ;;  %vm7662_vm6 = vcmask 64512   ;;  %s18968_s27 = smov [#allocation32]  }
  0xe7   :  { %vm7818_vm7 = vcmask 785408   ;;  %s14217_s29 = sshll.u32 %s18968_s27, 4  ;;  %s14218_s29 = int_to_ptr.vmem [resolvable:$true] %s14217_s29 }
  0xeb   :  { %v329_v0 = vld [vmem:[%s21588_s28 + $0xf0] sm:$0xff]  ;;  %v330_v1 = vld [vmem:[%s21588_s28 + $0xf8] sm:$0xff]  ;;  %v327_v11 = vld [vmem:[%s21588_s28 + $0xe0] sm:$0xff] }
  0xec   :  { %v361_v2 = vld [vmem:[%s21588_s28 + $0x1f0] sm:$0xff]  ;;  %v19171_v3 = vpack.c.bf16 %v330_v1, %v329_v0  ;;  %v362_v4 = vld [vmem:[%s21588_s28 + $0x1f8] sm:$0xff]  ;;  %v328_v13 = vld [vmem:[%s21588_s28 + $0xe8] sm:$0xff] }
  0xed   :  { %v313_v5 = vld [vmem:[%s21588_s28 + $0x70] sm:$0xff]  ;;  %v314_v6 = vld [vmem:[%s21588_s28 + $0x78] sm:$0xff]  ;;  %v19182_v7 = vpack.c.bf16 %v362_v4, %v361_v2  ;;  %v359_v14 = vld [vmem:[%s21588_s28 + $0x1e0] sm:$0xff]  ;;  %v19209_v16 = vpack.c.bf16 %v328_v13, %v327_v11 }
  0xee   :  { %21589 = vst [vmem:[#allocation46_spill] sm:$0xff] %v19171_v3  ;;  %v19184_v8 = vpack.c.bf16 %v314_v6, %v313_v5  ;;  %v345_v9 = vld [vmem:[%s21588_s28 + $0x170] sm:$0xff]  ;;  %v346_v10 = vld [vmem:[%s21588_s28 + $0x178] sm:$0xff]  ;;  %15454 = vmatprep.subr.bf16.mxu0 %v19171_v3  ;;  %v360_v15 = vld [vmem:[%s21588_s28 + $0x1e8] sm:$0xff] }
  0xef   :  { %21590 = vst [vmem:[#allocation47_spill] sm:$0xff] %v19182_v7  ;;  %v19196_v12 = vpack.c.bf16 %v346_v10, %v345_v9  ;;  %15518 = vmatprep.subr.bf16.mxu1 %v19182_v7  ;;  %v19211_v17 = vpack.c.bf16 %v360_v15, %v359_v14  ;;  %v311_v18 = vld [vmem:[%s21588_s28 + $0x60] sm:$0xff]  ;;  %v312_v19 = vld [vmem:[%s21588_s28 + $0x68] sm:$0xff]  ;;  %v325_v23 = vld [vmem:[%s21588_s28 + $0xd0] sm:$0xff] }
  0xf0   :  { %15455 = vmatpush3.bf16.msra.mxu0 %v19184_v8  ;;  %v343_v20 = vld [vmem:[%s21588_s28 + $0x160] sm:$0xff]  ;;  %v19223_v21 = vpack.c.bf16 %v312_v19, %v311_v18  ;;  %v344_v22 = vld [vmem:[%s21588_s28 + $0x168] sm:$0xff]  ;;  %v326_v24 = vld [vmem:[%s21588_s28 + $0xd8] sm:$0xff] }
  0xf1   :  { %21591 = vst [vmem:[#allocation48_spill] sm:$0xff] %v19196_v12  ;;  %21592 = vst [vmem:[#allocation49_spill] sm:$0xff] %v19211_v17  ;;  %15519 = vmatpush3.bf16.msra.mxu1 %v19196_v12  ;;  %15456 = vmatprep.subr.bf16.mxu0 %v19209_v16  ;;  %v19236_v25 = vpack.c.bf16 %v344_v22, %v343_v20  ;;  %v19238_v26 = vpack.c.bf16 %v326_v24, %v325_v23  ;;  %v357_v27 = vld [vmem:[%s21588_s28 + $0x1d0] sm:$0xff]  ;;  %v358_v28 = vld [vmem:[%s21588_s28 + $0x1d8] sm:$0xff] }
  0xf2   :  { %15520 = vmatprep.subr.bf16.mxu1 %v19211_v17  ;;  %v309_v29 = vld [vmem:[%s21588_s28 + $0x50] sm:$0xff]  ;;  %v19249_v30 = vpack.c.bf16 %v358_v28, %v357_v27  ;;  %v310_v31 = vld [vmem:[%s21588_s28 + $0x58] sm:$0xff]  ;;  %v323_v35 = vld [vmem:[%s21588_s28 + $0xc0] sm:$0xff] }
  0xf3   :  { %21593 = vst [vmem:[#allocation50_spill] sm:$0xff] %v19236_v25  ;;  %v341_v32 = vld [vmem:[%s21588_s28 + $0x150] sm:$0xff]  ;;  %v342_v33 = vld [vmem:[%s21588_s28 + $0x158] sm:$0xff]  ;;  %v19261_v34 = vpack.c.bf16 %v310_v31, %v309_v29  ;;  %v324_v36 = vld [vmem:[%s21588_s28 + $0xc8] sm:$0xff] }
  0xf4   :  { %21594 = vst [vmem:[#allocation51_spill] sm:$0xff] %v19249_v30  ;;  %15457 = vmatpush3.bf16.msra.mxu0 %v19223_v21  ;;  %v355_v37 = vld [vmem:[%s21588_s28 + $0x1c0] sm:$0xff]  ;;  %v19274_v38 = vpack.c.bf16 %v342_v33, %v341_v32  ;;  %v19276_v39 = vpack.c.bf16 %v324_v36, %v323_v35  ;;  %v356_v40 = vld [vmem:[%s21588_s28 + $0x1c8] sm:$0xff]  ;;  %v321_v46 = vld [vmem:[%s21588_s28 + $0xb0] sm:$0xff] }
  0xf5   :  { %21595 = vst [vmem:[#allocation52_spill] sm:$0xff] %v19261_v34  ;;  %15521 = vmatpush3.bf16.msra.mxu1 %v19236_v25  ;;  %15458 = vmatprep.subr.bf16.mxu0 %v19238_v26  ;;  %v307_v41 = vld [vmem:[%s21588_s28 + $0x40] sm:$0xff]  ;;  %v308_v42 = vld [vmem:[%s21588_s28 + $0x48] sm:$0xff]  ;;  %v19288_v43 = vpack.c.bf16 %v356_v40, %v355_v37  ;;  %v322_v47 = vld [vmem:[%s21588_s28 + $0xb8] sm:$0xff] }
  0xf6   :  { %21596 = vst [vmem:[#allocation53_spill] sm:$0xff] %v19274_v38  ;;  %21597 = vst [vmem:[#allocation54_spill] sm:$0xff] %v19276_v39  ;;  %15522 = vmatprep.subr.bf16.mxu1 %v19249_v30  ;;  %v339_v44 = vld [vmem:[%s21588_s28 + $0x140] sm:$0xff]  ;;  %v340_v45 = vld [vmem:[%s21588_s28 + $0x148] sm:$0xff]  ;;  %v19309_v50 = vpack.c.bf16 %v308_v42, %v307_v41  ;;  %v19315_v52 = vpack.c.bf16 %v322_v47, %v321_v46 }
  0xf7   :  { %21598 = vst [vmem:[#allocation55_spill] sm:$0xff] %v19288_v43  ;;  %v353_v48 = vld [vmem:[%s21588_s28 + $0x1b0] sm:$0xff]  ;;  %v354_v49 = vld [vmem:[%s21588_s28 + $0x1b8] sm:$0xff]  ;;  %v19313_v51 = vpack.c.bf16 %v340_v45, %v339_v44  ;;  %v319_v58 = vld [vmem:[%s21588_s28 + $0xa0] sm:$0xff] }
  0xf8   :  { %15459 = vmatpush3.bf16.msra.mxu0 %v19261_v34  ;;  %21599 = vst [vmem:[#allocation56_spill] sm:$0xff] %v19309_v50  ;;  %21601 = vst [vmem:[#allocation58_spill] sm:$0xff] %v19315_v52  ;;  %v305_v53 = vld [vmem:[%s21588_s28 + $0x30] sm:$0xff]  ;;  %v306_v54 = vld [vmem:[%s21588_s28 + $0x38] sm:$0xff]  ;;  %v19327_v56 = vpack.c.bf16 %v354_v49, %v353_v48 }
  0xf9   :  { %15523 = vmatpush3.bf16.msra.mxu1 %v19274_v38  ;;  %15460 = vmatprep.subr.bf16.mxu0 %v19276_v39  ;;  %21600 = vst [vmem:[#allocation57_spill] sm:$0xff] %v19313_v51  ;;  %v337_v55 = vld [vmem:[%s21588_s28 + $0x130] sm:$0xff]  ;;  %v338_v57 = vld [vmem:[%s21588_s28 + $0x138] sm:$0xff]  ;;  %v320_v59 = vld [vmem:[%s21588_s28 + $0xa8] sm:$0xff]  ;;  %v19345_v62 = vpack.c.bf16 %v306_v54, %v305_v53 }
  0xfa   :  { %15524 = vmatprep.subr.bf16.mxu1 %v19288_v43  ;;  %21602 = vst [vmem:[#allocation59_spill] sm:$0xff] %v19327_v56  ;;  %v351_v60 = vld [vmem:[%s21588_s28 + $0x1a0] sm:$0xff]  ;;  %v352_v61 = vld [vmem:[%s21588_s28 + $0x1a8] sm:$0xff]  ;;  %v19352_v0 = vpack.c.bf16 %v338_v57, %v337_v55  ;;  %v19354_v1 = vpack.c.bf16 %v320_v59, %v319_v58  ;;  %v317_v9 = vld [vmem:[%s21588_s28 + $0x90] sm:$0xff] }
  0xfb   :  { %21603 = vst [vmem:[#allocation60_spill] sm:$0xff] %v19345_v62  ;;  %v303_v63 = vld [vmem:[%s21588_s28 + $0x20] sm:$0xff]  ;;  %v304_v2 = vld [vmem:[%s21588_s28 + $0x28] sm:$0xff]  ;;  %v19366_v6 = vpack.c.bf16 %v352_v61, %v351_v60  ;;  %v318_v10 = vld [vmem:[%s21588_s28 + $0x98] sm:$0xff] }
  0xfc   :  { %15461 = vmatpush3.bf16.msra.mxu0 %v19309_v50  ;;  %21604 = vst [vmem:[#allocation61_spill] sm:$0xff] %v19352_v0  ;;  %21605 = vst [vmem:[#allocation62_spill] sm:$0xff] %v19354_v1  ;;  %v335_v4 = vld [vmem:[%s21588_s28 + $0x120] sm:$0xff]  ;;  %v336_v5 = vld [vmem:[%s21588_s28 + $0x128] sm:$0xff]  ;;  %v19387_v18 = vpack.c.bf16 %v304_v2, %v303_v63  ;;  %v19402_v24 = vpack.c.bf16 %v318_v10, %v317_v9 }
  0xfd   :  { %15525 = vmatpush3.bf16.msra.mxu1 %v19313_v51  ;;  %15462 = vmatprep.subr.bf16.mxu0 %v19315_v52  ;;  %21606 = vst [vmem:[#allocation63_spill] sm:$0xff] %v19366_v6  ;;  %v349_v11 = vld [vmem:[%s21588_s28 + $0x190] sm:$0xff]  ;;  %v350_v13 = vld [vmem:[%s21588_s28 + $0x198] sm:$0xff]  ;;  %v315_v22 = vld [vmem:[%s21588_s28 + $0x80] sm:$0xff]  ;;  %v19400_v23 = vpack.c.bf16 %v336_v5, %v335_v4 }
  0xfe   :  { %15526 = vmatprep.subr.bf16.mxu1 %v19327_v56  ;;  %v301_v14 = vld [vmem:[%s21588_s28 + $0x10] sm:$0xff]  ;;  %v302_v15 = vld [vmem:[%s21588_s28 + $0x18] sm:$0xff]  ;;  %21607 = vst [vmem:[#allocation64_spill] sm:$0xff] %v19387_v18  ;;  %21609 = vst [vmem:[#allocation66_spill] sm:$0xff] %v19402_v24  ;;  %v19408_v28 = vpack.c.bf16 %v350_v13, %v349_v11 }
  0xff   :  { %v333_v19 = vld [vmem:[%s21588_s28 + $0x110] sm:$0xff]  ;;  %v334_v20 = vld [vmem:[%s21588_s28 + $0x118] sm:$0xff]  ;;  %21608 = vst [vmem:[#allocation65_spill] sm:$0xff] %v19400_v23  ;;  %v316_v27 = vld [vmem:[%s21588_s28 + $0x88] sm:$0xff]  ;;  %v19417_v35 = vpack.c.bf16 %v302_v15, %v301_v14 }
 0x100   :  { %15463 = vmatpush3.bf16.msra.mxu0 %v19345_v62  ;;  %21610 = vst [vmem:[#allocation67_spill] sm:$0xff] %v19408_v28  ;;  %v347_v29 = vld [vmem:[%s21588_s28 + $0x180] sm:$0xff]  ;;  %v348_v32 = vld [vmem:[%s21588_s28 + $0x188] sm:$0xff]  ;;  %v19424_v37 = vpack.c.bf16 %v334_v20, %v333_v19  ;;  %v19426_v40 = vpack.c.bf16 %v316_v27, %v315_v22 }
 0x101   :  { %15527 = vmatpush3.bf16.msra.mxu1 %v19352_v0  ;;  %15464 = vmatprep.subr.bf16.mxu0 %v19354_v1  ;;  %v17860_v31 = vld [vmem:[#allocation7 + $0x4] ss:$16 sps:$4 sm:$0xff]   ;;  %v17863_v33 = vld [vmem:[#allocation7 + $0xc] ss:$16 sps:$4 sm:$0xff]   ;;  %21611 = vst [vmem:[#allocation68_spill] sm:$0xff] %v19417_v35  ;;  %v19432_v42 = vpack.c.bf16 %v348_v32, %v347_v29 }
 0x102   :  { %15528 = vmatprep.subr.bf16.mxu1 %v19366_v6  ;;  %v299_v36 = vld [vmem:[%s21588_s28] sm:$0xff]  ;;  %619 = vmatprep.mubr.bf16.mxu0 %v17860_v31  ;;  %21612 = vst [vmem:[#allocation69_spill] sm:$0xff] %v19424_v37  ;;  %21613 = vst [vmem:[#allocation70_spill] sm:$0xff] %v19426_v40  ;;  %v300_v41 = vld [vmem:[%s21588_s28 + $0x8] sm:$0xff] }
 0x103   :  { %21614 = vst [vmem:[#allocation71_spill] sm:$0xff] %v19432_v42  ;;  %v331_v44 = vld [vmem:[%s21588_s28 + $0x100] sm:$0xff]  ;;  %v332_v45 = vld [vmem:[%s21588_s28 + $0x108] sm:$0xff]  ;;  %716 = vmatprep.mubr.bf16.mxu1 %v17863_v33  ;;  %v19441_v46 = vpack.c.bf16 %v300_v41, %v299_v36 }
 0x104   :  { %15465 = vmatpush3.bf16.msra.mxu0 %v19387_v18  ;;  %v19445_v47 = vpack.c.bf16 %v332_v45, %v331_v44  ;;  %v17858_v48 = vld [vmem:[#allocation7] ss:$16 sps:$4 sm:$0xff]   ;;  %v17861_v49 = vld [vmem:[#allocation7 + $0x8] ss:$16 sps:$4 sm:$0xff]   ;;  %v17864_v53 = vld [vmem:[#allocation7 + $0x24] ss:$16 sps:$4 sm:$0xff]  }
 0x105   :  { %15529 = vmatpush3.bf16.msra.mxu1 %v19400_v23  ;;  %15466 = vmatprep.subr.bf16.mxu0 %v19402_v24  ;;  %21615 = vst [vmem:[#allocation72_spill] sm:$0xff] %v19441_v46  ;;  %v17866_v54 = vld [vmem:[#allocation7 + $0x2c] ss:$16 sps:$4 sm:$0xff]   ;;  %v17868_v55 = vld [vmem:[#allocation7 + $0x20] ss:$16 sps:$4 sm:$0xff]  }
 0x106   :  { %15530 = vmatprep.subr.bf16.mxu1 %v19408_v28  ;;  %21616 = vst [vmem:[#allocation73_spill] sm:$0xff] %v19445_v47  ;;  %v17869_v57 = vld [vmem:[#allocation7 + $0x28] ss:$16 sps:$4 sm:$0xff]   ;;  %v17870_v58 = vld [vmem:[#allocation7 + $0x44] ss:$16 sps:$4 sm:$0xff]  }
 0x107   :  { %v17872_v59 = vld [vmem:[#allocation7 + $0x4c] ss:$16 sps:$4 sm:$0xff]   ;;  %v17874_v60 = vld [vmem:[#allocation7 + $0x40] ss:$16 sps:$4 sm:$0xff]   ;;  %v17875_v61 = vld [vmem:[#allocation7 + $0x48] ss:$16 sps:$4 sm:$0xff]  }
 0x108   :  { %15467 = vmatpush3.bf16.msra.mxu0 %v19417_v35  ;;  %v17876_v63 = vld [vmem:[#allocation7 + $0x64] ss:$16 sps:$4 sm:$0xff]   ;;  %v17878_v2 = vld [vmem:[#allocation7 + $0x6c] ss:$16 sps:$4 sm:$0xff]   ;;  %v17880_v4 = vld [vmem:[#allocation7 + $0x60] ss:$16 sps:$4 sm:$0xff]  }
 0x109   :  { %15531 = vmatpush3.bf16.msra.mxu1 %v19424_v37  ;;  %15468 = vmatprep.subr.bf16.mxu0 %v19426_v40  ;;  %v17881_v5 = vld [vmem:[#allocation7 + $0x68] ss:$16 sps:$4 sm:$0xff]   ;;  %v17882_v9 = vld [vmem:[#allocation7 + $0x84] ss:$16 sps:$4 sm:$0xff]   ;;  %v17884_v10 = vld [vmem:[#allocation7 + $0x8c] ss:$16 sps:$4 sm:$0xff]  }
 0x10a   :  { %15532 = vmatprep.subr.bf16.mxu1 %v19432_v42  ;;  %v17886_v11 = vld [vmem:[#allocation7 + $0x80] ss:$16 sps:$4 sm:$0xff]   ;;  %v17887_v13 = vld [vmem:[#allocation7 + $0x88] ss:$16 sps:$4 sm:$0xff]   ;;  %v17888_v14 = vld [vmem:[#allocation7 + $0xa4] ss:$16 sps:$4 sm:$0xff]  }
 0x10b   :  { %v17890_v15 = vld [vmem:[#allocation7 + $0xac] ss:$16 sps:$4 sm:$0xff]   ;;  %v17892_v19 = vld [vmem:[#allocation7 + $0xa0] ss:$16 sps:$4 sm:$0xff]   ;;  %v17893_v20 = vld [vmem:[#allocation7 + $0xa8] ss:$16 sps:$4 sm:$0xff]  }
 0x10c   :  { %15469 = vmatpush3.bf16.msra.mxu0 %v19441_v46  ;;  %v17894_v22 = vld [vmem:[#allocation7 + $0xc4] ss:$16 sps:$4 sm:$0xff]   ;;  %v17896_v27 = vld [vmem:[#allocation7 + $0xcc] ss:$16 sps:$4 sm:$0xff]   ;;  %v17898_v29 = vld [vmem:[#allocation7 + $0xc0] ss:$16 sps:$4 sm:$0xff]  }
 0x10d   :  { %15533 = vmatpush3.bf16.msra.mxu1 %v19445_v47  ;;  %15582 = vmatprep.subr.bf16.mxu0 %v19171_v3  ;;  %v17899_v31 = vld [vmem:[#allocation7 + $0xc8] ss:$16 sps:$4 sm:$0xff]   ;;  %v17900_v32 = vld [vmem:[#allocation7 + $0xe4] ss:$16 sps:$4 sm:$0xff]   ;;  %v17902_v33 = vld [vmem:[#allocation7 + $0xec] ss:$16 sps:$4 sm:$0xff]  }
 0x10e   :  { %17802 = vmatprep.subr.bf16.mxu1 %v19182_v7  ;;  %v17904_v36 = vld [vmem:[#allocation7 + $0xe0] ss:$16 sps:$4 sm:$0xff]   ;;  %v17905_v41 = vld [vmem:[#allocation7 + $0xe8] ss:$16 sps:$4 sm:$0xff]   ;;  %v17908_v44 = vld [vmem:[#allocation7 + $0x104] ss:$16 sps:$4 sm:$0xff]  }
 0x10f   :  { %620 = vmatmul.mubr.bf16.vlgmr.msra.gmra.mxu0 %v17858_v48  ;;  %v17913_v45 = vld [vmem:[#allocation7 + $0x12c] ss:$16 sps:$4 sm:$0xff]   ;;  %v17906_v48 = vld [vmem:[#allocation7 + $0x100] ss:$16 sps:$4 sm:$0xff]  }
 0x110   :  { %717 = vmatmul.mubr.bf16.vlgmr.msra.gmra.mxu1 %v17861_v49  ;;  %627 = vmatprep.mubr.bf16.mxu0 %v17864_v53  ;;  %v17909_v49 = vld [vmem:[#allocation7 + $0x124] ss:$16 sps:$4 sm:$0xff]   ;;  %v17911_v53 = vld [vmem:[#allocation7 + $0x128] ss:$16 sps:$4 sm:$0xff]  }
 0x111   :  { %724 = vmatprep.mubr.bf16.mxu1 %v17866_v54  ;;  %15583 = vmatpush3.bf16.msra.mxu0 %v19184_v8  ;;  %v17917_v54 = vld [vmem:[#allocation7 + $0x14c] ss:$16 sps:$4 sm:$0xff]  }
 0x112   :  { %15584 = vmatprep.subr.bf16.mxu0 %v19209_v16  ;;  %17810 = vmatpush3.bf16.msra.mxu1 %v19196_v12 }
 0x113   :  { %17803 = vmatprep.subr.bf16.mxu1 %v19211_v17 }
 0x115   :  { %15585 = vmatpush3.bf16.msra.mxu0 %v19223_v21 }
 0x116   :  { %15586 = vmatprep.subr.bf16.mxu0 %v19238_v26  ;;  %17811 = vmatpush3.bf16.msra.mxu1 %v19236_v25 }
 0x117   :  { %628 = vmatmul.mubr.bf16.gmra.mxu0 %v17868_v55  ;;  %17804 = vmatprep.subr.bf16.mxu1 %v19249_v30  ;;  %v17914_v55 = vld [vmem:[#allocation7 + $0x120] ss:$16 sps:$4 sm:$0xff]  }
 0x118   :  { %725 = vmatmul.mubr.bf16.gmra.mxu1 %v17869_v57  ;;  %635 = vmatprep.mubr.bf16.mxu0 %v17870_v58  ;;  %v17915_v57 = vld [vmem:[#allocation7 + $0x144] ss:$16 sps:$4 sm:$0xff]   ;;  %v17920_v58 = vld [vmem:[#allocation7 + $0x148] ss:$16 sps:$4 sm:$0xff]  }
 0x119   :  { %732 = vmatprep.mubr.bf16.mxu1 %v17872_v59  ;;  %15587 = vmatpush3.bf16.msra.mxu0 %v19261_v34  ;;  %v17923_v59 = vld [vmem:[#allocation7 + $0x16c] ss:$16 sps:$4 sm:$0xff]  }
 0x11a   :  { %15588 = vmatprep.subr.bf16.mxu0 %v19276_v39  ;;  %17812 = vmatpush3.bf16.msra.mxu1 %v19274_v38 }
 0x11b   :  { %17805 = vmatprep.subr.bf16.mxu1 %v19288_v43 }
 0x11d   :  { %15589 = vmatpush3.bf16.msra.mxu0 %v19309_v50 }
 0x11e   :  { %15590 = vmatprep.subr.bf16.mxu0 %v19315_v52  ;;  %17813 = vmatpush3.bf16.msra.mxu1 %v19313_v51 }
 0x11f   :  { %636 = vmatmul.mubr.bf16.gmra.mxu0 %v17874_v60  ;;  %17806 = vmatprep.subr.bf16.mxu1 %v19327_v56  ;;  %v17919_v60 = vld [vmem:[#allocation7 + $0x140] ss:$16 sps:$4 sm:$0xff]  }
 0x120   :  { %733 = vmatmul.mubr.bf16.gmra.mxu1 %v17875_v61  ;;  %643 = vmatprep.mubr.bf16.mxu0 %v17876_v63  ;;  %v17921_v61 = vld [vmem:[#allocation7 + $0x164] ss:$16 sps:$4 sm:$0xff]   ;;  %v17926_v63 = vld [vmem:[#allocation7 + $0x168] ss:$16 sps:$4 sm:$0xff]  }
 0x121   :  { %740 = vmatprep.mubr.bf16.mxu1 %v17878_v2  ;;  %15591 = vmatpush3.bf16.msra.mxu0 %v19345_v62  ;;  %v17929_v2 = vld [vmem:[#allocation7 + $0x18c] ss:$16 sps:$4 sm:$0xff]  }
 0x122   :  { %15592 = vmatprep.subr.bf16.mxu0 %v19354_v1  ;;  %17814 = vmatpush3.bf16.msra.mxu1 %v19352_v0 }
 0x123   :  { %17807 = vmatprep.subr.bf16.mxu1 %v19366_v6 }
 0x125   :  { %15593 = vmatpush3.bf16.msra.mxu0 %v19387_v18 }
 0x126   :  { %15594 = vmatprep.subr.bf16.mxu0 %v19402_v24  ;;  %17815 = vmatpush3.bf16.msra.mxu1 %v19400_v23 }
 0x127   :  { %644 = vmatmul.mubr.bf16.gmra.mxu0 %v17880_v4  ;;  %17808 = vmatprep.subr.bf16.mxu1 %v19408_v28  ;;  %v789_v4 = vld [vmem:[#allocation8] sm:$0x3] }
 0x128   :  { %741 = vmatmul.mubr.bf16.gmra.mxu1 %v17881_v5  ;;  %651 = vmatprep.mubr.bf16.mxu0 %v17882_v9  ;;  %v17925_v5 = vld [vmem:[#allocation7 + $0x160] ss:$16 sps:$4 sm:$0xff]   ;;  %v1338_v9 = vsel %vm1212_vm0, %v789_v4, 0 }
 0x129   :  { %748 = vmatprep.mubr.bf16.mxu1 %v17884_v10  ;;  %15595 = vmatpush3.bf16.msra.mxu0 %v19417_v35  ;;  %v17927_v10 = vld [vmem:[#allocation7 + $0x184] ss:$16 sps:$4 sm:$0xff]  }
 0x12a   :  { %15596 = vmatprep.subr.bf16.mxu0 %v19426_v40  ;;  %17816 = vmatpush3.bf16.msra.mxu1 %v19424_v37 }
 0x12b   :  { %17809 = vmatprep.subr.bf16.mxu1 %v19432_v42 }
 0x12d   :  { %15597 = vmatpush3.bf16.msra.mxu0 %v19441_v46 }
 0x12e   :  { %17817 = vmatpush3.bf16.msra.mxu1 %v19445_v47  ;;  %15646 = vmatprep.subr.bf16.mxu0 %v19182_v7 }
 0x12f   :  { %652 = vmatmul.mubr.bf16.gmra.mxu0 %v17886_v11  ;;  %v17932_v11 = vld [vmem:[#allocation7 + $0x188] ss:$16 sps:$4 sm:$0xff]   ;;  %17819 = vmatprep.subr.msk.bf16.mxu1 %vm1212_vm0, %v789_v4 }
 0x130   :  { %749 = vmatmul.mubr.bf16.gmra.mxu1 %v17887_v13  ;;  %659 = vmatprep.mubr.bf16.mxu0 %v17888_v14  ;;  %v17935_v13 = vld [vmem:[#allocation7 + $0x1ac] ss:$16 sps:$4 sm:$0xff]   ;;  %v17931_v14 = vld [vmem:[#allocation7 + $0x180] ss:$16 sps:$4 sm:$0xff]  }
 0x131   :  { %756 = vmatprep.mubr.bf16.mxu1 %v17890_v15  ;;  %v17933_v15 = vld [vmem:[#allocation7 + $0x1a4] ss:$16 sps:$4 sm:$0xff]  }
 0x137   :  { %660 = vmatmul.mubr.bf16.gmra.mxu0 %v17892_v19  ;;  %v17938_v19 = vld [vmem:[#allocation7 + $0x1a8] ss:$16 sps:$4 sm:$0xff]  }
 0x138   :  { %757 = vmatmul.mubr.bf16.gmra.mxu1 %v17893_v20  ;;  %667 = vmatprep.mubr.bf16.mxu0 %v17894_v22  ;;  %v17941_v20 = vld [vmem:[#allocation7 + $0x1cc] ss:$16 sps:$4 sm:$0xff]   ;;  %v17937_v22 = vld [vmem:[#allocation7 + $0x1a0] ss:$16 sps:$4 sm:$0xff]  }
 0x139   :  { %764 = vmatprep.mubr.bf16.mxu1 %v17896_v27  ;;  %v17939_v27 = vld [vmem:[#allocation7 + $0x1c4] ss:$16 sps:$4 sm:$0xff]  }
 0x13f   :  { %668 = vmatmul.mubr.bf16.gmra.mxu0 %v17898_v29  ;;  %v17944_v29 = vld [vmem:[#allocation7 + $0x1c8] ss:$16 sps:$4 sm:$0xff]  }
 0x140   :  { %765 = vmatmul.mubr.bf16.gmra.mxu1 %v17899_v31  ;;  %675 = vmatprep.mubr.bf16.mxu0 %v17900_v32  ;;  %v17947_v31 = vld [vmem:[#allocation7 + $0x1ec] ss:$16 sps:$4 sm:$0xff]   ;;  %v17943_v32 = vld [vmem:[#allocation7 + $0x1c0] ss:$16 sps:$4 sm:$0xff]  }
 0x141   :  { %772 = vmatprep.mubr.bf16.mxu1 %v17902_v33  ;;  %v17945_v33 = vld [vmem:[#allocation7 + $0x1e4] ss:$16 sps:$4 sm:$0xff]  }
 0x147   :  { %676 = vmatmul.mubr.bf16.gmra.mxu0 %v17904_v36  ;;  %v17950_v36 = vld [vmem:[#allocation7 + $0x1e8] ss:$16 sps:$4 sm:$0xff]  }
 0x148   :  { %773 = vmatmul.mubr.bf16.gmra.mxu1 %v17905_v41  ;;  %1015 = vmatprep.mubr.bf16.mxu0 %v17908_v44  ;;  %v17949_v41 = vld [vmem:[#allocation7 + $0x1e0] ss:$16 sps:$4 sm:$0xff]   ;;  %v17953_v44 = vld [vmem:[#allocation7 + $0x10c] ss:$16 sps:$4 sm:$0xff]  }
 0x149   :  { %1120 = vmatprep.mubr.bf16.mxu1 %v17913_v45  ;;  %v17951_v45 = vld [vmem:[#allocation7 + $0x108] ss:$16 sps:$4 sm:$0xff]  }
 0x14f   :  { %1016 = vmatmul.mubr.bf16.vlgmr.msra.gmra.mxu0 %v17906_v48 }
 0x150   :  { %1023 = vmatprep.mubr.bf16.mxu0 %v17909_v49  ;;  %1121 = vmatmul.mubr.bf16.vlgmr.msra.gmra.mxu1 %v17911_v53 }
 0x151   :  { %1128 = vmatprep.mubr.bf16.mxu1 %v17917_v54  ;;  %15647 = vmatpush3.bf16.msra.mxu0 %v19196_v12 }
 0x152   :  { %15648 = vmatprep.subr.bf16.mxu0 %v19211_v17  ;;  %17029 = vmatpush3.bf16.msra.mxu1 %v1338_v9 }
 0x153   :  { %15792 = vmatprep.subr.bf16.mxu1 %v19182_v7 }
 0x155   :  { %15649 = vmatpush3.bf16.msra.mxu0 %v19236_v25 }
 0x156   :  { %15650 = vmatprep.subr.bf16.mxu0 %v19249_v30 }
 0x157   :  { %1024 = vmatmul.mubr.bf16.gmra.mxu0 %v17914_v55 }
 0x158   :  { %1031 = vmatprep.mubr.bf16.mxu0 %v17915_v57  ;;  %1129 = vmatmul.mubr.bf16.gmra.mxu1 %v17920_v58 }
 0x159   :  { %1136 = vmatprep.mubr.bf16.mxu1 %v17923_v59  ;;  %15651 = vmatpush3.bf16.msra.mxu0 %v19274_v38 }
 0x15a   :  { %15652 = vmatprep.subr.bf16.mxu0 %v19288_v43 }
 0x15d   :  { %15653 = vmatpush3.bf16.msra.mxu0 %v19313_v51 }
 0x15e   :  { %15654 = vmatprep.subr.bf16.mxu0 %v19327_v56 }
 0x15f   :  { %1032 = vmatmul.mubr.bf16.gmra.mxu0 %v17919_v60 }
 0x160   :  { %1039 = vmatprep.mubr.bf16.mxu0 %v17921_v61  ;;  %1137 = vmatmul.mubr.bf16.gmra.mxu1 %v17926_v63 }
 0x161   :  { %1144 = vmatprep.mubr.bf16.mxu1 %v17929_v2  ;;  %15655 = vmatpush3.bf16.msra.mxu0 %v19352_v0 }
 0x162   :  { %15656 = vmatprep.subr.bf16.mxu0 %v19366_v6 }
 0x165   :  { %15657 = vmatpush3.bf16.msra.mxu0 %v19400_v23 }
 0x166   :  { %15658 = vmatprep.subr.bf16.mxu0 %v19408_v28 }
 0x167   :  { %1040 = vmatmul.mubr.bf16.gmra.mxu0 %v17925_v5 }
 0x168   :  { %1047 = vmatprep.mubr.bf16.mxu0 %v17927_v10  ;;  %1145 = vmatmul.mubr.bf16.gmra.mxu1 %v17932_v11 }
 0x169   :  { %1152 = vmatprep.mubr.bf16.mxu1 %v17935_v13  ;;  %15659 = vmatpush3.bf16.msra.mxu0 %v19424_v37  ;;  %v1186_v13 = vld [vmem:[#allocation8 + $0x2] sm:$0x3] }
 0x16a   :  { %15660 = vmatprep.subr.bf16.mxu0 %v19432_v42 }
 0x16d   :  { %15661 = vmatpush3.bf16.msra.mxu0 %v19445_v47 }
 0x16e   :  { %17818 = vmatprep.subr.msk.bf16.mxu0 %vm1212_vm0, %v1186_v13 }
 0x16f   :  { %1048 = vmatmul.mubr.bf16.gmra.mxu0 %v17931_v14 }
 0x170   :  { %1055 = vmatprep.mubr.bf16.mxu0 %v17933_v15  ;;  %1153 = vmatmul.mubr.bf16.gmra.mxu1 %v17938_v19  ;;  %v1214_v15 = vsel %vm1212_vm0, %v1186_v13, 0 }
 0x171   :  { %1160 = vmatprep.mubr.bf16.mxu1 %v17941_v20 }
 0x177   :  { %1056 = vmatmul.mubr.bf16.gmra.mxu0 %v17937_v22 }
 0x178   :  { %1063 = vmatprep.mubr.bf16.mxu0 %v17939_v27  ;;  %1161 = vmatmul.mubr.bf16.gmra.mxu1 %v17944_v29 }
 0x179   :  { %1168 = vmatprep.mubr.bf16.mxu1 %v17947_v31 }
 0x17f   :  { %1064 = vmatmul.mubr.bf16.gmra.mxu0 %v17943_v32 }
 0x180   :  { %1071 = vmatprep.mubr.bf16.mxu0 %v17945_v33  ;;  %1169 = vmatmul.mubr.bf16.gmra.mxu1 %v17950_v36 }
 0x187   :  { %1072 = vmatmul.mubr.bf16.gmra.mxu0 %v17949_v41 }
 0x188   :  { %1112 = vmatprep.mubr.bf16.mxu0 %v17953_v44 }
 0x18f   :  { %1113 = vmatmul.mubr.bf16.vlgmr.msra.gmra.mxu0 %v17951_v45 }
 0x190   :  { %17011 = vmatpush3.bf16.msra.mxu0 %v1214_v15 }
 0x191   :  { %15728 = vmatprep.subr.bf16.mxu0 %v19171_v3 }
 0x1cf   :  { %v15470_v48 = vpop.f32.mrf.mxu0 }
 0x1d0   :  { %v15534_v49 = vpop.f32.mrf.mxu1 }
 0x1d1   :  { %v15471_v53 = vpop.f32.mrf.mxu0 }
 0x1d2   :  { %v15535_v54 = vpop.f32.mrf.mxu1  ;;  %v15472_v58 = vadd.f32 %v15471_v53, %v15470_v48 }
 0x1d3   :  { %v15473_v55 = vpop.f32.mrf.mxu0  ;;  %v15536_v59 = vadd.f32 %v15535_v54, %v15534_v49 }
 0x1d4   :  { %v15537_v57 = vpop.f32.mrf.mxu1 }
 0x1d5   :  { %v15474_v60 = vpop.f32.mrf.mxu0  ;;  %v719_v9 = vadd.f32 %v15536_v59, %v15472_v58 }
 0x1d6   :  { %v15475_v61 = vadd.f32 %v15474_v60, %v15473_v55  ;;  %v15538_v63 = vpop.f32.mrf.mxu1 }
 0x1d7   :  { %v15539_v2 = vadd.f32 %v15538_v63, %v15537_v57  ;;  %v15476_v4 = vpop.f32.mrf.mxu0 }
 0x1d8   :  { %v15540_v5 = vpop.f32.mrf.mxu1 }
 0x1d9   :  { %v722_v10 = vadd.f32 %v15539_v2, %v15475_v61  ;;  %v15477_v11 = vpop.f32.mrf.mxu0 }
 0x1da   :  { %v15541_v14 = vpop.f32.mrf.mxu1  ;;  %v15478_v27 = vadd.f32 %v15477_v11, %v15476_v4 }
 0x1db   :  { %v781_v19 = vpack.c.bf16 %v722_v10, %v719_v9  ;;  %v15479_v20 = vpop.f32.mrf.mxu0  ;;  %v15542_v29 = vadd.f32 %v15541_v14, %v15540_v5 }
 0x1dc   :  { %v15543_v22 = vpop.f32.mrf.mxu1 }
 0x1dd   :  { %17030 = vmatprep.mubr.msk.bf16.mxu1 %vm1187_vm1, %v781_v19  ;;  %v15480_v31 = vpop.f32.mrf.mxu0  ;;  %v727_v45 = vadd.f32 %v15542_v29, %v15478_v27 }
 0x1de   :  { %v15481_v32 = vadd.f32 %v15480_v31, %v15479_v20  ;;  %v15544_v33 = vpop.f32.mrf.mxu1 }
 0x1df   :  { %v15545_v36 = vadd.f32 %v15544_v33, %v15543_v22  ;;  %v15482_v41 = vpop.f32.mrf.mxu0 }
 0x1e0   :  { %v15546_v44 = vpop.f32.mrf.mxu1 }
 0x1e1   :  { %v730_v48 = vadd.f32 %v15545_v36, %v15481_v32  ;;  %v15483_v49 = vpop.f32.mrf.mxu0 }
 0x1e2   :  { %v15547_v53 = vpop.f32.mrf.mxu1  ;;  %v15484_v58 = vadd.f32 %v15483_v49, %v15482_v41 }
 0x1e3   :  { %v782_v54 = vpack.c.bf16 %v730_v48, %v727_v45  ;;  %v15485_v55 = vpop.f32.mrf.mxu0  ;;  %v15548_v59 = vadd.f32 %v15547_v53, %v15546_v44 }
 0x1e4   :  { %v15549_v57 = vpop.f32.mrf.mxu1 }
 0x1e5   :  { %17031 = vmatmul.mubr.msk.bf16.vlgmr.msra.gmra.mxu1 %vm1187_vm1, %v782_v54  ;;  %v15486_v60 = vpop.f32.mrf.mxu0  ;;  %v735_v9 = vadd.f32 %v15548_v59, %v15484_v58 }
 0x1e6   :  { %v15487_v61 = vadd.f32 %v15486_v60, %v15485_v55  ;;  %v15550_v63 = vpop.f32.mrf.mxu1  ;;  %15793 = vmatpush3.bf16.msra.mxu1 %v19196_v12 }
 0x1e7   :  { %v15551_v2 = vadd.f32 %v15550_v63, %v15549_v57  ;;  %v15488_v4 = vpop.f32.mrf.mxu0  ;;  %15794 = vmatprep.subr.bf16.mxu1 %v19211_v17  ;;  %v17990_v17 = vld [vmem:[#allocation7 + $0x2cc] ss:$16 sps:$4 sm:$0xff]  }
 0x1e8   :  { %v15552_v5 = vpop.f32.mrf.mxu1 }
 0x1e9   :  { %v738_v10 = vadd.f32 %v15551_v2, %v15487_v61  ;;  %v15489_v11 = vpop.f32.mrf.mxu0 }
 0x1ea   :  { %v15553_v13 = vpop.f32.mrf.mxu1  ;;  %15795 = vmatpush3.bf16.msra.mxu1 %v19236_v25  ;;  %v15490_v20 = vadd.f32 %v15489_v11, %v15488_v4  ;;  %v17986_v25 = vld [vmem:[#allocation7 + $0x2a8] ss:$16 sps:$4 sm:$0xff]  }
 0x1eb   :  { %v783_v14 = vpack.c.bf16 %v738_v10, %v735_v9  ;;  %v15491_v15 = vpop.f32.mrf.mxu0  ;;  %15796 = vmatprep.subr.bf16.mxu1 %v19249_v30  ;;  %v15554_v22 = vadd.f32 %v15553_v13, %v15552_v5 }
 0x1ec   :  { %v15555_v19 = vpop.f32.mrf.mxu1 }
 0x1ed   :  { %17034 = vmatprep.mubr.msk.bf16.mxu1 %vm1187_vm1, %v783_v14  ;;  %v15492_v27 = vpop.f32.mrf.mxu0  ;;  %v743_v41 = vadd.f32 %v15554_v22, %v15490_v20 }
 0x1ee   :  { %v15493_v29 = vadd.f32 %v15492_v27, %v15491_v15  ;;  %v15556_v31 = vpop.f32.mrf.mxu1  ;;  %15797 = vmatpush3.bf16.msra.mxu1 %v19274_v38 }
 0x1ef   :  { %v15557_v32 = vadd.f32 %v15556_v31, %v15555_v19  ;;  %v15494_v33 = vpop.f32.mrf.mxu0  ;;  %15798 = vmatprep.subr.bf16.mxu1 %v19288_v43 }
 0x1f0   :  { %v15558_v36 = vpop.f32.mrf.mxu1 }
 0x1f1   :  { %v746_v44 = vadd.f32 %v15557_v32, %v15493_v29  ;;  %v15495_v45 = vpop.f32.mrf.mxu0 }
 0x1f2   :  { %v15559_v48 = vpop.f32.mrf.mxu1  ;;  %15799 = vmatpush3.bf16.msra.mxu1 %v19313_v51  ;;  %v15496_v55 = vadd.f32 %v15495_v45, %v15494_v33 }
 0x1f3   :  { %v784_v49 = vpack.c.bf16 %v746_v44, %v743_v41  ;;  %v15497_v53 = vpop.f32.mrf.mxu0  ;;  %15800 = vmatprep.subr.bf16.mxu1 %v19327_v56  ;;  %v15560_v57 = vadd.f32 %v15559_v48, %v15558_v36  ;;  %v17984_v56 = vld [vmem:[#allocation7 + $0x2ac] ss:$16 sps:$4 sm:$0xff]  }
 0x1f4   :  { %v15561_v54 = vpop.f32.mrf.mxu1 }
 0x1f5   :  { %17035 = vmatmul.mubr.msk.bf16.gmra.mxu1 %vm1187_vm1, %v784_v49  ;;  %v15498_v58 = vpop.f32.mrf.mxu0  ;;  %v751_v4 = vadd.f32 %v15560_v57, %v15496_v55 }
 0x1f6   :  { %v15499_v59 = vadd.f32 %v15498_v58, %v15497_v53  ;;  %v15562_v60 = vpop.f32.mrf.mxu1  ;;  %15801 = vmatpush3.bf16.msra.mxu1 %v19352_v0  ;;  %v17980_v0 = vld [vmem:[#allocation7 + $0x288] ss:$16 sps:$4 sm:$0xff]  }
 0x1f7   :  { %v15563_v61 = vadd.f32 %v15562_v60, %v15561_v54  ;;  %v15500_v63 = vpop.f32.mrf.mxu0  ;;  %15802 = vmatprep.subr.bf16.mxu1 %v19366_v6 }
 0x1f8   :  { %v15564_v2 = vpop.f32.mrf.mxu1 }
 0x1f9   :  { %v754_v5 = vadd.f32 %v15563_v61, %v15499_v59  ;;  %v15501_v9 = vpop.f32.mrf.mxu0 }
 0x1fa   :  { %v15565_v10 = vpop.f32.mrf.mxu1  ;;  %15803 = vmatpush3.bf16.msra.mxu1 %v19400_v23  ;;  %v15502_v15 = vadd.f32 %v15501_v9, %v15500_v63 }
 0x1fb   :  { %v785_v11 = vpack.c.bf16 %v754_v5, %v751_v4  ;;  %v15503_v13 = vpop.f32.mrf.mxu0  ;;  %15804 = vmatprep.subr.bf16.mxu1 %v19408_v28  ;;  %v15566_v19 = vadd.f32 %v15565_v10, %v15564_v2 }
 0x1fc   :  { %v15567_v14 = vpop.f32.mrf.mxu1 }
 0x1fd   :  { %17038 = vmatprep.mubr.msk.bf16.mxu1 %vm1187_vm1, %v785_v11  ;;  %v15504_v20 = vpop.f32.mrf.mxu0  ;;  %v759_v33 = vadd.f32 %v15566_v19, %v15502_v15 }
 0x1fe   :  { %v15505_v22 = vadd.f32 %v15504_v20, %v15503_v13  ;;  %v15568_v27 = vpop.f32.mrf.mxu1  ;;  %15805 = vmatpush3.bf16.msra.mxu1 %v19424_v37 }
 0x1ff   :  { %v15569_v29 = vadd.f32 %v15568_v27, %v15567_v14  ;;  %v15506_v31 = vpop.f32.mrf.mxu0  ;;  %15806 = vmatprep.subr.bf16.mxu1 %v19432_v42  ;;  %v17978_v42 = vld [vmem:[#allocation7 + $0x28c] ss:$16 sps:$4 sm:$0xff]  }
 0x200   :  { %v15570_v32 = vpop.f32.mrf.mxu1 }
 0x201   :  { %v762_v36 = vadd.f32 %v15569_v29, %v15505_v22  ;;  %v15507_v41 = vpop.f32.mrf.mxu0 }
 0x202   :  { %v15571_v44 = vpop.f32.mrf.mxu1  ;;  %15807 = vmatpush3.bf16.msra.mxu1 %v19445_v47  ;;  %v15508_v53 = vadd.f32 %v15507_v41, %v15506_v31  ;;  %v17974_v47 = vld [vmem:[#allocation7 + $0x268] ss:$16 sps:$4 sm:$0xff]  }
 0x203   :  { %v786_v45 = vpack.c.bf16 %v762_v36, %v759_v33  ;;  %v15509_v48 = vpop.f32.mrf.mxu0  ;;  %15865 = vmatprep.subr.bf16.mxu1 %v19171_v3  ;;  %v15572_v54 = vadd.f32 %v15571_v44, %v15570_v32  ;;  %v17956_v44 = vld [vmem:[#allocation7 + $0x20c] ss:$16 sps:$4 sm:$0xff]  }
 0x204   :  { %v15573_v49 = vpop.f32.mrf.mxu1 }
 0x205   :  { %17039 = vmatmul.mubr.msk.bf16.gmra.mxu1 %vm1187_vm1, %v786_v45  ;;  %v15510_v55 = vpop.f32.mrf.mxu0  ;;  %v767_v63 = vadd.f32 %v15572_v54, %v15508_v53 }
 0x206   :  { %v15511_v57 = vadd.f32 %v15510_v55, %v15509_v48  ;;  %v15574_v58 = vpop.f32.mrf.mxu1 }
 0x207   :  { %v15575_v59 = vadd.f32 %v15574_v58, %v15573_v49  ;;  %v15512_v60 = vpop.f32.mrf.mxu0 }
 0x208   :  { %v15576_v61 = vpop.f32.mrf.mxu1 }
 0x209   :  { %v770_v2 = vadd.f32 %v15575_v59, %v15511_v57  ;;  %v15513_v4 = vpop.f32.mrf.mxu0  ;;  %v17954_v59 = vld [vmem:[#allocation7 + $0x208] ss:$16 sps:$4 sm:$0xff]  }
 0x20a   :  { %v15577_v5 = vpop.f32.mrf.mxu1  ;;  %v15514_v13 = vadd.f32 %v15513_v4, %v15512_v60 }
 0x20b   :  { %v787_v9 = vpack.c.bf16 %v770_v2, %v767_v63  ;;  %v15515_v10 = vpop.f32.mrf.mxu0  ;;  %v15578_v14 = vadd.f32 %v15577_v5, %v15576_v61  ;;  %v17960_v61 = vld [vmem:[#allocation7 + $0x22c] ss:$16 sps:$4 sm:$0xff]  }
 0x20c   :  { %v15579_v11 = vpop.f32.mrf.mxu1 }
 0x20d   :  { %17042 = vmatprep.mubr.msk.bf16.mxu1 %vm1187_vm1, %v787_v9  ;;  %v15516_v15 = vpop.f32.mrf.mxu0  ;;  %v775_v31 = vadd.f32 %v15578_v14, %v15514_v13  ;;  %v17962_v13 = vld [vmem:[#allocation7 + $0x228] ss:$16 sps:$4 sm:$0xff]  }
 0x20e   :  { %v15517_v19 = vadd.f32 %v15516_v15, %v15515_v10  ;;  %v15580_v20 = vpop.f32.mrf.mxu1  ;;  %v17966_v15 = vld [vmem:[#allocation7 + $0x24c] ss:$16 sps:$4 sm:$0xff]  }
 0x20f   :  { %v15581_v22 = vadd.f32 %v15580_v20, %v15579_v11  ;;  %v15598_v27 = vpop.f32.mrf.mxu0 }
 0x210   :  { %v19527_v29 = vpop.f32.mrf.mxu1 }
 0x211   :  { %v778_v32 = vadd.f32 %v15581_v22, %v15517_v19  ;;  %v15599_v33 = vpop.f32.mrf.mxu0 }
 0x212   :  { %v19529_v36 = vadd.f32 %v15599_v33, %v15598_v27  ;;  %v19531_v41 = vpop.f32.mrf.mxu1  ;;  %v17968_v33 = vld [vmem:[#allocation7 + $0x248] ss:$16 sps:$4 sm:$0xff]  }
 0x213   :  { %v788_v45 = vpack.c.bf16 %v778_v32, %v775_v31  ;;  %v19533_v48 = vpop.f32.mrf.mxu0 }
 0x214   :  { %v19535_v49 = vpop.f32.mrf.mxu1 }
 0x215   :  { %17043 = vmatmul.mubr.msk.bf16.gmra.mxu1 %vm1187_vm1, %v788_v45  ;;  %v19538_v53 = vpop.f32.mrf.mxu0 }
 0x216   :  { %v19540_v54 = vpop.f32.mrf.mxu1  ;;  %1759 = vmatprep.mubr.bf16.mxu1 %v17956_v44  ;;  %v17972_v44 = vld [vmem:[#allocation7 + $0x26c] ss:$16 sps:$4 sm:$0xff]  }
 0x217   :  { %v19542_v55 = vpop.f32.mrf.mxu0 }
 0x218   :  { %v19544_v57 = vpop.f32.mrf.mxu1 }
 0x219   :  { %v19546_v58 = vpop.f32.mrf.mxu0 }
 0x21a   :  { %v19548_v60 = vpop.f32.mrf.mxu1 }
 0x21b   :  { %v19550_v63 = vpop.f32.mrf.mxu0 }
 0x21c   :  { %v19552_v2 = vpop.f32.mrf.mxu1 }
 0x21d   :  { %v19554_v4 = vpop.f32.mrf.mxu0  ;;  %1760 = vmatmul.mubr.bf16.vlgmr.msra.gmra.mxu1 %v17954_v59 }
 0x21e   :  { %v19556_v5 = vpop.f32.mrf.mxu1  ;;  %1767 = vmatprep.mubr.bf16.mxu1 %v17960_v61  ;;  %15866 = vmatpush3.bf16.msra.mxu1 %v19184_v8 }
 0x21f   :  { %v19559_v9 = vpop.f32.mrf.mxu0  ;;  %15867 = vmatprep.subr.bf16.mxu1 %v19209_v16 }
 0x220   :  { %v19562_v10 = vpop.f32.mrf.mxu1 }
 0x221   :  { %v19564_v11 = vpop.f32.mrf.mxu0 }
 0x222   :  { %v19566_v14 = vpop.f32.mrf.mxu1  ;;  %15868 = vmatpush3.bf16.msra.mxu1 %v19223_v21 }
 0x223   :  { %v19569_v19 = vpop.f32.mrf.mxu0  ;;  %15869 = vmatprep.subr.bf16.mxu1 %v19238_v26 }
 0x224   :  { %v19572_v20 = vpop.f32.mrf.mxu1 }
 0x225   :  { %v19574_v22 = vpop.f32.mrf.mxu0  ;;  %1768 = vmatmul.mubr.bf16.gmra.mxu1 %v17962_v13 }
 0x226   :  { %1775 = vmatprep.mubr.bf16.mxu1 %v17966_v15  ;;  %15870 = vmatpush3.bf16.msra.mxu1 %v19261_v34  ;;  %v19580_v31 = vpop.f32.mrf.mxu1  ;;  %v15679_v34 = vadd.f32 %v19556_v5, %v19552_v2 }
 0x227   :  { %v19577_v27 = vpop.f32.mrf.mxu0  ;;  %15871 = vmatprep.subr.bf16.mxu1 %v19276_v39 }
 0x228   :  { %v19588_v59 = vpop.f32.mrf.mxu1 }
 0x229   :  { %v19582_v32 = vpop.f32.mrf.mxu0 }
 0x22a   :  { %15872 = vmatpush3.bf16.msra.mxu1 %v19309_v50  ;;  %v19596_v15 = vpop.f32.mrf.mxu1 }
 0x22b   :  { %v19585_v45 = vpop.f32.mrf.mxu0  ;;  %15873 = vmatprep.subr.bf16.mxu1 %v19315_v52 }
 0x22d   :  { %v19590_v61 = vpop.f32.mrf.mxu0  ;;  %1776 = vmatmul.mubr.bf16.gmra.mxu1 %v17968_v33  ;;  %v19604_v33 = vpop.f32.mrf.mxu1 }
 0x22e   :  { %1783 = vmatprep.mubr.bf16.mxu1 %v17972_v44  ;;  %15874 = vmatpush3.bf16.msra.mxu1 %v19345_v62 }
 0x22f   :  { %v19593_v13 = vpop.f32.mrf.mxu0  ;;  %15875 = vmatprep.subr.bf16.mxu1 %v19354_v1  ;;  %v15690_v23 = vpop.f32.mrf.mxu1 }
 0x231   :  { %v19598_v3 = vpop.f32.mrf.mxu0  ;;  %v19617_v43 = vpop.f32.mrf.mxu1 }
 0x232   :  { %15876 = vmatpush3.bf16.msra.mxu1 %v19387_v18 }
 0x233   :  { %v19601_v37 = vpop.f32.mrf.mxu0  ;;  %15877 = vmatprep.subr.bf16.mxu1 %v19402_v24  ;;  %v17996_v24 = vld [vmem:[#allocation7 + $0x2ec] ss:$16 sps:$4 sm:$0xff]  }
 0x235   :  { %v19606_v44 = vpop.f32.mrf.mxu0  ;;  %1784 = vmatmul.mubr.bf16.gmra.mxu1 %v17974_v47  ;;  %v19623_v47 = vpop.f32.mrf.mxu1 }
 0x236   :  { %1791 = vmatprep.mubr.bf16.mxu1 %v17978_v42  ;;  %15878 = vmatpush3.bf16.msra.mxu1 %v19417_v35  ;;  %v17992_v35 = vld [vmem:[#allocation7 + $0x2c8] ss:$16 sps:$4 sm:$0xff]  }
 0x237   :  { %v19609_v28 = vpop.f32.mrf.mxu0  ;;  %15879 = vmatprep.subr.bf16.mxu1 %v19426_v40  ;;  %v19629_v7 = vpop.f32.mrf.mxu1 }
 0x239   :  { %v19612_v6 = vpop.f32.mrf.mxu0 }
 0x23a   :  { %15880 = vmatpush3.bf16.msra.mxu1 %v19441_v46 }
 0x23b   :  { %v19615_v51 = vpop.f32.mrf.mxu0 }
 0x23d   :  { %v19619_v38 = vpop.f32.mrf.mxu0  ;;  %1792 = vmatmul.mubr.bf16.gmra.mxu1 %v17980_v0  ;;  %v15696_v0 = vpop.f32.mrf.mxu1 }
 0x23e   :  { %1799 = vmatprep.mubr.bf16.mxu1 %v17984_v56 }
 0x23f   :  { %v19621_v42 = vpop.f32.mrf.mxu0  ;;  %v19639_v1 = vpop.f32.mrf.mxu1 }
 0x240   :  { %21621 = vst [vmem:[#allocation78_spill] sm:$0xff] %v19639_v1  ;;  %v15670_v1 = vadd.f32 %v19531_v41, %v19527_v29 }
 0x241   :  { %v19625_v30 = vpop.f32.mrf.mxu0  ;;  %v15699_v50 = vpop.f32.mrf.mxu1 }
 0x242   :  { %21617 = vst [vmem:[#allocation74_spill] sm:$0xff] %v19625_v30 }
 0x243   :  { %v19627_v12 = vpop.f32.mrf.mxu0 }
 0x245   :  { %v19631_v46 = vpop.f32.mrf.mxu0  ;;  %1800 = vmatmul.mubr.bf16.gmra.mxu1 %v17986_v25  ;;  %v17998_v25 = vld [vmem:[#allocation7 + $0x2e8] ss:$16 sps:$4 sm:$0xff]  }
 0x246   :  { %1807 = vmatprep.mubr.bf16.mxu1 %v17990_v17  ;;  %v15609_v17 = vadd.f32 %v19554_v4, %v19550_v63  ;;  %v15676_v63 = vadd.f32 %v19548_v60, %v19544_v57  ;;  %v15688_v57 = vadd.f32 %v19596_v15, %v19588_v59  ;;  %v15694_v59 = vadd.f32 %v19623_v47, %v19617_v43 }
 0x247   :  { %v19633_v40 = vpop.f32.mrf.mxu0 }
 0x248   :  { %21618 = vst [vmem:[#allocation75_spill] sm:$0xff] %v19633_v40 }
 0x249   :  { %v19635_v56 = vpop.f32.mrf.mxu0 }
 0x24a   :  { %21619 = vst [vmem:[#allocation76_spill] sm:$0xff] %v19635_v56  ;;  %v15673_v56 = vadd.f32 %v19540_v54, %v19535_v49  ;;  %v15603_v49 = vadd.f32 %v19538_v53, %v19533_v48  ;;  %v15612_v54 = vadd.f32 %v19564_v11, %v19559_v9  ;;  %v15621_v48 = vadd.f32 %v19590_v61, %v19585_v45 }
 0x24b   :  { %v19637_v18 = vpop.f32.mrf.mxu0  ;;  %v15685_v53 = vadd.f32 %v19580_v31, %v19572_v20  ;;  %v15630_v45 = vadd.f32 %v19612_v6, %v19609_v28 }
 0x24c   :  { %21620 = vst [vmem:[#allocation77_spill] sm:$0xff] %v19637_v18  ;;  %v15615_v18 = vadd.f32 %v19574_v22, %v19569_v19  ;;  %v1126_v4 = vadd.f32 %v15673_v56, %v15609_v17  ;;  %v1131_v29 = vadd.f32 %v15676_v63, %v15612_v54  ;;  %v21630_v56 = vld [vmem:[#allocation58_spill] sm:$0xff] }
 0x24d   :  { %v19641_v62 = vpop.f32.mrf.mxu0  ;;  %1808 = vmatmul.mubr.bf16.gmra.mxu1 %v17992_v35  ;;  %v1155_v6 = vadd.f32 %v15694_v59, %v15630_v45  ;;  %v21634_v63 = vld [vmem:[#allocation62_spill] sm:$0xff] }
 0x24e   :  { %21622 = vst [vmem:[#allocation79_spill] sm:$0xff] %v19641_v62  ;;  %1815 = vmatprep.mubr.bf16.mxu1 %v17996_v24  ;;  %v15701_v62 = vpop.f32.mrf.mxu1  ;;  %v15606_v24 = vadd.f32 %v19546_v58, %v19542_v55 }
 0x24f   :  { %v15662_v52 = vpop.f32.mrf.mxu0 }
 0x250   :  { %v1123_v5 = vadd.f32 %v15670_v1, %v15606_v24  ;;  %v15618_v1 = vadd.f32 %v19582_v32, %v19577_v27  ;;  %v15639_v27 = vadd.f32 %v19631_v46, %v19627_v12 }
 0x251   :  { %v15663_v39 = vpop.f32.mrf.mxu0  ;;  %v21632_v17 = vld [vmem:[#allocation76_spill] sm:$0xff] }
 0x252   :  { %v15664_v35 = vadd.f32 %v15663_v39, %v15662_v52  ;;  %v1134_v39 = vadd.f32 %v15679_v34, %v15615_v18  ;;  %v15702_v52 = vpop.f32.mrf.mxu1  ;;  %v1178_v19 = vpack.c.bf16 %v1126_v4, %v1123_v5  ;;  %v15691_v34 = vadd.f32 %v15690_v23, %v19604_v33  ;;  %v21627_v33 = vld [vmem:[#allocation56_spill] sm:$0xff]  ;;  %v21638_v5 = vld [vmem:[#allocation70_spill] sm:$0xff] }
 0x253   :  { %v15665_v40 = vpop.f32.mrf.mxu0  ;;  %v1142_v23 = vadd.f32 %v15685_v53, %v15621_v48  ;;  %v15703_v31 = vadd.f32 %v15702_v52, %v15701_v62  ;;  %v21626_v62 = vld [vmem:[#allocation54_spill] sm:$0xff]  ;;  %v21635_v4 = vld [vmem:[#allocation64_spill] sm:$0xff] }
 0x254   :  { %v1115_v55 = vadd.f32 %v15664_v35, %v19529_v36  ;;  %v1179_v9 = vpack.c.bf16 %v1134_v39, %v1131_v29  ;;  %v15704_v18 = vpop.f32.mrf.mxu1  ;;  %v15624_v36 = vadd.f32 %v19598_v3, %v19593_v13  ;;  %v15633_v3 = vadd.f32 %v19619_v38, %v19615_v51  ;;  %v21623_v38 = vld [vmem:[#allocation74_spill] sm:$0xff]  ;;  %v21625_v13 = vld [vmem:[#allocation52_spill] sm:$0xff] }
 0x255   :  { %v15666_v30 = vpop.f32.mrf.mxu0  ;;  %1816 = vmatmul.mubr.bf16.gmra.mxu1 %v17998_v25  ;;  %v15636_v51 = vadd.f32 %v21623_v38, %v19621_v42  ;;  %v1166_v46 = vadd.f32 %v15703_v31, %v15639_v27  ;;  %v21629_v47 = vld [vmem:[#allocation79_spill] sm:$0xff]  ;;  %v17959_v39 = vld [vmem:[#allocation7 + $0x204] ss:$16 sps:$4 sm:$0xff]   ;;  %v17957_v29 = vld [vmem:[#allocation7 + $0x200] ss:$16 sps:$4 sm:$0xff]  }
 0x256   :  { %v15667_v2 = vadd.f32 %v15666_v30, %v15665_v40  ;;  %v15627_v30 = vadd.f32 %v19606_v44, %v19601_v37  ;;  %v15682_v40 = vadd.f32 %v19566_v14, %v19562_v10  ;;  %v15705_v60 = vpop.f32.mrf.mxu1  ;;  %v1147_v20 = vadd.f32 %v15688_v57, %v15624_v36  ;;  %v21628_v44 = vld [vmem:[#allocation77_spill] sm:$0xff]  ;;  %v21631_v25 = vld [vmem:[#allocation75_spill] sm:$0xff]  ;;  %v17965_v48 = vld [vmem:[#allocation7 + $0x220] ss:$16 sps:$4 sm:$0xff]  }
 0x257   :  { %v15697_v14 = vadd.f32 %v15696_v0, %v19629_v7  ;;  %v21624_v7 = vld [vmem:[#allocation78_spill] sm:$0xff]  ;;  %v15645_v0 = vadd.f32 %v21629_v47, %v21628_v44  ;;  %v15642_v35 = vadd.f32 %v21632_v17, %v21631_v25  ;;  %v15706_v24 = vadd.f32 %v15705_v60, %v15704_v18 }
 0x258   :  { %v1118_v58 = vadd.f32 %v15667_v2, %v15603_v49  ;;  %v1150_v37 = vadd.f32 %v15691_v34, %v15627_v30  ;;  %v1139_v11 = vadd.f32 %v15682_v40, %v15618_v1  ;;  %v15707_v32 = vpop.f32.mrf.mxu1  ;;  %v15700_v61 = vadd.f32 %v15699_v50, %v21624_v7  ;;  %v21633_v49 = vld [vmem:[#allocation60_spill] sm:$0xff] }
 0x259   :  { %v1158_v12 = vadd.f32 %v15697_v14, %v15633_v3  ;;  %v1171_v2 = vadd.f32 %v15706_v24, %v15642_v35  ;;  %v17969_v53 = vld [vmem:[#allocation7 + $0x244] ss:$16 sps:$4 sm:$0xff]   ;;  %v17977_v34 = vld [vmem:[#allocation7 + $0x260] ss:$16 sps:$4 sm:$0xff]   ;;  %v21640_v14 = vld [vmem:[#allocation47_spill] sm:$0xff] }
 0x25a   :  { %v1177_v41 = vpack.c.bf16 %v1118_v58, %v1115_v55  ;;  %v1180_v10 = vpack.c.bf16 %v1142_v23, %v1139_v11  ;;  %v1181_v22 = vpack.c.bf16 %v1150_v37, %v1147_v20  ;;  %v15708_v15 = vpop.f32.mrf.mxu1  ;;  %v1163_v28 = vadd.f32 %v15700_v61, %v15636_v51  ;;  %v21636_v55 = vld [vmem:[#allocation66_spill] sm:$0xff]  ;;  %v21637_v58 = vld [vmem:[#allocation68_spill] sm:$0xff] }
 0x25b   :  { %v1182_v43 = vpack.c.bf16 %v1158_v12, %v1155_v6  ;;  %v15709_v42 = vadd.f32 %v15708_v15, %v15707_v32  ;;  %v17975_v30 = vld [vmem:[#allocation7 + $0x264] ss:$16 sps:$4 sm:$0xff]   ;;  %v17983_v1 = vld [vmem:[#allocation7 + $0x280] ss:$16 sps:$4 sm:$0xff]  }
 0x25c   :  { %17012 = vmatprep.mubr.msk.bf16.mxu0 %vm1187_vm1, %v1177_v41  ;;  %v1183_v50 = vpack.c.bf16 %v1166_v46, %v1163_v28  ;;  %v21639_v41 = vld [vmem:[#allocation72_spill] sm:$0xff] }
 0x25d   :  { %17013 = vmatmul.mubr.msk.bf16.vlgmr.msra.gmra.mxu0 %vm1187_vm1, %v1178_v19  ;;  %v1174_v54 = vadd.f32 %v15709_v42, %v15645_v0  ;;  %v17963_v19 = vld [vmem:[#allocation7 + $0x224] ss:$16 sps:$4 sm:$0xff]   ;;  %v17989_v36 = vld [vmem:[#allocation7 + $0x2a0] ss:$16 sps:$4 sm:$0xff]  }
 0x25e   :  { %17016 = vmatprep.mubr.msk.bf16.mxu0 %vm1187_vm1, %v1179_v9  ;;  %15729 = vmatpush3.bf16.msra.mxu0 %v19184_v8  ;;  %v17971_v9 = vld [vmem:[#allocation7 + $0x240] ss:$16 sps:$4 sm:$0xff]   ;;  %v17981_v18 = vld [vmem:[#allocation7 + $0x284] ss:$16 sps:$4 sm:$0xff]  }
 0x25f   :  { %15730 = vmatprep.subr.bf16.mxu0 %v19209_v16  ;;  %v1184_v52 = vpack.c.bf16 %v1174_v54, %v1171_v2  ;;  %v17987_v40 = vld [vmem:[#allocation7 + $0x2a4] ss:$16 sps:$4 sm:$0xff]   ;;  %v17995_v23 = vld [vmem:[#allocation7 + $0x2c0] ss:$16 sps:$4 sm:$0xff]  }
 0x260   :  { %v17993_v57 = vld [vmem:[#allocation7 + $0x2c4] ss:$16 sps:$4 sm:$0xff]   ;;  %v17999_v60 = vld [vmem:[#allocation7 + $0x2e0] ss:$16 sps:$4 sm:$0xff]  }
 0x261   :  { %v18001_v37 = vld [vmem:[#allocation7 + $0x2e4] ss:$16 sps:$4 sm:$0xff]   ;;  %v18002_v44 = vld [vmem:[#allocation7 + $0x300] ss:$16 sps:$4 sm:$0xff]  }
 0x262   :  { %15731 = vmatpush3.bf16.msra.mxu0 %v19223_v21  ;;  %v1833_v11 = vld [vmem:[#allocation8 + $0x4] sm:$0x3]  ;;  %v18014_v24 = vld [vmem:[#allocation7 + $0x340] ss:$16 sps:$4 sm:$0xff]  }
 0x263   :  { %15732 = vmatprep.subr.bf16.mxu0 %v19238_v26  ;;  %v18004_v47 = vld [vmem:[#allocation7 + $0x304] ss:$16 sps:$4 sm:$0xff]  }
 0x264   :  { %2199 = vmatprep.mubr.bf16.mxu1 %v18004_v47  ;;  %v18010_v25 = vld [vmem:[#allocation7 + $0x324] ss:$16 sps:$4 sm:$0xff]  }
 0x265   :  { %17017 = vmatmul.mubr.msk.bf16.gmra.mxu0 %vm1187_vm1, %v1180_v10  ;;  %v1859_v10 = vsel %vm1212_vm0, %v1833_v11, 0  ;;  %2200 = vmatmul.mubr.bf16.vlgmr.msra.gmra.mxu1 %v18002_v44  ;;  %v18016_v54 = vld [vmem:[#allocation7 + $0x344] ss:$16 sps:$4 sm:$0xff]  }
 0x266   :  { %17020 = vmatprep.mubr.msk.bf16.mxu0 %vm1187_vm1, %v1181_v22  ;;  %15733 = vmatpush3.bf16.msra.mxu0 %v21625_v13 }
 0x267   :  { %15734 = vmatprep.subr.bf16.mxu0 %v21626_v62  ;;  %2207 = vmatprep.mubr.bf16.mxu1 %v18010_v25 }
 0x26a   :  { %15735 = vmatpush3.bf16.msra.mxu0 %v21627_v33 }
 0x26b   :  { %15736 = vmatprep.subr.bf16.mxu0 %v21630_v56 }
 0x26d   :  { %17021 = vmatmul.mubr.msk.bf16.gmra.mxu0 %vm1187_vm1, %v1182_v43 }
 0x26e   :  { %17024 = vmatprep.mubr.msk.bf16.mxu0 %vm1187_vm1, %v1183_v50  ;;  %15737 = vmatpush3.bf16.msra.mxu0 %v21633_v49  ;;  %v18008_v50 = vld [vmem:[#allocation7 + $0x320] ss:$16 sps:$4 sm:$0xff]  }
 0x26f   :  { %15738 = vmatprep.subr.bf16.mxu0 %v21634_v63  ;;  %2208 = vmatmul.mubr.bf16.gmra.mxu1 %v18008_v50 }
 0x270   :  { %2215 = vmatprep.mubr.bf16.mxu1 %v18016_v54  ;;  %v18038_v54 = vld [vmem:[#allocation7 + $0x3c0] ss:$16 sps:$4 sm:$0xff]  }
 0x272   :  { %15739 = vmatpush3.bf16.msra.mxu0 %v21635_v4 }
 0x273   :  { %15740 = vmatprep.subr.bf16.mxu0 %v21636_v55 }
 0x275   :  { %17025 = vmatmul.mubr.msk.bf16.gmra.mxu0 %vm1187_vm1, %v1184_v52  ;;  %v18020_v52 = vld [vmem:[#allocation7 + $0x360] ss:$16 sps:$4 sm:$0xff]  }
 0x276   :  { %15741 = vmatpush3.bf16.msra.mxu0 %v21637_v58  ;;  %1662 = vmatprep.mubr.bf16.mxu0 %v17959_v39 }
 0x277   :  { %15742 = vmatprep.subr.bf16.mxu0 %v21638_v5  ;;  %2216 = vmatmul.mubr.bf16.gmra.mxu1 %v18014_v24 }
 0x27a   :  { %15743 = vmatpush3.bf16.msra.mxu0 %v21639_v41 }
 0x27b   :  { %17820 = vmatprep.subr.msk.bf16.mxu0 %vm1212_vm0, %v1833_v11  ;;  %v18034_v11 = vld [vmem:[#allocation7 + $0x3a4] ss:$16 sps:$4 sm:$0xff]  }
 0x27d   :  { %1663 = vmatmul.mubr.bf16.vlgmr.msra.gmra.mxu0 %v17957_v29  ;;  %v18022_v29 = vld [vmem:[#allocation7 + $0x364] ss:$16 sps:$4 sm:$0xff]  }
 0x27e   :  { %1670 = vmatprep.mubr.bf16.mxu0 %v17963_v19  ;;  %17047 = vmatpush3.bf16.msra.mxu0 %v1859_v10 }
 0x27f   :  { %15929 = vmatprep.subr.bf16.mxu0 %v21640_v14  ;;  %2223 = vmatprep.mubr.bf16.mxu1 %v18022_v29 }
 0x280   :  { %2224 = vmatmul.mubr.bf16.gmra.mxu1 %v18020_v52  ;;  %v18040_v52 = vld [vmem:[#allocation7 + $0x3c4] ss:$16 sps:$4 sm:$0xff]  }
 0x285   :  { %1671 = vmatmul.mubr.bf16.gmra.mxu0 %v17965_v48 }
 0x286   :  { %1678 = vmatprep.mubr.bf16.mxu0 %v17969_v53 }
 0x28d   :  { %1679 = vmatmul.mubr.bf16.gmra.mxu0 %v17971_v9 }
 0x28e   :  { %1686 = vmatprep.mubr.bf16.mxu0 %v17975_v30 }
 0x295   :  { %1687 = vmatmul.mubr.bf16.gmra.mxu0 %v17977_v34  ;;  %v18026_v34 = vld [vmem:[#allocation7 + $0x380] ss:$16 sps:$4 sm:$0xff]  }
 0x296   :  { %1694 = vmatprep.mubr.bf16.mxu0 %v17981_v18  ;;  %v18028_v18 = vld [vmem:[#allocation7 + $0x384] ss:$16 sps:$4 sm:$0xff]  }
 0x297   :  { %2231 = vmatprep.mubr.bf16.mxu1 %v18028_v18 }
 0x298   :  { %2232 = vmatmul.mubr.bf16.gmra.mxu1 %v18026_v34 }
 0x299   :  { %2239 = vmatprep.mubr.bf16.mxu1 %v18034_v11 }
 0x29d   :  { %1695 = vmatmul.mubr.bf16.gmra.mxu0 %v17983_v1 }
 0x29e   :  { %1702 = vmatprep.mubr.bf16.mxu0 %v17987_v40 }
 0x2a5   :  { %1703 = vmatmul.mubr.bf16.gmra.mxu0 %v17989_v36  ;;  %v19717_v20 = vpop.f32.mrf.mxu1 }
 0x2a6   :  { %1710 = vmatprep.mubr.bf16.mxu0 %v17993_v57 }
 0x2a7   :  { %v19720_v3 = vpop.f32.mrf.mxu1 }
 0x2a9   :  { %v19723_v22 = vpop.f32.mrf.mxu1 }
 0x2ab   :  { %v19725_v27 = vpop.f32.mrf.mxu1 }
 0x2ac   :  { %21641 = vst [vmem:[#allocation74_spill] sm:$0xff] %v19725_v27 }
 0x2ad   :  { %1711 = vmatmul.mubr.bf16.gmra.mxu0 %v17995_v23 }
 0x2ae   :  { %1718 = vmatprep.mubr.bf16.mxu0 %v18001_v37 }
 0x2b5   :  { %1719 = vmatmul.mubr.bf16.gmra.mxu0 %v17999_v60  ;;  %v19727_v31 = vpop.f32.mrf.mxu1  ;;  %v18032_v60 = vld [vmem:[#allocation7 + $0x3a0] ss:$16 sps:$4 sm:$0xff]  }
 0x2b6   :  { %2240 = vmatmul.mubr.bf16.gmra.mxu1 %v18032_v60 }
 0x2b7   :  { %v19729_v32 = vpop.f32.mrf.mxu1  ;;  %2247 = vmatprep.mubr.bf16.mxu1 %v18040_v52 }
 0x2b9   :  { %v19731_v45 = vpop.f32.mrf.mxu1 }
 0x2bb   :  { %v19733_v59 = vpop.f32.mrf.mxu1 }
 0x2bc   :  { %21642 = vst [vmem:[#allocation78_spill] sm:$0xff] %v19733_v59  ;;  %v18046_v59 = vld [vmem:[#allocation7 + $0x3e4] ss:$16 sps:$4 sm:$0xff]  }
 0x2be   :  { %2248 = vmatmul.mubr.bf16.gmra.mxu1 %v18038_v54 }
 0x2bf   :  { %2255 = vmatprep.mubr.bf16.mxu1 %v18046_v59 }
 0x2c5   :  { %v19735_v38 = vpop.f32.mrf.mxu1 }
 0x2c6   :  { %21643 = vst [vmem:[#allocation52_spill] sm:$0xff] %v19735_v38 }
 0x2c7   :  { %v19737_v51 = vpop.f32.mrf.mxu1 }
 0x2c8   :  { %21644 = vst [vmem:[#allocation54_spill] sm:$0xff] %v19737_v51 }
 0x2c9   :  { %v19739_v7 = vpop.f32.mrf.mxu1 }
 0x2ca   :  { %21645 = vst [vmem:[#allocation56_spill] sm:$0xff] %v19739_v7 }
 0x2cb   :  { %v19741_v61 = vpop.f32.mrf.mxu1 }
 0x2cc   :  { %21646 = vst [vmem:[#allocation77_spill] sm:$0xff] %v19741_v61 }
 0x2d5   :  { %v19743_v12 = vpop.f32.mrf.mxu1 }
 0x2d6   :  { %21647 = vst [vmem:[#allocation79_spill] sm:$0xff] %v19743_v12 }
 0x2d7   :  { %v19745_v46 = vpop.f32.mrf.mxu1 }
 0x2d8   :  { %21648 = vst [vmem:[#allocation58_spill] sm:$0xff] %v19745_v46 }
 0x2d9   :  { %v19747_v15 = vpop.f32.mrf.mxu1 }
 0x2da   :  { %21649 = vst [vmem:[#allocation75_spill] sm:$0xff] %v19747_v15 }
 0x2db   :  { %v19749_v6 = vpop.f32.mrf.mxu1 }
 0x2dc   :  { %21650 = vst [vmem:[#allocation76_spill] sm:$0xff] %v19749_v6 }
 0x2dd   :  { %v19751_v28 = vpop.f32.mrf.mxu1 }
 0x2df   :  { %v19753_v43 = vpop.f32.mrf.mxu1 }
 0x2e1   :  { %v19755_v0 = vpop.f32.mrf.mxu1 }
 0x2e3   :  { %v19757_v42 = vpop.f32.mrf.mxu1 }
 0x2e5   :  { %v19759_v17 = vpop.f32.mrf.mxu1 }
 0x2e7   :  { %v19761_v35 = vpop.f32.mrf.mxu1 }
 0x2e9   :  { %v19763_v2 = vpop.f32.mrf.mxu1 }
 0x2eb   :  { %v19765_v39 = vpop.f32.mrf.mxu1 }
 0x2ed   :  { %v19769_v48 = vpop.f32.mrf.mxu1 }
 0x2ef   :  { %v19775_v30 = vpop.f32.mrf.mxu1 }
 0x2f1   :  { %v19781_v36 = vpop.f32.mrf.mxu1 }
 0x2f3   :  { %v19787_v37 = vpop.f32.mrf.mxu1 }
 0x2f5   :  { %v19793_v47 = vpop.f32.mrf.mxu1 }
 0x2f7   :  { %v19799_v24 = vpop.f32.mrf.mxu1 }
 0x2f9   :  { %v19805_v18 = vpop.f32.mrf.mxu1 }
 0x2fb   :  { %v15830_v60 = vpop.f32.mrf.mxu1 }
 0x2fd   :  { %v19813_v6 = vpop.f32.mrf.mxu1 }
 0x2ff   :  { %v19815_v15 = vpop.f32.mrf.mxu1 }
 0x31d   :  { %v19767_v19 = vpop.f32.mrf.mxu0 }
 0x31f   :  { %v19771_v53 = vpop.f32.mrf.mxu0 }
 0x321   :  { %v19773_v9 = vpop.f32.mrf.mxu0 }
 0x323   :  { %v19777_v1 = vpop.f32.mrf.mxu0 }
 0x324   :  { %21651 = vst [vmem:[#allocation60_spill] sm:$0xff] %v19777_v1  ;;  %v18044_v1 = vld [vmem:[#allocation7 + $0x3e0] ss:$16 sps:$4 sm:$0xff]  }
 0x325   :  { %v19779_v40 = vpop.f32.mrf.mxu0  ;;  %2256 = vmatmul.mubr.bf16.gmra.mxu1 %v18044_v1 }
 0x327   :  { %v19783_v57 = vpop.f32.mrf.mxu0 }
 0x329   :  { %v19785_v23 = vpop.f32.mrf.mxu0 }
 0x32b   :  { %v19789_v10 = vpop.f32.mrf.mxu0 }
 0x32c   :  { %21652 = vst [vmem:[#allocation62_spill] sm:$0xff] %v19789_v10 }
 0x32d   :  { %v19791_v44 = vpop.f32.mrf.mxu0 }
 0x32f   :  { %v19795_v50 = vpop.f32.mrf.mxu0 }
 0x330   :  { %21653 = vst [vmem:[#allocation64_spill] sm:$0xff] %v19795_v50 }
 0x331   :  { %v19797_v25 = vpop.f32.mrf.mxu0 }
 0x332   :  { %21654 = vst [vmem:[#allocation66_spill] sm:$0xff] %v19797_v25 }
 0x333   :  { %v19801_v29 = vpop.f32.mrf.mxu0 }
 0x334   :  { %21655 = vst [vmem:[#allocation68_spill] sm:$0xff] %v19801_v29 }
 0x335   :  { %v19803_v34 = vpop.f32.mrf.mxu0 }
 0x336   :  { %21656 = vst [vmem:[#allocation80_spill] sm:$0xff] %v19803_v34 }
 0x337   :  { %v19807_v11 = vpop.f32.mrf.mxu0 }
 0x338   :  { %21657 = vst [vmem:[#allocation81_spill] sm:$0xff] %v19807_v11  ;;  %v15810_v11 = vadd.f32 %v19753_v43, %v19751_v28  ;;  %v15819_v28 = vadd.f32 %v19765_v39, %v19763_v2  ;;  %v21661_v39 = vld [vmem:[#allocation49_spill] sm:$0xff] }
 0x339   :  { %v19809_v27 = vpop.f32.mrf.mxu0 }
 0x33a   :  { %21658 = vst [vmem:[#allocation82_spill] sm:$0xff] %v19809_v27  ;;  %v15813_v27 = vadd.f32 %v19757_v42, %v19755_v0 }
 0x33b   :  { %v19811_v10 = vpop.f32.mrf.mxu0 }
 0x33c   :  { %21659 = vst [vmem:[#allocation83_spill] sm:$0xff] %v19811_v10  ;;  %v15835_v10 = vpop.f32.mrf.mxu1 }
 0x33d   :  { %v15744_v61 = vpop.f32.mrf.mxu0 }
 0x33e   :  { %v15836_v50 = vpop.f32.mrf.mxu1 }
 0x33f   :  { %v15745_v52 = vpop.f32.mrf.mxu0 }
 0x340   :  { %v15746_v46 = vadd.f32 %v15745_v52, %v15744_v61  ;;  %v15816_v52 = vadd.f32 %v19761_v35, %v19759_v17  ;;  %v19826_v42 = vpop.f32.mrf.mxu1  ;;  %v15822_v17 = vadd.f32 %v19775_v30, %v19769_v48  ;;  %v15825_v35 = vadd.f32 %v19787_v37, %v19781_v36  ;;  %v21664_v30 = vld [vmem:[#allocation53_spill] sm:$0xff] }
 0x341   :  { %v15747_v29 = vpop.f32.mrf.mxu0  ;;  %v15828_v36 = vadd.f32 %v19799_v24, %v19793_v47  ;;  %v15831_v37 = vadd.f32 %v15830_v60, %v19805_v18  ;;  %v21668_v24 = vld [vmem:[#allocation61_spill] sm:$0xff]  ;;  %v15834_v18 = vadd.f32 %v19815_v15, %v19813_v6  ;;  %v15837_v60 = vadd.f32 %v15836_v50, %v15835_v10 }
 0x342   :  { %v1762_v59 = vadd.f32 %v15810_v11, %v15746_v46  ;;  %v15839_v11 = vpop.f32.mrf.mxu1  ;;  %v21672_v6 = vld [vmem:[#allocation69_spill] sm:$0xff] }
 0x343   :  { %v15748_v54 = vpop.f32.mrf.mxu0  ;;  %v15840_v10 = vadd.f32 %v15839_v11, %v19826_v42 }
 0x344   :  { %v15749_v12 = vadd.f32 %v15748_v54, %v15747_v29  ;;  %v15841_v54 = vpop.f32.mrf.mxu1 }
 0x345   :  { %v15750_v34 = vpop.f32.mrf.mxu0 }
 0x346   :  { %v1765_v7 = vadd.f32 %v15813_v27, %v15749_v12 }
 0x347   :  { %v15751_v25 = vpop.f32.mrf.mxu0 }
 0x348   :  { %v1824_v51 = vpack.c.bf16 %v1765_v7, %v1762_v59  ;;  %v15752_v38 = vadd.f32 %v15751_v25, %v15750_v34  ;;  %v21660_v34 = vld [vmem:[#allocation48_spill] sm:$0xff] }
 0x349   :  { %v15753_v1 = vpop.f32.mrf.mxu0 }
 0x34a   :  { %17048 = vmatprep.mubr.msk.bf16.mxu0 %vm1187_vm1, %v1824_v51  ;;  %v1770_v46 = vadd.f32 %v15816_v52, %v15752_v38  ;;  %v21662_v52 = vld [vmem:[#allocation50_spill] sm:$0xff] }
 0x34b   :  { %v15754_v61 = vpop.f32.mrf.mxu0 }
 0x34c   :  { %v15755_v43 = vadd.f32 %v15754_v61, %v15753_v1 }
 0x34d   :  { %v15756_v0 = vpop.f32.mrf.mxu0 }
 0x34e   :  { %v1773_v27 = vadd.f32 %v15819_v28, %v15755_v43  ;;  %v21663_v43 = vld [vmem:[#allocation51_spill] sm:$0xff] }
 0x34f   :  { %v15757_v12 = vpop.f32.mrf.mxu0 }
 0x350   :  { %v1825_v7 = vpack.c.bf16 %v1773_v27, %v1770_v46  ;;  %v15758_v25 = vadd.f32 %v15757_v12, %v15756_v0  ;;  %v15842_v46 = vpop.f32.mrf.mxu1 }
 0x351   :  { %v15759_v29 = vpop.f32.mrf.mxu0  ;;  %v15843_v50 = vadd.f32 %v15842_v46, %v15841_v54 }
 0x352   :  { %17049 = vmatmul.mubr.msk.bf16.vlgmr.msra.gmra.mxu0 %vm1187_vm1, %v1825_v7  ;;  %v1778_v59 = vadd.f32 %v15822_v17, %v15758_v25  ;;  %v21665_v7 = vld [vmem:[#allocation55_spill] sm:$0xff]  ;;  %v15844_v25 = vpop.f32.mrf.mxu1 }
 0x353   :  { %v15760_v51 = vpop.f32.mrf.mxu0  ;;  %15930 = vmatpush3.bf16.msra.mxu0 %v21660_v34 }
 0x354   :  { %v15761_v2 = vadd.f32 %v15760_v51, %v15759_v29  ;;  %15931 = vmatprep.subr.bf16.mxu0 %v21661_v39 }
 0x355   :  { %v15762_v38 = vpop.f32.mrf.mxu0 }
 0x356   :  { %v1781_v1 = vadd.f32 %v15825_v35, %v15761_v2  ;;  %v21666_v2 = vld [vmem:[#allocation57_spill] sm:$0xff] }
 0x357   :  { %v15763_v61 = vpop.f32.mrf.mxu0  ;;  %15932 = vmatpush3.bf16.msra.mxu0 %v21662_v52 }
 0x358   :  { %v1826_v28 = vpack.c.bf16 %v1781_v1, %v1778_v59  ;;  %15933 = vmatprep.subr.bf16.mxu0 %v21663_v43  ;;  %v15764_v27 = vadd.f32 %v15763_v61, %v15762_v38  ;;  %v21667_v59 = vld [vmem:[#allocation59_spill] sm:$0xff]  ;;  %v15845_v61 = vpop.f32.mrf.mxu1 }
 0x359   :  { %v15765_v0 = vpop.f32.mrf.mxu0  ;;  %v15846_v11 = vadd.f32 %v15845_v61, %v15844_v25  ;;  %v18007_v25 = vld [vmem:[#allocation7 + $0x30c] ss:$16 sps:$4 sm:$0xff]   ;;  %v18005_v61 = vld [vmem:[#allocation7 + $0x308] ss:$16 sps:$4 sm:$0xff]  }
 0x35a   :  { %17052 = vmatprep.mubr.msk.bf16.mxu0 %vm1187_vm1, %v1826_v28  ;;  %v1786_v51 = vadd.f32 %v15828_v36, %v15764_v27  ;;  %v21669_v27 = vld [vmem:[#allocation63_spill] sm:$0xff]  ;;  %v15847_v36 = vpop.f32.mrf.mxu1 }
 0x35b   :  { %v15766_v48 = vpop.f32.mrf.mxu0  ;;  %15934 = vmatpush3.bf16.msra.mxu0 %v21664_v30 }
 0x35c   :  { %v15767_v12 = vadd.f32 %v15766_v48, %v15765_v0  ;;  %15935 = vmatprep.subr.bf16.mxu0 %v21665_v7 }
 0x35d   :  { %v15768_v29 = vpop.f32.mrf.mxu0 }
 0x35e   :  { %v1789_v17 = vadd.f32 %v15831_v37, %v15767_v12 }
 0x35f   :  { %v15769_v35 = vpop.f32.mrf.mxu0  ;;  %15936 = vmatpush3.bf16.msra.mxu0 %v21666_v2 }
 0x360   :  { %v1827_v38 = vpack.c.bf16 %v1789_v17, %v1786_v51  ;;  %15937 = vmatprep.subr.bf16.mxu0 %v21667_v59  ;;  %v15770_v28 = vadd.f32 %v15769_v35, %v15768_v29  ;;  %v21670_v17 = vld [vmem:[#allocation65_spill] sm:$0xff]  ;;  %v21671_v35 = vld [vmem:[#allocation67_spill] sm:$0xff]  ;;  %v15848_v59 = vpop.f32.mrf.mxu1 }
 0x361   :  { %v15771_v1 = vpop.f32.mrf.mxu0  ;;  %v15849_v54 = vadd.f32 %v15848_v59, %v15847_v36  ;;  %v18013_v36 = vld [vmem:[#allocation7 + $0x32c] ss:$16 sps:$4 sm:$0xff]  }
 0x362   :  { %17053 = vmatmul.mubr.msk.bf16.gmra.mxu0 %vm1187_vm1, %v1827_v38  ;;  %v1794_v37 = vadd.f32 %v15834_v18, %v15770_v28  ;;  %v21673_v28 = vld [vmem:[#allocation71_spill] sm:$0xff]  ;;  %v15850_v18 = vpop.f32.mrf.mxu1 }
 0x363   :  { %v15772_v47 = vpop.f32.mrf.mxu0  ;;  %15938 = vmatpush3.bf16.msra.mxu0 %v21668_v24 }
 0x364   :  { %v15773_v0 = vadd.f32 %v15772_v47, %v15771_v1  ;;  %15939 = vmatprep.subr.bf16.mxu0 %v21669_v27 }
 0x365   :  { %v15774_v48 = vpop.f32.mrf.mxu0 }
 0x366   :  { %v1797_v12 = vadd.f32 %v15837_v60, %v15773_v0 }
 0x367   :  { %v15775_v51 = vpop.f32.mrf.mxu0  ;;  %15940 = vmatpush3.bf16.msra.mxu0 %v21670_v17 }
 0x368   :  { %v1828_v29 = vpack.c.bf16 %v1797_v12, %v1794_v37  ;;  %15941 = vmatprep.subr.bf16.mxu0 %v21671_v35  ;;  %v15776_v24 = vadd.f32 %v15775_v51, %v15774_v48  ;;  %v21674_v12 = vld [vmem:[#allocation73_spill] sm:$0xff]  ;;  %v21675_v48 = vld [vmem:[#allocation46_spill] sm:$0xff] }
 0x369   :  { %v15777_v38 = vpop.f32.mrf.mxu0 }
 0x36a   :  { %17056 = vmatprep.mubr.msk.bf16.mxu0 %vm1187_vm1, %v1828_v29  ;;  %v1802_v60 = vadd.f32 %v15840_v10, %v15776_v24  ;;  %v15851_v29 = vpop.f32.mrf.mxu1 }
 0x36b   :  { %v15778_v15 = vpop.f32.mrf.mxu0  ;;  %15942 = vmatpush3.bf16.msra.mxu0 %v21672_v6 }
 0x36c   :  { %v15779_v1 = vadd.f32 %v15778_v15, %v15777_v38  ;;  %15943 = vmatprep.subr.bf16.mxu0 %v21673_v28  ;;  %v15853_v38 = vpop.f32.mrf.mxu1 }
 0x36d   :  { %v15780_v47 = vpop.f32.mrf.mxu0 }
 0x36e   :  { %v1805_v0 = vadd.f32 %v15843_v50, %v15779_v1  ;;  %v15854_v1 = vpop.f32.mrf.mxu1 }
 0x36f   :  { %v15781_v37 = vpop.f32.mrf.mxu0  ;;  %15944 = vmatpush3.bf16.msra.mxu0 %v21674_v12 }
 0x370   :  { %v1829_v35 = vpack.c.bf16 %v1805_v0, %v1802_v60  ;;  %16002 = vmatprep.subr.bf16.mxu0 %v21675_v48  ;;  %v15782_v17 = vadd.f32 %v15781_v37, %v15780_v47  ;;  %v15852_v48 = vadd.f32 %v15851_v29, %v15850_v18  ;;  %v15855_v47 = vadd.f32 %v15854_v1, %v15853_v38  ;;  %v18025_v18 = vld [vmem:[#allocation7 + $0x36c] ss:$16 sps:$4 sm:$0xff]   ;;  %v18047_v38 = vld [vmem:[#allocation7 + $0x3e8] ss:$16 sps:$4 sm:$0xff]   ;;  %v18050_v1 = vld [vmem:[#allocation7 + $0x400] ss:$16 sps:$4 sm:$0xff]  }
 0x371   :  { %v15783_v51 = vpop.f32.mrf.mxu0  ;;  %v18037_v29 = vld [vmem:[#allocation7 + $0x3ac] ss:$16 sps:$4 sm:$0xff]  }
 0x372   :  { %17057 = vmatmul.mubr.msk.bf16.gmra.mxu0 %vm1187_vm1, %v1829_v35  ;;  %v1810_v28 = vadd.f32 %v15846_v11, %v15782_v17  ;;  %v18011_v17 = vld [vmem:[#allocation7 + $0x328] ss:$16 sps:$4 sm:$0xff]   ;;  %v18043_v11 = vld [vmem:[#allocation7 + $0x3cc] ss:$16 sps:$4 sm:$0xff]  }
 0x373   :  { %v15784_v42 = vpop.f32.mrf.mxu0 }
 0x374   :  { %v15785_v46 = vadd.f32 %v15784_v42, %v15783_v51  ;;  %v18029_v51 = vld [vmem:[#allocation7 + $0x388] ss:$16 sps:$4 sm:$0xff]  }
 0x375   :  { %v15786_v15 = vpop.f32.mrf.mxu0  ;;  %v18035_v42 = vld [vmem:[#allocation7 + $0x3a8] ss:$16 sps:$4 sm:$0xff]  }
 0x376   :  { %v1813_v24 = vadd.f32 %v15849_v54, %v15785_v46  ;;  %v18041_v54 = vld [vmem:[#allocation7 + $0x3c8] ss:$16 sps:$4 sm:$0xff]   ;;  %v18049_v46 = vld [vmem:[#allocation7 + $0x3ec] ss:$16 sps:$4 sm:$0xff]  }
 0x377   :  { %v15787_v10 = vpop.f32.mrf.mxu0 }
 0x378   :  { %v1830_v50 = vpack.c.bf16 %v1813_v24, %v1810_v28  ;;  %v15788_v60 = vadd.f32 %v15787_v10, %v15786_v15  ;;  %v18019_v28 = vld [vmem:[#allocation7 + $0x34c] ss:$16 sps:$4 sm:$0xff]   ;;  %v2370_v15 = vld [vmem:[#allocation8 + $0x6] sm:$0x3]  ;;  %v19879_v10 = vpop.f32.mrf.mxu1 }
 0x379   :  { %v15789_v12 = vpop.f32.mrf.mxu0  ;;  %17821 = vmatprep.subr.msk.bf16.mxu1 %vm1212_vm0, %v2370_v15  ;;  %v2396_v24 = vsel %vm1212_vm0, %v2370_v15, 0 }
 0x37a   :  { %17060 = vmatprep.mubr.msk.bf16.mxu0 %vm1187_vm1, %v1830_v50  ;;  %v1818_v35 = vadd.f32 %v15852_v48, %v15788_v60  ;;  %v18031_v48 = vld [vmem:[#allocation7 + $0x38c] ss:$16 sps:$4 sm:$0xff]   ;;  %17065 = vmatpush3.bf16.msra.mxu1 %v2396_v24  ;;  %v19881_v50 = vpop.f32.mrf.mxu1  ;;  %v18052_v60 = vld [vmem:[#allocation7 + $0x404] ss:$16 sps:$4 sm:$0xff]  }
 0x37b   :  { %v15790_v0 = vpop.f32.mrf.mxu0  ;;  %16066 = vmatprep.subr.bf16.mxu1 %v21640_v14  ;;  %v18070_v24 = vld [vmem:[#allocation7 + $0x464] ss:$16 sps:$4 sm:$0xff]  }
 0x37c   :  { %v15791_v37 = vadd.f32 %v15790_v0, %v15789_v12  ;;  %v18023_v12 = vld [vmem:[#allocation7 + $0x368] ss:$16 sps:$4 sm:$0xff]   ;;  %v1383_v0 = vadd.f32 %v19717_v20, %v19767_v19  ;;  %v18056_v19 = vld [vmem:[#allocation7 + $0x420] ss:$16 sps:$4 sm:$0xff]  }
 0x37e   :  { %v1821_v6 = vadd.f32 %v15855_v47, %v15791_v37  ;;  %v19885_v37 = vpop.f32.mrf.mxu1 }
 0x380   :  { %v1831_v59 = vpack.c.bf16 %v1821_v6, %v1818_v35  ;;  %v18017_v6 = vld [vmem:[#allocation7 + $0x348] ss:$16 sps:$4 sm:$0xff]   ;;  %v1375_v35 = vadd.f32 %v19720_v3, %v19771_v53  ;;  %v18062_v53 = vld [vmem:[#allocation7 + $0x440] ss:$16 sps:$4 sm:$0xff]  }
 0x382   :  { %17061 = vmatmul.mubr.msk.bf16.gmra.mxu0 %vm1187_vm1, %v1831_v59 }
 0x383   :  { %2296 = vmatprep.mubr.bf16.mxu0 %v18007_v25 }
 0x38a   :  { %2297 = vmatmul.mubr.bf16.vlgmr.msra.gmra.mxu0 %v18005_v61  ;;  %v1386_v61 = vadd.f32 %v19723_v22, %v19773_v9  ;;  %v1399_v22 = vadd.f32 %v19727_v31, %v19779_v40  ;;  %v18068_v40 = vld [vmem:[#allocation7 + $0x460] ss:$16 sps:$4 sm:$0xff]  }
 0x38b   :  { %2304 = vmatprep.mubr.bf16.mxu0 %v18013_v36  ;;  %16003 = vmatpush3.bf16.msra.mxu0 %v19184_v8 }
 0x38c   :  { %16004 = vmatprep.subr.bf16.mxu0 %v19209_v16 }
 0x38f   :  { %16005 = vmatpush3.bf16.msra.mxu0 %v19223_v21 }
 0x390   :  { %16006 = vmatprep.subr.bf16.mxu0 %v19238_v26 }
 0x392   :  { %2305 = vmatmul.mubr.bf16.gmra.mxu0 %v18011_v17 }
 0x393   :  { %2312 = vmatprep.mubr.bf16.mxu0 %v18019_v28  ;;  %16007 = vmatpush3.bf16.msra.mxu0 %v21625_v13  ;;  %v19895_v28 = vpop.f32.mrf.mxu1 }
 0x394   :  { %16008 = vmatprep.subr.bf16.mxu0 %v21626_v62 }
 0x397   :  { %16009 = vmatpush3.bf16.msra.mxu0 %v21627_v33 }
 0x398   :  { %16010 = vmatprep.subr.bf16.mxu0 %v21630_v56 }
 0x39a   :  { %2313 = vmatmul.mubr.bf16.gmra.mxu0 %v18017_v6  ;;  %v18058_v6 = vld [vmem:[#allocation7 + $0x424] ss:$16 sps:$4 sm:$0xff]  }
 0x39b   :  { %2320 = vmatprep.mubr.bf16.mxu0 %v18025_v18  ;;  %16011 = vmatpush3.bf16.msra.mxu0 %v21633_v49  ;;  %v19899_v18 = vpop.f32.mrf.mxu1 }
 0x39c   :  { %16012 = vmatprep.subr.bf16.mxu0 %v21634_v63 }
 0x39d   :  { %v19901_v3 = vpop.f32.mrf.mxu1 }
 0x39f   :  { %16013 = vmatpush3.bf16.msra.mxu0 %v21635_v4 }
 0x3a0   :  { %16014 = vmatprep.subr.bf16.mxu0 %v21636_v55 }
 0x3a2   :  { %2321 = vmatmul.mubr.bf16.gmra.mxu0 %v18023_v12  ;;  %v18064_v12 = vld [vmem:[#allocation7 + $0x444] ss:$16 sps:$4 sm:$0xff]  }
 0x3a3   :  { %2328 = vmatprep.mubr.bf16.mxu0 %v18031_v48  ;;  %16015 = vmatpush3.bf16.msra.mxu0 %v21637_v58 }
 0x3a4   :  { %16016 = vmatprep.subr.bf16.mxu0 %v21638_v5 }
 0x3a7   :  { %16017 = vmatpush3.bf16.msra.mxu0 %v21639_v41 }
 0x3aa   :  { %2329 = vmatmul.mubr.bf16.gmra.mxu0 %v18029_v51  ;;  %v19907_v51 = vpop.f32.mrf.mxu1 }
 0x3ab   :  { %2336 = vmatprep.mubr.bf16.mxu0 %v18037_v29  ;;  %v1391_v29 = vadd.f32 %v19729_v32, %v19783_v57  ;;  %v18074_v57 = vld [vmem:[#allocation7 + $0x480] ss:$16 sps:$4 sm:$0xff]  }
 0x3ac   :  { %v19917_v15 = vpop.f32.mrf.mxu1 }
 0x3b2   :  { %2337 = vmatmul.mubr.bf16.gmra.mxu0 %v18035_v42 }
 0x3b3   :  { %2344 = vmatprep.mubr.bf16.mxu0 %v18043_v11 }
 0x3ba   :  { %2345 = vmatmul.mubr.bf16.gmra.mxu0 %v18041_v54  ;;  %v1402_v54 = vadd.f32 %v19731_v45, %v19785_v23  ;;  %v21679_v45 = vld [vmem:[#allocation52_spill] sm:$0xff] }
 0x3bb   :  { %2352 = vmatprep.mubr.bf16.mxu0 %v18049_v46  ;;  %v1415_v23 = vadd.f32 %v21679_v45, %v19791_v44 }
 0x3c2   :  { %2353 = vmatmul.mubr.bf16.gmra.mxu0 %v18047_v38 }
 0x3c3   :  { %2736 = vmatprep.mubr.bf16.mxu0 %v18052_v60  ;;  %v18076_v60 = vld [vmem:[#allocation7 + $0x484] ss:$16 sps:$4 sm:$0xff]  }
 0x3ca   :  { %2737 = vmatmul.mubr.bf16.vlgmr.msra.gmra.mxu0 %v18050_v1  ;;  %v19921_v1 = vpop.f32.mrf.mxu1 }
 0x3cb   :  { %2744 = vmatprep.mubr.bf16.mxu0 %v18058_v6 }
 0x3cc   :  { %v19923_v32 = vpop.f32.mrf.mxu1 }
 0x3d2   :  { %2745 = vmatmul.mubr.bf16.gmra.mxu0 %v18056_v19 }
 0x3d3   :  { %2752 = vmatprep.mubr.bf16.mxu0 %v18064_v12  ;;  %v21684_v12 = vld [vmem:[#allocation56_spill] sm:$0xff] }
 0x3da   :  { %2753 = vmatmul.mubr.bf16.gmra.mxu0 %v18062_v53  ;;  %v21683_v53 = vld [vmem:[#allocation66_spill] sm:$0xff] }
 0x3db   :  { %2760 = vmatprep.mubr.bf16.mxu0 %v18070_v24 }
 0x3e2   :  { %2761 = vmatmul.mubr.bf16.gmra.mxu0 %v18068_v40 }
 0x3e3   :  { %2768 = vmatprep.mubr.bf16.mxu0 %v18076_v60  ;;  %v18088_v60 = vld [vmem:[#allocation7 + $0x4c4] ss:$16 sps:$4 sm:$0xff]  }
 0x3ea   :  { %2769 = vmatmul.mubr.bf16.gmra.mxu0 %v18074_v57  ;;  %v18086_v57 = vld [vmem:[#allocation7 + $0x4c0] ss:$16 sps:$4 sm:$0xff]  }
 0x412   :  { %v17050_v47 = vpop.f32.mrf.mxu0 }
 0x413   :  { %v19889_v25 = vadd.f32 %v17050_v47, %v1383_v0 }
 0x414   :  { %v1895_v59 = vpop.f32.mrf.mxu0 }
 0x415   :  { %v19893_v36 = vadd.f32 %v1895_v59, %v1375_v35  ;;  %v19929_v35 = vpop.f32.mrf.mxu1  ;;  %v21680_v59 = vld [vmem:[#allocation64_spill] sm:$0xff] }
 0x416   :  { %v17051_v17 = vpop.f32.mrf.mxu0 }
 0x417   :  { %v19897_v20 = vadd.f32 %v17051_v17, %v1386_v61  ;;  %v21681_v61 = vld [vmem:[#allocation54_spill] sm:$0xff] }
 0x418   :  { %v19903_v48 = vpop.f32.mrf.mxu0  ;;  %v1407_v17 = vadd.f32 %v21681_v61, %v21680_v59 }
 0x419   :  { %21676 = vst [vmem:[#allocation48_spill] sm:$0xff] %v19903_v48 }
 0x422   :  { %v17054_v9 = vpop.f32.mrf.mxu0 }
 0x423   :  { %v19911_v42 = vadd.f32 %v17054_v9, %v1399_v22  ;;  %v1418_v22 = vadd.f32 %v21684_v12, %v21683_v53  ;;  %v21691_v53 = vld [vmem:[#allocation58_spill] sm:$0xff] }
 0x424   :  { %v1911_v11 = vpop.f32.mrf.mxu0 }
 0x425   :  { %v19915_v46 = vadd.f32 %v1911_v11, %v1391_v29  ;;  %v19939_v11 = vpop.f32.mrf.mxu1 }
 0x426   :  { %v17055_v38 = vpop.f32.mrf.mxu0 }
 0x427   :  { %v19919_v31 = vadd.f32 %v17055_v38, %v1402_v54  ;;  %v18080_v54 = vld [vmem:[#allocation7 + $0x4a0] ss:$16 sps:$4 sm:$0xff]   ;;  %v18082_v38 = vld [vmem:[#allocation7 + $0x4a4] ss:$16 sps:$4 sm:$0xff]   ;;  %v19943_v40 = vpop.f32.mrf.mxu1 }
 0x428   :  { %v19925_v0 = vpop.f32.mrf.mxu0  ;;  %2776 = vmatprep.mubr.bf16.mxu0 %v18082_v38  ;;  %v21694_v38 = vld [vmem:[#allocation75_spill] sm:$0xff] }
 0x429   :  { %21677 = vst [vmem:[#allocation49_spill] sm:$0xff] %v19919_v31  ;;  %21678 = vst [vmem:[#allocation50_spill] sm:$0xff] %v19925_v0  ;;  %2777 = vmatmul.mubr.bf16.gmra.mxu0 %v18080_v54  ;;  %v19945_v24 = vpop.f32.mrf.mxu1  ;;  %v21693_v54 = vld [vmem:[#allocation82_spill] sm:$0xff] }
 0x42a   :  { %2784 = vmatprep.mubr.bf16.mxu0 %v18088_v60  ;;  %v1434_v48 = vadd.f32 %v21694_v38, %v21693_v54  ;;  %v18092_v60 = vld [vmem:[#allocation7 + $0x4e0] ss:$16 sps:$4 sm:$0xff]  }
 0x431   :  { %2785 = vmatmul.mubr.bf16.gmra.mxu0 %v18086_v57 }
 0x432   :  { %v17058_v47 = vpop.f32.mrf.mxu0 }
 0x433   :  { %v19933_v19 = vadd.f32 %v17058_v47, %v1415_v23  ;;  %v21688_v23 = vld [vmem:[#allocation80_spill] sm:$0xff]  ;;  %v21689_v47 = vld [vmem:[#allocation79_spill] sm:$0xff] }
 0x434   :  { %v1927_v6 = vpop.f32.mrf.mxu0  ;;  %v1431_v59 = vadd.f32 %v21689_v47, %v21688_v23  ;;  %v18094_v23 = vld [vmem:[#allocation7 + $0x4e4] ss:$16 sps:$4 sm:$0xff]  }
 0x435   :  { %21682 = vst [vmem:[#allocation51_spill] sm:$0xff] %v19933_v19  ;;  %v19937_v9 = vadd.f32 %v1927_v6, %v1407_v17  ;;  %v19951_v17 = vpop.f32.mrf.mxu1  ;;  %v21690_v6 = vld [vmem:[#allocation81_spill] sm:$0xff]  ;;  %2792 = vmatprep.mubr.bf16.mxu0 %v18094_v23 }
 0x436   :  { %v17059_v29 = vpop.f32.mrf.mxu0  ;;  %v1423_v12 = vadd.f32 %v21691_v53, %v21690_v6 }
 0x437   :  { %21685 = vst [vmem:[#allocation53_spill] sm:$0xff] %v19937_v9  ;;  %v19941_v44 = vadd.f32 %v17059_v29, %v1418_v22 }
 0x438   :  { %v19947_v45 = vpop.f32.mrf.mxu0 }
 0x439   :  { %21686 = vst [vmem:[#allocation55_spill] sm:$0xff] %v19941_v44  ;;  %21687 = vst [vmem:[#allocation57_spill] sm:$0xff] %v19947_v45  ;;  %v15903_v44 = vpop.f32.mrf.mxu1  ;;  %2793 = vmatmul.mubr.bf16.gmra.mxu0 %v18092_v60 }
 0x43b   :  { %v19965_v19 = vpop.f32.mrf.mxu1 }
 0x43d   :  { %v19967_v6 = vpop.f32.mrf.mxu1 }
 0x43f   :  { %v15908_v38 = vpop.f32.mrf.mxu1 }
 0x442   :  { %v17062_v61 = vpop.f32.mrf.mxu0 }
 0x443   :  { %v19955_v22 = vadd.f32 %v17062_v61, %v1431_v59 }
 0x444   :  { %v1943_v29 = vpop.f32.mrf.mxu0 }
 0x445   :  { %21692 = vst [vmem:[#allocation63_spill] sm:$0xff] %v19955_v22  ;;  %v19959_v0 = vadd.f32 %v1943_v29, %v1423_v12  ;;  %v15883_v29 = vadd.f32 %v19881_v50, %v19879_v10  ;;  %v15909_v22 = vpop.f32.mrf.mxu1  ;;  %v15892_v10 = vadd.f32 %v19917_v15, %v19907_v51 }
 0x446   :  { %v17063_v45 = vpop.f32.mrf.mxu0 }
 0x447   :  { %21695 = vst [vmem:[#allocation52_spill] sm:$0xff] %v19959_v0  ;;  %v19961_v9 = vadd.f32 %v17063_v45, %v1434_v48  ;;  %v15886_v48 = vadd.f32 %v19895_v28, %v19885_v37  ;;  %v19978_v28 = vpop.f32.mrf.mxu1 }
 0x448   :  { %v19963_v47 = vpop.f32.mrf.mxu0 }
 0x449   :  { %21696 = vst [vmem:[#allocation64_spill] sm:$0xff] %v19961_v9  ;;  %21697 = vst [vmem:[#allocation54_spill] sm:$0xff] %v19963_v47 }
 0x44a   :  { %v15945_v57 = vpop.f32.mrf.mxu0 }
 0x44c   :  { %v15946_v59 = vpop.f32.mrf.mxu0 }
 0x44d   :  { %v15947_v53 = vadd.f32 %v15946_v59, %v15945_v57  ;;  %v15889_v59 = vadd.f32 %v19901_v3, %v19899_v18  ;;  %v15895_v18 = vadd.f32 %v19923_v32, %v19921_v1  ;;  %v15898_v3 = vadd.f32 %v19939_v11, %v19929_v35 }
 0x44e   :  { %v15948_v61 = vpop.f32.mrf.mxu0  ;;  %v15901_v32 = vadd.f32 %v19945_v24, %v19943_v40  ;;  %v15904_v35 = vadd.f32 %v15903_v44, %v19951_v17  ;;  %v21699_v44 = vld [vmem:[#allocation61_spill] sm:$0xff]  ;;  %v15907_v24 = vadd.f32 %v19967_v6, %v19965_v19  ;;  %v15910_v17 = vadd.f32 %v15909_v22, %v15908_v38 }
 0x44f   :  { %v2299_v23 = vadd.f32 %v15947_v53, %v15883_v29  ;;  %v21702_v22 = vld [vmem:[#allocation69_spill] sm:$0xff] }
 0x450   :  { %v15949_v12 = vpop.f32.mrf.mxu0 }
 0x451   :  { %v15950_v45 = vadd.f32 %v15949_v12, %v15948_v61 }
 0x452   :  { %v15951_v54 = vpop.f32.mrf.mxu0 }
 0x453   :  { %v2302_v47 = vadd.f32 %v15950_v45, %v15886_v48  ;;  %v15912_v48 = vpop.f32.mrf.mxu1 }
 0x454   :  { %v15952_v9 = vpop.f32.mrf.mxu0  ;;  %v15913_v6 = vadd.f32 %v15912_v48, %v19978_v28 }
 0x455   :  { %v2361_v0 = vpack.c.bf16 %v2302_v47, %v2299_v23  ;;  %v15953_v31 = vadd.f32 %v15952_v9, %v15951_v54 }
 0x456   :  { %v15954_v60 = vpop.f32.mrf.mxu0 }
 0x457   :  { %17066 = vmatprep.mubr.msk.bf16.mxu1 %vm1187_vm1, %v2361_v0  ;;  %v2307_v61 = vadd.f32 %v15953_v31, %v15889_v59  ;;  %v15914_v31 = vpop.f32.mrf.mxu1 }
 0x458   :  { %v15955_v57 = vpop.f32.mrf.mxu0 }
 0x459   :  { %v15956_v50 = vadd.f32 %v15955_v57, %v15954_v60  ;;  %v15915_v59 = vpop.f32.mrf.mxu1 }
 0x45a   :  { %v15957_v37 = vpop.f32.mrf.mxu0  ;;  %v15916_v38 = vadd.f32 %v15915_v59, %v15914_v31 }
 0x45b   :  { %v2310_v53 = vadd.f32 %v15956_v50, %v15892_v10 }
 0x45c   :  { %v15958_v12 = vpop.f32.mrf.mxu0 }
 0x45d   :  { %v2362_v47 = vpack.c.bf16 %v2310_v53, %v2307_v61  ;;  %v15959_v9 = vadd.f32 %v15958_v12, %v15957_v37  ;;  %v15917_v37 = vpop.f32.mrf.mxu1 }
 0x45e   :  { %v15960_v29 = vpop.f32.mrf.mxu0 }
 0x45f   :  { %17067 = vmatmul.mubr.msk.bf16.vlgmr.msra.gmra.mxu1 %vm1187_vm1, %v2362_v47  ;;  %v2315_v45 = vadd.f32 %v15959_v9, %v15895_v18 }
 0x460   :  { %v15961_v0 = vpop.f32.mrf.mxu0  ;;  %16067 = vmatpush3.bf16.msra.mxu1 %v21660_v34 }
 0x461   :  { %v15962_v51 = vadd.f32 %v15961_v0, %v15960_v29  ;;  %16068 = vmatprep.subr.bf16.mxu1 %v21661_v39  ;;  %v21698_v29 = vld [vmem:[#allocation59_spill] sm:$0xff]  ;;  %v15918_v0 = vpop.f32.mrf.mxu1 }
 0x462   :  { %v15963_v15 = vpop.f32.mrf.mxu0  ;;  %v15919_v48 = vadd.f32 %v15918_v0, %v15917_v37  ;;  %v18055_v37 = vld [vmem:[#allocation7 + $0x40c] ss:$16 sps:$4 sm:$0xff]  }
 0x463   :  { %v2318_v54 = vadd.f32 %v15962_v51, %v15898_v3 }
 0x464   :  { %v15964_v23 = vpop.f32.mrf.mxu0  ;;  %16069 = vmatpush3.bf16.msra.mxu1 %v21662_v52 }
 0x465   :  { %v2363_v60 = vpack.c.bf16 %v2318_v54, %v2315_v45  ;;  %16070 = vmatprep.subr.bf16.mxu1 %v21663_v43  ;;  %v15965_v10 = vadd.f32 %v15964_v23, %v15963_v15  ;;  %v15920_v15 = vpop.f32.mrf.mxu1 }
 0x466   :  { %v15966_v57 = vpop.f32.mrf.mxu0 }
 0x467   :  { %17070 = vmatprep.mubr.msk.bf16.mxu1 %vm1187_vm1, %v2363_v60  ;;  %v2323_v61 = vadd.f32 %v15965_v10, %v15901_v32  ;;  %v21700_v60 = vld [vmem:[#allocation65_spill] sm:$0xff]  ;;  %v21701_v10 = vld [vmem:[#allocation67_spill] sm:$0xff]  ;;  %v15921_v32 = vpop.f32.mrf.mxu1 }
 0x468   :  { %v15967_v1 = vpop.f32.mrf.mxu0  ;;  %16071 = vmatpush3.bf16.msra.mxu1 %v21664_v30  ;;  %v15922_v31 = vadd.f32 %v15921_v32, %v15920_v15  ;;  %v18053_v15 = vld [vmem:[#allocation7 + $0x408] ss:$16 sps:$4 sm:$0xff]   ;;  %v18061_v32 = vld [vmem:[#allocation7 + $0x42c] ss:$16 sps:$4 sm:$0xff]  }
 0x469   :  { %v15968_v11 = vadd.f32 %v15967_v1, %v15966_v57  ;;  %16072 = vmatprep.subr.bf16.mxu1 %v21665_v7 }
 0x46a   :  { %v15969_v50 = vpop.f32.mrf.mxu0 }
 0x46b   :  { %v2326_v53 = vadd.f32 %v15968_v11, %v15904_v35 }
 0x46c   :  { %v15970_v12 = vpop.f32.mrf.mxu0  ;;  %16073 = vmatpush3.bf16.msra.mxu1 %v21666_v2 }
 0x46d   :  { %v2364_v47 = vpack.c.bf16 %v2326_v53, %v2323_v61  ;;  %16074 = vmatprep.subr.bf16.mxu1 %v21698_v29  ;;  %v15971_v18 = vadd.f32 %v15970_v12, %v15969_v50  ;;  %v21703_v50 = vld [vmem:[#allocation71_spill] sm:$0xff]  ;;  %v15923_v53 = vpop.f32.mrf.mxu1 }
 0x46e   :  { %v15972_v9 = vpop.f32.mrf.mxu0 }
 0x46f   :  { %17071 = vmatmul.mubr.msk.bf16.gmra.mxu1 %vm1187_vm1, %v2364_v47  ;;  %v2331_v45 = vadd.f32 %v15971_v18, %v15907_v24  ;;  %v21704_v18 = vld [vmem:[#allocation73_spill] sm:$0xff]  ;;  %v21705_v24 = vld [vmem:[#allocation46_spill] sm:$0xff] }
 0x470   :  { %v15973_v40 = vpop.f32.mrf.mxu0  ;;  %16075 = vmatpush3.bf16.msra.mxu1 %v21699_v44 }
 0x471   :  { %v15974_v3 = vadd.f32 %v15973_v40, %v15972_v9  ;;  %16076 = vmatprep.subr.bf16.mxu1 %v21669_v27 }
 0x472   :  { %v15975_v51 = vpop.f32.mrf.mxu0 }
 0x473   :  { %v2334_v54 = vadd.f32 %v15974_v3, %v15910_v17  ;;  %v15924_v17 = vpop.f32.mrf.mxu1 }
 0x474   :  { %v15976_v23 = vpop.f32.mrf.mxu0  ;;  %16077 = vmatpush3.bf16.msra.mxu1 %v21700_v60 }
 0x475   :  { %v2365_v57 = vpack.c.bf16 %v2334_v54, %v2331_v45  ;;  %16078 = vmatprep.subr.bf16.mxu1 %v21701_v10  ;;  %v15977_v35 = vadd.f32 %v15976_v23, %v15975_v51  ;;  %v15926_v45 = vpop.f32.mrf.mxu1 }
 0x476   :  { %v15978_v1 = vpop.f32.mrf.mxu0 }
 0x477   :  { %17074 = vmatprep.mubr.msk.bf16.mxu1 %vm1187_vm1, %v2365_v57  ;;  %v2339_v12 = vadd.f32 %v15977_v35, %v15913_v6 }
 0x478   :  { %v15979_v19 = vpop.f32.mrf.mxu0  ;;  %16079 = vmatpush3.bf16.msra.mxu1 %v21702_v22 }
 0x479   :  { %v15980_v11 = vadd.f32 %v15979_v19, %v15978_v1  ;;  %16080 = vmatprep.subr.bf16.mxu1 %v21703_v50  ;;  %v15927_v19 = vpop.f32.mrf.mxu1 }
 0x47a   :  { %v15981_v61 = vpop.f32.mrf.mxu0 }
 0x47b   :  { %v2342_v47 = vadd.f32 %v15980_v11, %v15916_v38 }
 0x47c   :  { %v15982_v9 = vpop.f32.mrf.mxu0  ;;  %16081 = vmatpush3.bf16.msra.mxu1 %v21704_v18 }
 0x47d   :  { %v2366_v40 = vpack.c.bf16 %v2342_v47, %v2339_v12  ;;  %16139 = vmatprep.subr.bf16.mxu1 %v21705_v24  ;;  %v15983_v51 = vadd.f32 %v15982_v9, %v15981_v61  ;;  %v15925_v12 = vadd.f32 %v15924_v17, %v15923_v53  ;;  %v15928_v61 = vadd.f32 %v15927_v19, %v15926_v45  ;;  %v18065_v53 = vld [vmem:[#allocation7 + $0x448] ss:$16 sps:$4 sm:$0xff]   ;;  %v18073_v17 = vld [vmem:[#allocation7 + $0x46c] ss:$16 sps:$4 sm:$0xff]  }
 0x47e   :  { %v15984_v3 = vpop.f32.mrf.mxu0  ;;  %v18083_v45 = vld [vmem:[#allocation7 + $0x4a8] ss:$16 sps:$4 sm:$0xff]  }
 0x47f   :  { %17075 = vmatmul.mubr.msk.bf16.gmra.mxu1 %vm1187_vm1, %v2366_v40  ;;  %v2347_v23 = vadd.f32 %v15983_v51, %v15919_v48  ;;  %v18067_v51 = vld [vmem:[#allocation7 + $0x44c] ss:$16 sps:$4 sm:$0xff]  }
 0x480   :  { %v15985_v28 = vpop.f32.mrf.mxu0  ;;  %v18079_v48 = vld [vmem:[#allocation7 + $0x48c] ss:$16 sps:$4 sm:$0xff]  }
 0x481   :  { %v15986_v59 = vadd.f32 %v15985_v28, %v15984_v3  ;;  %v18059_v3 = vld [vmem:[#allocation7 + $0x428] ss:$16 sps:$4 sm:$0xff]  }
 0x482   :  { %v15987_v54 = vpop.f32.mrf.mxu0  ;;  %v18071_v28 = vld [vmem:[#allocation7 + $0x468] ss:$16 sps:$4 sm:$0xff]  }
 0x483   :  { %v2350_v57 = vadd.f32 %v15986_v59, %v15922_v31  ;;  %v18077_v31 = vld [vmem:[#allocation7 + $0x488] ss:$16 sps:$4 sm:$0xff]   ;;  %v18085_v59 = vld [vmem:[#allocation7 + $0x4ac] ss:$16 sps:$4 sm:$0xff]  }
 0x484   :  { %v15988_v1 = vpop.f32.mrf.mxu0 }
 0x485   :  { %v2367_v35 = vpack.c.bf16 %v2350_v57, %v2347_v23  ;;  %v15989_v38 = vadd.f32 %v15988_v1, %v15987_v54  ;;  %v18091_v54 = vld [vmem:[#allocation7 + $0x4cc] ss:$16 sps:$4 sm:$0xff]   ;;  %v18089_v23 = vld [vmem:[#allocation7 + $0x4c8] ss:$16 sps:$4 sm:$0xff]  }
 0x486   :  { %v15990_v6 = vpop.f32.mrf.mxu0  ;;  %v18097_v57 = vld [vmem:[#allocation7 + $0x4ec] ss:$16 sps:$4 sm:$0xff]   ;;  %v18095_v1 = vld [vmem:[#allocation7 + $0x4e8] ss:$16 sps:$4 sm:$0xff]  }
 0x487   :  { %17078 = vmatprep.mubr.msk.bf16.mxu1 %vm1187_vm1, %v2367_v35  ;;  %v2355_v9 = vadd.f32 %v15989_v38, %v15925_v12  ;;  %v2907_v35 = vld [vmem:[#allocation8 + $0x8] sm:$0x3]  ;;  %v18100_v12 = vld [vmem:[#allocation7 + $0x504] ss:$16 sps:$4 sm:$0xff]  }
 0x488   :  { %v15991_v11 = vpop.f32.mrf.mxu0  ;;  %17822 = vmatprep.subr.msk.bf16.mxu0 %vm1212_vm0, %v2907_v35  ;;  %v2933_v19 = vsel %vm1212_vm0, %v2907_v35, 0  ;;  %v18116_v35 = vld [vmem:[#allocation7 + $0x560] ss:$16 sps:$4 sm:$0xff]  }
 0x489   :  { %v15992_v47 = vadd.f32 %v15991_v11, %v15990_v6  ;;  %17083 = vmatpush3.bf16.msra.mxu0 %v2933_v19  ;;  %v18098_v11 = vld [vmem:[#allocation7 + $0x500] ss:$16 sps:$4 sm:$0xff]   ;;  %v18118_v19 = vld [vmem:[#allocation7 + $0x564] ss:$16 sps:$4 sm:$0xff]  }
 0x48a   :  { %16203 = vmatprep.subr.bf16.mxu0 %v21640_v14  ;;  %v20031_v6 = vpop.f32.mrf.mxu0 }
 0x48b   :  { %v2358_v40 = vadd.f32 %v15992_v47, %v15928_v61 }
 0x48c   :  { %v20033_v38 = vpop.f32.mrf.mxu0 }
 0x48d   :  { %v2368_v0 = vpack.c.bf16 %v2358_v40, %v2355_v9 }
 0x48e   :  { %v20035_v47 = vpop.f32.mrf.mxu0 }
 0x48f   :  { %17079 = vmatmul.mubr.msk.bf16.gmra.mxu1 %vm1187_vm1, %v2368_v0 }
 0x490   :  { %2833 = vmatprep.mubr.bf16.mxu1 %v18055_v37 }
 0x497   :  { %2834 = vmatmul.mubr.bf16.vlgmr.msra.gmra.mxu1 %v18053_v15  ;;  %v20043_v15 = vpop.f32.mrf.mxu0 }
 0x498   :  { %2841 = vmatprep.mubr.bf16.mxu1 %v18061_v32  ;;  %16140 = vmatpush3.bf16.msra.mxu1 %v19184_v8 }
 0x499   :  { %16141 = vmatprep.subr.bf16.mxu1 %v19209_v16 }
 0x49c   :  { %16142 = vmatpush3.bf16.msra.mxu1 %v19223_v21 }
 0x49d   :  { %16143 = vmatprep.subr.bf16.mxu1 %v19238_v26 }
 0x49f   :  { %2842 = vmatmul.mubr.bf16.gmra.mxu1 %v18059_v3  ;;  %v18104_v3 = vld [vmem:[#allocation7 + $0x520] ss:$16 sps:$4 sm:$0xff]  }
 0x4a0   :  { %2849 = vmatprep.mubr.bf16.mxu1 %v18067_v51  ;;  %16144 = vmatpush3.bf16.msra.mxu1 %v21625_v13  ;;  %v18106_v51 = vld [vmem:[#allocation7 + $0x524] ss:$16 sps:$4 sm:$0xff]  }
 0x4a1   :  { %16145 = vmatprep.subr.bf16.mxu1 %v21626_v62 }
 0x4a4   :  { %16146 = vmatpush3.bf16.msra.mxu1 %v21627_v33 }
 0x4a5   :  { %16147 = vmatprep.subr.bf16.mxu1 %v21630_v56 }
 0x4a7   :  { %2850 = vmatmul.mubr.bf16.gmra.mxu1 %v18065_v53  ;;  %v20048_v53 = vpop.f32.mrf.mxu0 }
 0x4a8   :  { %2857 = vmatprep.mubr.bf16.mxu1 %v18073_v17  ;;  %16148 = vmatpush3.bf16.msra.mxu1 %v21633_v49 }
 0x4a9   :  { %16149 = vmatprep.subr.bf16.mxu1 %v21634_v63  ;;  %v20050_v17 = vpop.f32.mrf.mxu0 }
 0x4ac   :  { %16150 = vmatpush3.bf16.msra.mxu1 %v21635_v4 }
 0x4ad   :  { %16151 = vmatprep.subr.bf16.mxu1 %v21636_v55 }
 0x4af   :  { %2858 = vmatmul.mubr.bf16.gmra.mxu1 %v18071_v28  ;;  %v18112_v28 = vld [vmem:[#allocation7 + $0x544] ss:$16 sps:$4 sm:$0xff]  }
 0x4b0   :  { %2865 = vmatprep.mubr.bf16.mxu1 %v18079_v48  ;;  %16152 = vmatpush3.bf16.msra.mxu1 %v21637_v58 }
 0x4b1   :  { %16153 = vmatprep.subr.bf16.mxu1 %v21638_v5 }
 0x4b4   :  { %16154 = vmatpush3.bf16.msra.mxu1 %v21639_v41 }
 0x4b7   :  { %2866 = vmatmul.mubr.bf16.gmra.mxu1 %v18077_v31  ;;  %v20054_v31 = vpop.f32.mrf.mxu0 }
 0x4b8   :  { %2873 = vmatprep.mubr.bf16.mxu1 %v18085_v59 }
 0x4bf   :  { %2874 = vmatmul.mubr.bf16.gmra.mxu1 %v18083_v45 }
 0x4c0   :  { %2881 = vmatprep.mubr.bf16.mxu1 %v18091_v54 }
 0x4c7   :  { %2882 = vmatmul.mubr.bf16.gmra.mxu1 %v18089_v23  ;;  %v20062_v23 = vpop.f32.mrf.mxu0 }
 0x4c8   :  { %2889 = vmatprep.mubr.bf16.mxu1 %v18097_v57  ;;  %v21712_v57 = vld [vmem:[#allocation49_spill] sm:$0xff] }
 0x4cf   :  { %2890 = vmatmul.mubr.bf16.gmra.mxu1 %v18095_v1 }
 0x4d0   :  { %3273 = vmatprep.mubr.bf16.mxu1 %v18100_v12 }
 0x4d7   :  { %3274 = vmatmul.mubr.bf16.vlgmr.msra.gmra.mxu1 %v18098_v11  ;;  %v20067_v11 = vpop.f32.mrf.mxu0 }
 0x4d8   :  { %3281 = vmatprep.mubr.bf16.mxu1 %v18106_v51 }
 0x4d9   :  { %v20069_v12 = vpop.f32.mrf.mxu0 }
 0x4df   :  { %3282 = vmatmul.mubr.bf16.gmra.mxu1 %v18104_v3  ;;  %v21715_v3 = vld [vmem:[#allocation51_spill] sm:$0xff] }
 0x4e0   :  { %3289 = vmatprep.mubr.bf16.mxu1 %v18112_v28  ;;  %v21717_v28 = vld [vmem:[#allocation53_spill] sm:$0xff] }
 0x51f   :  { %v17068_v61 = vpop.f32.mrf.mxu1 }
 0x520   :  { %v20038_v9 = vadd.f32 %v17068_v61, %v19889_v25  ;;  %v18110_v25 = vld [vmem:[#allocation7 + $0x540] ss:$16 sps:$4 sm:$0xff]   ;;  %v18124_v61 = vld [vmem:[#allocation7 + $0x584] ss:$16 sps:$4 sm:$0xff]  }
 0x521   :  { %v2432_v40 = vpop.f32.mrf.mxu1  ;;  %3290 = vmatmul.mubr.bf16.gmra.mxu1 %v18110_v25 }
 0x522   :  { %21706 = vst [vmem:[#allocation66_spill] sm:$0xff] %v20038_v9  ;;  %v20041_v37 = vadd.f32 %v2432_v40, %v19893_v36  ;;  %3297 = vmatprep.mubr.bf16.mxu1 %v18118_v19  ;;  %v18128_v19 = vld [vmem:[#allocation7 + $0x5a0] ss:$16 sps:$4 sm:$0xff]  }
 0x523   :  { %v17069_v0 = vpop.f32.mrf.mxu1 }
 0x524   :  { %21707 = vst [vmem:[#allocation56_spill] sm:$0xff] %v20041_v37  ;;  %v20046_v32 = vadd.f32 %v17069_v0, %v19897_v20  ;;  %v20073_v0 = vpop.f32.mrf.mxu0 }
 0x525   :  { %v20052_v48 = vpop.f32.mrf.mxu1 }
 0x526   :  { %21708 = vst [vmem:[#allocation80_spill] sm:$0xff] %v20046_v32  ;;  %21709 = vst [vmem:[#allocation79_spill] sm:$0xff] %v20052_v48  ;;  %v18130_v48 = vld [vmem:[#allocation7 + $0x5a4] ss:$16 sps:$4 sm:$0xff]  }
 0x527   :  { %v18142_v32 = vld [vmem:[#allocation7 + $0x5e4] ss:$16 sps:$4 sm:$0xff]  }
 0x529   :  { %3298 = vmatmul.mubr.bf16.gmra.mxu1 %v18116_v35 }
 0x52a   :  { %3305 = vmatprep.mubr.bf16.mxu1 %v18124_v61 }
 0x52f   :  { %v17072_v36 = vpop.f32.mrf.mxu1 }
 0x530   :  { %v20057_v20 = vadd.f32 %v17072_v36, %v19911_v42  ;;  %v18122_v42 = vld [vmem:[#allocation7 + $0x580] ss:$16 sps:$4 sm:$0xff]  }
 0x531   :  { %v2448_v59 = vpop.f32.mrf.mxu1  ;;  %3306 = vmatmul.mubr.bf16.gmra.mxu1 %v18122_v42 }
 0x532   :  { %21710 = vst [vmem:[#allocation81_spill] sm:$0xff] %v20057_v20  ;;  %v20060_v45 = vadd.f32 %v2448_v59, %v19915_v46  ;;  %3313 = vmatprep.mubr.bf16.mxu1 %v18130_v48  ;;  %v18140_v20 = vld [vmem:[#allocation7 + $0x5e0] ss:$16 sps:$4 sm:$0xff]  }
 0x533   :  { %v17073_v54 = vpop.f32.mrf.mxu1 }
 0x534   :  { %21711 = vst [vmem:[#allocation58_spill] sm:$0xff] %v20060_v45  ;;  %v20065_v1 = vadd.f32 %v17073_v54, %v21712_v57  ;;  %v20081_v54 = vpop.f32.mrf.mxu0  ;;  %v21719_v57 = vld [vmem:[#allocation55_spill] sm:$0xff] }
 0x535   :  { %v20071_v40 = vpop.f32.mrf.mxu1 }
 0x536   :  { %21713 = vst [vmem:[#allocation82_spill] sm:$0xff] %v20065_v1  ;;  %21714 = vst [vmem:[#allocation75_spill] sm:$0xff] %v20071_v40  ;;  %v20086_v61 = vpop.f32.mrf.mxu0  ;;  %v21726_v1 = vld [vmem:[#allocation64_spill] sm:$0xff] }
 0x538   :  { %v20088_v42 = vpop.f32.mrf.mxu0 }
 0x539   :  { %3314 = vmatmul.mubr.bf16.gmra.mxu1 %v18128_v19 }
 0x53f   :  { %v17076_v46 = vpop.f32.mrf.mxu1 }
 0x540   :  { %v20076_v51 = vadd.f32 %v17076_v46, %v21715_v3  ;;  %v18134_v46 = vld [vmem:[#allocation7 + $0x5c0] ss:$16 sps:$4 sm:$0xff]   ;;  %v18136_v3 = vld [vmem:[#allocation7 + $0x5c4] ss:$16 sps:$4 sm:$0xff]  }
 0x541   :  { %v2464_v25 = vpop.f32.mrf.mxu1  ;;  %3321 = vmatprep.mubr.bf16.mxu1 %v18136_v3 }
 0x542   :  { %21716 = vst [vmem:[#allocation59_spill] sm:$0xff] %v20076_v51  ;;  %v20079_v36 = vadd.f32 %v2464_v25, %v21717_v28  ;;  %v20092_v28 = vpop.f32.mrf.mxu0  ;;  %3322 = vmatmul.mubr.bf16.gmra.mxu1 %v18134_v46 }
 0x543   :  { %v17077_v59 = vpop.f32.mrf.mxu1  ;;  %3329 = vmatprep.mubr.bf16.mxu1 %v18142_v32 }
 0x544   :  { %21718 = vst [vmem:[#allocation61_spill] sm:$0xff] %v20079_v36  ;;  %v20084_v35 = vadd.f32 %v17077_v59, %v21719_v57  ;;  %v21722_v36 = vld [vmem:[#allocation63_spill] sm:$0xff]  ;;  %v16040_v19 = vpop.f32.mrf.mxu0 }
 0x545   :  { %v20090_v40 = vpop.f32.mrf.mxu1 }
 0x546   :  { %21720 = vst [vmem:[#allocation65_spill] sm:$0xff] %v20084_v35  ;;  %21721 = vst [vmem:[#allocation67_spill] sm:$0xff] %v20090_v40  ;;  %v21724_v35 = vld [vmem:[#allocation52_spill] sm:$0xff]  ;;  %v20105_v37 = vpop.f32.mrf.mxu0 }
 0x54a   :  { %3330 = vmatmul.mubr.bf16.gmra.mxu1 %v18140_v20 }
 0x54f   :  { %v17080_v25 = vpop.f32.mrf.mxu1 }
 0x550   :  { %v20095_v59 = vadd.f32 %v17080_v25, %v21722_v36  ;;  %v20107_v25 = vpop.f32.mrf.mxu0 }
 0x551   :  { %v2480_v57 = vpop.f32.mrf.mxu1 }
 0x552   :  { %21723 = vst [vmem:[#allocation69_spill] sm:$0xff] %v20095_v59  ;;  %v20098_v48 = vadd.f32 %v2480_v57, %v21724_v35 }
 0x553   :  { %v17081_v51 = vpop.f32.mrf.mxu1 }
 0x554   :  { %21725 = vst [vmem:[#allocation71_spill] sm:$0xff] %v20098_v48  ;;  %v20101_v45 = vadd.f32 %v17081_v51, %v21726_v1  ;;  %v16020_v48 = vadd.f32 %v20033_v38, %v20031_v6  ;;  %v16023_v1 = vadd.f32 %v20043_v15, %v20035_v47  ;;  %v16029_v6 = vadd.f32 %v20062_v23, %v20054_v31 }
 0x555   :  { %v20103_v40 = vpop.f32.mrf.mxu1 }
 0x556   :  { %21727 = vst [vmem:[#allocation73_spill] sm:$0xff] %v20101_v45  ;;  %21728 = vst [vmem:[#allocation46_spill] sm:$0xff] %v20103_v40  ;;  %v16045_v40 = vpop.f32.mrf.mxu0 }
 0x557   :  { %v16082_v3 = vpop.f32.mrf.mxu1 }
 0x558   :  { %v16046_v41 = vpop.f32.mrf.mxu0 }
 0x559   :  { %v16083_v36 = vpop.f32.mrf.mxu1 }
 0x55a   :  { %v16084_v35 = vadd.f32 %v16083_v36, %v16082_v3  ;;  %v16026_v36 = vadd.f32 %v20050_v17, %v20048_v53  ;;  %v20118_v15 = vpop.f32.mrf.mxu0  ;;  %v16032_v53 = vadd.f32 %v20069_v12, %v20067_v11  ;;  %v16035_v17 = vadd.f32 %v20081_v54, %v20073_v0 }
 0x55b   :  { %v16085_v46 = vpop.f32.mrf.mxu1  ;;  %v16038_v12 = vadd.f32 %v20088_v42, %v20086_v61  ;;  %v16041_v0 = vadd.f32 %v16040_v19, %v20092_v28  ;;  %v16044_v42 = vadd.f32 %v20107_v25, %v20105_v37  ;;  %v16047_v28 = vadd.f32 %v16046_v41, %v16045_v40 }
 0x55c   :  { %v2836_v32 = vadd.f32 %v16084_v35, %v16020_v48 }
 0x55d   :  { %v16086_v57 = vpop.f32.mrf.mxu1 }
 0x55e   :  { %v16087_v51 = vadd.f32 %v16086_v57, %v16085_v46 }
 0x55f   :  { %v16088_v45 = vpop.f32.mrf.mxu1 }
 0x560   :  { %v2839_v59 = vadd.f32 %v16087_v51, %v16023_v1  ;;  %v16049_v1 = vpop.f32.mrf.mxu0 }
 0x561   :  { %v16089_v9 = vpop.f32.mrf.mxu1  ;;  %v16050_v41 = vadd.f32 %v16049_v1, %v20118_v15 }
 0x562   :  { %v2898_v14 = vpack.c.bf16 %v2839_v59, %v2836_v32  ;;  %v16090_v5 = vadd.f32 %v16089_v9, %v16088_v45  ;;  %v16051_v45 = vpop.f32.mrf.mxu0 }
 0x563   :  { %v16091_v20 = vpop.f32.mrf.mxu1 }
 0x564   :  { %17084 = vmatprep.mubr.msk.bf16.mxu0 %vm1187_vm1, %v2898_v14  ;;  %v2844_v48 = vadd.f32 %v16090_v5, %v16026_v36  ;;  %v16052_v36 = vpop.f32.mrf.mxu0 }
 0x565   :  { %v16092_v3 = vpop.f32.mrf.mxu1  ;;  %v16053_v40 = vadd.f32 %v16052_v36, %v16051_v45 }
 0x566   :  { %v16093_v38 = vadd.f32 %v16092_v3, %v16091_v20 }
 0x567   :  { %v16094_v47 = vpop.f32.mrf.mxu1 }
 0x568   :  { %v2847_v46 = vadd.f32 %v16093_v38, %v16029_v6 }
 0x569   :  { %v16095_v35 = vpop.f32.mrf.mxu1 }
 0x56a   :  { %v2899_v59 = vpack.c.bf16 %v2847_v46, %v2844_v48  ;;  %v16096_v9 = vadd.f32 %v16095_v35, %v16094_v47  ;;  %v16054_v47 = vpop.f32.mrf.mxu0 }
 0x56b   :  { %v16097_v57 = vpop.f32.mrf.mxu1 }
 0x56c   :  { %17085 = vmatmul.mubr.msk.bf16.vlgmr.msra.gmra.mxu0 %vm1187_vm1, %v2899_v59  ;;  %v2852_v23 = vadd.f32 %v16096_v9, %v16032_v53  ;;  %v16055_v9 = vpop.f32.mrf.mxu0 }
 0x56d   :  { %v16098_v14 = vpop.f32.mrf.mxu1  ;;  %16204 = vmatpush3.bf16.msra.mxu0 %v21660_v34  ;;  %v16056_v1 = vadd.f32 %v16055_v9, %v16054_v47  ;;  %v18103_v47 = vld [vmem:[#allocation7 + $0x50c] ss:$16 sps:$4 sm:$0xff]  }
 0x56e   :  { %v16099_v31 = vadd.f32 %v16098_v14, %v16097_v57  ;;  %16205 = vmatprep.subr.bf16.mxu0 %v21661_v39 }
 0x56f   :  { %v16100_v5 = vpop.f32.mrf.mxu1 }
 0x570   :  { %v2855_v51 = vadd.f32 %v16099_v31, %v16035_v17  ;;  %v16057_v17 = vpop.f32.mrf.mxu0 }
 0x571   :  { %v16101_v32 = vpop.f32.mrf.mxu1  ;;  %16206 = vmatpush3.bf16.msra.mxu0 %v21662_v52 }
 0x572   :  { %v2900_v20 = vpack.c.bf16 %v2855_v51, %v2852_v23  ;;  %16207 = vmatprep.subr.bf16.mxu0 %v21663_v43  ;;  %v16102_v6 = vadd.f32 %v16101_v32, %v16100_v5 }
 0x573   :  { %v16103_v3 = vpop.f32.mrf.mxu1 }
 0x574   :  { %17088 = vmatprep.mubr.msk.bf16.mxu0 %vm1187_vm1, %v2900_v20  ;;  %v2860_v48 = vadd.f32 %v16102_v6, %v16038_v12  ;;  %v16058_v20 = vpop.f32.mrf.mxu0 }
 0x575   :  { %v16104_v11 = vpop.f32.mrf.mxu1  ;;  %16208 = vmatpush3.bf16.msra.mxu0 %v21664_v30  ;;  %v16059_v45 = vadd.f32 %v16058_v20, %v16057_v17  ;;  %v18101_v17 = vld [vmem:[#allocation7 + $0x508] ss:$16 sps:$4 sm:$0xff]   ;;  %v18109_v20 = vld [vmem:[#allocation7 + $0x52c] ss:$16 sps:$4 sm:$0xff]  }
 0x576   :  { %v16105_v54 = vadd.f32 %v16104_v11, %v16103_v3  ;;  %16209 = vmatprep.subr.bf16.mxu0 %v21665_v7  ;;  %v16060_v11 = vpop.f32.mrf.mxu0 }
 0x577   :  { %v16106_v38 = vpop.f32.mrf.mxu1 }
 0x578   :  { %v2863_v46 = vadd.f32 %v16105_v54, %v16041_v0 }
 0x579   :  { %v16107_v35 = vpop.f32.mrf.mxu1  ;;  %16210 = vmatpush3.bf16.msra.mxu0 %v21666_v2 }
 0x57a   :  { %v2901_v59 = vpack.c.bf16 %v2863_v46, %v2860_v48  ;;  %16211 = vmatprep.subr.bf16.mxu0 %v21698_v29  ;;  %v16108_v14 = vadd.f32 %v16107_v35, %v16106_v38  ;;  %v16061_v48 = vpop.f32.mrf.mxu0 }
 0x57b   :  { %v16109_v57 = vpop.f32.mrf.mxu1 }
 0x57c   :  { %17089 = vmatmul.mubr.msk.bf16.gmra.mxu0 %vm1187_vm1, %v2901_v59  ;;  %v2868_v31 = vadd.f32 %v16108_v14, %v16044_v42  ;;  %v16063_v59 = vpop.f32.mrf.mxu0 }
 0x57d   :  { %v16110_v61 = vpop.f32.mrf.mxu1  ;;  %16212 = vmatpush3.bf16.msra.mxu0 %v21699_v44 }
 0x57e   :  { %v16111_v19 = vadd.f32 %v16110_v61, %v16109_v57  ;;  %16213 = vmatprep.subr.bf16.mxu0 %v21669_v27 }
 0x57f   :  { %v16112_v53 = vpop.f32.mrf.mxu1 }
 0x580   :  { %v2871_v5 = vadd.f32 %v16111_v19, %v16047_v28  ;;  %v16064_v19 = vpop.f32.mrf.mxu0 }
 0x581   :  { %v16113_v23 = vpop.f32.mrf.mxu1  ;;  %16214 = vmatpush3.bf16.msra.mxu0 %v21700_v60 }
 0x582   :  { %v2902_v51 = vpack.c.bf16 %v2871_v5, %v2868_v31  ;;  %16215 = vmatprep.subr.bf16.mxu0 %v21701_v10  ;;  %v16114_v3 = vadd.f32 %v16113_v23, %v16112_v53  ;;  %v16062_v23 = vadd.f32 %v16061_v48, %v16060_v11  ;;  %v18119_v11 = vld [vmem:[#allocation7 + $0x568] ss:$16 sps:$4 sm:$0xff]   ;;  %v21730_v48 = vld [vmem:[#allocation72_spill] sm:$0xff] }
 0x583   :  { %v16115_v32 = vpop.f32.mrf.mxu1 }
 0x584   :  { %17092 = vmatprep.mubr.msk.bf16.mxu0 %vm1187_vm1, %v2902_v51  ;;  %v2876_v12 = vadd.f32 %v16114_v3, %v16050_v41  ;;  %v16065_v51 = vadd.f32 %v16064_v19, %v16063_v59  ;;  %v18107_v41 = vld [vmem:[#allocation7 + $0x528] ss:$16 sps:$4 sm:$0xff]  }
 0x585   :  { %v16116_v37 = vpop.f32.mrf.mxu1  ;;  %16216 = vmatpush3.bf16.msra.mxu0 %v21702_v22 }
 0x586   :  { %v16117_v25 = vadd.f32 %v16116_v37, %v16115_v32  ;;  %16217 = vmatprep.subr.bf16.mxu0 %v21703_v50 }
 0x587   :  { %v16118_v6 = vpop.f32.mrf.mxu1 }
 0x588   :  { %v2879_v0 = vadd.f32 %v16117_v25, %v16053_v40  ;;  %v18115_v40 = vld [vmem:[#allocation7 + $0x54c] ss:$16 sps:$4 sm:$0xff]   ;;  %v18113_v25 = vld [vmem:[#allocation7 + $0x548] ss:$16 sps:$4 sm:$0xff]  }
 0x589   :  { %v16119_v54 = vpop.f32.mrf.mxu1  ;;  %16218 = vmatpush3.bf16.msra.mxu0 %v21704_v18 }
 0x58a   :  { %v2903_v38 = vpack.c.bf16 %v2879_v0, %v2876_v12  ;;  %16276 = vmatprep.subr.bf16.mxu0 %v21705_v24  ;;  %v16120_v35 = vadd.f32 %v16119_v54, %v16118_v6  ;;  %v18121_v6 = vld [vmem:[#allocation7 + $0x56c] ss:$16 sps:$4 sm:$0xff]   ;;  %v21729_v0 = vld [vmem:[#allocation70_spill] sm:$0xff]  ;;  %v18125_v54 = vld [vmem:[#allocation7 + $0x588] ss:$16 sps:$4 sm:$0xff]  }
 0x58b   :  { %v16121_v46 = vpop.f32.mrf.mxu1  ;;  %v18127_v12 = vld [vmem:[#allocation7 + $0x58c] ss:$16 sps:$4 sm:$0xff]  }
 0x58c   :  { %17093 = vmatmul.mubr.msk.bf16.gmra.mxu0 %vm1187_vm1, %v2903_v38  ;;  %v2884_v14 = vadd.f32 %v16120_v35, %v16056_v1  ;;  %v18133_v38 = vld [vmem:[#allocation7 + $0x5ac] ss:$16 sps:$4 sm:$0xff]  }
 0x58d   :  { %v16122_v15 = vpop.f32.mrf.mxu1  ;;  %v18139_v35 = vld [vmem:[#allocation7 + $0x5cc] ss:$16 sps:$4 sm:$0xff]  }
 0x58e   :  { %v16123_v36 = vadd.f32 %v16122_v15, %v16121_v46  ;;  %v18131_v46 = vld [vmem:[#allocation7 + $0x5a8] ss:$16 sps:$4 sm:$0xff]   ;;  %v18145_v1 = vld [vmem:[#allocation7 + $0x5ec] ss:$16 sps:$4 sm:$0xff]  }
 0x58f   :  { %v16124_v57 = vpop.f32.mrf.mxu1  ;;  %v18137_v15 = vld [vmem:[#allocation7 + $0x5c8] ss:$16 sps:$4 sm:$0xff]  }
 0x590   :  { %v2887_v61 = vadd.f32 %v16123_v36, %v16059_v45  ;;  %v18143_v45 = vld [vmem:[#allocation7 + $0x5e8] ss:$16 sps:$4 sm:$0xff]  }
 0x591   :  { %v16125_v42 = vpop.f32.mrf.mxu1  ;;  %v3444_v36 = vld [vmem:[#allocation8 + $0xa] sm:$0x3] }
 0x592   :  { %v2904_v28 = vpack.c.bf16 %v2887_v61, %v2884_v14  ;;  %v16126_v31 = vadd.f32 %v16125_v42, %v16124_v57  ;;  %17823 = vmatprep.subr.msk.bf16.mxu1 %vm1212_vm0, %v3444_v36  ;;  %v3470_v59 = vsel %vm1212_vm0, %v3444_v36, 0  ;;  %v21731_v57 = vld [vmem:[#allocation47_spill] sm:$0xff]  ;;  %v18146_v42 = vld [vmem:[#allocation7 + $0x600] ss:$16 sps:$4 sm:$0xff]  }
 0x593   :  { %v16127_v53 = vpop.f32.mrf.mxu1  ;;  %17101 = vmatpush3.bf16.msra.mxu1 %v3470_v59  ;;  %v21743_v59 = vld [vmem:[#allocation82_spill] sm:$0xff] }
 0x594   :  { %17096 = vmatprep.mubr.msk.bf16.mxu0 %vm1187_vm1, %v2904_v28  ;;  %v2892_v3 = vadd.f32 %v16126_v31, %v16062_v23  ;;  %16340 = vmatprep.subr.bf16.mxu1 %v21731_v57  ;;  %v18148_v28 = vld [vmem:[#allocation7 + $0x604] ss:$16 sps:$4 sm:$0xff]  }
 0x595   :  { %v16128_v5 = vpop.f32.mrf.mxu1  ;;  %v21732_v31 = vld [vmem:[#allocation66_spill] sm:$0xff] }
 0x596   :  { %v16129_v32 = vadd.f32 %v16128_v5, %v16127_v53 }
 0x597   :  { %v20171_v14 = vpop.f32.mrf.mxu1 }
 0x598   :  { %v2895_v37 = vadd.f32 %v16129_v32, %v16065_v51  ;;  %v21734_v51 = vld [vmem:[#allocation56_spill] sm:$0xff] }
 0x599   :  { %v20173_v61 = vpop.f32.mrf.mxu1 }
 0x59a   :  { %v2905_v9 = vpack.c.bf16 %v2895_v37, %v2892_v3 }
 0x59b   :  { %v20175_v53 = vpop.f32.mrf.mxu1 }
 0x59c   :  { %17097 = vmatmul.mubr.msk.bf16.gmra.mxu0 %vm1187_vm1, %v2905_v9 }
 0x59d   :  { %3370 = vmatprep.mubr.bf16.mxu0 %v18103_v47  ;;  %v20183_v37 = vpop.f32.mrf.mxu1  ;;  %v21736_v47 = vld [vmem:[#allocation80_spill] sm:$0xff] }
 0x5a4   :  { %3371 = vmatmul.mubr.bf16.vlgmr.msra.gmra.mxu0 %v18101_v17  ;;  %v18152_v17 = vld [vmem:[#allocation7 + $0x620] ss:$16 sps:$4 sm:$0xff]  }
 0x5a5   :  { %3378 = vmatprep.mubr.bf16.mxu0 %v18109_v20  ;;  %16277 = vmatpush3.bf16.msra.mxu0 %v19184_v8  ;;  %v18154_v20 = vld [vmem:[#allocation7 + $0x624] ss:$16 sps:$4 sm:$0xff]  }
 0x5a6   :  { %16278 = vmatprep.subr.bf16.mxu0 %v19209_v16 }
 0x5a9   :  { %16279 = vmatpush3.bf16.msra.mxu0 %v19223_v21 }
 0x5aa   :  { %16280 = vmatprep.subr.bf16.mxu0 %v19238_v26 }
 0x5ac   :  { %3379 = vmatmul.mubr.bf16.gmra.mxu0 %v18107_v41  ;;  %v20188_v41 = vpop.f32.mrf.mxu1 }
 0x5ad   :  { %3386 = vmatprep.mubr.bf16.mxu0 %v18115_v40  ;;  %16281 = vmatpush3.bf16.msra.mxu0 %v21625_v13 }
 0x5ae   :  { %16282 = vmatprep.subr.bf16.mxu0 %v21626_v62  ;;  %v20190_v40 = vpop.f32.mrf.mxu1 }
 0x5b1   :  { %16283 = vmatpush3.bf16.msra.mxu0 %v21627_v33 }
 0x5b2   :  { %16284 = vmatprep.subr.bf16.mxu0 %v21630_v56 }
 0x5b4   :  { %3387 = vmatmul.mubr.bf16.gmra.mxu0 %v18113_v25  ;;  %v18158_v25 = vld [vmem:[#allocation7 + $0x640] ss:$16 sps:$4 sm:$0xff]  }
 0x5b5   :  { %3394 = vmatprep.mubr.bf16.mxu0 %v18121_v6  ;;  %16285 = vmatpush3.bf16.msra.mxu0 %v21633_v49  ;;  %v18160_v6 = vld [vmem:[#allocation7 + $0x644] ss:$16 sps:$4 sm:$0xff]  }
 0x5b6   :  { %16286 = vmatprep.subr.bf16.mxu0 %v21634_v63 }
 0x5b9   :  { %16287 = vmatpush3.bf16.msra.mxu0 %v21635_v4 }
 0x5ba   :  { %16288 = vmatprep.subr.bf16.mxu0 %v21636_v55 }
 0x5bc   :  { %3395 = vmatmul.mubr.bf16.gmra.mxu0 %v18119_v11 }
 0x5bd   :  { %3402 = vmatprep.mubr.bf16.mxu0 %v18127_v12  ;;  %16289 = vmatpush3.bf16.msra.mxu0 %v21637_v58 }
 0x5be   :  { %16290 = vmatprep.subr.bf16.mxu0 %v21729_v0 }
 0x5c1   :  { %16291 = vmatpush3.bf16.msra.mxu0 %v21730_v48 }
 0x5c4   :  { %3403 = vmatmul.mubr.bf16.gmra.mxu0 %v18125_v54  ;;  %v20194_v54 = vpop.f32.mrf.mxu1 }
 0x5c5   :  { %3410 = vmatprep.mubr.bf16.mxu0 %v18133_v38  ;;  %v21739_v38 = vld [vmem:[#allocation81_spill] sm:$0xff] }
 0x5c6   :  { %v20202_v36 = vpop.f32.mrf.mxu1 }
 0x5cc   :  { %3411 = vmatmul.mubr.bf16.gmra.mxu0 %v18131_v46 }
 0x5cd   :  { %3418 = vmatprep.mubr.bf16.mxu0 %v18139_v35 }
 0x5d4   :  { %3419 = vmatmul.mubr.bf16.gmra.mxu0 %v18137_v15  ;;  %v21741_v15 = vld [vmem:[#allocation58_spill] sm:$0xff] }
 0x5d5   :  { %3426 = vmatprep.mubr.bf16.mxu0 %v18145_v1 }
 0x5dc   :  { %3427 = vmatmul.mubr.bf16.gmra.mxu0 %v18143_v45 }
 0x5dd   :  { %3810 = vmatprep.mubr.bf16.mxu0 %v18148_v28  ;;  %v18164_v28 = vld [vmem:[#allocation7 + $0x660] ss:$16 sps:$4 sm:$0xff]  }
 0x5e4   :  { %3811 = vmatmul.mubr.bf16.vlgmr.msra.gmra.mxu0 %v18146_v42 }
 0x5e5   :  { %3818 = vmatprep.mubr.bf16.mxu0 %v18154_v20 }
 0x5ec   :  { %3819 = vmatmul.mubr.bf16.gmra.mxu0 %v18152_v17 }
 0x5ed   :  { %3826 = vmatprep.mubr.bf16.mxu0 %v18160_v6 }
 0x5f4   :  { %3827 = vmatmul.mubr.bf16.gmra.mxu0 %v18158_v25  ;;  %v21746_v25 = vld [vmem:[#allocation59_spill] sm:$0xff] }
 0x62c   :  { %v17086_v19 = vpop.f32.mrf.mxu0 }
 0x62d   :  { %v20178_v5 = vadd.f32 %v17086_v19, %v21732_v31  ;;  %v18166_v19 = vld [vmem:[#allocation7 + $0x664] ss:$16 sps:$4 sm:$0xff]   ;;  %v20207_v31 = vpop.f32.mrf.mxu1 }
 0x62e   :  { %v2969_v23 = vpop.f32.mrf.mxu0  ;;  %3834 = vmatprep.mubr.bf16.mxu0 %v18166_v19  ;;  %v18176_v19 = vld [vmem:[#allocation7 + $0x6a0] ss:$16 sps:$4 sm:$0xff]  }
 0x62f   :  { %21733 = vst [vmem:[#allocation49_spill] sm:$0xff] %v20178_v5  ;;  %v20181_v32 = vadd.f32 %v2969_v23, %v21734_v51  ;;  %3835 = vmatmul.mubr.bf16.gmra.mxu0 %v18164_v28  ;;  %v20209_v23 = vpop.f32.mrf.mxu1  ;;  %v18170_v51 = vld [vmem:[#allocation7 + $0x680] ss:$16 sps:$4 sm:$0xff]  }
 0x630   :  { %v17087_v3 = vpop.f32.mrf.mxu0 }
 0x631   :  { %21735 = vst [vmem:[#allocation51_spill] sm:$0xff] %v20181_v32  ;;  %v20186_v9 = vadd.f32 %v17087_v3, %v21736_v47  ;;  %v18172_v3 = vld [vmem:[#allocation7 + $0x684] ss:$16 sps:$4 sm:$0xff]   ;;  %v20213_v20 = vpop.f32.mrf.mxu1 }
 0x632   :  { %v20192_v11 = vpop.f32.mrf.mxu0  ;;  %3842 = vmatprep.mubr.bf16.mxu0 %v18172_v3 }
 0x633   :  { %21737 = vst [vmem:[#allocation53_spill] sm:$0xff] %v20186_v9  ;;  %21738 = vst [vmem:[#allocation55_spill] sm:$0xff] %v20192_v11  ;;  %v18178_v11 = vld [vmem:[#allocation7 + $0x6a4] ss:$16 sps:$4 sm:$0xff]  }
 0x634   :  { %v18190_v9 = vld [vmem:[#allocation7 + $0x6e4] ss:$16 sps:$4 sm:$0xff]  }
 0x637   :  { %3843 = vmatmul.mubr.bf16.gmra.mxu0 %v18170_v51 }
 0x638   :  { %3850 = vmatprep.mubr.bf16.mxu0 %v18178_v11 }
 0x63c   :  { %v17090_v12 = vpop.f32.mrf.mxu0 }
 0x63d   :  { %v20197_v46 = vadd.f32 %v17090_v12, %v21739_v38  ;;  %v21748_v38 = vld [vmem:[#allocation61_spill] sm:$0xff] }
 0x63e   :  { %v2985_v35 = vpop.f32.mrf.mxu0 }
 0x63f   :  { %21740 = vst [vmem:[#allocation63_spill] sm:$0xff] %v20197_v46  ;;  %v20200_v1 = vadd.f32 %v2985_v35, %v21741_v15  ;;  %3851 = vmatmul.mubr.bf16.gmra.mxu0 %v18176_v19  ;;  %v18188_v46 = vld [vmem:[#allocation7 + $0x6e0] ss:$16 sps:$4 sm:$0xff]  }
 0x640   :  { %v17091_v45 = vpop.f32.mrf.mxu0 }
 0x641   :  { %21742 = vst [vmem:[#allocation52_spill] sm:$0xff] %v20200_v1  ;;  %v20205_v42 = vadd.f32 %v17091_v45, %v21743_v59  ;;  %v20221_v45 = vpop.f32.mrf.mxu1  ;;  %v21750_v59 = vld [vmem:[#allocation65_spill] sm:$0xff] }
 0x642   :  { %v20211_v47 = vpop.f32.mrf.mxu0 }
 0x643   :  { %21744 = vst [vmem:[#allocation64_spill] sm:$0xff] %v20205_v42  ;;  %21745 = vst [vmem:[#allocation66_spill] sm:$0xff] %v20211_v47  ;;  %v20226_v3 = vpop.f32.mrf.mxu1  ;;  %v21757_v42 = vld [vmem:[#allocation73_spill] sm:$0xff] }
 0x645   :  { %v20228_v51 = vpop.f32.mrf.mxu1 }
 0x64c   :  { %v17094_v17 = vpop.f32.mrf.mxu0 }
 0x64d   :  { %v20216_v6 = vadd.f32 %v17094_v17, %v21746_v25  ;;  %v18182_v17 = vld [vmem:[#allocation7 + $0x6c0] ss:$16 sps:$4 sm:$0xff]   ;;  %v18184_v25 = vld [vmem:[#allocation7 + $0x6c4] ss:$16 sps:$4 sm:$0xff]  }
 0x64e   :  { %v3001_v12 = vpop.f32.mrf.mxu0  ;;  %3858 = vmatprep.mubr.bf16.mxu0 %v18184_v25 }
 0x64f   :  { %21747 = vst [vmem:[#allocation56_spill] sm:$0xff] %v20216_v6  ;;  %v20219_v35 = vadd.f32 %v3001_v12, %v21748_v38  ;;  %v20232_v38 = vpop.f32.mrf.mxu1  ;;  %3859 = vmatmul.mubr.bf16.gmra.mxu0 %v18182_v17 }
 0x650   :  { %v17095_v15 = vpop.f32.mrf.mxu0  ;;  %3866 = vmatprep.mubr.bf16.mxu0 %v18190_v9 }
 0x651   :  { %21749 = vst [vmem:[#allocation80_spill] sm:$0xff] %v20219_v35  ;;  %v20224_v28 = vadd.f32 %v17095_v15, %v21750_v59  ;;  %v21753_v35 = vld [vmem:[#allocation69_spill] sm:$0xff]  ;;  %v16177_v19 = vpop.f32.mrf.mxu1 }
 0x652   :  { %v20230_v47 = vpop.f32.mrf.mxu0 }
 0x653   :  { %21751 = vst [vmem:[#allocation81_spill] sm:$0xff] %v20224_v28  ;;  %21752 = vst [vmem:[#allocation58_spill] sm:$0xff] %v20230_v47  ;;  %v21755_v28 = vld [vmem:[#allocation71_spill] sm:$0xff]  ;;  %v20245_v32 = vpop.f32.mrf.mxu1 }
 0x657   :  { %3867 = vmatmul.mubr.bf16.gmra.mxu0 %v18188_v46 }
 0x65c   :  { %v17098_v12 = vpop.f32.mrf.mxu0 }
 0x65d   :  { %v20235_v15 = vadd.f32 %v17098_v12, %v21753_v35  ;;  %v20247_v12 = vpop.f32.mrf.mxu1 }
 0x65e   :  { %v3017_v59 = vpop.f32.mrf.mxu0 }
 0x65f   :  { %21754 = vst [vmem:[#allocation82_spill] sm:$0xff] %v20235_v15  ;;  %v20238_v11 = vadd.f32 %v3017_v59, %v21755_v28 }
 0x660   :  { %v17099_v6 = vpop.f32.mrf.mxu0 }
 0x661   :  { %21756 = vst [vmem:[#allocation59_spill] sm:$0xff] %v20238_v11  ;;  %v20241_v1 = vadd.f32 %v17099_v6, %v21757_v42  ;;  %v16157_v11 = vadd.f32 %v20173_v61, %v20171_v14  ;;  %v16160_v42 = vadd.f32 %v20183_v37, %v20175_v53  ;;  %v16166_v14 = vadd.f32 %v20202_v36, %v20194_v54 }
 0x662   :  { %v20243_v47 = vpop.f32.mrf.mxu0 }
 0x663   :  { %21758 = vst [vmem:[#allocation61_spill] sm:$0xff] %v20241_v1  ;;  %21759 = vst [vmem:[#allocation65_spill] sm:$0xff] %v20243_v47  ;;  %v16182_v47 = vpop.f32.mrf.mxu1 }
 0x664   :  { %v16219_v25 = vpop.f32.mrf.mxu0 }
 0x665   :  { %v16183_v48 = vpop.f32.mrf.mxu1 }
 0x666   :  { %v16220_v35 = vpop.f32.mrf.mxu0 }
 0x667   :  { %v16221_v28 = vadd.f32 %v16220_v35, %v16219_v25  ;;  %v16163_v35 = vadd.f32 %v20190_v40, %v20188_v41  ;;  %v20258_v37 = vpop.f32.mrf.mxu1  ;;  %v16169_v41 = vadd.f32 %v20209_v23, %v20207_v31  ;;  %v16172_v40 = vadd.f32 %v20221_v45, %v20213_v20 }
 0x668   :  { %v16222_v17 = vpop.f32.mrf.mxu0  ;;  %v16175_v23 = vadd.f32 %v20228_v51, %v20226_v3  ;;  %v16178_v20 = vadd.f32 %v16177_v19, %v20232_v38  ;;  %v16181_v51 = vadd.f32 %v20247_v12, %v20245_v32  ;;  %v16184_v38 = vadd.f32 %v16183_v48, %v16182_v47 }
 0x669   :  { %v3373_v9 = vadd.f32 %v16221_v28, %v16157_v11 }
 0x66a   :  { %v16223_v59 = vpop.f32.mrf.mxu0 }
 0x66b   :  { %v16224_v6 = vadd.f32 %v16223_v59, %v16222_v17 }
 0x66c   :  { %v16225_v1 = vpop.f32.mrf.mxu0 }
 0x66d   :  { %v3376_v15 = vadd.f32 %v16224_v6, %v16160_v42  ;;  %v16186_v42 = vpop.f32.mrf.mxu1 }
 0x66e   :  { %v16226_v5 = vpop.f32.mrf.mxu0  ;;  %v16187_v48 = vadd.f32 %v16186_v42, %v20258_v37 }
 0x66f   :  { %v3435_v57 = vpack.c.bf16 %v3376_v15, %v3373_v9  ;;  %v16227_v0 = vadd.f32 %v16226_v5, %v16225_v1  ;;  %v16188_v1 = vpop.f32.mrf.mxu1 }
 0x670   :  { %v16228_v46 = vpop.f32.mrf.mxu0 }
 0x671   :  { %17102 = vmatprep.mubr.msk.bf16.mxu1 %vm1187_vm1, %v3435_v57  ;;  %v3381_v11 = vadd.f32 %v16227_v0, %v16163_v35  ;;  %v16189_v35 = vpop.f32.mrf.mxu1 }
 0x672   :  { %v16229_v25 = vpop.f32.mrf.mxu0  ;;  %v16190_v47 = vadd.f32 %v16189_v35, %v16188_v1 }
 0x673   :  { %v16230_v61 = vadd.f32 %v16229_v25, %v16228_v46 }
 0x674   :  { %v16231_v53 = vpop.f32.mrf.mxu0 }
 0x675   :  { %v3384_v17 = vadd.f32 %v16230_v61, %v16166_v14 }
 0x676   :  { %v16232_v28 = vpop.f32.mrf.mxu0 }
 0x677   :  { %v3436_v15 = vpack.c.bf16 %v3384_v17, %v3381_v11  ;;  %v16233_v5 = vadd.f32 %v16232_v28, %v16231_v53  ;;  %v16191_v53 = vpop.f32.mrf.mxu1 }
 0x678   :  { %v16234_v59 = vpop.f32.mrf.mxu0 }
 0x679   :  { %17103 = vmatmul.mubr.msk.bf16.vlgmr.msra.gmra.mxu1 %vm1187_vm1, %v3436_v15  ;;  %v3389_v36 = vadd.f32 %v16233_v5, %v16169_v41  ;;  %v16192_v5 = vpop.f32.mrf.mxu1 }
 0x67a   :  { %v16235_v57 = vpop.f32.mrf.mxu0  ;;  %16341 = vmatpush3.bf16.msra.mxu1 %v21660_v34  ;;  %v16193_v42 = vadd.f32 %v16192_v5, %v16191_v53  ;;  %v18151_v53 = vld [vmem:[#allocation7 + $0x60c] ss:$16 sps:$4 sm:$0xff]  }
 0x67b   :  { %v16236_v54 = vadd.f32 %v16235_v57, %v16234_v59  ;;  %16342 = vmatprep.subr.bf16.mxu1 %v21661_v39 }
 0x67c   :  { %v16237_v0 = vpop.f32.mrf.mxu0 }
 0x67d   :  { %v3392_v6 = vadd.f32 %v16236_v54, %v16172_v40  ;;  %v16194_v40 = vpop.f32.mrf.mxu1 }
 0x67e   :  { %v16238_v9 = vpop.f32.mrf.mxu0  ;;  %16343 = vmatpush3.bf16.msra.mxu1 %v21662_v52 }
 0x67f   :  { %v3437_v46 = vpack.c.bf16 %v3392_v6, %v3389_v36  ;;  %16344 = vmatprep.subr.bf16.mxu1 %v21663_v43  ;;  %v16239_v14 = vadd.f32 %v16238_v9, %v16237_v0 }
 0x680   :  { %v16240_v25 = vpop.f32.mrf.mxu0 }
 0x681   :  { %17106 = vmatprep.mubr.msk.bf16.mxu1 %vm1187_vm1, %v3437_v46  ;;  %v3397_v11 = vadd.f32 %v16239_v14, %v16175_v23  ;;  %v16195_v46 = vpop.f32.mrf.mxu1 }
 0x682   :  { %v16241_v31 = vpop.f32.mrf.mxu0  ;;  %16345 = vmatpush3.bf16.msra.mxu1 %v21664_v30  ;;  %v16196_v1 = vadd.f32 %v16195_v46, %v16194_v40  ;;  %v18149_v40 = vld [vmem:[#allocation7 + $0x608] ss:$16 sps:$4 sm:$0xff]   ;;  %v18157_v46 = vld [vmem:[#allocation7 + $0x62c] ss:$16 sps:$4 sm:$0xff]  }
 0x683   :  { %v16242_v45 = vadd.f32 %v16241_v31, %v16240_v25  ;;  %16346 = vmatprep.subr.bf16.mxu1 %v21665_v7  ;;  %v16197_v31 = vpop.f32.mrf.mxu1 }
 0x684   :  { %v16243_v61 = vpop.f32.mrf.mxu0 }
 0x685   :  { %v3400_v17 = vadd.f32 %v16242_v45, %v16178_v20 }
 0x686   :  { %v16244_v28 = vpop.f32.mrf.mxu0  ;;  %16347 = vmatpush3.bf16.msra.mxu1 %v21666_v2 }
 0x687   :  { %v3438_v15 = vpack.c.bf16 %v3400_v17, %v3397_v11  ;;  %16348 = vmatprep.subr.bf16.mxu1 %v21698_v29  ;;  %v16245_v57 = vadd.f32 %v16244_v28, %v16243_v61  ;;  %v16198_v11 = vpop.f32.mrf.mxu1 }
 0x688   :  { %v16246_v59 = vpop.f32.mrf.mxu0 }
 0x689   :  { %17107 = vmatmul.mubr.msk.bf16.gmra.mxu1 %vm1187_vm1, %v3438_v15  ;;  %v3405_v54 = vadd.f32 %v16245_v57, %v16181_v51  ;;  %v16200_v15 = vpop.f32.mrf.mxu1 }
 0x68a   :  { %v16247_v3 = vpop.f32.mrf.mxu0  ;;  %16349 = vmatpush3.bf16.msra.mxu1 %v21699_v44 }
 0x68b   :  { %v16248_v19 = vadd.f32 %v16247_v3, %v16246_v59  ;;  %16350 = vmatprep.subr.bf16.mxu1 %v21669_v27 }
 0x68c   :  { %v16249_v41 = vpop.f32.mrf.mxu0 }
 0x68d   :  { %v3408_v0 = vadd.f32 %v16248_v19, %v16184_v38  ;;  %v16201_v19 = vpop.f32.mrf.mxu1 }
 0x68e   :  { %v16250_v36 = vpop.f32.mrf.mxu0  ;;  %16351 = vmatpush3.bf16.msra.mxu1 %v21700_v60 }
 0x68f   :  { %v3439_v6 = vpack.c.bf16 %v3408_v0, %v3405_v54  ;;  %16352 = vmatprep.subr.bf16.mxu1 %v21701_v10  ;;  %v16251_v25 = vadd.f32 %v16250_v36, %v16249_v41  ;;  %v16199_v36 = vadd.f32 %v16198_v11, %v16197_v31  ;;  %v18167_v31 = vld [vmem:[#allocation7 + $0x668] ss:$16 sps:$4 sm:$0xff]   ;;  %v21761_v11 = vld [vmem:[#allocation72_spill] sm:$0xff] }
 0x690   :  { %v16252_v9 = vpop.f32.mrf.mxu0 }
 0x691   :  { %17110 = vmatprep.mubr.msk.bf16.mxu1 %vm1187_vm1, %v3439_v6  ;;  %v3413_v23 = vadd.f32 %v16251_v25, %v16187_v48  ;;  %v16202_v6 = vadd.f32 %v16201_v19, %v16200_v15  ;;  %v18155_v48 = vld [vmem:[#allocation7 + $0x628] ss:$16 sps:$4 sm:$0xff]  }
 0x692   :  { %v16253_v32 = vpop.f32.mrf.mxu0  ;;  %16353 = vmatpush3.bf16.msra.mxu1 %v21702_v22 }
 0x693   :  { %v16254_v12 = vadd.f32 %v16253_v32, %v16252_v9  ;;  %16354 = vmatprep.subr.bf16.mxu1 %v21703_v50 }
 0x694   :  { %v16255_v14 = vpop.f32.mrf.mxu0 }
 0x695   :  { %v3416_v20 = vadd.f32 %v16254_v12, %v16190_v47  ;;  %v18163_v47 = vld [vmem:[#allocation7 + $0x64c] ss:$16 sps:$4 sm:$0xff]   ;;  %v18161_v12 = vld [vmem:[#allocation7 + $0x648] ss:$16 sps:$4 sm:$0xff]  }
 0x696   :  { %v16256_v45 = vpop.f32.mrf.mxu0  ;;  %16355 = vmatpush3.bf16.msra.mxu1 %v21704_v18 }
 0x697   :  { %v3440_v61 = vpack.c.bf16 %v3416_v20, %v3413_v23  ;;  %16413 = vmatprep.subr.bf16.mxu1 %v21705_v24  ;;  %v16257_v28 = vadd.f32 %v16256_v45, %v16255_v14  ;;  %v18169_v14 = vld [vmem:[#allocation7 + $0x66c] ss:$16 sps:$4 sm:$0xff]   ;;  %v21760_v20 = vld [vmem:[#allocation70_spill] sm:$0xff]  ;;  %v18173_v45 = vld [vmem:[#allocation7 + $0x688] ss:$16 sps:$4 sm:$0xff]  }
 0x698   :  { %v16258_v17 = vpop.f32.mrf.mxu0  ;;  %v18175_v23 = vld [vmem:[#allocation7 + $0x68c] ss:$16 sps:$4 sm:$0xff]  }
 0x699   :  { %17111 = vmatmul.mubr.msk.bf16.gmra.mxu1 %vm1187_vm1, %v3440_v61  ;;  %v3421_v57 = vadd.f32 %v16257_v28, %v16193_v42  ;;  %v18181_v61 = vld [vmem:[#allocation7 + $0x6ac] ss:$16 sps:$4 sm:$0xff]  }
 0x69a   :  { %v16259_v37 = vpop.f32.mrf.mxu0  ;;  %v18187_v28 = vld [vmem:[#allocation7 + $0x6cc] ss:$16 sps:$4 sm:$0xff]  }
 0x69b   :  { %v16260_v35 = vadd.f32 %v16259_v37, %v16258_v17  ;;  %v18179_v17 = vld [vmem:[#allocation7 + $0x6a8] ss:$16 sps:$4 sm:$0xff]   ;;  %v18193_v42 = vld [vmem:[#allocation7 + $0x6ec] ss:$16 sps:$4 sm:$0xff]  }
 0x69c   :  { %v16261_v59 = vpop.f32.mrf.mxu0  ;;  %v18185_v37 = vld [vmem:[#allocation7 + $0x6c8] ss:$16 sps:$4 sm:$0xff]  }
 0x69d   :  { %v3424_v3 = vadd.f32 %v16260_v35, %v16196_v1  ;;  %v18191_v1 = vld [vmem:[#allocation7 + $0x6e8] ss:$16 sps:$4 sm:$0xff]   ;;  %v3981_v35 = vld [vmem:[#allocation8 + $0xc] sm:$0x3] }
 0x69e   :  { %v16262_v51 = vpop.f32.mrf.mxu0  ;;  %17824 = vmatprep.subr.msk.bf16.mxu0 %vm1212_vm0, %v3981_v35  ;;  %v4007_v15 = vsel %vm1212_vm0, %v3981_v35, 0 }
 0x69f   :  { %v3441_v38 = vpack.c.bf16 %v3424_v3, %v3421_v57  ;;  %v16263_v54 = vadd.f32 %v16262_v51, %v16261_v59  ;;  %17119 = vmatpush3.bf16.msra.mxu0 %v4007_v15  ;;  %v21762_v59 = vld [vmem:[#allocation47_spill] sm:$0xff]  ;;  %v18194_v51 = vld [vmem:[#allocation7 + $0x700] ss:$16 sps:$4 sm:$0xff]  }
 0x6a0   :  { %v16264_v41 = vpop.f32.mrf.mxu0  ;;  %16477 = vmatprep.subr.bf16.mxu0 %v21762_v59  ;;  %v21774_v15 = vld [vmem:[#allocation64_spill] sm:$0xff] }
 0x6a1   :  { %17114 = vmatprep.mubr.msk.bf16.mxu1 %vm1187_vm1, %v3441_v38  ;;  %v3429_v25 = vadd.f32 %v16263_v54, %v16199_v36  ;;  %v18196_v38 = vld [vmem:[#allocation7 + $0x704] ss:$16 sps:$4 sm:$0xff]   ;;  %v21763_v54 = vld [vmem:[#allocation49_spill] sm:$0xff] }
 0x6a2   :  { %v16265_v0 = vpop.f32.mrf.mxu0 }
 0x6a3   :  { %v16266_v9 = vadd.f32 %v16265_v0, %v16264_v41 }
 0x6a4   :  { %v20311_v57 = vpop.f32.mrf.mxu0 }
 0x6a5   :  { %v3432_v32 = vadd.f32 %v16266_v9, %v16202_v6  ;;  %v21765_v6 = vld [vmem:[#allocation51_spill] sm:$0xff] }
 0x6a6   :  { %v20313_v3 = vpop.f32.mrf.mxu0 }
 0x6a7   :  { %v3442_v5 = vpack.c.bf16 %v3432_v32, %v3429_v25 }
 0x6a8   :  { %v20315_v41 = vpop.f32.mrf.mxu0 }
 0x6a9   :  { %17115 = vmatmul.mubr.msk.bf16.gmra.mxu1 %vm1187_vm1, %v3442_v5 }
 0x6aa   :  { %3907 = vmatprep.mubr.bf16.mxu1 %v18151_v53  ;;  %v20323_v32 = vpop.f32.mrf.mxu0  ;;  %v21767_v53 = vld [vmem:[#allocation53_spill] sm:$0xff] }
 0x6b1   :  { %3908 = vmatmul.mubr.bf16.vlgmr.msra.gmra.mxu1 %v18149_v40  ;;  %v18200_v40 = vld [vmem:[#allocation7 + $0x720] ss:$16 sps:$4 sm:$0xff]  }
 0x6b2   :  { %3915 = vmatprep.mubr.bf16.mxu1 %v18157_v46  ;;  %16414 = vmatpush3.bf16.msra.mxu1 %v19184_v8  ;;  %v18202_v46 = vld [vmem:[#allocation7 + $0x724] ss:$16 sps:$4 sm:$0xff]  }
 0x6b3   :  { %16415 = vmatprep.subr.bf16.mxu1 %v19209_v16 }
 0x6b6   :  { %16416 = vmatpush3.bf16.msra.mxu1 %v19223_v21 }
 0x6b7   :  { %16417 = vmatprep.subr.bf16.mxu1 %v19238_v26 }
 0x6b9   :  { %3916 = vmatmul.mubr.bf16.gmra.mxu1 %v18155_v48  ;;  %v20328_v48 = vpop.f32.mrf.mxu0 }
 0x6ba   :  { %3923 = vmatprep.mubr.bf16.mxu1 %v18163_v47  ;;  %16418 = vmatpush3.bf16.msra.mxu1 %v21625_v13 }
 0x6bb   :  { %16419 = vmatprep.subr.bf16.mxu1 %v21626_v62  ;;  %v20330_v47 = vpop.f32.mrf.mxu0 }
 0x6be   :  { %16420 = vmatpush3.bf16.msra.mxu1 %v21627_v33 }
 0x6bf   :  { %16421 = vmatprep.subr.bf16.mxu1 %v21630_v56 }
 0x6c1   :  { %3924 = vmatmul.mubr.bf16.gmra.mxu1 %v18161_v12  ;;  %v18206_v12 = vld [vmem:[#allocation7 + $0x740] ss:$16 sps:$4 sm:$0xff]  }
 0x6c2   :  { %3931 = vmatprep.mubr.bf16.mxu1 %v18169_v14  ;;  %16422 = vmatpush3.bf16.msra.mxu1 %v21633_v49  ;;  %v18208_v14 = vld [vmem:[#allocation7 + $0x744] ss:$16 sps:$4 sm:$0xff]  }
 0x6c3   :  { %16423 = vmatprep.subr.bf16.mxu1 %v21634_v63 }
 0x6c6   :  { %16424 = vmatpush3.bf16.msra.mxu1 %v21635_v4 }
 0x6c7   :  { %16425 = vmatprep.subr.bf16.mxu1 %v21636_v55 }
 0x6c9   :  { %3932 = vmatmul.mubr.bf16.gmra.mxu1 %v18167_v31 }
 0x6ca   :  { %3939 = vmatprep.mubr.bf16.mxu1 %v18175_v23  ;;  %16426 = vmatpush3.bf16.msra.mxu1 %v21637_v58 }
 0x6cb   :  { %16427 = vmatprep.subr.bf16.mxu1 %v21760_v20 }
 0x6ce   :  { %16428 = vmatpush3.bf16.msra.mxu1 %v21761_v11 }
 0x6d1   :  { %3940 = vmatmul.mubr.bf16.gmra.mxu1 %v18173_v45  ;;  %v20334_v45 = vpop.f32.mrf.mxu0 }
 0x6d2   :  { %3947 = vmatprep.mubr.bf16.mxu1 %v18181_v61  ;;  %v21770_v61 = vld [vmem:[#allocation63_spill] sm:$0xff] }
 0x6d3   :  { %v20342_v35 = vpop.f32.mrf.mxu0 }
 0x6d9   :  { %3948 = vmatmul.mubr.bf16.gmra.mxu1 %v18179_v17 }
 0x6da   :  { %3955 = vmatprep.mubr.bf16.mxu1 %v18187_v28 }
 0x6e1   :  { %3956 = vmatmul.mubr.bf16.gmra.mxu1 %v18185_v37  ;;  %v21772_v37 = vld [vmem:[#allocation52_spill] sm:$0xff] }
 0x6e2   :  { %3963 = vmatprep.mubr.bf16.mxu1 %v18193_v42 }
 0x6e9   :  { %3964 = vmatmul.mubr.bf16.gmra.mxu1 %v18191_v1 }
 0x6ea   :  { %4347 = vmatprep.mubr.bf16.mxu1 %v18196_v38  ;;  %v18212_v38 = vld [vmem:[#allocation7 + $0x760] ss:$16 sps:$4 sm:$0xff]  }
 0x6f1   :  { %4348 = vmatmul.mubr.bf16.vlgmr.msra.gmra.mxu1 %v18194_v51 }
 0x6f2   :  { %4355 = vmatprep.mubr.bf16.mxu1 %v18202_v46 }
 0x6f9   :  { %4356 = vmatmul.mubr.bf16.gmra.mxu1 %v18200_v40 }
 0x6fa   :  { %4363 = vmatprep.mubr.bf16.mxu1 %v18208_v14 }
 0x701   :  { %4364 = vmatmul.mubr.bf16.gmra.mxu1 %v18206_v12  ;;  %v21777_v12 = vld [vmem:[#allocation56_spill] sm:$0xff] }
 0x739   :  { %v17104_v19 = vpop.f32.mrf.mxu1 }
 0x73a   :  { %v20318_v0 = vadd.f32 %v17104_v19, %v21763_v54  ;;  %v18214_v19 = vld [vmem:[#allocation7 + $0x764] ss:$16 sps:$4 sm:$0xff]   ;;  %v20347_v54 = vpop.f32.mrf.mxu0 }
 0x73b   :  { %v3506_v36 = vpop.f32.mrf.mxu1  ;;  %4371 = vmatprep.mubr.bf16.mxu1 %v18214_v19  ;;  %v18224_v19 = vld [vmem:[#allocation7 + $0x7a0] ss:$16 sps:$4 sm:$0xff]  }
 0x73c   :  { %21764 = vst [vmem:[#allocation69_spill] sm:$0xff] %v20318_v0  ;;  %v20321_v9 = vadd.f32 %v3506_v36, %v21765_v6  ;;  %4372 = vmatmul.mubr.bf16.gmra.mxu1 %v18212_v38  ;;  %v20349_v36 = vpop.f32.mrf.mxu0  ;;  %v18218_v6 = vld [vmem:[#allocation7 + $0x780] ss:$16 sps:$4 sm:$0xff]  }
 0x73d   :  { %v17105_v25 = vpop.f32.mrf.mxu1 }
 0x73e   :  { %21766 = vst [vmem:[#allocation71_spill] sm:$0xff] %v20321_v9  ;;  %v20326_v5 = vadd.f32 %v17105_v25, %v21767_v53  ;;  %v18220_v25 = vld [vmem:[#allocation7 + $0x784] ss:$16 sps:$4 sm:$0xff]   ;;  %v20353_v46 = vpop.f32.mrf.mxu0 }
 0x73f   :  { %v20332_v31 = vpop.f32.mrf.mxu1  ;;  %4379 = vmatprep.mubr.bf16.mxu1 %v18220_v25 }
 0x740   :  { %21768 = vst [vmem:[#allocation73_spill] sm:$0xff] %v20326_v5  ;;  %21769 = vst [vmem:[#allocation49_spill] sm:$0xff] %v20332_v31  ;;  %v18226_v31 = vld [vmem:[#allocation7 + $0x7a4] ss:$16 sps:$4 sm:$0xff]  }
 0x741   :  { %v18238_v5 = vld [vmem:[#allocation7 + $0x7e4] ss:$16 sps:$4 sm:$0xff]  }
 0x744   :  { %4380 = vmatmul.mubr.bf16.gmra.mxu1 %v18218_v6 }
 0x745   :  { %4387 = vmatprep.mubr.bf16.mxu1 %v18226_v31 }
 0x749   :  { %v17108_v23 = vpop.f32.mrf.mxu1 }
 0x74a   :  { %v20337_v17 = vadd.f32 %v17108_v23, %v21770_v61  ;;  %v21779_v61 = vld [vmem:[#allocation80_spill] sm:$0xff] }
 0x74b   :  { %v3522_v28 = vpop.f32.mrf.mxu1 }
 0x74c   :  { %21771 = vst [vmem:[#allocation51_spill] sm:$0xff] %v20337_v17  ;;  %v20340_v42 = vadd.f32 %v3522_v28, %v21772_v37  ;;  %4388 = vmatmul.mubr.bf16.gmra.mxu1 %v18224_v19  ;;  %v18236_v17 = vld [vmem:[#allocation7 + $0x7e0] ss:$16 sps:$4 sm:$0xff]  }
 0x74d   :  { %v17109_v1 = vpop.f32.mrf.mxu1 }
 0x74e   :  { %21773 = vst [vmem:[#allocation53_spill] sm:$0xff] %v20340_v42  ;;  %v20345_v51 = vadd.f32 %v17109_v1, %v21774_v15  ;;  %v20361_v1 = vpop.f32.mrf.mxu0  ;;  %v21781_v15 = vld [vmem:[#allocation81_spill] sm:$0xff] }
 0x74f   :  { %v20351_v53 = vpop.f32.mrf.mxu1 }
 0x750   :  { %21775 = vst [vmem:[#allocation63_spill] sm:$0xff] %v20345_v51  ;;  %21776 = vst [vmem:[#allocation52_spill] sm:$0xff] %v20351_v53  ;;  %v20366_v25 = vpop.f32.mrf.mxu0  ;;  %v21788_v51 = vld [vmem:[#allocation61_spill] sm:$0xff] }
 0x752   :  { %v20368_v6 = vpop.f32.mrf.mxu0 }
 0x759   :  { %v17112_v40 = vpop.f32.mrf.mxu1 }
 0x75a   :  { %v20356_v14 = vadd.f32 %v17112_v40, %v21777_v12  ;;  %v18230_v40 = vld [vmem:[#allocation7 + $0x7c0] ss:$16 sps:$4 sm:$0xff]   ;;  %v18232_v12 = vld [vmem:[#allocation7 + $0x7c4] ss:$16 sps:$4 sm:$0xff]  }
 0x75b   :  { %v3538_v23 = vpop.f32.mrf.mxu1  ;;  %4395 = vmatprep.mubr.bf16.mxu1 %v18232_v12 }
 0x75c   :  { %21778 = vst [vmem:[#allocation64_spill] sm:$0xff] %v20356_v14  ;;  %v20359_v28 = vadd.f32 %v3538_v23, %v21779_v61  ;;  %v20372_v61 = vpop.f32.mrf.mxu0  ;;  %4396 = vmatmul.mubr.bf16.gmra.mxu1 %v18230_v40 }
 0x75d   :  { %v17113_v37 = vpop.f32.mrf.mxu1  ;;  %4403 = vmatprep.mubr.bf16.mxu1 %v18238_v5 }
 0x75e   :  { %21780 = vst [vmem:[#allocation56_spill] sm:$0xff] %v20359_v28  ;;  %v20364_v38 = vadd.f32 %v17113_v37, %v21781_v15  ;;  %v21784_v28 = vld [vmem:[#allocation82_spill] sm:$0xff]  ;;  %v16314_v19 = vpop.f32.mrf.mxu0 }
 0x75f   :  { %v20370_v53 = vpop.f32.mrf.mxu1 }
 0x760   :  { %21782 = vst [vmem:[#allocation80_spill] sm:$0xff] %v20364_v38  ;;  %21783 = vst [vmem:[#allocation81_spill] sm:$0xff] %v20370_v53  ;;  %v21786_v38 = vld [vmem:[#allocation59_spill] sm:$0xff]  ;;  %v20385_v9 = vpop.f32.mrf.mxu0 }
 0x764   :  { %4404 = vmatmul.mubr.bf16.gmra.mxu1 %v18236_v17 }
 0x769   :  { %v17116_v23 = vpop.f32.mrf.mxu1 }
 0x76a   :  { %v20375_v37 = vadd.f32 %v17116_v23, %v21784_v28  ;;  %v20387_v23 = vpop.f32.mrf.mxu0 }
 0x76b   :  { %v3554_v15 = vpop.f32.mrf.mxu1 }
 0x76c   :  { %21785 = vst [vmem:[#allocation82_spill] sm:$0xff] %v20375_v37  ;;  %v20378_v31 = vadd.f32 %v3554_v15, %v21786_v38 }
 0x76d   :  { %v17117_v14 = vpop.f32.mrf.mxu1 }
 0x76e   :  { %21787 = vst [vmem:[#allocation59_spill] sm:$0xff] %v20378_v31  ;;  %v20381_v42 = vadd.f32 %v17117_v14, %v21788_v51  ;;  %v16294_v31 = vadd.f32 %v20313_v3, %v20311_v57  ;;  %v16297_v51 = vadd.f32 %v20323_v32, %v20315_v41  ;;  %v16303_v57 = vadd.f32 %v20342_v35, %v20334_v45 }
 0x76f   :  { %v20383_v53 = vpop.f32.mrf.mxu1 }
 0x770   :  { %21789 = vst [vmem:[#allocation61_spill] sm:$0xff] %v20381_v42  ;;  %21790 = vst [vmem:[#allocation84_spill] sm:$0xff] %v20383_v53  ;;  %v16319_v53 = vpop.f32.mrf.mxu0 }
 0x771   :  { %v16356_v12 = vpop.f32.mrf.mxu1 }
 0x772   :  { %v16320_v11 = vpop.f32.mrf.mxu0 }
 0x773   :  { %v16357_v28 = vpop.f32.mrf.mxu1 }
 0x774   :  { %v16358_v38 = vadd.f32 %v16357_v28, %v16356_v12  ;;  %v16300_v28 = vadd.f32 %v20330_v47, %v20328_v48  ;;  %v20398_v32 = vpop.f32.mrf.mxu0  ;;  %v16306_v48 = vadd.f32 %v20349_v36, %v20347_v54  ;;  %v16309_v47 = vadd.f32 %v20361_v1, %v20353_v46 }
 0x775   :  { %v16359_v40 = vpop.f32.mrf.mxu1  ;;  %v16312_v36 = vadd.f32 %v20368_v6, %v20366_v25  ;;  %v16315_v46 = vadd.f32 %v16314_v19, %v20372_v61  ;;  %v16318_v6 = vadd.f32 %v20387_v23, %v20385_v9  ;;  %v16321_v61 = vadd.f32 %v16320_v11, %v16319_v53 }
 0x776   :  { %v3910_v5 = vadd.f32 %v16358_v38, %v16294_v31 }
 0x777   :  { %v16360_v15 = vpop.f32.mrf.mxu1 }
 0x778   :  { %v16361_v14 = vadd.f32 %v16360_v15, %v16359_v40 }
 0x779   :  { %v16362_v42 = vpop.f32.mrf.mxu1 }
 0x77a   :  { %v3913_v37 = vadd.f32 %v16361_v14, %v16297_v51  ;;  %v16323_v51 = vpop.f32.mrf.mxu0 }
 0x77b   :  { %v16363_v0 = vpop.f32.mrf.mxu1  ;;  %v16324_v11 = vadd.f32 %v16323_v51, %v20398_v32 }
 0x77c   :  { %v3972_v59 = vpack.c.bf16 %v3913_v37, %v3910_v5  ;;  %v16364_v20 = vadd.f32 %v16363_v0, %v16362_v42  ;;  %v16325_v42 = vpop.f32.mrf.mxu0 }
 0x77d   :  { %v16365_v17 = vpop.f32.mrf.mxu1 }
 0x77e   :  { %17120 = vmatprep.mubr.msk.bf16.mxu0 %vm1187_vm1, %v3972_v59  ;;  %v3918_v31 = vadd.f32 %v16364_v20, %v16300_v28  ;;  %v16326_v28 = vpop.f32.mrf.mxu0 }
 0x77f   :  { %v16366_v12 = vpop.f32.mrf.mxu1  ;;  %v16327_v53 = vadd.f32 %v16326_v28, %v16325_v42 }
 0x780   :  { %v16367_v3 = vadd.f32 %v16366_v12, %v16365_v17 }
 0x781   :  { %v16368_v41 = vpop.f32.mrf.mxu1 }
 0x782   :  { %v3921_v40 = vadd.f32 %v16367_v3, %v16303_v57 }
 0x783   :  { %v16369_v38 = vpop.f32.mrf.mxu1 }
 0x784   :  { %v3973_v37 = vpack.c.bf16 %v3921_v40, %v3918_v31  ;;  %v16370_v0 = vadd.f32 %v16369_v38, %v16368_v41  ;;  %v16328_v41 = vpop.f32.mrf.mxu0 }
 0x785   :  { %v16371_v15 = vpop.f32.mrf.mxu1 }
 0x786   :  { %17121 = vmatmul.mubr.msk.bf16.vlgmr.msra.gmra.mxu0 %vm1187_vm1, %v3973_v37  ;;  %v3926_v35 = vadd.f32 %v16370_v0, %v16306_v48  ;;  %v16329_v0 = vpop.f32.mrf.mxu0 }
 0x787   :  { %v16372_v59 = vpop.f32.mrf.mxu1  ;;  %16478 = vmatpush3.bf16.msra.mxu0 %v21660_v34  ;;  %v16330_v51 = vadd.f32 %v16329_v0, %v16328_v41  ;;  %v18199_v41 = vld [vmem:[#allocation7 + $0x70c] ss:$16 sps:$4 sm:$0xff]  }
 0x788   :  { %v16373_v45 = vadd.f32 %v16372_v59, %v16371_v15  ;;  %16479 = vmatprep.subr.bf16.mxu0 %v21661_v39 }
 0x789   :  { %v16374_v20 = vpop.f32.mrf.mxu1 }
 0x78a   :  { %v3929_v14 = vadd.f32 %v16373_v45, %v16309_v47  ;;  %v16331_v47 = vpop.f32.mrf.mxu0 }
 0x78b   :  { %v16375_v5 = vpop.f32.mrf.mxu1  ;;  %16480 = vmatpush3.bf16.msra.mxu0 %v21662_v52 }
 0x78c   :  { %v3974_v17 = vpack.c.bf16 %v3929_v14, %v3926_v35  ;;  %16481 = vmatprep.subr.bf16.mxu0 %v21663_v43  ;;  %v16376_v57 = vadd.f32 %v16375_v5, %v16374_v20 }
 0x78d   :  { %v16377_v12 = vpop.f32.mrf.mxu1 }
 0x78e   :  { %17124 = vmatprep.mubr.msk.bf16.mxu0 %vm1187_vm1, %v3974_v17  ;;  %v3934_v31 = vadd.f32 %v16376_v57, %v16312_v36  ;;  %v16332_v17 = vpop.f32.mrf.mxu0 }
 0x78f   :  { %v16378_v54 = vpop.f32.mrf.mxu1  ;;  %16482 = vmatpush3.bf16.msra.mxu0 %v21664_v30  ;;  %v16333_v42 = vadd.f32 %v16332_v17, %v16331_v47  ;;  %v18197_v47 = vld [vmem:[#allocation7 + $0x708] ss:$16 sps:$4 sm:$0xff]   ;;  %v18205_v17 = vld [vmem:[#allocation7 + $0x72c] ss:$16 sps:$4 sm:$0xff]  }
 0x790   :  { %v16379_v1 = vadd.f32 %v16378_v54, %v16377_v12  ;;  %16483 = vmatprep.subr.bf16.mxu0 %v21665_v7  ;;  %v16334_v54 = vpop.f32.mrf.mxu0 }
 0x791   :  { %v16380_v3 = vpop.f32.mrf.mxu1 }
 0x792   :  { %v3937_v40 = vadd.f32 %v16379_v1, %v16315_v46 }
 0x793   :  { %v16381_v38 = vpop.f32.mrf.mxu1  ;;  %16484 = vmatpush3.bf16.msra.mxu0 %v21666_v2 }
 0x794   :  { %v3975_v37 = vpack.c.bf16 %v3937_v40, %v3934_v31  ;;  %16485 = vmatprep.subr.bf16.mxu0 %v21698_v29  ;;  %v16382_v59 = vadd.f32 %v16381_v38, %v16380_v3  ;;  %v16335_v31 = vpop.f32.mrf.mxu0 }
 0x795   :  { %v16383_v15 = vpop.f32.mrf.mxu1 }
 0x796   :  { %17125 = vmatmul.mubr.msk.bf16.gmra.mxu0 %vm1187_vm1, %v3975_v37  ;;  %v3942_v45 = vadd.f32 %v16382_v59, %v16318_v6  ;;  %v16337_v37 = vpop.f32.mrf.mxu0 }
 0x797   :  { %v16384_v25 = vpop.f32.mrf.mxu1  ;;  %16486 = vmatpush3.bf16.msra.mxu0 %v21699_v44 }
 0x798   :  { %v16385_v19 = vadd.f32 %v16384_v25, %v16383_v15  ;;  %16487 = vmatprep.subr.bf16.mxu0 %v21669_v27 }
 0x799   :  { %v16386_v48 = vpop.f32.mrf.mxu1 }
 0x79a   :  { %v3945_v20 = vadd.f32 %v16385_v19, %v16321_v61  ;;  %v16338_v19 = vpop.f32.mrf.mxu0 }
 0x79b   :  { %v16387_v35 = vpop.f32.mrf.mxu1  ;;  %16488 = vmatpush3.bf16.msra.mxu0 %v21700_v60 }
 0x79c   :  { %v3976_v14 = vpack.c.bf16 %v3945_v20, %v3942_v45  ;;  %16489 = vmatprep.subr.bf16.mxu0 %v21701_v10  ;;  %v16388_v12 = vadd.f32 %v16387_v35, %v16386_v48  ;;  %v16336_v20 = vadd.f32 %v16335_v31, %v16334_v54  ;;  %v16339_v35 = vadd.f32 %v16338_v19, %v16337_v37 }
 0x79d   :  { %v16389_v5 = vpop.f32.mrf.mxu1 }
 0x79e   :  { %17128 = vmatprep.mubr.msk.bf16.mxu0 %vm1187_vm1, %v3976_v14  ;;  %v3950_v36 = vadd.f32 %v16388_v12, %v16324_v11  ;;  %v18211_v11 = vld [vmem:[#allocation7 + $0x74c] ss:$16 sps:$4 sm:$0xff]  }
 0x79f   :  { %v16390_v9 = vpop.f32.mrf.mxu1  ;;  %16490 = vmatpush3.bf16.msra.mxu0 %v21702_v22 }
 0x7a0   :  { %v16391_v23 = vadd.f32 %v16390_v9, %v16389_v5  ;;  %16491 = vmatprep.subr.bf16.mxu0 %v21703_v50  ;;  %v18203_v9 = vld [vmem:[#allocation7 + $0x728] ss:$16 sps:$4 sm:$0xff]  }
 0x7a1   :  { %v16392_v57 = vpop.f32.mrf.mxu1 }
 0x7a2   :  { %v3953_v46 = vadd.f32 %v16391_v23, %v16327_v53  ;;  %v18209_v53 = vld [vmem:[#allocation7 + $0x748] ss:$16 sps:$4 sm:$0xff]   ;;  %v18217_v23 = vld [vmem:[#allocation7 + $0x76c] ss:$16 sps:$4 sm:$0xff]  }
 0x7a3   :  { %v16393_v1 = vpop.f32.mrf.mxu1  ;;  %16492 = vmatpush3.bf16.msra.mxu0 %v21704_v18 }
 0x7a4   :  { %v3977_v3 = vpack.c.bf16 %v3953_v46, %v3950_v36  ;;  %16550 = vmatprep.subr.bf16.mxu0 %v21705_v24  ;;  %v16394_v38 = vadd.f32 %v16393_v1, %v16392_v57  ;;  %v21793_v57 = vld [vmem:[#allocation47_spill] sm:$0xff]  ;;  %v18242_v46 = vld [vmem:[#allocation7 + $0x800] ss:$16 sps:$4 sm:$0xff]   ;;  %v18244_v1 = vld [vmem:[#allocation7 + $0x804] ss:$16 sps:$4 sm:$0xff]  }
 0x7a5   :  { %v16395_v40 = vpop.f32.mrf.mxu1 }
 0x7a6   :  { %17129 = vmatmul.mubr.msk.bf16.gmra.mxu0 %vm1187_vm1, %v3977_v3  ;;  %v3958_v59 = vadd.f32 %v16394_v38, %v16330_v51  ;;  %v21795_v51 = vld [vmem:[#allocation71_spill] sm:$0xff] }
 0x7a7   :  { %v16396_v32 = vpop.f32.mrf.mxu1 }
 0x7a8   :  { %v16397_v28 = vadd.f32 %v16396_v32, %v16395_v40  ;;  %v21794_v40 = vld [vmem:[#allocation69_spill] sm:$0xff] }
 0x7a9   :  { %v16398_v15 = vpop.f32.mrf.mxu1 }
 0x7aa   :  { %v3961_v25 = vadd.f32 %v16397_v28, %v16333_v42 }
 0x7ab   :  { %v16399_v6 = vpop.f32.mrf.mxu1 }
 0x7ac   :  { %v3978_v61 = vpack.c.bf16 %v3961_v25, %v3958_v59  ;;  %v16400_v45 = vadd.f32 %v16399_v6, %v16398_v15  ;;  %v21796_v15 = vld [vmem:[#allocation73_spill] sm:$0xff]  ;;  %v18248_v25 = vld [vmem:[#allocation7 + $0x820] ss:$16 sps:$4 sm:$0xff]   ;;  %v18250_v6 = vld [vmem:[#allocation7 + $0x824] ss:$16 sps:$4 sm:$0xff]  }
 0x7ad   :  { %v16401_v48 = vpop.f32.mrf.mxu1 }
 0x7ae   :  { %17132 = vmatprep.mubr.msk.bf16.mxu0 %vm1187_vm1, %v3978_v61  ;;  %v3966_v5 = vadd.f32 %v16400_v45, %v16336_v20  ;;  %v18256_v45 = vld [vmem:[#allocation7 + $0x844] ss:$16 sps:$4 sm:$0xff]  }
 0x7af   :  { %v16402_v24 = vpop.f32.mrf.mxu1 }
 0x7b0   :  { %v16403_v14 = vadd.f32 %v16402_v24, %v16401_v48  ;;  %v18254_v48 = vld [vmem:[#allocation7 + $0x840] ss:$16 sps:$4 sm:$0xff]  }
 0x7b1   :  { %v20451_v54 = vpop.f32.mrf.mxu1 }
 0x7b2   :  { %v3969_v12 = vadd.f32 %v16403_v14, %v16339_v35  ;;  %v21798_v14 = vld [vmem:[#allocation51_spill] sm:$0xff] }
 0x7b3   :  { %v20453_v36 = vpop.f32.mrf.mxu1 }
 0x7b4   :  { %v3979_v0 = vpack.c.bf16 %v3969_v12, %v3966_v5 }
 0x7b5   :  { %v20455_v31 = vpop.f32.mrf.mxu1 }
 0x7b6   :  { %17133 = vmatmul.mubr.msk.bf16.gmra.mxu0 %vm1187_vm1, %v3979_v0 }
 0x7b7   :  { %4444 = vmatprep.mubr.bf16.mxu0 %v18199_v41  ;;  %v20463_v37 = vpop.f32.mrf.mxu1  ;;  %v21799_v41 = vld [vmem:[#allocation53_spill] sm:$0xff] }
 0x7b9   :  { %v20468_v61 = vpop.f32.mrf.mxu1 }
 0x7bb   :  { %v20470_v19 = vpop.f32.mrf.mxu1 }
 0x7bd   :  { %v20474_v35 = vpop.f32.mrf.mxu1 }
 0x7be   :  { %4445 = vmatmul.mubr.bf16.vlgmr.msra.gmra.mxu0 %v18197_v47 }
 0x7bf   :  { %4452 = vmatprep.mubr.bf16.mxu0 %v18205_v17  ;;  %16551 = vmatpush3.bf16.msra.mxu0 %v19184_v8  ;;  %v18215_v8 = vld [vmem:[#allocation7 + $0x768] ss:$16 sps:$4 sm:$0xff]   ;;  %v20482_v17 = vpop.f32.mrf.mxu1 }
 0x7c0   :  { %16552 = vmatprep.subr.bf16.mxu0 %v19209_v16  ;;  %v18223_v16 = vld [vmem:[#allocation7 + $0x78c] ss:$16 sps:$4 sm:$0xff]  }
 0x7c3   :  { %16553 = vmatpush3.bf16.msra.mxu0 %v19223_v21  ;;  %v21791_v21 = vld [vmem:[#allocation70_spill] sm:$0xff] }
 0x7c4   :  { %16554 = vmatprep.subr.bf16.mxu0 %v19238_v26  ;;  %v18221_v26 = vld [vmem:[#allocation7 + $0x788] ss:$16 sps:$4 sm:$0xff]  }
 0x7c6   :  { %4453 = vmatmul.mubr.bf16.gmra.mxu0 %v18203_v9  ;;  %v21800_v9 = vld [vmem:[#allocation63_spill] sm:$0xff] }
 0x7c7   :  { %4460 = vmatprep.mubr.bf16.mxu0 %v18211_v11  ;;  %16555 = vmatpush3.bf16.msra.mxu0 %v21625_v13  ;;  %v18229_v13 = vld [vmem:[#allocation7 + $0x7ac] ss:$16 sps:$4 sm:$0xff]  }
 0x7c8   :  { %16556 = vmatprep.subr.bf16.mxu0 %v21626_v62  ;;  %v21792_v62 = vld [vmem:[#allocation72_spill] sm:$0xff] }
 0x7cb   :  { %16557 = vmatpush3.bf16.msra.mxu0 %v21627_v33  ;;  %v18227_v33 = vld [vmem:[#allocation7 + $0x7a8] ss:$16 sps:$4 sm:$0xff]  }
 0x7cc   :  { %16558 = vmatprep.subr.bf16.mxu0 %v21630_v56  ;;  %v18235_v56 = vld [vmem:[#allocation7 + $0x7cc] ss:$16 sps:$4 sm:$0xff]  }
 0x7ce   :  { %4461 = vmatmul.mubr.bf16.gmra.mxu0 %v18209_v53  ;;  %v18260_v53 = vld [vmem:[#allocation7 + $0x860] ss:$16 sps:$4 sm:$0xff]  }
 0x7cf   :  { %4468 = vmatprep.mubr.bf16.mxu0 %v18217_v23  ;;  %16559 = vmatpush3.bf16.msra.mxu0 %v21633_v49  ;;  %v18233_v49 = vld [vmem:[#allocation7 + $0x7c8] ss:$16 sps:$4 sm:$0xff]   ;;  %v18262_v23 = vld [vmem:[#allocation7 + $0x864] ss:$16 sps:$4 sm:$0xff]  }
 0x7d0   :  { %16560 = vmatprep.subr.bf16.mxu0 %v21634_v63  ;;  %v18241_v63 = vld [vmem:[#allocation7 + $0x7ec] ss:$16 sps:$4 sm:$0xff]  }
 0x7d3   :  { %16561 = vmatpush3.bf16.msra.mxu0 %v21635_v4  ;;  %v18239_v4 = vld [vmem:[#allocation7 + $0x7e8] ss:$16 sps:$4 sm:$0xff]  }
 0x7d4   :  { %16562 = vmatprep.subr.bf16.mxu0 %v21636_v55  ;;  %v4518_v55 = vld [vmem:[#allocation8 + $0xe] sm:$0x3] }
 0x7d5   :  { %17825 = vmatprep.subr.msk.bf16.mxu1 %vm1212_vm0, %v4518_v55 }
 0x7d6   :  { %4469 = vmatmul.mubr.bf16.gmra.mxu0 %v18215_v8  ;;  %v20487_v8 = vpop.f32.mrf.mxu1 }
 0x7d7   :  { %4476 = vmatprep.mubr.bf16.mxu0 %v18223_v16  ;;  %16563 = vmatpush3.bf16.msra.mxu0 %v21637_v58  ;;  %v4544_v58 = vsel %vm1212_vm0, %v4518_v55, 0 }
 0x7d8   :  { %16564 = vmatprep.subr.bf16.mxu0 %v21791_v21  ;;  %17137 = vmatpush3.bf16.msra.mxu1 %v4544_v58  ;;  %v20489_v16 = vpop.f32.mrf.mxu1  ;;  %v18266_v21 = vld [vmem:[#allocation7 + $0x880] ss:$16 sps:$4 sm:$0xff]  }
 0x7d9   :  { %16614 = vmatprep.subr.bf16.mxu1 %v21793_v57 }
 0x7db   :  { %16565 = vmatpush3.bf16.msra.mxu0 %v21792_v62 }
 0x7de   :  { %4477 = vmatmul.mubr.bf16.gmra.mxu0 %v18221_v26  ;;  %v18268_v26 = vld [vmem:[#allocation7 + $0x884] ss:$16 sps:$4 sm:$0xff]  }
 0x7df   :  { %4484 = vmatprep.mubr.bf16.mxu0 %v18229_v13 }
 0x7e6   :  { %4485 = vmatmul.mubr.bf16.gmra.mxu0 %v18227_v33  ;;  %v20493_v33 = vpop.f32.mrf.mxu1 }
 0x7e7   :  { %4492 = vmatprep.mubr.bf16.mxu0 %v18235_v56  ;;  %v21802_v56 = vld [vmem:[#allocation64_spill] sm:$0xff] }
 0x7e8   :  { %v20501_v57 = vpop.f32.mrf.mxu1 }
 0x7ee   :  { %4493 = vmatmul.mubr.bf16.gmra.mxu0 %v18233_v49 }
 0x7ef   :  { %4500 = vmatprep.mubr.bf16.mxu0 %v18241_v63 }
 0x7f6   :  { %4501 = vmatmul.mubr.bf16.gmra.mxu0 %v18239_v4  ;;  %v21803_v4 = vld [vmem:[#allocation56_spill] sm:$0xff] }
 0x7f7   :  { %4884 = vmatprep.mubr.bf16.mxu0 %v18244_v1 }
 0x7fe   :  { %4885 = vmatmul.mubr.bf16.vlgmr.msra.gmra.mxu0 %v18242_v46  ;;  %v21804_v46 = vld [vmem:[#allocation80_spill] sm:$0xff] }
 0x7ff   :  { %4892 = vmatprep.mubr.bf16.mxu0 %v18250_v6 }
 0x806   :  { %4893 = vmatmul.mubr.bf16.gmra.mxu0 %v18248_v25 }
 0x807   :  { %4900 = vmatprep.mubr.bf16.mxu0 %v18256_v45  ;;  %v21805_v45 = vld [vmem:[#allocation82_spill] sm:$0xff] }
 0x80e   :  { %4901 = vmatmul.mubr.bf16.gmra.mxu0 %v18254_v48 }
 0x80f   :  { %4908 = vmatprep.mubr.bf16.mxu0 %v18262_v23 }
 0x816   :  { %4909 = vmatmul.mubr.bf16.gmra.mxu0 %v18260_v53  ;;  %v21807_v53 = vld [vmem:[#allocation61_spill] sm:$0xff] }
 0x817   :  { %4916 = vmatprep.mubr.bf16.mxu0 %v18268_v26  ;;  %v18286_v26 = vld [vmem:[#allocation7 + $0x8e4] ss:$16 sps:$4 sm:$0xff]  }
 0x81e   :  { %4917 = vmatmul.mubr.bf16.gmra.mxu0 %v18266_v21  ;;  %v18284_v21 = vld [vmem:[#allocation7 + $0x8e0] ss:$16 sps:$4 sm:$0xff]  }
 0x846   :  { %v17122_v3 = vpop.f32.mrf.mxu0 }
 0x847   :  { %v20458_v38 = vadd.f32 %v17122_v3, %v21794_v40  ;;  %v18272_v3 = vld [vmem:[#allocation7 + $0x8a0] ss:$16 sps:$4 sm:$0xff]   ;;  %v18274_v40 = vld [vmem:[#allocation7 + $0x8a4] ss:$16 sps:$4 sm:$0xff]  }
 0x848   :  { %v4043_v32 = vpop.f32.mrf.mxu0  ;;  %4924 = vmatprep.mubr.bf16.mxu0 %v18274_v40 }
 0x849   :  { %v20461_v42 = vadd.f32 %v4043_v32, %v21795_v51  ;;  %v20506_v32 = vpop.f32.mrf.mxu1  ;;  %4925 = vmatmul.mubr.bf16.gmra.mxu0 %v18272_v3 }
 0x84a   :  { %v17123_v28 = vpop.f32.mrf.mxu0 }
 0x84b   :  { %v20466_v59 = vadd.f32 %v17123_v28, %v21796_v15  ;;  %v20508_v51 = vpop.f32.mrf.mxu1  ;;  %v18278_v28 = vld [vmem:[#allocation7 + $0x8c0] ss:$16 sps:$4 sm:$0xff]   ;;  %v18280_v15 = vld [vmem:[#allocation7 + $0x8c4] ss:$16 sps:$4 sm:$0xff]  }
 0x84c   :  { %v20472_v24 = vpop.f32.mrf.mxu0  ;;  %4932 = vmatprep.mubr.bf16.mxu0 %v18280_v15  ;;  %v16434_v15 = vadd.f32 %v20463_v37, %v20455_v31 }
 0x84d   :  { %21797 = vst [vmem:[#allocation70_spill] sm:$0xff] %v20472_v24  ;;  %v20512_v48 = vpop.f32.mrf.mxu1 }
 0x851   :  { %4933 = vmatmul.mubr.bf16.gmra.mxu0 %v18278_v28  ;;  %v16431_v28 = vadd.f32 %v20453_v36, %v20451_v54  ;;  %v16440_v54 = vadd.f32 %v20482_v17, %v20474_v35 }
 0x852   :  { %4940 = vmatprep.mubr.bf16.mxu0 %v18286_v26 }
 0x856   :  { %v17126_v20 = vpop.f32.mrf.mxu0 }
 0x857   :  { %v20477_v5 = vadd.f32 %v17126_v20, %v21798_v14 }
 0x858   :  { %v4059_v12 = vpop.f32.mrf.mxu0 }
 0x859   :  { %v20480_v0 = vadd.f32 %v4059_v12, %v21799_v41  ;;  %v21806_v12 = vld [vmem:[#allocation59_spill] sm:$0xff]  ;;  %4941 = vmatmul.mubr.bf16.gmra.mxu0 %v18284_v21 }
 0x85a   :  { %v17127_v47 = vpop.f32.mrf.mxu0 }
 0x85b   :  { %v20485_v11 = vadd.f32 %v17127_v47, %v21800_v9  ;;  %v16451_v9 = vpop.f32.mrf.mxu1 }
 0x85c   :  { %v20491_v13 = vpop.f32.mrf.mxu0 }
 0x85d   :  { %21801 = vst [vmem:[#allocation72_spill] sm:$0xff] %v20491_v13 }
 0x866   :  { %v17130_v62 = vpop.f32.mrf.mxu0 }
 0x867   :  { %v20496_v49 = vadd.f32 %v17130_v62, %v21802_v56 }
 0x868   :  { %v4075_v63 = vpop.f32.mrf.mxu0 }
 0x869   :  { %v20499_v55 = vadd.f32 %v4075_v63, %v21803_v4  ;;  %v20525_v63 = vpop.f32.mrf.mxu1 }
 0x86a   :  { %v17131_v58 = vpop.f32.mrf.mxu0 }
 0x86b   :  { %v20504_v1 = vadd.f32 %v17131_v58, %v21804_v46  ;;  %v20527_v46 = vpop.f32.mrf.mxu1 }
 0x86c   :  { %v20510_v25 = vpop.f32.mrf.mxu0 }
 0x876   :  { %v17134_v6 = vpop.f32.mrf.mxu0 }
 0x877   :  { %v20515_v20 = vadd.f32 %v17134_v6, %v21805_v45 }
 0x878   :  { %v4091_v14 = vpop.f32.mrf.mxu0 }
 0x879   :  { %v20518_v41 = vadd.f32 %v4091_v14, %v21806_v12  ;;  %v16456_v14 = vpop.f32.mrf.mxu1 }
 0x87a   :  { %v17135_v47 = vpop.f32.mrf.mxu0 }
 0x87b   :  { %v20521_v23 = vadd.f32 %v17135_v47, %v21807_v53  ;;  %v16457_v24 = vpop.f32.mrf.mxu1 }
 0x87c   :  { %v20523_v62 = vpop.f32.mrf.mxu0 }
 0x87d   :  { %v20538_v37 = vpop.f32.mrf.mxu1 }
 0x87e   :  { %v16493_v56 = vpop.f32.mrf.mxu0 }
 0x880   :  { %v16494_v4 = vpop.f32.mrf.mxu0 }
 0x881   :  { %v16495_v3 = vadd.f32 %v16494_v4, %v16493_v56  ;;  %v16437_v4 = vadd.f32 %v20470_v19, %v20468_v61  ;;  %v16443_v61 = vadd.f32 %v20489_v16, %v20487_v8  ;;  %v16446_v19 = vadd.f32 %v20501_v57, %v20493_v33 }
 0x882   :  { %v16496_v58 = vpop.f32.mrf.mxu0  ;;  %v16452_v16 = vadd.f32 %v16451_v9, %v20512_v48 }
 0x883   :  { %v4447_v12 = vadd.f32 %v16495_v3, %v16431_v28 }
 0x884   :  { %v16497_v40 = vpop.f32.mrf.mxu0 }
 0x885   :  { %v16498_v6 = vadd.f32 %v16497_v40, %v16496_v58 }
 0x886   :  { %v16499_v45 = vpop.f32.mrf.mxu0 }
 0x887   :  { %v4450_v47 = vadd.f32 %v16498_v6, %v16434_v15  ;;  %v16460_v6 = vpop.f32.mrf.mxu1 }
 0x888   :  { %v16500_v53 = vpop.f32.mrf.mxu0 }
 0x889   :  { %v4509_v26 = vpack.c.bf16 %v4450_v47, %v4447_v12  ;;  %v16501_v13 = vadd.f32 %v16500_v53, %v16499_v45 }
 0x88a   :  { %v16502_v21 = vpop.f32.mrf.mxu0 }
 0x88b   :  { %17138 = vmatprep.mubr.msk.bf16.mxu1 %vm1187_vm1, %v4509_v26  ;;  %v4455_v58 = vadd.f32 %v16501_v13, %v16437_v4  ;;  %v16462_v13 = vpop.f32.mrf.mxu1 }
 0x88c   :  { %v16503_v56 = vpop.f32.mrf.mxu0 }
 0x88d   :  { %v16504_v36 = vadd.f32 %v16503_v56, %v16502_v21  ;;  %v16463_v56 = vpop.f32.mrf.mxu1 }
 0x88e   :  { %v16505_v31 = vpop.f32.mrf.mxu0 }
 0x88f   :  { %v4458_v3 = vadd.f32 %v16504_v36, %v16440_v54  ;;  %v16465_v57 = vpop.f32.mrf.mxu1 }
 0x890   :  { %v16506_v40 = vpop.f32.mrf.mxu0 }
 0x891   :  { %v4510_v28 = vpack.c.bf16 %v4458_v3, %v4455_v58  ;;  %v16507_v45 = vadd.f32 %v16506_v40, %v16505_v31 }
 0x892   :  { %v16508_v15 = vpop.f32.mrf.mxu0 }
 0x893   :  { %17139 = vmatmul.mubr.msk.bf16.vlgmr.msra.gmra.mxu1 %vm1187_vm1, %v4510_v28  ;;  %v4463_v47 = vadd.f32 %v16507_v45, %v16443_v61 }
 0x894   :  { %v16509_v12 = vpop.f32.mrf.mxu0  ;;  %16615 = vmatpush3.bf16.msra.mxu1 %v21660_v34 }
 0x895   :  { %v16510_v35 = vadd.f32 %v16509_v12, %v16508_v15  ;;  %16616 = vmatprep.subr.bf16.mxu1 %v21661_v39  ;;  %v16449_v39 = vadd.f32 %v20508_v51, %v20506_v32  ;;  %v16458_v51 = vadd.f32 %v16457_v24, %v16456_v14  ;;  %v16464_v24 = vadd.f32 %v16463_v56, %v16462_v13 }
 0x896   :  { %v16511_v17 = vpop.f32.mrf.mxu0 }
 0x897   :  { %v4466_v53 = vadd.f32 %v16510_v35, %v16446_v19 }
 0x898   :  { %v16512_v26 = vpop.f32.mrf.mxu0  ;;  %16617 = vmatpush3.bf16.msra.mxu1 %v21662_v52 }
 0x899   :  { %v4511_v21 = vpack.c.bf16 %v4466_v53, %v4463_v47  ;;  %16618 = vmatprep.subr.bf16.mxu1 %v21663_v43  ;;  %v16513_v4 = vadd.f32 %v16512_v26, %v16511_v17 }
 0x89a   :  { %v16514_v34 = vpop.f32.mrf.mxu0 }
 0x89b   :  { %17142 = vmatprep.mubr.msk.bf16.mxu1 %vm1187_vm1, %v4511_v21  ;;  %v4471_v54 = vadd.f32 %v16513_v4, %v16449_v39 }
 0x89c   :  { %v16515_v8 = vpop.f32.mrf.mxu0  ;;  %16619 = vmatpush3.bf16.msra.mxu1 %v21664_v30  ;;  %v16466_v30 = vpop.f32.mrf.mxu1 }
 0x89d   :  { %v16516_v33 = vadd.f32 %v16515_v8, %v16514_v34  ;;  %16620 = vmatprep.subr.bf16.mxu1 %v21665_v7  ;;  %v16455_v7 = vadd.f32 %v20527_v46, %v20525_v63  ;;  %v16467_v26 = vadd.f32 %v16466_v30, %v16465_v57  ;;  %v18247_v57 = vld [vmem:[#allocation7 + $0x80c] ss:$16 sps:$4 sm:$0xff]  }
 0x89e   :  { %v16517_v52 = vpop.f32.mrf.mxu0  ;;  %v18253_v30 = vld [vmem:[#allocation7 + $0x82c] ss:$16 sps:$4 sm:$0xff]  }
 0x89f   :  { %v4474_v43 = vadd.f32 %v16516_v33, %v16452_v16 }
 0x8a0   :  { %v16518_v36 = vpop.f32.mrf.mxu0  ;;  %16621 = vmatpush3.bf16.msra.mxu1 %v21666_v2  ;;  %v16468_v2 = vpop.f32.mrf.mxu1 }
 0x8a1   :  { %v4512_v31 = vpack.c.bf16 %v4474_v43, %v4471_v54  ;;  %16622 = vmatprep.subr.bf16.mxu1 %v21698_v29  ;;  %v16519_v3 = vadd.f32 %v16518_v36, %v16517_v52 }
 0x8a2   :  { %v16520_v58 = vpop.f32.mrf.mxu0  ;;  %v16469_v12 = vpop.f32.mrf.mxu1 }
 0x8a3   :  { %17143 = vmatmul.mubr.msk.bf16.gmra.mxu1 %vm1187_vm1, %v4512_v31  ;;  %v4479_v40 = vadd.f32 %v16519_v3, %v16455_v7  ;;  %v18251_v3 = vld [vmem:[#allocation7 + $0x828] ss:$16 sps:$4 sm:$0xff]  }
 0x8a4   :  { %v16521_v32 = vpop.f32.mrf.mxu0  ;;  %16623 = vmatpush3.bf16.msra.mxu1 %v21699_v44  ;;  %v16471_v61 = vpop.f32.mrf.mxu1  ;;  %v18257_v7 = vld [vmem:[#allocation7 + $0x848] ss:$16 sps:$4 sm:$0xff]  }
 0x8a5   :  { %v16522_v48 = vadd.f32 %v16521_v32, %v16520_v58  ;;  %16624 = vmatprep.subr.bf16.mxu1 %v21669_v27  ;;  %v16461_v27 = vadd.f32 %v16460_v6, %v20538_v37  ;;  %v16470_v37 = vadd.f32 %v16469_v12, %v16468_v2  ;;  %v18245_v58 = vld [vmem:[#allocation7 + $0x808] ss:$16 sps:$4 sm:$0xff]   ;;  %v18259_v32 = vld [vmem:[#allocation7 + $0x84c] ss:$16 sps:$4 sm:$0xff]  }
 0x8a6   :  { %v16523_v9 = vpop.f32.mrf.mxu0  ;;  %v16472_v17 = vpop.f32.mrf.mxu1  ;;  %v18269_v2 = vld [vmem:[#allocation7 + $0x888] ss:$16 sps:$4 sm:$0xff]  }
 0x8a7   :  { %v4482_v28 = vadd.f32 %v16522_v48, %v16458_v51  ;;  %v16473_v33 = vadd.f32 %v16472_v17, %v16471_v61  ;;  %v18265_v51 = vld [vmem:[#allocation7 + $0x86c] ss:$16 sps:$4 sm:$0xff]   ;;  %v18263_v48 = vld [vmem:[#allocation7 + $0x868] ss:$16 sps:$4 sm:$0xff]  }
 0x8a8   :  { %v16524_v29 = vpop.f32.mrf.mxu0  ;;  %16625 = vmatpush3.bf16.msra.mxu1 %v21700_v60  ;;  %v16474_v13 = vpop.f32.mrf.mxu1  ;;  %v18287_v12 = vld [vmem:[#allocation7 + $0x8e8] ss:$16 sps:$4 sm:$0xff]  }
 0x8a9   :  { %v4513_v15 = vpack.c.bf16 %v4482_v28, %v4479_v40  ;;  %16626 = vmatprep.subr.bf16.mxu1 %v21701_v10  ;;  %v16525_v44 = vadd.f32 %v16524_v29, %v16523_v9  ;;  %v18271_v9 = vld [vmem:[#allocation7 + $0x88c] ss:$16 sps:$4 sm:$0xff]   ;;  %v18275_v28 = vld [vmem:[#allocation7 + $0x8a8] ss:$16 sps:$4 sm:$0xff]  }
 0x8aa   :  { %v16526_v45 = vpop.f32.mrf.mxu0  ;;  %v16475_v8 = vpop.f32.mrf.mxu1  ;;  %v18277_v40 = vld [vmem:[#allocation7 + $0x8ac] ss:$16 sps:$4 sm:$0xff]  }
 0x8ab   :  { %17146 = vmatprep.mubr.msk.bf16.mxu1 %vm1187_vm1, %v4513_v15  ;;  %v4487_v60 = vadd.f32 %v16525_v44, %v16461_v27  ;;  %v16476_v52 = vadd.f32 %v16475_v8, %v16474_v13  ;;  %v18283_v29 = vld [vmem:[#allocation7 + $0x8cc] ss:$16 sps:$4 sm:$0xff]   ;;  %v18281_v15 = vld [vmem:[#allocation7 + $0x8c8] ss:$16 sps:$4 sm:$0xff]   ;;  %v5055_v44 = vld [vmem:[#allocation8 + $0x10] sm:$0x3] }
 0x8ac   :  { %v16527_v63 = vpop.f32.mrf.mxu0  ;;  %16627 = vmatpush3.bf16.msra.mxu1 %v21702_v22  ;;  %17826 = vmatprep.subr.msk.bf16.mxu0 %vm1212_vm0, %v5055_v44 }
 0x8ad   :  { %v16528_v46 = vadd.f32 %v16527_v63, %v16526_v45  ;;  %16628 = vmatprep.subr.bf16.mxu1 %v21703_v50  ;;  %v18289_v45 = vld [vmem:[#allocation7 + $0x8ec] ss:$16 sps:$4 sm:$0xff]   ;;  %v5081_v63 = vsel %vm1212_vm0, %v5055_v44, 0 }
 0x8ae   :  { %v16529_v14 = vpop.f32.mrf.mxu0  ;;  %17155 = vmatpush3.bf16.msra.mxu0 %v5081_v63 }
 0x8af   :  { %v4490_v19 = vadd.f32 %v16528_v46, %v16464_v24 }
 0x8b0   :  { %v16530_v35 = vpop.f32.mrf.mxu0  ;;  %16629 = vmatpush3.bf16.msra.mxu1 %v21704_v18 }
 0x8b1   :  { %v4514_v10 = vpack.c.bf16 %v4490_v19, %v4487_v60  ;;  %v16531_v53 = vadd.f32 %v16530_v35, %v16529_v14 }
 0x8b2   :  { %v16532_v47 = vpop.f32.mrf.mxu0 }
 0x8b3   :  { %17147 = vmatmul.mubr.msk.bf16.gmra.mxu1 %vm1187_vm1, %v4514_v10  ;;  %v4495_v50 = vadd.f32 %v16531_v53, %v16467_v26 }
 0x8b4   :  { %v16533_v22 = vpop.f32.mrf.mxu0 }
 0x8b5   :  { %v16534_v6 = vadd.f32 %v16533_v22, %v16532_v47 }
 0x8b6   :  { %v16535_v21 = vpop.f32.mrf.mxu0 }
 0x8b7   :  { %v4498_v34 = vadd.f32 %v16534_v6, %v16470_v37 }
 0x8b8   :  { %v16536_v56 = vpop.f32.mrf.mxu0 }
 0x8b9   :  { %v4515_v4 = vpack.c.bf16 %v4498_v34, %v4495_v50  ;;  %v16537_v16 = vadd.f32 %v16536_v56, %v16535_v21 }
 0x8ba   :  { %v16538_v39 = vpop.f32.mrf.mxu0 }
 0x8bb   :  { %17150 = vmatprep.mubr.msk.bf16.mxu1 %vm1187_vm1, %v4515_v4  ;;  %v4503_v43 = vadd.f32 %v16537_v16, %v16473_v33 }
 0x8bc   :  { %v16539_v18 = vpop.f32.mrf.mxu0 }
 0x8bd   :  { %v16540_v54 = vadd.f32 %v16539_v18, %v16538_v39 }
 0x8be   :  { %v16566_v27 = vpop.f32.mrf.mxu0 }
 0x8bf   :  { %v4506_v36 = vadd.f32 %v16540_v54, %v16476_v52 }
 0x8c0   :  { %v16567_v24 = vpop.f32.mrf.mxu0 }
 0x8c1   :  { %v4516_v31 = vpack.c.bf16 %v4506_v36, %v4503_v43 }
 0x8c2   :  { %v16569_v14 = vpop.f32.mrf.mxu0 }
 0x8c3   :  { %17151 = vmatmul.mubr.msk.bf16.gmra.mxu1 %vm1187_vm1, %v4516_v31 }
 0x8c4   :  { %4981 = vmatprep.mubr.bf16.mxu1 %v18247_v57  ;;  %v16570_v10 = vpop.f32.mrf.mxu0 }
 0x8c6   :  { %v16572_v47 = vpop.f32.mrf.mxu0 }
 0x8c8   :  { %v16573_v53 = vpop.f32.mrf.mxu0 }
 0x8ca   :  { %v16575_v37 = vpop.f32.mrf.mxu0 }
 0x8cb   :  { %4982 = vmatmul.mubr.bf16.vlgmr.msra.gmra.mxu1 %v18245_v58 }
 0x8cc   :  { %4989 = vmatprep.mubr.bf16.mxu1 %v18253_v30  ;;  %v16576_v21 = vpop.f32.mrf.mxu0 }
 0x8d3   :  { %4990 = vmatmul.mubr.bf16.gmra.mxu1 %v18251_v3 }
 0x8d4   :  { %4997 = vmatprep.mubr.bf16.mxu1 %v18259_v32 }
 0x8db   :  { %4998 = vmatmul.mubr.bf16.gmra.mxu1 %v18257_v7 }
 0x8dc   :  { %5005 = vmatprep.mubr.bf16.mxu1 %v18265_v51 }
 0x8e3   :  { %5006 = vmatmul.mubr.bf16.gmra.mxu1 %v18263_v48 }
 0x8e4   :  { %5013 = vmatprep.mubr.bf16.mxu1 %v18271_v9 }
 0x8eb   :  { %5014 = vmatmul.mubr.bf16.gmra.mxu1 %v18269_v2 }
 0x8ec   :  { %5021 = vmatprep.mubr.bf16.mxu1 %v18277_v40  ;;  %v16571_v40 = vadd.f32 %v16570_v10, %v16569_v14 }
 0x8f3   :  { %5022 = vmatmul.mubr.bf16.gmra.mxu1 %v18275_v28 }
 0x8f4   :  { %5029 = vmatprep.mubr.bf16.mxu1 %v18283_v29 }
 0x8fb   :  { %5030 = vmatmul.mubr.bf16.gmra.mxu1 %v18281_v15 }
 0x8fc   :  { %5037 = vmatprep.mubr.bf16.mxu1 %v18289_v45 }
 0x903   :  { %5038 = vmatmul.mubr.bf16.gmra.mxu1 %v18287_v12 }
 0x953   :  { %v17140_v46 = vpop.f32.mrf.mxu1 }
 0x954   :  { %v20575_v61 = vadd.f32 %v17140_v46, %v20458_v38 }
 0x955   :  { %v4580_v60 = vpop.f32.mrf.mxu1 }
 0x956   :  { %v20578_v19 = vadd.f32 %v4580_v60, %v20461_v42 }
 0x957   :  { %v17141_v35 = vpop.f32.mrf.mxu1 }
 0x958   :  { %v20581_v17 = vadd.f32 %v17141_v35, %v20466_v59  ;;  %v16578_v59 = vpop.f32.mrf.mxu0  ;;  %v16574_v35 = vadd.f32 %v16573_v53, %v16572_v47 }
 0x959   :  { %v20583_v22 = vpop.f32.mrf.mxu1 }
 0x95a   :  { %v16579_v34 = vpop.f32.mrf.mxu0 }
 0x95c   :  { %v16581_v8 = vpop.f32.mrf.mxu0 }
 0x95e   :  { %v16582_v18 = vpop.f32.mrf.mxu0 }
 0x963   :  { %v17144_v26 = vpop.f32.mrf.mxu1 }
 0x964   :  { %v20586_v6 = vadd.f32 %v17144_v26, %v20477_v5  ;;  %v16577_v26 = vadd.f32 %v16576_v21, %v16575_v37 }
 0x965   :  { %v4596_v38 = vpop.f32.mrf.mxu1 }
 0x966   :  { %v20589_v13 = vadd.f32 %v4596_v38, %v20480_v0 }
 0x967   :  { %v17145_v42 = vpop.f32.mrf.mxu1 }
 0x968   :  { %v20592_v50 = vadd.f32 %v17145_v42, %v20485_v11  ;;  %v16584_v11 = vpop.f32.mrf.mxu0 }
 0x969   :  { %v20594_v56 = vpop.f32.mrf.mxu1 }
 0x96a   :  { %v16585_v52 = vpop.f32.mrf.mxu0 }
 0x96c   :  { %v16587_v36 = vpop.f32.mrf.mxu0 }
 0x96e   :  { %v16588_v58 = vpop.f32.mrf.mxu0 }
 0x970   :  { %v16590_v32 = vpop.f32.mrf.mxu0 }
 0x972   :  { %v16591_v48 = vpop.f32.mrf.mxu0 }
 0x973   :  { %v17148_v4 = vpop.f32.mrf.mxu1 }
 0x974   :  { %v20597_v39 = vadd.f32 %v17148_v4, %v20496_v49 }
 0x975   :  { %v4612_v5 = vpop.f32.mrf.mxu1 }
 0x976   :  { %v20600_v16 = vadd.f32 %v4612_v5, %v20499_v55 }
 0x977   :  { %v17149_v0 = vpop.f32.mrf.mxu1 }
 0x978   :  { %v20603_v33 = vadd.f32 %v17149_v0, %v20504_v1 }
 0x979   :  { %v20605_v54 = vpop.f32.mrf.mxu1 }
 0x983   :  { %v17152_v43 = vpop.f32.mrf.mxu1 }
 0x984   :  { %v20608_v57 = vadd.f32 %v17152_v43, %v20515_v20  ;;  %v16568_v20 = vadd.f32 %v16567_v24, %v16566_v27 }
 0x985   :  { %v4628_v49 = vpop.f32.mrf.mxu1 }
 0x986   :  { %v20611_v31 = vadd.f32 %v4628_v49, %v20518_v41  ;;  %v16593_v41 = vpop.f32.mrf.mxu0 }
 0x987   :  { %v17153_v55 = vpop.f32.mrf.mxu1 }
 0x988   :  { %v20614_v30 = vadd.f32 %v17153_v55, %v20521_v23  ;;  %v16594_v63 = vpop.f32.mrf.mxu0  ;;  %v16580_v55 = vadd.f32 %v16579_v34, %v16578_v59 }
 0x989   :  { %v20616_v1 = vpop.f32.mrf.mxu1 }
 0x98a   :  { %v16596_v4 = vpop.f32.mrf.mxu0 }
 0x98b   :  { %v16630_v3 = vpop.f32.mrf.mxu1 }
 0x98c   :  { %v16597_v0 = vpop.f32.mrf.mxu0 }
 0x98d   :  { %v16631_v7 = vpop.f32.mrf.mxu1 }
 0x98e   :  { %v16632_v9 = vadd.f32 %v16631_v7, %v16630_v3  ;;  %v16583_v3 = vadd.f32 %v16582_v18, %v16581_v8 }
 0x98f   :  { %v16633_v51 = vpop.f32.mrf.mxu1 }
 0x990   :  { %v4984_v15 = vadd.f32 %v16632_v9, %v16568_v20  ;;  %v16599_v9 = vpop.f32.mrf.mxu0 }
 0x991   :  { %v16634_v2 = vpop.f32.mrf.mxu1 }
 0x992   :  { %v16635_v28 = vadd.f32 %v16634_v2, %v16633_v51  ;;  %v16600_v20 = vpop.f32.mrf.mxu0 }
 0x993   :  { %v16636_v29 = vpop.f32.mrf.mxu1 }
 0x994   :  { %v4987_v45 = vadd.f32 %v16635_v28, %v16571_v40 }
 0x995   :  { %v16637_v12 = vpop.f32.mrf.mxu1 }
 0x996   :  { %v5046_v44 = vpack.c.bf16 %v4987_v45, %v4984_v15  ;;  %v16638_v46 = vadd.f32 %v16637_v12, %v16636_v29  ;;  %v16586_v29 = vadd.f32 %v16585_v52, %v16584_v11  ;;  %v16589_v15 = vadd.f32 %v16588_v58, %v16587_v36 }
 0x997   :  { %v16639_v23 = vpop.f32.mrf.mxu1 }
 0x998   :  { %17156 = vmatprep.mubr.msk.bf16.mxu0 %vm1187_vm1, %v5046_v44  ;;  %v4992_v27 = vadd.f32 %v16638_v46, %v16574_v35  ;;  %v16602_v44 = vpop.f32.mrf.mxu0 }
 0x999   :  { %v16640_v60 = vpop.f32.mrf.mxu1 }
 0x99a   :  { %v16641_v38 = vadd.f32 %v16640_v60, %v16639_v23  ;;  %v16603_v46 = vpop.f32.mrf.mxu0 }
 0x99b   :  { %v16642_v42 = vpop.f32.mrf.mxu1 }
 0x99c   :  { %v4995_v24 = vadd.f32 %v16641_v38, %v16577_v26  ;;  %v16592_v26 = vadd.f32 %v16591_v48, %v16590_v32  ;;  %v16595_v38 = vadd.f32 %v16594_v63, %v16593_v41 }
 0x99d   :  { %v16643_v14 = vpop.f32.mrf.mxu1 }
 0x99e   :  { %v5047_v10 = vpack.c.bf16 %v4995_v24, %v4992_v27  ;;  %v16644_v43 = vadd.f32 %v16643_v14, %v16642_v42  ;;  %v16605_v24 = vpop.f32.mrf.mxu0 }
 0x99f   :  { %v16645_v5 = vpop.f32.mrf.mxu1 }
 0x9a0   :  { %17157 = vmatmul.mubr.msk.bf16.vlgmr.msra.gmra.mxu0 %vm1187_vm1, %v5047_v10  ;;  %v5000_v47 = vadd.f32 %v16644_v43, %v16580_v55  ;;  %v16606_v10 = vpop.f32.mrf.mxu0  ;;  %v16601_v55 = vadd.f32 %v16600_v20, %v16599_v9 }
 0x9a1   :  { %v16646_v49 = vpop.f32.mrf.mxu1 }
 0x9a2   :  { %v16647_v7 = vadd.f32 %v16646_v49, %v16645_v5  ;;  %v16598_v49 = vadd.f32 %v16597_v0, %v16596_v4 }
 0x9a3   :  { %v16648_v51 = vpop.f32.mrf.mxu1 }
 0x9a4   :  { %v5003_v53 = vadd.f32 %v16647_v7, %v16583_v3 }
 0x9a5   :  { %v16649_v37 = vpop.f32.mrf.mxu1 }
 0x9a6   :  { %v5048_v21 = vpack.c.bf16 %v5003_v53, %v5000_v47  ;;  %v16650_v40 = vadd.f32 %v16649_v37, %v16648_v51  ;;  %v16608_v51 = vpop.f32.mrf.mxu0 }
 0x9a7   :  { %v16651_v2 = vpop.f32.mrf.mxu1 }
 0x9a8   :  { %17160 = vmatprep.mubr.msk.bf16.mxu0 %vm1187_vm1, %v5048_v21  ;;  %v5008_v59 = vadd.f32 %v16650_v40, %v16586_v29  ;;  %v16609_v47 = vpop.f32.mrf.mxu0  ;;  %v16607_v40 = vadd.f32 %v16606_v10, %v16605_v24 }
 0x9a9   :  { %v16652_v28 = vpop.f32.mrf.mxu1 }
 0x9aa   :  { %v16653_v45 = vadd.f32 %v16652_v28, %v16651_v2  ;;  %v16604_v2 = vadd.f32 %v16603_v46, %v16602_v44  ;;  %v16611_v29 = vpop.f32.mrf.mxu0  ;;  %v18290_v46 = vld [vmem:[#allocation11 + $0x10] sm:$0xff]  }
 0x9ab   :  { %v16654_v12 = vpop.f32.mrf.mxu1 }
 0x9ac   :  { %v5011_v34 = vadd.f32 %v16653_v45, %v16589_v15  ;;  %v16612_v45 = vpop.f32.mrf.mxu0 }
 0x9ad   :  { %v16655_v8 = vpop.f32.mrf.mxu1 }
 0x9ae   :  { %v5049_v18 = vpack.c.bf16 %v5011_v34, %v5008_v59  ;;  %v16656_v60 = vadd.f32 %v16655_v8, %v16654_v12  ;;  %v16610_v8 = vadd.f32 %v16609_v47, %v16608_v51 }
 0x9af   :  { %v16657_v23 = vpop.f32.mrf.mxu1 }
 0x9b0   :  { %17161 = vmatmul.mubr.msk.bf16.gmra.mxu0 %vm1187_vm1, %v5049_v18  ;;  %v5016_v11 = vadd.f32 %v16656_v60, %v16592_v26  ;;  %v16613_v18 = vadd.f32 %v16612_v45, %v16611_v29  ;;  %v18294_v26 = vld [vmem:[#allocation11] sm:$0xff]  }
 0x9b1   :  { %v16658_v35 = vpop.f32.mrf.mxu1  ;;  %17188 = vmatprep.mubr.bf16.mxu1 %v18294_v26  ;;  %v21812_v45 = vld [vmem:[#allocation54_spill] sm:$0xff] }
 0x9b2   :  { %v16659_v42 = vadd.f32 %v16658_v35, %v16657_v23  ;;  %v21817_v26 = vld [vmem:[#allocation58_spill] sm:$0xff] }
 0x9b3   :  { %v16660_v27 = vpop.f32.mrf.mxu1 }
 0x9b4   :  { %v5019_v52 = vadd.f32 %v16659_v42, %v16595_v38 }
 0x9b5   :  { %v16661_v36 = vpop.f32.mrf.mxu1 }
 0x9b6   :  { %v5050_v58 = vpack.c.bf16 %v5019_v52, %v5016_v11  ;;  %v16662_v5 = vadd.f32 %v16661_v36, %v16660_v27  ;;  %v20627_v27 = vld [vmem:[#allocation10] ss:$0 sm:$0xff] }
 0x9b7   :  { %v16663_v14 = vpop.f32.mrf.mxu1 }
 0x9b8   :  { %17164 = vmatprep.mubr.msk.bf16.mxu0 %vm1187_vm1, %v5050_v58  ;;  %v5024_v32 = vadd.f32 %v16662_v5, %v16598_v49 }
 0x9b9   :  { %v16664_v43 = vpop.f32.mrf.mxu1 }
 0x9ba   :  { %v16665_v3 = vadd.f32 %v16664_v43, %v16663_v14 }
 0x9bb   :  { %v16666_v7 = vpop.f32.mrf.mxu1 }
 0x9bc   :  { %v5027_v48 = vadd.f32 %v16665_v3, %v16601_v55 }
 0x9bd   :  { %v16667_v41 = vpop.f32.mrf.mxu1 }
 0x9be   :  { %v5051_v63 = vpack.c.bf16 %v5027_v48, %v5024_v32  ;;  %v16668_v37 = vadd.f32 %v16667_v41, %v16666_v7 }
 0x9bf   :  { %v16669_v53 = vpop.f32.mrf.mxu1 }
 0x9c0   :  { %17165 = vmatmul.mubr.msk.bf16.gmra.mxu0 %vm1187_vm1, %v5051_v63  ;;  %v5032_v4 = vadd.f32 %v16668_v37, %v16604_v2 }
 0x9c1   :  { %v16670_v21 = vpop.f32.mrf.mxu1 }
 0x9c2   :  { %v16671_v28 = vadd.f32 %v16670_v21, %v16669_v53 }
 0x9c3   :  { %v16672_v15 = vpop.f32.mrf.mxu1 }
 0x9c4   :  { %v5035_v0 = vadd.f32 %v16671_v28, %v16607_v40  ;;  %v21809_v28 = vld [vmem:[#allocation76_spill] sm:$0xff] }
 0x9c5   :  { %v16673_v9 = vpop.f32.mrf.mxu1 }
 0x9c6   :  { %v5052_v20 = vpack.c.bf16 %v5035_v0, %v5032_v4  ;;  %v16674_v59 = vadd.f32 %v16673_v9, %v16672_v15  ;;  %v21810_v0 = vld [vmem:[#allocation68_spill] sm:$0xff]  ;;  %v21811_v9 = vld [vmem:[#allocation77_spill] sm:$0xff] }
 0x9c7   :  { %v16675_v12 = vpop.f32.mrf.mxu1 }
 0x9c8   :  { %17168 = vmatprep.mubr.msk.bf16.mxu0 %vm1187_vm1, %v5052_v20  ;;  %v5040_v60 = vadd.f32 %v16674_v59, %v16610_v8  ;;  %v1410_v20 = vadd.f32 %v21811_v9, %v21810_v0  ;;  %v21814_v8 = vld [vmem:[#allocation46_spill] sm:$0xff]  ;;  %v21825_v0 = vld [vmem:[#allocation60_spill] sm:$0xff] }
 0x9c9   :  { %v16676_v34 = vpop.f32.mrf.mxu1  ;;  %v21826_v9 = vld [vmem:[#allocation74_spill] sm:$0xff] }
 0x9ca   :  { %v16677_v23 = vadd.f32 %v16676_v34, %v16675_v12 }
 0x9cc   :  { %v5043_v35 = vadd.f32 %v16677_v23, %v16613_v18 }
 0x9ce   :  { %v5053_v44 = vpack.c.bf16 %v5043_v35, %v5040_v60  ;;  %v21816_v35 = vld [vmem:[#allocation65_spill] sm:$0xff] }
 0x9d0   :  { %17169 = vmatmul.mubr.msk.bf16.gmra.mxu0 %vm1187_vm1, %v5053_v44 }
 0x9d1   :  { %17208 = vmatprep.mubr.bf16.mxu0 %v18290_v46 }
 0xa60   :  { %v17158_v38 = vpop.f32.mrf.mxu0 }
 0xa61   :  { %v5182_v42 = vadd.f32 %v17158_v38, %v20575_v61 }
 0xa62   :  { %v20629_v24 = vpop.f32.mrf.mxu0 }
 0xa63   :  { %v5205_v52 = vadd.f32 %v20627_v27, %v5182_v42  ;;  %v21818_v42 = vld [vmem:[#allocation84_spill] sm:$0xff] }
 0xa64   :  { %v17159_v11 = vpop.f32.mrf.mxu0 }
 0xa65   :  { %v5183_v36 = vadd.f32 %v17159_v11, %v20581_v17  ;;  %v5221_v14 = vmax.f32 %v5205_v52, 0.0 }
 0xa66   :  { %v20636_v43 = vpop.f32.mrf.mxu0 }
 0xa67   :  { %v5206_v58 = vadd.f32 %v20627_v27, %v5183_v36  ;;  %v21819_v36 = vld [vmem:[#allocation62_spill] sm:$0xff] }
 0xa69   :  { %v5222_v10 = vmax.f32 %v5206_v58, 0.0  ;;  %v21820_v58 = vld [vmem:[#allocation78_spill] sm:$0xff] }
 0xa6b   :  { %v20634_v5 = vpack.c.bf16 %v5222_v10, %v5221_v14  ;;  %v1394_v14 = vadd.f32 %v21820_v58, %v21819_v36 }
 0xa70   :  { %v17162_v49 = vpop.f32.mrf.mxu0 }
 0xa71   :  { %v5186_v61 = vadd.f32 %v17162_v49, %v20586_v6  ;;  %v21821_v49 = vld [vmem:[#allocation81_spill] sm:$0xff] }
 0xa72   :  { %v20639_v55 = vpop.f32.mrf.mxu0 }
 0xa73   :  { %v5209_v7 = vadd.f32 %v20627_v27, %v5186_v61 }
 0xa74   :  { %v17163_v3 = vpop.f32.mrf.mxu0 }
 0xa75   :  { %v5187_v51 = vadd.f32 %v17163_v3, %v20592_v50  ;;  %v5225_v32 = vmax.f32 %v5209_v7, 0.0  ;;  %v21808_v50 = vld [vmem:[#allocation83_spill] sm:$0xff] }
 0xa76   :  { %v20646_v63 = vpop.f32.mrf.mxu0  ;;  %v1426_v29 = vadd.f32 %v21809_v28, %v21808_v50  ;;  %v21824_v28 = vld [vmem:[#allocation66_spill] sm:$0xff] }
 0xa77   :  { %v5210_v17 = vadd.f32 %v20627_v27, %v5187_v51  ;;  %v21822_v51 = vld [vmem:[#allocation50_spill] sm:$0xff] }
 0xa78   :  { %v1971_v12 = vadd.f32 %v21812_v45, %v1426_v29 }
 0xa79   :  { %v5226_v48 = vmax.f32 %v5210_v17, 0.0  ;;  %v1963_v17 = vadd.f32 %v21822_v51, %v1394_v14  ;;  %v21833_v14 = vld [vmem:[#allocation70_spill] sm:$0xff] }
 0xa7a   :  { %v2508_v18 = vadd.f32 %v21814_v8, %v1971_v12  ;;  %v21828_v8 = vld [vmem:[#allocation48_spill] sm:$0xff] }
 0xa7b   :  { %v20644_v41 = vpack.c.bf16 %v5226_v48, %v5225_v32 }
 0xa7c   :  { %v3045_v44 = vadd.f32 %v21816_v35, %v2508_v18 }
 0xa7e   :  { %v3582_v11 = vadd.f32 %v21818_v42, %v3045_v44 }
 0xa80   :  { %v17166_v47 = vpop.f32.mrf.mxu0  ;;  %v4119_v3 = vadd.f32 %v20523_v62, %v3582_v11 }
 0xa81   :  { %v5190_v53 = vadd.f32 %v17166_v47, %v20597_v39  ;;  %v21813_v39 = vld [vmem:[#allocation57_spill] sm:$0xff] }
 0xa82   :  { %v5149_v37 = vpop.f32.mrf.mxu0  ;;  %v1967_v34 = vadd.f32 %v21813_v39, %v1410_v20  ;;  %v4656_v47 = vadd.f32 %v20616_v1, %v4119_v3  ;;  %v21827_v20 = vld [vmem:[#allocation52_spill] sm:$0xff] }
 0xa83   :  { %v5213_v21 = vadd.f32 %v20627_v27, %v5190_v53  ;;  %v5188_v12 = vadd.f32 %v5149_v37, %v20600_v16  ;;  %v21830_v16 = vld [vmem:[#allocation79_spill] sm:$0xff] }
 0xa84   :  { %v17167_v6 = vpop.f32.mrf.mxu0 }
 0xa85   :  { %v5191_v2 = vadd.f32 %v17167_v6, %v20603_v33  ;;  %v5229_v15 = vmax.f32 %v5213_v21, 0.0  ;;  %v21815_v33 = vld [vmem:[#allocation67_spill] sm:$0xff] }
 0xa86   :  { %v5152_v23 = vpop.f32.mrf.mxu0  ;;  %v2504_v60 = vadd.f32 %v21815_v33, %v1967_v34  ;;  %v21823_v6 = vld [vmem:[#allocation75_spill] sm:$0xff]  ;;  %v21829_v33 = vld [vmem:[#allocation72_spill] sm:$0xff] }
 0xa87   :  { %v5214_v40 = vadd.f32 %v20627_v27, %v5191_v2  ;;  %v2500_v21 = vadd.f32 %v21823_v6, %v1963_v17  ;;  %v18297_v6 = vld [vmem:[#allocation13 + $0x10] sm:$0xff]  }
 0xa88   :  { %v3041_v38 = vadd.f32 %v21817_v26, %v2504_v60  ;;  %v21831_v26 = vld [vmem:[#allocation55_spill] sm:$0xff] }
 0xa89   :  { %v5230_v4 = vmax.f32 %v5214_v40, 0.0  ;;  %v3037_v29 = vadd.f32 %v21824_v28, %v2500_v21  ;;  %v18298_v21 = vld [vmem:[#allocation13 + $0x8] sm:$0xff]  }
 0xa8a   :  { %v3578_v61 = vadd.f32 %v21821_v49, %v3041_v38 }
 0xa8b   :  { %v20657_v59 = vpack.c.bf16 %v5230_v4, %v5229_v15  ;;  %v3574_v45 = vadd.f32 %v21827_v20, %v3037_v29  ;;  %v18302_v20 = vld [vmem:[#allocation13 + $0x38] sm:$0xff]  }
 0xa8c   :  { %v4115_v48 = vadd.f32 %v20510_v25, %v3578_v61 }
 0xa8d   :  { %v4111_v60 = vadd.f32 %v21829_v33, %v3574_v45  ;;  %v18301_v45 = vld [vmem:[#allocation11 + $0x28] sm:$0xff]  }
 0xa8e   :  { %v4652_v40 = vadd.f32 %v20605_v54, %v4115_v48  ;;  %v18291_v48 = vld [vmem:[#allocation11 + $0x18] sm:$0xff]  }
 0xa8f   :  { %v4648_v44 = vadd.f32 %v20594_v56, %v4111_v60  ;;  %v5184_v56 = vadd.f32 %v20639_v55, %v20589_v13 }
 0xa90   :  { %v17170_v46 = vpop.f32.mrf.mxu0  ;;  %v5189_v15 = vadd.f32 %v5152_v23, %v4652_v40 }
 0xa91   :  { %v5194_v52 = vadd.f32 %v17170_v46, %v20608_v57  ;;  %v5211_v46 = vadd.f32 %v20627_v27, %v5188_v12  ;;  %v5185_v42 = vadd.f32 %v20646_v63, %v4648_v44  ;;  %v5207_v3 = vadd.f32 %v20627_v27, %v5184_v56  ;;  %v18303_v12 = vld [vmem:[#allocation13 + $0x30] sm:$0xff]  }
 0xa92   :  { %v5165_v10 = vpop.f32.mrf.mxu0  ;;  %v5212_v23 = vadd.f32 %v20627_v27, %v5189_v15 }
 0xa93   :  { %v5192_v7 = vadd.f32 %v5165_v10, %v20611_v31  ;;  %v5217_v53 = vadd.f32 %v20627_v27, %v5194_v52  ;;  %v21832_v52 = vld [vmem:[#allocation49_spill] sm:$0xff]  ;;  %v5227_v58 = vmax.f32 %v5211_v46, 0.0  ;;  %v5208_v49 = vadd.f32 %v20627_v27, %v5185_v42 }
 0xa94   :  { %v17171_v32 = vpop.f32.mrf.mxu0  ;;  %v5228_v11 = vmax.f32 %v5212_v23, 0.0  ;;  %v5223_v51 = vmax.f32 %v5207_v3, 0.0 }
 0xa95   :  { %v5195_v57 = vadd.f32 %v17171_v32, %v20614_v30  ;;  %v5215_v62 = vadd.f32 %v20627_v27, %v5192_v7  ;;  %v5233_v25 = vmax.f32 %v5217_v53, 0.0  ;;  %v1378_v30 = vadd.f32 %v21826_v9, %v21825_v0  ;;  %v18293_v53 = vld [vmem:[#allocation13 + $0x20] sm:$0xff]   ;;  %v18300_v9 = vld [vmem:[#allocation11 + $0x20] sm:$0xff]  }
 0xa96   :  { %v5168_v2 = vpop.f32.mrf.mxu0  ;;  %v20713_v63 = vpack.c.bf16 %v5228_v11, %v5227_v58  ;;  %v5224_v55 = vmax.f32 %v5208_v49, 0.0  ;;  %v5180_v7 = vadd.f32 %v20629_v24, %v20578_v19  ;;  %v18299_v0 = vld [vmem:[#allocation13] sm:$0xff]   ;;  %v18306_v58 = vld [vmem:[#allocation13 + $0x48] sm:$0xff]  }
 0xa97   :  { %v5218_v31 = vadd.f32 %v20627_v27, %v5195_v57  ;;  %v5193_v50 = vadd.f32 %v5168_v2, %v4656_v47  ;;  %v5231_v54 = vmax.f32 %v5215_v62, 0.0  ;;  %v1959_v18 = vadd.f32 %v21828_v8, %v1378_v30  ;;  %v18295_v47 = vld [vmem:[#allocation11 + $0x8] sm:$0xff]  }
 0xa98   :  { %v20729_v17 = vpack.c.bf16 %v5224_v55, %v5223_v51  ;;  %v18296_v57 = vld [vmem:[#allocation13 + $0x18] sm:$0xff]  }
 0xa99   :  { %v5234_v4 = vmax.f32 %v5218_v31, 0.0  ;;  %v5216_v1 = vadd.f32 %v20627_v27, %v5193_v50  ;;  %v2496_v37 = vadd.f32 %v21830_v16, %v1959_v18 }
 0xa9b   :  { %v20686_v39 = vpack.c.bf16 %v5234_v4, %v5233_v25  ;;  %v5232_v34 = vmax.f32 %v5216_v1, 0.0  ;;  %v3033_v38 = vadd.f32 %v21831_v26, %v2496_v37 }
 0xa9d   :  { %v20691_v35 = vpack.c.bf16 %v5232_v34, %v5231_v54  ;;  %17172 = vmatprep.subr.bf16.mxu1 %v20686_v39  ;;  %17192 = vmatprep.subr.bf16.mxu0 %v20686_v39  ;;  %v3570_v36 = vadd.f32 %v21832_v52, %v3033_v38 }
 0xa9e   :  { %17173 = vmatpush3.bf16.msra.mxu1 %v20686_v39  ;;  %17193 = vmatpush3.bf16.msra.mxu0 %v20686_v39 }
 0xa9f   :  { %17174 = vmatprep.subr.bf16.mxu1 %v20691_v35  ;;  %17194 = vmatprep.subr.bf16.mxu0 %v20691_v35  ;;  %v4107_v10 = vadd.f32 %v21833_v14, %v3570_v36  ;;  %v18304_v36 = vld [vmem:[#allocation11 + $0x30] sm:$0xff]   ;;  %v18305_v14 = vld [vmem:[#allocation11 + $0x38] sm:$0xff]  }
 0xaa1   :  { %v4644_v61 = vadd.f32 %v20583_v22, %v4107_v10  ;;  %v18307_v10 = vld [vmem:[#allocation13 + $0x40] sm:$0xff]  }
 0xaa2   :  { %17175 = vmatpush3.bf16.msra.mxu1 %v20691_v35  ;;  %17195 = vmatpush3.bf16.msra.mxu0 %v20691_v35 }
 0xaa3   :  { %17176 = vmatprep.subr.bf16.mxu1 %v20657_v59  ;;  %17196 = vmatprep.subr.bf16.mxu0 %v20657_v59  ;;  %v5181_v13 = vadd.f32 %v20636_v43, %v4644_v61  ;;  %v5203_v43 = vadd.f32 %v20627_v27, %v5180_v7 }
 0xaa5   :  { %v5204_v22 = vadd.f32 %v20627_v27, %v5181_v13  ;;  %v5219_v24 = vmax.f32 %v5203_v43, 0.0  ;;  %v18292_v27 = vld [vmem:[#allocation13 + $0x28] sm:$0xff]  }
 0xaa6   :  { %17177 = vmatpush3.bf16.msra.mxu1 %v20657_v59  ;;  %17197 = vmatpush3.bf16.msra.mxu0 %v20657_v59 }
 0xaa7   :  { %17178 = vmatprep.subr.bf16.mxu1 %v20713_v63  ;;  %17198 = vmatprep.subr.bf16.mxu0 %v20713_v63  ;;  %v5220_v19 = vmax.f32 %v5204_v22, 0.0 }
 0xaa9   :  { %v20740_v32 = vpack.c.bf16 %v5220_v19, %v5219_v24 }
 0xaaa   :  { %17179 = vmatpush3.bf16.msra.mxu1 %v20713_v63  ;;  %17199 = vmatpush3.bf16.msra.mxu0 %v20713_v63 }
 0xaab   :  { %17180 = vmatprep.subr.bf16.mxu1 %v20644_v41  ;;  %17200 = vmatprep.subr.bf16.mxu0 %v20644_v41 }
 0xaae   :  { %17181 = vmatpush3.bf16.msra.mxu1 %v20644_v41  ;;  %17201 = vmatpush3.bf16.msra.mxu0 %v20644_v41 }
 0xaaf   :  { %17182 = vmatprep.subr.bf16.mxu1 %v20729_v17  ;;  %17202 = vmatprep.subr.bf16.mxu0 %v20729_v17 }
 0xab2   :  { %17183 = vmatpush3.bf16.msra.mxu1 %v20729_v17  ;;  %17203 = vmatpush3.bf16.msra.mxu0 %v20729_v17 }
 0xab3   :  { %17184 = vmatprep.subr.bf16.mxu1 %v20634_v5  ;;  %17204 = vmatprep.subr.bf16.mxu0 %v20634_v5 }
 0xab6   :  { %17185 = vmatpush3.bf16.msra.mxu1 %v20634_v5  ;;  %17205 = vmatpush3.bf16.msra.mxu0 %v20634_v5 }
 0xab7   :  { %17186 = vmatprep.subr.bf16.mxu1 %v20740_v32  ;;  %17206 = vmatprep.subr.bf16.mxu0 %v20740_v32 }
 0xaba   :  { %17187 = vmatpush3.bf16.msra.mxu1 %v20740_v32  ;;  %17207 = vmatpush3.bf16.msra.mxu0 %v20740_v32 }
 0xabb   :  { %17248 = vmatprep.subr.bf16.mxu0 %v18292_v27  ;;  %17212 = vmatprep.subr.bf16.mxu1 %v18296_v57 }
 0xabd   :  { %17209 = vmatmul.mubr.bf16.vlgmr.msra.gmra.mxu0 %v18291_v48  ;;  %17189 = vmatmul.mubr.bf16.vlgmr.msra.gmra.mxu1 %v18295_v47  ;;  %v18308_v48 = vld [vmem:[#allocation11 + $0x40] sm:$0xff]  }
 0xabe   :  { %17249 = vmatpush3.bf16.msra.mxu0 %v18292_v27  ;;  %17213 = vmatpush3.bf16.msra.mxu1 %v18296_v57  ;;  %v18309_v57 = vld [vmem:[#allocation11 + $0x48] sm:$0xff]  }
 0xabf   :  { %17250 = vmatprep.subr.bf16.mxu0 %v18293_v53  ;;  %17214 = vmatprep.subr.bf16.mxu1 %v18297_v6 }
 0xac2   :  { %17251 = vmatpush3.bf16.msra.mxu0 %v18293_v53  ;;  %17215 = vmatpush3.bf16.msra.mxu1 %v18297_v6  ;;  %v18310_v53 = vld [vmem:[#allocation13 + $0x58] sm:$0xff]   ;;  %v18311_v6 = vld [vmem:[#allocation13 + $0x50] sm:$0xff]  }
 0xac3   :  { %17256 = vmatprep.subr.bf16.mxu0 %v20686_v39  ;;  %17220 = vmatprep.subr.bf16.mxu1 %v18298_v21 }
 0xb7d   :  { %v17210_v2 = vpop.f32.mrf.mxu0  ;;  %v17190_v40 = vpop.f32.mrf.mxu1 }
 0xb7f   :  { %v5365_v62 = vpop.f32.mrf.mxu0  ;;  %v5293_v31 = vpop.f32.mrf.mxu1 }
 0xb81   :  { %v17211_v50 = vpop.f32.mrf.mxu0  ;;  %v17191_v28 = vpop.f32.mrf.mxu1 }
 0xb82   :  { %v5381_v1 = vpack.c.bf16 %v17211_v50, %v17210_v2  ;;  %v5309_v30 = vpack.c.bf16 %v17191_v28, %v17190_v40 }
 0xb83   :  { %v5368_v29 = vpop.f32.mrf.mxu0  ;;  %v5296_v15 = vpop.f32.mrf.mxu1 }
 0xb84   :  { %v5380_v25 = vpack.c.bf16 %v5368_v29, %v5365_v62  ;;  %v5308_v4 = vpack.c.bf16 %v5296_v15, %v5293_v31 }
 0xb86   :  { %17216 = vmatprep.mubr.msk.bf16.mxu1 %vm5399_vm2, %v5380_v25 }
 0xb87   :  { %17217 = vmatmul.mubr.msk.bf16.vlgmr.msra.gmra.mxu1 %vm5399_vm2, %v5381_v1 }
 0xb88   :  { %17221 = vmatpush3.bf16.msra.mxu1 %v18298_v21  ;;  %17224 = vmatprep.mubr.msk.bf16.mxu1 %vm5399_vm2, %v5308_v4 }
 0xb89   :  { %17222 = vmatprep.subr.bf16.mxu1 %v18299_v0 }
 0xb8c   :  { %17223 = vmatpush3.bf16.msra.mxu1 %v18299_v0  ;;  %v18312_v0 = vld [vmem:[#allocation11 + $0x50] sm:$0xff]  }
 0xb8d   :  { %17228 = vmatprep.subr.bf16.mxu1 %v20686_v39 }
 0xb8f   :  { %17225 = vmatmul.mubr.msk.bf16.vlgmr.msra.gmra.mxu1 %vm5399_vm2, %v5309_v30  ;;  %v18314_v30 = vld [vmem:[#allocation13 + $0x68] sm:$0xff]  }
 0xb90   :  { %17229 = vmatpush3.bf16.msra.mxu1 %v20686_v39  ;;  %17244 = vmatprep.mubr.bf16.mxu1 %v18300_v9 }
 0xb91   :  { %17230 = vmatprep.subr.bf16.mxu1 %v20691_v35 }
 0xb94   :  { %17231 = vmatpush3.bf16.msra.mxu1 %v20691_v35 }
 0xb95   :  { %17232 = vmatprep.subr.bf16.mxu1 %v20657_v59 }
 0xb98   :  { %17233 = vmatpush3.bf16.msra.mxu1 %v20657_v59 }
 0xb99   :  { %17234 = vmatprep.subr.bf16.mxu1 %v20713_v63 }
 0xb9c   :  { %17235 = vmatpush3.bf16.msra.mxu1 %v20713_v63 }
 0xb9d   :  { %17236 = vmatprep.subr.bf16.mxu1 %v20644_v41 }
 0xba0   :  { %17237 = vmatpush3.bf16.msra.mxu1 %v20644_v41 }
 0xba1   :  { %17238 = vmatprep.subr.bf16.mxu1 %v20729_v17 }
 0xba4   :  { %17239 = vmatpush3.bf16.msra.mxu1 %v20729_v17 }
 0xba5   :  { %17240 = vmatprep.subr.bf16.mxu1 %v20634_v5 }
 0xba8   :  { %17241 = vmatpush3.bf16.msra.mxu1 %v20634_v5 }
 0xba9   :  { %17242 = vmatprep.subr.bf16.mxu1 %v20740_v32 }
 0xbac   :  { %17243 = vmatpush3.bf16.msra.mxu1 %v20740_v32 }
 0xbad   :  { %17276 = vmatprep.subr.bf16.mxu1 %v18302_v20 }
 0xbaf   :  { %17245 = vmatmul.mubr.bf16.vlgmr.msra.gmra.mxu1 %v18301_v45  ;;  %v18315_v45 = vld [vmem:[#allocation13 + $0x60] sm:$0xff]  }
 0xbb0   :  { %17277 = vmatpush3.bf16.msra.mxu1 %v18302_v20  ;;  %v18313_v20 = vld [vmem:[#allocation11 + $0x58] sm:$0xff]  }
 0xbb1   :  { %17278 = vmatprep.subr.bf16.mxu1 %v18303_v12 }
 0xbb4   :  { %17279 = vmatpush3.bf16.msra.mxu1 %v18303_v12 }
 0xbb5   :  { %17284 = vmatprep.subr.bf16.mxu1 %v20686_v39 }
 0xc47   :  { %v17218_v54 = vpop.f32.mrf.mxu1 }
 0xc49   :  { %v5440_v34 = vpop.f32.mrf.mxu1 }
 0xc4b   :  { %v17219_v8 = vpop.f32.mrf.mxu1 }
 0xc4d   :  { %v20770_v18 = vpop.f32.mrf.mxu1 }
 0xc4f   :  { %v17226_v33 = vpop.f32.mrf.mxu1 }
 0xc50   :  { %v5516_v60 = vadd.f32 %v17226_v33, %v17218_v54 }
 0xc51   :  { %v5507_v23 = vpop.f32.mrf.mxu1 }
 0xc52   :  { %v5508_v16 = vadd.f32 %v5507_v23, %v5440_v34 }
 0xc53   :  { %v17227_v37 = vpop.f32.mrf.mxu1 }
 0xc54   :  { %v5519_v44 = vadd.f32 %v17227_v37, %v17219_v8 }
 0xc55   :  { %v20772_v46 = vpop.f32.mrf.mxu1 }
 0xc6f   :  { %v17246_v26 = vpop.f32.mrf.mxu1 }
 0xc71   :  { %v5573_v38 = vpop.f32.mrf.mxu1 }
 0xc73   :  { %v17247_v42 = vpop.f32.mrf.mxu1 }
 0xc74   :  { %v5589_v56 = vpack.c.bf16 %v17247_v42, %v17246_v26  ;;  %v18316_v42 = vld [vmem:[#allocation11 + $0x60] sm:$0xff]  }
 0xc75   :  { %v5576_v11 = vpop.f32.mrf.mxu1 }
 0xc76   :  { %v5588_v52 = vpack.c.bf16 %v5576_v11, %v5573_v38 }
 0xc78   :  { %17252 = vmatprep.mubr.msk.bf16.mxu0 %vm5399_vm2, %v5588_v52  ;;  %v18318_v52 = vld [vmem:[#allocation13 + $0x78] sm:$0xff]  }
 0xc79   :  { %17253 = vmatmul.mubr.msk.bf16.vlgmr.msra.gmra.mxu0 %vm5399_vm2, %v5589_v56  ;;  %v18319_v56 = vld [vmem:[#allocation13 + $0x70] sm:$0xff]  }
 0xc7a   :  { %17257 = vmatpush3.bf16.msra.mxu0 %v20686_v39  ;;  %17272 = vmatprep.mubr.bf16.mxu0 %v18304_v36  ;;  %v18317_v36 = vld [vmem:[#allocation11 + $0x68] sm:$0xff]  }
 0xc7b   :  { %17258 = vmatprep.subr.bf16.mxu0 %v20691_v35 }
 0xc7e   :  { %17259 = vmatpush3.bf16.msra.mxu0 %v20691_v35 }
 0xc7f   :  { %17260 = vmatprep.subr.bf16.mxu0 %v20657_v59 }
 0xc82   :  { %17261 = vmatpush3.bf16.msra.mxu0 %v20657_v59 }
 0xc83   :  { %17262 = vmatprep.subr.bf16.mxu0 %v20713_v63 }
 0xc86   :  { %17263 = vmatpush3.bf16.msra.mxu0 %v20713_v63 }
 0xc87   :  { %17264 = vmatprep.subr.bf16.mxu0 %v20644_v41 }
 0xc8a   :  { %17265 = vmatpush3.bf16.msra.mxu0 %v20644_v41 }
 0xc8b   :  { %17266 = vmatprep.subr.bf16.mxu0 %v20729_v17 }
 0xc8e   :  { %17267 = vmatpush3.bf16.msra.mxu0 %v20729_v17 }
 0xc8f   :  { %17268 = vmatprep.subr.bf16.mxu0 %v20634_v5 }
 0xc92   :  { %17269 = vmatpush3.bf16.msra.mxu0 %v20634_v5 }
 0xc93   :  { %17270 = vmatprep.subr.bf16.mxu0 %v20740_v32 }
 0xc96   :  { %17271 = vmatpush3.bf16.msra.mxu0 %v20740_v32 }
 0xc97   :  { %17304 = vmatprep.subr.bf16.mxu0 %v18306_v58 }
 0xc99   :  { %17273 = vmatmul.mubr.bf16.vlgmr.msra.gmra.mxu0 %v18305_v14 }
 0xc9a   :  { %17305 = vmatpush3.bf16.msra.mxu0 %v18306_v58 }
 0xc9b   :  { %17306 = vmatprep.subr.bf16.mxu0 %v18307_v10 }
 0xc9e   :  { %17307 = vmatpush3.bf16.msra.mxu0 %v18307_v10 }
 0xc9f   :  { %17312 = vmatprep.subr.bf16.mxu0 %v20686_v39 }
 0xd39   :  { %v17254_v49 = vpop.f32.mrf.mxu0 }
 0xd3a   :  { %v5664_v61 = vadd.f32 %v17254_v49, %v5516_v60 }
 0xd3b   :  { %v5647_v3 = vpop.f32.mrf.mxu0 }
 0xd3c   :  { %v5662_v13 = vadd.f32 %v5647_v3, %v5508_v16 }
 0xd3d   :  { %v17255_v55 = vpop.f32.mrf.mxu0 }
 0xd3e   :  { %v5665_v7 = vadd.f32 %v17255_v55, %v5519_v44 }
 0xd3f   :  { %v20792_v51 = vpop.f32.mrf.mxu0 }
 0xd59   :  { %v17274_v22 = vpop.f32.mrf.mxu0 }
 0xd5b   :  { %v5717_v43 = vpop.f32.mrf.mxu0 }
 0xd5d   :  { %v17275_v19 = vpop.f32.mrf.mxu0 }
 0xd5e   :  { %v5733_v47 = vpack.c.bf16 %v17275_v19, %v17274_v22 }
 0xd5f   :  { %v5720_v24 = vpop.f32.mrf.mxu0 }
 0xd60   :  { %v5732_v27 = vpack.c.bf16 %v5720_v24, %v5717_v43  ;;  %v18320_v24 = vld [vmem:[#allocation11 + $0x70] sm:$0xff]  }
 0xd62   :  { %17280 = vmatprep.mubr.msk.bf16.mxu1 %vm5399_vm2, %v5732_v27 }
 0xd63   :  { %17281 = vmatmul.mubr.msk.bf16.vlgmr.msra.gmra.mxu1 %vm5399_vm2, %v5733_v47 }
 0xd64   :  { %17285 = vmatpush3.bf16.msra.mxu1 %v20686_v39  ;;  %17300 = vmatprep.mubr.bf16.mxu1 %v18308_v48  ;;  %v18321_v48 = vld [vmem:[#allocation11 + $0x78] sm:$0xff]  }
 0xd65   :  { %17286 = vmatprep.subr.bf16.mxu1 %v20691_v35 }
 0xd68   :  { %17287 = vmatpush3.bf16.msra.mxu1 %v20691_v35 }
 0xd69   :  { %17288 = vmatprep.subr.bf16.mxu1 %v20657_v59 }
 0xd6c   :  { %17289 = vmatpush3.bf16.msra.mxu1 %v20657_v59 }
 0xd6d   :  { %17290 = vmatprep.subr.bf16.mxu1 %v20713_v63 }
 0xd70   :  { %17291 = vmatpush3.bf16.msra.mxu1 %v20713_v63 }
 0xd71   :  { %17292 = vmatprep.subr.bf16.mxu1 %v20644_v41 }
 0xd74   :  { %17293 = vmatpush3.bf16.msra.mxu1 %v20644_v41 }
 0xd75   :  { %17294 = vmatprep.subr.bf16.mxu1 %v20729_v17 }
 0xd78   :  { %17295 = vmatpush3.bf16.msra.mxu1 %v20729_v17 }
 0xd79   :  { %17296 = vmatprep.subr.bf16.mxu1 %v20634_v5 }
 0xd7c   :  { %17297 = vmatpush3.bf16.msra.mxu1 %v20634_v5 }
 0xd7d   :  { %17298 = vmatprep.subr.bf16.mxu1 %v20740_v32 }
 0xd80   :  { %17299 = vmatpush3.bf16.msra.mxu1 %v20740_v32 }
 0xd81   :  { %17332 = vmatprep.subr.bf16.mxu1 %v18310_v53 }
 0xd83   :  { %17301 = vmatmul.mubr.bf16.vlgmr.msra.gmra.mxu1 %v18309_v57 }
 0xd84   :  { %17333 = vmatpush3.bf16.msra.mxu1 %v18310_v53 }
 0xd85   :  { %17334 = vmatprep.subr.bf16.mxu1 %v18311_v6 }
 0xd88   :  { %17335 = vmatpush3.bf16.msra.mxu1 %v18311_v6 }
 0xd89   :  { %17340 = vmatprep.subr.bf16.mxu1 %v20686_v39 }
 0xe23   :  { %v17282_v21 = vpop.f32.mrf.mxu1 }
 0xe24   :  { %v5808_v2 = vadd.f32 %v17282_v21, %v5664_v61 }
 0xe25   :  { %v5791_v40 = vpop.f32.mrf.mxu1 }
 0xe26   :  { %v5806_v62 = vadd.f32 %v5791_v40, %v5662_v13 }
 0xe27   :  { %v17283_v31 = vpop.f32.mrf.mxu1 }
 0xe28   :  { %v5809_v50 = vadd.f32 %v17283_v31, %v5665_v7 }
 0xe29   :  { %v20812_v28 = vpop.f32.mrf.mxu1 }
 0xe43   :  { %v17302_v29 = vpop.f32.mrf.mxu1 }
 0xe45   :  { %v5861_v15 = vpop.f32.mrf.mxu1 }
 0xe47   :  { %v17303_v25 = vpop.f32.mrf.mxu1 }
 0xe48   :  { %v5877_v9 = vpack.c.bf16 %v17303_v25, %v17302_v29  ;;  %v18322_v25 = vld [vmem:[#allocation11 + $0x80] sm:$0xff]  }
 0xe49   :  { %v5864_v4 = vpop.f32.mrf.mxu1 }
 0xe4a   :  { %v5876_v1 = vpack.c.bf16 %v5864_v4, %v5861_v15 }
 0xe4c   :  { %17308 = vmatprep.mubr.msk.bf16.mxu0 %vm5399_vm2, %v5876_v1 }
 0xe4d   :  { %17309 = vmatmul.mubr.msk.bf16.vlgmr.msra.gmra.mxu0 %vm5399_vm2, %v5877_v9 }
 0xe4e   :  { %17313 = vmatpush3.bf16.msra.mxu0 %v20686_v39  ;;  %17328 = vmatprep.mubr.bf16.mxu0 %v18312_v0 }
 0xe4f   :  { %17314 = vmatprep.subr.bf16.mxu0 %v20691_v35 }
 0xe52   :  { %17315 = vmatpush3.bf16.msra.mxu0 %v20691_v35 }
 0xe53   :  { %17316 = vmatprep.subr.bf16.mxu0 %v20657_v59 }
 0xe56   :  { %17317 = vmatpush3.bf16.msra.mxu0 %v20657_v59 }
 0xe57   :  { %17318 = vmatprep.subr.bf16.mxu0 %v20713_v63 }
 0xe5a   :  { %17319 = vmatpush3.bf16.msra.mxu0 %v20713_v63 }
 0xe5b   :  { %17320 = vmatprep.subr.bf16.mxu0 %v20644_v41 }
 0xe5e   :  { %17321 = vmatpush3.bf16.msra.mxu0 %v20644_v41 }
 0xe5f   :  { %17322 = vmatprep.subr.bf16.mxu0 %v20729_v17 }
 0xe62   :  { %17323 = vmatpush3.bf16.msra.mxu0 %v20729_v17 }
 0xe63   :  { %17324 = vmatprep.subr.bf16.mxu0 %v20634_v5 }
 0xe66   :  { %17325 = vmatpush3.bf16.msra.mxu0 %v20634_v5 }
 0xe67   :  { %17326 = vmatprep.subr.bf16.mxu0 %v20740_v32 }
 0xe6a   :  { %17327 = vmatpush3.bf16.msra.mxu0 %v20740_v32 }
 0xe6b   :  { %17360 = vmatprep.subr.bf16.mxu0 %v18314_v30 }
 0xe6d   :  { %17329 = vmatmul.mubr.bf16.vlgmr.msra.gmra.mxu0 %v18313_v20 }
 0xe6e   :  { %17361 = vmatpush3.bf16.msra.mxu0 %v18314_v30 }
 0xe6f   :  { %17362 = vmatprep.subr.bf16.mxu0 %v18315_v45 }
 0xe72   :  { %17363 = vmatpush3.bf16.msra.mxu0 %v18315_v45 }
 0xe73   :  { %17368 = vmatprep.subr.bf16.mxu0 %v20686_v39 }
 0xf0d   :  { %v17310_v12 = vpop.f32.mrf.mxu0 }
 0xf0e   :  { %v5952_v54 = vadd.f32 %v17310_v12, %v5808_v2 }
 0xf0f   :  { %v5935_v34 = vpop.f32.mrf.mxu0 }
 0xf10   :  { %v5950_v8 = vadd.f32 %v5935_v34, %v5806_v62  ;;  %v18963_v34 = vmov 0.0  }
 0xf11   :  { %v17311_v33 = vpop.f32.mrf.mxu0 }
 0xf12   :  { %v5953_v60 = vadd.f32 %v17311_v33, %v5809_v50  ;;  %v18327_v33 = vld [vmem:[#allocation17 + $0x30] sm:$0xff]  }
 0xf13   :  { %v20832_v23 = vpop.f32.mrf.mxu0 }
 0xf2d   :  { %v17330_v16 = vpop.f32.mrf.mxu0 }
 0xf2f   :  { %v6005_v37 = vpop.f32.mrf.mxu0 }
 0xf31   :  { %v17331_v44 = vpop.f32.mrf.mxu0 }
 0xf32   :  { %v6021_v11 = vpack.c.bf16 %v17331_v44, %v17330_v16 }
 0xf33   :  { %v6008_v26 = vpop.f32.mrf.mxu0 }
 0xf34   :  { %v6020_v38 = vpack.c.bf16 %v6008_v26, %v6005_v37 }
 0xf36   :  { %17336 = vmatprep.mubr.msk.bf16.mxu1 %vm5399_vm2, %v6020_v38 }
 0xf37   :  { %17337 = vmatmul.mubr.msk.bf16.vlgmr.msra.gmra.mxu1 %vm5399_vm2, %v6021_v11  ;;  %v14656_v11 = vld [vmem:[#allocation14] ss:$0 sm:$0xff] }
 0xf38   :  { %17341 = vmatpush3.bf16.msra.mxu1 %v20686_v39  ;;  %17356 = vmatprep.mubr.bf16.mxu1 %v18316_v42 }
 0xf39   :  { %17342 = vmatprep.subr.bf16.mxu1 %v20691_v35 }
 0xf3c   :  { %17343 = vmatpush3.bf16.msra.mxu1 %v20691_v35 }
 0xf3d   :  { %17344 = vmatprep.subr.bf16.mxu1 %v20657_v59 }
 0xf40   :  { %17345 = vmatpush3.bf16.msra.mxu1 %v20657_v59 }
 0xf41   :  { %17346 = vmatprep.subr.bf16.mxu1 %v20713_v63 }
 0xf44   :  { %17347 = vmatpush3.bf16.msra.mxu1 %v20713_v63 }
 0xf45   :  { %17348 = vmatprep.subr.bf16.mxu1 %v20644_v41 }
 0xf48   :  { %17349 = vmatpush3.bf16.msra.mxu1 %v20644_v41 }
 0xf49   :  { %17350 = vmatprep.subr.bf16.mxu1 %v20729_v17 }
 0xf4c   :  { %17351 = vmatpush3.bf16.msra.mxu1 %v20729_v17 }
 0xf4d   :  { %17352 = vmatprep.subr.bf16.mxu1 %v20634_v5 }
 0xf50   :  { %17353 = vmatpush3.bf16.msra.mxu1 %v20634_v5 }
 0xf51   :  { %17354 = vmatprep.subr.bf16.mxu1 %v20740_v32 }
 0xf54   :  { %17355 = vmatpush3.bf16.msra.mxu1 %v20740_v32 }
 0xf55   :  { %17388 = vmatprep.subr.bf16.mxu1 %v18318_v52 }
 0xf57   :  { %17357 = vmatmul.mubr.bf16.vlgmr.msra.gmra.mxu1 %v18317_v36 }
 0xf58   :  { %17389 = vmatpush3.bf16.msra.mxu1 %v18318_v52 }
 0xf59   :  { %17390 = vmatprep.subr.bf16.mxu1 %v18319_v56 }
 0xf5c   :  { %17391 = vmatpush3.bf16.msra.mxu1 %v18319_v56 }
 0xf5d   :  { %17396 = vmatprep.subr.bf16.mxu1 %v20686_v39 }
 0xff7   :  { %v17338_v58 = vpop.f32.mrf.mxu1 }
 0xff8   :  { %v6096_v14 = vadd.f32 %v17338_v58, %v5952_v54 }
 0xff9   :  { %v6079_v10 = vpop.f32.mrf.mxu1 }
 0xffa   :  { %v6094_v49 = vadd.f32 %v6079_v10, %v5950_v8  ;;  %v18326_v8 = vld [vmem:[#allocation17 + $0x38] sm:$0xff]  }
 0xffb   :  { %v17339_v61 = vpop.f32.mrf.mxu1 }
 0xffc   :  { %v6097_v3 = vadd.f32 %v17339_v61, %v5953_v60  ;;  %v5511_v60 = vadd.f32 %v20772_v46, %v20770_v18 }
 0xffd   :  { %v20852_v13 = vpop.f32.mrf.mxu1 }
 0xffe   :  { %v5663_v16 = vadd.f32 %v20792_v51, %v5511_v60 }
0x1000   :  { %v5807_v37 = vadd.f32 %v20812_v28, %v5663_v16 }
0x1002   :  { %v5951_v44 = vadd.f32 %v20832_v23, %v5807_v37 }
0x1004   :  { %v6095_v38 = vadd.f32 %v20852_v13, %v5951_v44 }
0x1017   :  { %v17358_v55 = vpop.f32.mrf.mxu1 }
0x1019   :  { %v6149_v7 = vpop.f32.mrf.mxu1 }
0x101b   :  { %v17359_v22 = vpop.f32.mrf.mxu1 }
0x101c   :  { %v6165_v27 = vpack.c.bf16 %v17359_v22, %v17358_v55 }
0x101d   :  { %v6152_v43 = vpop.f32.mrf.mxu1 }
0x101e   :  { %v6164_v19 = vpack.c.bf16 %v6152_v43, %v6149_v7  ;;  %v6547_v43 = vld [vmem:[#allocation16] sm:$0xf] }
0x1020   :  { %17364 = vmatprep.mubr.msk.bf16.mxu0 %vm5399_vm2, %v6164_v19  ;;  %v6601_v19 = vld [vmem:[#allocation16 + $0x4] sm:$0xf] }
0x1021   :  { %17365 = vmatmul.mubr.msk.bf16.vlgmr.msra.gmra.mxu0 %vm5399_vm2, %v6165_v27  ;;  %v18330_v27 = vld [vmem:[#allocation17 + $0x10] sm:$0xff]  }
0x1022   :  { %17369 = vmatpush3.bf16.msra.mxu0 %v20686_v39  ;;  %17384 = vmatprep.mubr.bf16.mxu0 %v18320_v24  ;;  %v18328_v24 = vld [vmem:[#allocation17 + $0x18] sm:$0xff]  }
0x1023   :  { %17370 = vmatprep.subr.bf16.mxu0 %v20691_v35 }
0x1026   :  { %17371 = vmatpush3.bf16.msra.mxu0 %v20691_v35 }
0x1027   :  { %17372 = vmatprep.subr.bf16.mxu0 %v20657_v59 }
0x102a   :  { %17373 = vmatpush3.bf16.msra.mxu0 %v20657_v59 }
0x102b   :  { %17374 = vmatprep.subr.bf16.mxu0 %v20713_v63 }
0x102e   :  { %17375 = vmatpush3.bf16.msra.mxu0 %v20713_v63 }
0x102f   :  { %17376 = vmatprep.subr.bf16.mxu0 %v20644_v41 }
0x1032   :  { %17377 = vmatpush3.bf16.msra.mxu0 %v20644_v41 }
0x1033   :  { %17378 = vmatprep.subr.bf16.mxu0 %v20729_v17 }
0x1036   :  { %17379 = vmatpush3.bf16.msra.mxu0 %v20729_v17 }
0x1037   :  { %17380 = vmatprep.subr.bf16.mxu0 %v20634_v5 }
0x103a   :  { %17381 = vmatpush3.bf16.msra.mxu0 %v20634_v5 }
0x103b   :  { %17382 = vmatprep.subr.bf16.mxu0 %v20740_v32 }
0x103e   :  { %17383 = vmatpush3.bf16.msra.mxu0 %v20740_v32 }
0x1041   :  { %17385 = vmatmul.mubr.bf16.vlgmr.msra.gmra.mxu0 %v18321_v48  ;;  %v18332_v48 = vld [vmem:[#allocation17 + $0x8] sm:$0xff]  }
0x10e1   :  { %v17366_v47 = vpop.f32.mrf.mxu0 }
0x10e2   :  { %v6240_v53 = vadd.f32 %v17366_v47, %v6096_v14  ;;  %v18333_v47 = vld [vmem:[#allocation17] sm:$0xff]  }
0x10e3   :  { %v6223_v57 = vpop.f32.mrf.mxu0 }
0x10e4   :  { %v6238_v6 = vadd.f32 %v6223_v57, %v6094_v49  ;;  %v18331_v57 = vld [vmem:[#allocation17 + $0x20] sm:$0xff]  }
0x10e5   :  { %v17367_v21 = vpop.f32.mrf.mxu0 }
0x10e6   :  { %v6241_v2 = vadd.f32 %v17367_v21, %v6097_v3  ;;  %v18334_v21 = vld [vmem:[#allocation17 + $0x58] sm:$0xff]  }
0x10e7   :  { %v20871_v40 = vpop.f32.mrf.mxu0 }
0x10e8   :  { %v6239_v36 = vadd.f32 %v20871_v40, %v6095_v38 }
0x1101   :  { %v17386_v62 = vpop.f32.mrf.mxu0 }
0x1103   :  { %v6293_v31 = vpop.f32.mrf.mxu0 }
0x1105   :  { %v17387_v50 = vpop.f32.mrf.mxu0 }
0x1106   :  { %v6309_v4 = vpack.c.bf16 %v17387_v50, %v17386_v62 }
0x1107   :  { %v6296_v29 = vpop.f32.mrf.mxu0 }
0x1108   :  { %v6308_v15 = vpack.c.bf16 %v6296_v29, %v6293_v31  ;;  %v18335_v31 = vld [vmem:[#allocation17 + $0x50] sm:$0xff]  }
0x110a   :  { %17392 = vmatprep.mubr.msk.bf16.mxu1 %vm5399_vm2, %v6308_v15 }
0x110b   :  { %17393 = vmatmul.mubr.msk.bf16.vlgmr.msra.gmra.mxu1 %vm5399_vm2, %v6309_v4 }
0x110c   :  { %17397 = vmatpush3.bf16.msra.mxu1 %v20686_v39  ;;  %17412 = vmatprep.mubr.bf16.mxu1 %v18322_v25  ;;  %v18323_v39 = vld [vmem:[#allocation11 + $0x88] sm:$0xff]  }
0x110d   :  { %17398 = vmatprep.subr.bf16.mxu1 %v20691_v35 }
0x1110   :  { %17399 = vmatpush3.bf16.msra.mxu1 %v20691_v35  ;;  %v18325_v35 = vld [vmem:[#allocation13 + $0x80] sm:$0xff]  }
0x1111   :  { %17400 = vmatprep.subr.bf16.mxu1 %v20657_v59 }
0x1114   :  { %17401 = vmatpush3.bf16.msra.mxu1 %v20657_v59  ;;  %v18324_v59 = vld [vmem:[#allocation13 + $0x88] sm:$0xff]  }
0x1115   :  { %17402 = vmatprep.subr.bf16.mxu1 %v20713_v63  ;;  %17416 = vmatprep.subr.bf16.mxu0 %v18324_v59 }
0x1116   :  { %17417 = vmatpush3.bf16.msra.mxu0 %v18324_v59  ;;  %v6791_v59 = vld [vmem:[#allocation16 + $0x8] sm:$0xf] }
0x1117   :  { %17418 = vmatprep.subr.bf16.mxu0 %v18325_v35 }
0x1118   :  { %17403 = vmatpush3.bf16.msra.mxu1 %v20713_v63 }
0x1119   :  { %17404 = vmatprep.subr.bf16.mxu1 %v20644_v41 }
0x111a   :  { %17419 = vmatpush3.bf16.msra.mxu0 %v18325_v35  ;;  %v6914_v35 = vld [vmem:[#allocation16 + $0xc] sm:$0xf] }
0x111b   :  { %17424 = vmatprep.subr.bf16.mxu0 %v18963_v34 }
0x111c   :  { %17405 = vmatpush3.bf16.msra.mxu1 %v20644_v41 }
0x111d   :  { %17406 = vmatprep.subr.bf16.mxu1 %v20729_v17 }
0x1120   :  { %17407 = vmatpush3.bf16.msra.mxu1 %v20729_v17 }
0x1121   :  { %17408 = vmatprep.subr.bf16.mxu1 %v20634_v5 }
0x1124   :  { %17409 = vmatpush3.bf16.msra.mxu1 %v20634_v5 }
0x1125   :  { %17410 = vmatprep.subr.bf16.mxu1 %v20740_v32 }
0x1128   :  { %17411 = vmatpush3.bf16.msra.mxu1 %v20740_v32 }
0x1129   :  { %17440 = vmatprep.subr.bf16.mxu1 %v18963_v34 }
0x112b   :  { %17413 = vmatmul.mubr.bf16.vlgmr.msra.gmra.mxu1 %v18323_v39 }
0x112c   :  { %17448 = vmatprep.mubr.msk.bf16.mxu1 %vm18964_vm3, %v18963_v34  ;;  %17441 = vmatpush3.bf16.msra.mxu1 %v18326_v8 }
0x112d   :  { %17442 = vmatprep.subr.bf16.mxu1 %v18963_v34 }
0x1130   :  { %17443 = vmatpush3.bf16.msra.mxu1 %v18327_v33 }
0x1131   :  { %17444 = vmatprep.subr.bf16.mxu1 %v18963_v34 }
0x11cb   :  { %v17394_v41 = vpop.f32.mrf.mxu1 }
0x11cc   :  { %v6384_v63 = vadd.f32 %v17394_v41, %v6240_v53  ;;  %v18329_v53 = vld [vmem:[#allocation17 + $0x28] sm:$0xff]  }
0x11cd   :  { %v6367_v1 = vpop.f32.mrf.mxu1  ;;  %17445 = vmatpush3.bf16.msra.mxu1 %v18329_v53  ;;  %v18336_v41 = vld [vmem:[#allocation17 + $0x48] sm:$0xff]  }
0x11ce   :  { %v6382_v17 = vadd.f32 %v6367_v1, %v6238_v6  ;;  %17446 = vmatprep.subr.bf16.mxu1 %v18963_v34  ;;  %v18338_v1 = vld [vmem:[#allocation17 + $0x40] sm:$0xff]  }
0x11cf   :  { %v17395_v0 = vpop.f32.mrf.mxu1 }
0x11d0   :  { %v6385_v9 = vadd.f32 %v17395_v0, %v6241_v2  ;;  %v18340_v0 = vld [vmem:[#allocation17 + $0x68] sm:$0xff]  }
0x11d1   :  { %v6370_v30 = vpop.f32.mrf.mxu1  ;;  %17447 = vmatpush3.bf16.msra.mxu1 %v18331_v57 }
0x11d2   :  { %v6383_v58 = vadd.f32 %v6370_v30, %v6239_v36  ;;  %17464 = vmatprep.subr.bf16.mxu1 %v18963_v34 }
0x11eb   :  { %v17414_v5 = vpop.f32.mrf.mxu1 }
0x11ed   :  { %v6437_v20 = vpop.f32.mrf.mxu1 }
0x11ef   :  { %v17415_v45 = vpop.f32.mrf.mxu1 }
0x11f0   :  { %v6453_v32 = vpack.c.bf16 %v17415_v45, %v17414_v5 }
0x11f1   :  { %v6440_v12 = vpop.f32.mrf.mxu1 }
0x11f2   :  { %v6452_v54 = vpack.c.bf16 %v6440_v12, %v6437_v20 }
0x11f4   :  { %17420 = vmatprep.mubr.msk.bf16.mxu0 %vm5399_vm2, %v6452_v54 }
0x11f5   :  { %17421 = vmatmul.mubr.msk.bf16.vlgmr.msra.gmra.mxu0 %vm5399_vm2, %v6453_v32 }
0x11f6   :  { %17428 = vmatprep.mubr.msk.bf16.mxu0 %vm18964_vm3, %v18963_v34 }
0x12b5   :  { %v17422_v26 = vpop.f32.mrf.mxu0 }
0x12b6   :  { %v6528_v42 = vadd.f32 %v17422_v26, %v6384_v63  ;;  %v18337_v63 = vld [vmem:[#allocation17 + $0x78] sm:$0xff]  }
0x12b7   :  { %v6511_v52 = vpop.f32.mrf.mxu0 }
0x12b8   :  { %v6539_v14 = vadd.f32 %v14656_v11, %v6528_v42  ;;  %v6526_v10 = vadd.f32 %v6511_v52, %v6382_v17  ;;  %v18339_v17 = vld [vmem:[#allocation17 + $0x70] sm:$0xff]   ;;  %v7037_v42 = vld [vmem:[#allocation16 + $0x10] sm:$0xf]  ;;  %v18342_v52 = vld [vmem:[#allocation17 + $0x98] sm:$0xff]  }
0x12b9   :  { %v17423_v56 = vpop.f32.mrf.mxu0 }
0x12ba   :  { %v6529_v49 = vadd.f32 %v17423_v56, %v6385_v9  ;;  %v6543_v61 = vmax.f32 %v6539_v14, 0.0  ;;  %v6537_v28 = vadd.f32 %v14656_v11, %v6526_v10  ;;  %v18341_v9 = vld [vmem:[#allocation17 + $0x60] sm:$0xff]   ;;  %v7160_v10 = vld [vmem:[#allocation16 + $0x14] sm:$0xf] }
0x12bb   :  { %v6514_v18 = vpop.f32.mrf.mxu0 }
0x12bc   :  { %v6540_v46 = vadd.f32 %v14656_v11, %v6529_v49  ;;  %v6527_v51 = vadd.f32 %v6514_v18, %v6383_v58  ;;  %v6541_v7 = vmax.f32 %v6537_v28, 0.0  ;;  %v18343_v58 = vld [vmem:[#allocation17 + $0x90] sm:$0xff]   ;;  %v18344_v49 = vld [vmem:[#allocation17 + $0x88] sm:$0xff]   ;;  %v18345_v18 = vld [vmem:[#allocation17 + $0xb8] sm:$0xff]  }
0x12bd   :  { %v18349_v28 = vld [vmem:[#allocation17 + $0xa0] sm:$0xff]  }
0x12be   :  { %v6544_v3 = vmax.f32 %v6540_v46, 0.0  ;;  %v6538_v23 = vadd.f32 %v14656_v11, %v6527_v51  ;;  %v18346_v46 = vld [vmem:[#allocation17 + $0x80] sm:$0xff]   ;;  %v18347_v51 = vld [vmem:[#allocation17 + $0xb0] sm:$0xff]  }
0x12c0   :  { %v20907_v55 = vpack.c.bf16 %v6544_v3, %v6543_v61  ;;  %v6542_v13 = vmax.f32 %v6538_v23, 0.0  ;;  %v18348_v61 = vld [vmem:[#allocation17 + $0xa8] sm:$0xff]  }
0x12c2   :  { %17425 = vmatpush3.bf16.msra.mxu0 %v20907_v55  ;;  %v20911_v22 = vpack.c.bf16 %v6542_v13, %v6541_v7 }
0x12c3   :  { %17426 = vmatprep.subr.bf16.mxu0 %v18963_v34 }
0x12c6   :  { %17427 = vmatpush3.bf16.msra.mxu0 %v20911_v22 }
0x12c7   :  { %17432 = vmatprep.subr.bf16.mxu0 %v18963_v34 }
0x12c9   :  { %17429 = vmatmul.mubr.msk.bf16.vlgmr.msra.gmra.mxu0 %vm5399_vm2, %v6547_v43 }
0x12ca   :  { %17433 = vmatpush3.bf16.msra.mxu0 %v20907_v55  ;;  %17436 = vmatprep.mubr.msk.bf16.mxu0 %vm18964_vm3, %v18963_v34 }
0x12cb   :  { %17434 = vmatprep.subr.bf16.mxu0 %v18963_v34 }
0x12ce   :  { %17435 = vmatpush3.bf16.msra.mxu0 %v20911_v22 }
0x12cf   :  { %17452 = vmatprep.subr.bf16.mxu0 %v18963_v34 }
0x12d1   :  { %17437 = vmatmul.mubr.msk.bf16.vlgmr.msra.gmra.mxu0 %vm5399_vm2, %v6601_v19 }
0x12d2   :  { %17460 = vmatprep.mubr.msk.bf16.mxu0 %vm18964_vm3, %v18963_v34  ;;  %17453 = vmatpush3.bf16.msra.mxu0 %v18328_v24 }
0x12d3   :  { %17454 = vmatprep.subr.bf16.mxu0 %v18963_v34 }
0x12d6   :  { %17455 = vmatpush3.bf16.msra.mxu0 %v18330_v27 }
0x12d7   :  { %17456 = vmatprep.subr.bf16.mxu0 %v18963_v34 }
0x12da   :  { %17457 = vmatpush3.bf16.msra.mxu0 %v18332_v48 }
0x12db   :  { %17458 = vmatprep.subr.bf16.mxu0 %v18963_v34 }
0x12de   :  { %17459 = vmatpush3.bf16.msra.mxu0 %v18333_v47 }
0x12df   :  { %17472 = vmatprep.subr.bf16.mxu0 %v18963_v34 }
0x1389   :  { %v6585_v6 = vpop.f32.mrf.mxu0 }
0x138a   :  { %v6591_v2 = vpack.c.bf16 %v6585_v6, %v6585_v6 }
0x138b   :  { %v17430_v40 = vpop.f32.mrf.mxu0 }
0x138c   :  { %17461 = vmatmul.mubr.msk.bf16.vlgmr.msra.gmra.mxu0 %vm6679_vm4, %v6591_v2 }
0x138d   :  { %v6588_v62 = vpop.f32.mrf.mxu0  ;;  %17473 = vmatpush3.bf16.msra.mxu0 %v18334_v21  ;;  %17480 = vmatprep.mubr.msk.bf16.mxu0 %vm18964_vm3, %v18963_v34 }
0x138e   :  { %17474 = vmatprep.subr.bf16.mxu0 %v18963_v34  ;;  %v7283_v62 = vld [vmem:[#allocation16 + $0x18] sm:$0xf] }
0x138f   :  { %v17431_v50 = vpop.f32.mrf.mxu0 }
0x1390   :  { %v18350_v50 = vld [vmem:[#allocation17 + $0xd8] sm:$0xff]  }
0x1391   :  { %v6639_v29 = vpop.f32.mrf.mxu0  ;;  %17475 = vmatpush3.bf16.msra.mxu0 %v18335_v31 }
0x1392   :  { %v6645_v15 = vpack.c.bf16 %v6639_v29, %v6639_v29  ;;  %17476 = vmatprep.subr.bf16.mxu0 %v18963_v34 }
0x1393   :  { %v17438_v25 = vpop.f32.mrf.mxu0 }
0x1394   :  { %17449 = vmatmul.mubr.msk.bf16.vlgmr.msra.gmra.mxu1 %vm6679_vm4, %v6645_v15  ;;  %v18351_v25 = vld [vmem:[#allocation17 + $0xd0] sm:$0xff]  }
0x1395   :  { %17465 = vmatpush3.bf16.msra.mxu1 %v20907_v55  ;;  %17468 = vmatprep.mubr.msk.bf16.mxu1 %vm18964_vm3, %v18963_v34  ;;  %v6642_v4 = vpop.f32.mrf.mxu0 }
0x1396   :  { %17466 = vmatprep.subr.bf16.mxu1 %v18963_v34  ;;  %17477 = vmatpush3.bf16.msra.mxu0 %v18336_v41  ;;  %v18354_v41 = vld [vmem:[#allocation17 + $0xc0] sm:$0xff]  }
0x1397   :  { %v17439_v39 = vpop.f32.mrf.mxu0  ;;  %17478 = vmatprep.subr.bf16.mxu0 %v18963_v34 }
0x1398   :  { %v7406_v39 = vld [vmem:[#allocation16 + $0x1c] sm:$0xf] }
0x1399   :  { %17467 = vmatpush3.bf16.msra.mxu1 %v20911_v22 }
0x139a   :  { %17484 = vmatprep.subr.bf16.mxu1 %v18963_v34  ;;  %17479 = vmatpush3.bf16.msra.mxu0 %v18338_v1  ;;  %v18356_v1 = vld [vmem:[#allocation17 + $0xe8] sm:$0xff]  }
0x139b   :  { %17504 = vmatprep.subr.bf16.mxu0 %v18963_v34 }
0x139c   :  { %17469 = vmatmul.mubr.msk.bf16.vlgmr.msra.gmra.mxu1 %vm5399_vm2, %v6791_v59  ;;  %v18352_v59 = vld [vmem:[#allocation17 + $0xc8] sm:$0xff]  }
0x139d   :  { %17485 = vmatpush3.bf16.msra.mxu1 %v20907_v55  ;;  %17488 = vmatprep.mubr.msk.bf16.mxu1 %vm18964_vm3, %v18963_v34 }
0x139e   :  { %17486 = vmatprep.subr.bf16.mxu1 %v18963_v34 }
0x13a1   :  { %17487 = vmatpush3.bf16.msra.mxu1 %v20911_v22 }
0x13a2   :  { %17492 = vmatprep.subr.bf16.mxu1 %v18963_v34 }
0x13a4   :  { %17489 = vmatmul.mubr.msk.bf16.vlgmr.msra.gmra.mxu1 %vm5399_vm2, %v6914_v35  ;;  %v18353_v35 = vld [vmem:[#allocation17 + $0xf8] sm:$0xff]  }
0x13a5   :  { %17500 = vmatprep.mubr.msk.bf16.mxu1 %vm18964_vm3, %v18963_v34  ;;  %17493 = vmatpush3.bf16.msra.mxu1 %v18337_v63  ;;  %v18355_v63 = vld [vmem:[#allocation17 + $0xf0] sm:$0xff]  }
0x13a6   :  { %17494 = vmatprep.subr.bf16.mxu1 %v18963_v34 }
0x13a9   :  { %17495 = vmatpush3.bf16.msra.mxu1 %v18339_v17  ;;  %v18357_v17 = vld [vmem:[#allocation17 + $0xe0] sm:$0xff]  }
0x13aa   :  { %17496 = vmatprep.subr.bf16.mxu1 %v18963_v34 }
0x13ad   :  { %17497 = vmatpush3.bf16.msra.mxu1 %v18340_v0 }
0x13ae   :  { %17498 = vmatprep.subr.bf16.mxu1 %v18963_v34 }
0x13b1   :  { %17499 = vmatpush3.bf16.msra.mxu1 %v18341_v9 }
0x13b2   :  { %17524 = vmatprep.subr.bf16.mxu1 %v18963_v34 }
0x144c   :  { %v6784_v30 = vpop.f32.mrf.mxu0 }
0x144e   :  { %v17462_v5 = vpop.f32.mrf.mxu0 }
0x1450   :  { %v6787_v20 = vpop.f32.mrf.mxu0 }
0x1452   :  { %v17463_v45 = vpop.f32.mrf.mxu0 }
0x1454   :  { %v6717_v12 = vpop.f32.mrf.mxu1 }
0x1455   :  { %v6785_v54 = vadd.f32 %v6784_v30, %v6717_v12 }
0x1456   :  { %v17450_v32 = vpop.f32.mrf.mxu1 }
0x1458   :  { %v6720_v8 = vpop.f32.mrf.mxu1 }
0x145a   :  { %v17451_v33 = vpop.f32.mrf.mxu1 }
0x145c   :  { %v6829_v60 = vpop.f32.mrf.mxu1 }
0x145d   :  { %v6835_v16 = vpack.c.bf16 %v6829_v60, %v6829_v60 }
0x145e   :  { %v17470_v37 = vpop.f32.mrf.mxu1 }
0x145f   :  { %17481 = vmatmul.mubr.msk.bf16.vlgmr.msra.gmra.mxu0 %vm6679_vm4, %v6835_v16 }
0x1460   :  { %17505 = vmatpush3.bf16.msra.mxu0 %v20907_v55  ;;  %v6832_v44 = vpop.f32.mrf.mxu1  ;;  %17508 = vmatprep.mubr.msk.bf16.mxu0 %vm18964_vm3, %v18963_v34 }
0x1461   :  { %17506 = vmatprep.subr.bf16.mxu0 %v18963_v34 }
0x1462   :  { %v17471_v26 = vpop.f32.mrf.mxu1 }
0x1464   :  { %17507 = vmatpush3.bf16.msra.mxu0 %v20911_v22  ;;  %v6952_v38 = vpop.f32.mrf.mxu1 }
0x1465   :  { %v6958_v11 = vpack.c.bf16 %v6952_v38, %v6952_v38  ;;  %17512 = vmatprep.subr.bf16.mxu0 %v18963_v34  ;;  %v7529_v38 = vld [vmem:[#allocation16 + $0x20] sm:$0xf] }
0x1466   :  { %v17490_v36 = vpop.f32.mrf.mxu1 }
0x1467   :  { %17501 = vmatmul.mubr.msk.bf16.vlgmr.msra.gmra.mxu1 %vm6679_vm4, %v6958_v11  ;;  %17509 = vmatmul.mubr.msk.bf16.vlgmr.msra.gmra.mxu0 %vm5399_vm2, %v7037_v42  ;;  %v18358_v42 = vld [vmem:[#allocation17 + $0x118] sm:$0xff]   ;;  %v18359_v36 = vld [vmem:[#allocation17 + $0x110] sm:$0xff]  }
0x1468   :  { %17525 = vmatpush3.bf16.msra.mxu1 %v20907_v55  ;;  %17528 = vmatprep.mubr.msk.bf16.mxu1 %vm18964_vm3, %v18963_v34  ;;  %v6955_v56 = vpop.f32.mrf.mxu1 }
0x1469   :  { %17526 = vmatprep.subr.bf16.mxu1 %v18963_v34  ;;  %17513 = vmatpush3.bf16.msra.mxu0 %v18342_v52  ;;  %v18360_v56 = vld [vmem:[#allocation17 + $0x108] sm:$0xff]  }
0x146a   :  { %17514 = vmatprep.subr.bf16.mxu0 %v18963_v34  ;;  %v17491_v14 = vpop.f32.mrf.mxu1  ;;  %17520 = vmatprep.mubr.msk.bf16.mxu0 %vm18964_vm3, %v18963_v34 }
0x146c   :  { %17527 = vmatpush3.bf16.msra.mxu1 %v20911_v22 }
0x146d   :  { %17515 = vmatpush3.bf16.msra.mxu0 %v18343_v58  ;;  %17532 = vmatprep.subr.bf16.mxu1 %v18963_v34  ;;  %v18361_v58 = vld [vmem:[#allocation17 + $0x100] sm:$0xff]  }
0x146e   :  { %17516 = vmatprep.subr.bf16.mxu0 %v18963_v34 }
0x146f   :  { %17529 = vmatmul.mubr.msk.bf16.vlgmr.msra.gmra.mxu1 %vm5399_vm2, %v7160_v10 }
0x1470   :  { %17540 = vmatprep.mubr.msk.bf16.mxu1 %vm18964_vm3, %v18963_v34  ;;  %17533 = vmatpush3.bf16.msra.mxu1 %v18345_v18 }
0x1471   :  { %17517 = vmatpush3.bf16.msra.mxu0 %v18344_v49  ;;  %17534 = vmatprep.subr.bf16.mxu1 %v18963_v34 }
0x1472   :  { %17518 = vmatprep.subr.bf16.mxu0 %v18963_v34 }
0x1474   :  { %17535 = vmatpush3.bf16.msra.mxu1 %v18347_v51 }
0x1475   :  { %17519 = vmatpush3.bf16.msra.mxu0 %v18346_v46  ;;  %17536 = vmatprep.subr.bf16.mxu1 %v18963_v34 }
0x1476   :  { %17544 = vmatprep.subr.bf16.mxu0 %v18963_v34 }
0x1478   :  { %17537 = vmatpush3.bf16.msra.mxu1 %v18348_v61 }
0x1479   :  { %17538 = vmatprep.subr.bf16.mxu1 %v18963_v34 }
0x147c   :  { %17539 = vmatpush3.bf16.msra.mxu1 %v18349_v28 }
0x147d   :  { %17564 = vmatprep.subr.bf16.mxu1 %v18963_v34 }
0x151f   :  { %v6906_v3 = vpop.f32.mrf.mxu0 }
0x1520   :  { %v6912_v23 = vadd.f32 %v6906_v3, %v6785_v54 }
0x1521   :  { %v17482_v13 = vpop.f32.mrf.mxu0 }
0x1523   :  { %v6909_v7 = vpop.f32.mrf.mxu0 }
0x1525   :  { %v17483_v43 = vpop.f32.mrf.mxu0 }
0x1527   :  { %v7029_v19 = vpop.f32.mrf.mxu1  ;;  %v7075_v24 = vpop.f32.mrf.mxu0 }
0x1528   :  { %v7035_v27 = vadd.f32 %v7029_v19, %v6912_v23  ;;  %v7081_v48 = vpack.c.bf16 %v7075_v24, %v7075_v24 }
0x1529   :  { %v17502_v47 = vpop.f32.mrf.mxu1  ;;  %v17510_v53 = vpop.f32.mrf.mxu0 }
0x152a   :  { %17521 = vmatmul.mubr.msk.bf16.vlgmr.msra.gmra.mxu0 %vm6679_vm4, %v7081_v48  ;;  %v18363_v48 = vld [vmem:[#allocation20 + $0x50] sm:$0xff]   ;;  %v18364_v47 = vld [vmem:[#allocation20 + $0x48] sm:$0xff]   ;;  %v18365_v53 = vld [vmem:[#allocation20 + $0x40] sm:$0xff]  }
0x152b   :  { %17545 = vmatpush3.bf16.msra.mxu0 %v20907_v55  ;;  %v7032_v57 = vpop.f32.mrf.mxu1  ;;  %17548 = vmatprep.mubr.msk.bf16.mxu0 %vm18964_vm3, %v18963_v34  ;;  %v7078_v6 = vpop.f32.mrf.mxu0 }
0x152c   :  { %17546 = vmatprep.subr.bf16.mxu0 %v18963_v34  ;;  %v14711_v6 = vld [vmem:[#allocation19] ss:$0 sm:$0xff] }
0x152d   :  { %v17503_v21 = vpop.f32.mrf.mxu1  ;;  %v17511_v2 = vpop.f32.mrf.mxu0 }
0x152f   :  { %17547 = vmatpush3.bf16.msra.mxu0 %v20911_v22  ;;  %v7198_v40 = vpop.f32.mrf.mxu1 }
0x1530   :  { %v7204_v31 = vpack.c.bf16 %v7198_v40, %v7198_v40  ;;  %17552 = vmatprep.subr.bf16.mxu0 %v18963_v34 }
0x1531   :  { %v17530_v29 = vpop.f32.mrf.mxu1 }
0x1532   :  { %17541 = vmatmul.mubr.msk.bf16.vlgmr.msra.gmra.mxu1 %vm6679_vm4, %v7204_v31  ;;  %17549 = vmatmul.mubr.msk.bf16.vlgmr.msra.gmra.mxu0 %vm5399_vm2, %v7283_v62 }
0x1533   :  { %17565 = vmatpush3.bf16.msra.mxu1 %v20907_v55  ;;  %17568 = vmatprep.mubr.msk.bf16.mxu1 %vm18964_vm3, %v18963_v34  ;;  %v7201_v15 = vpop.f32.mrf.mxu1 }
0x1534   :  { %17566 = vmatprep.subr.bf16.mxu1 %v18963_v34  ;;  %17553 = vmatpush3.bf16.msra.mxu0 %v18350_v50 }
0x1535   :  { %17554 = vmatprep.subr.bf16.mxu0 %v18963_v34  ;;  %v17531_v4 = vpop.f32.mrf.mxu1  ;;  %17560 = vmatprep.mubr.msk.bf16.mxu0 %vm18964_vm3, %v18963_v34 }
0x1536   :  { %v14713_v4 = vld [vmem:[%s21504_s12 + $0x1] sm:$0x1] }
0x1537   :  { %17567 = vmatpush3.bf16.msra.mxu1 %v20911_v22 }
0x1538   :  { %17555 = vmatpush3.bf16.msra.mxu0 %v18351_v25  ;;  %17572 = vmatprep.subr.bf16.mxu1 %v18963_v34  ;;  %v7661_v25 = vld [vmem:[%s21504_s12] sm:$0x1] }
0x1539   :  { %17556 = vmatprep.subr.bf16.mxu0 %v18963_v34 }
0x153a   :  { %17569 = vmatmul.mubr.msk.bf16.vlgmr.msra.gmra.mxu1 %vm5399_vm2, %v7406_v39  ;;  %v18366_v39 = vld [vmem:[#allocation20 + $0x28] sm:$0xff]  }
0x153b   :  { %17580 = vmatprep.mubr.msk.bf16.mxu1 %vm18964_vm3, %v18963_v34  ;;  %17573 = vmatpush3.bf16.msra.mxu1 %v18353_v35  ;;  %v18370_v35 = vld [vmem:[#allocation20 + $0x18] sm:$0xff]  }
0x153c   :  { %17557 = vmatpush3.bf16.msra.mxu0 %v18352_v59  ;;  %17574 = vmatprep.subr.bf16.mxu1 %v18963_v34  ;;  %v18368_v59 = vld [vmem:[#allocation20 + $0x20] sm:$0xff]  }
0x153d   :  { %17558 = vmatprep.subr.bf16.mxu0 %v18963_v34 }
0x153f   :  { %17575 = vmatpush3.bf16.msra.mxu1 %v18355_v63  ;;  %v18372_v63 = vld [vmem:[#allocation20 + $0x8] sm:$0xff]  }
0x1540   :  { %17559 = vmatpush3.bf16.msra.mxu0 %v18354_v41  ;;  %17576 = vmatprep.subr.bf16.mxu1 %v18963_v34  ;;  %v18371_v41 = vld [vmem:[#allocation20 + $0x10] sm:$0xff]  }
0x1541   :  { %17584 = vmatprep.subr.bf16.mxu0 %v18963_v34 }
0x1543   :  { %17577 = vmatpush3.bf16.msra.mxu1 %v18356_v1  ;;  %v18373_v1 = vld [vmem:[#allocation20] sm:$0xff]  }
0x1544   :  { %17578 = vmatprep.subr.bf16.mxu1 %v18963_v34 }
0x1547   :  { %17579 = vmatpush3.bf16.msra.mxu1 %v18357_v17  ;;  %v18367_v17 = vld [vmem:[#allocation20 + $0x38] sm:$0xff]  }
0x1548   :  { %17604 = vmatprep.subr.bf16.mxu1 %v18963_v34 }
0x15ea   :  { %v7152_v0 = vpop.f32.mrf.mxu0 }
0x15eb   :  { %v7158_v9 = vadd.f32 %v7152_v0, %v7035_v27  ;;  %v18362_v27 = vld [vmem:[#allocation20 + $0x58] sm:$0xff]   ;;  %v18369_v0 = vld [vmem:[#allocation20 + $0x30] sm:$0xff]  }
0x15ec   :  { %v17522_v30 = vpop.f32.mrf.mxu0 }
0x15ed   :  { %v18374_v30 = vld [vmem:[#allocation20 + $0x88] sm:$0xff]  }
0x15ee   :  { %v7155_v5 = vpop.f32.mrf.mxu0 }
0x15f0   :  { %v17523_v20 = vpop.f32.mrf.mxu0 }
0x15f2   :  { %v7275_v45 = vpop.f32.mrf.mxu1  ;;  %v7321_v12 = vpop.f32.mrf.mxu0 }
0x15f3   :  { %v7281_v54 = vadd.f32 %v7275_v45, %v7158_v9  ;;  %v7327_v32 = vpack.c.bf16 %v7321_v12, %v7321_v12  ;;  %v18375_v12 = vld [vmem:[#allocation20 + $0x80] sm:$0xff]  }
0x15f4   :  { %v17542_v8 = vpop.f32.mrf.mxu1  ;;  %v17550_v33 = vpop.f32.mrf.mxu0 }
0x15f5   :  { %17561 = vmatmul.mubr.msk.bf16.vlgmr.msra.gmra.mxu0 %vm6679_vm4, %v7327_v32  ;;  %v18376_v33 = vld [vmem:[#allocation20 + $0x78] sm:$0xff]  }
0x15f6   :  { %17585 = vmatpush3.bf16.msra.mxu0 %v20907_v55  ;;  %v7278_v60 = vpop.f32.mrf.mxu1  ;;  %17588 = vmatprep.mubr.msk.bf16.mxu0 %vm18964_vm3, %v18963_v34  ;;  %v7324_v16 = vpop.f32.mrf.mxu0 }
0x15f7   :  { %17586 = vmatprep.subr.bf16.mxu0 %v18963_v34 }
0x15f8   :  { %v17543_v37 = vpop.f32.mrf.mxu1  ;;  %v17551_v44 = vpop.f32.mrf.mxu0 }
0x15f9   :  { %v18378_v37 = vld [vmem:[#allocation20 + $0x70] sm:$0xff]  }
0x15fa   :  { %17587 = vmatpush3.bf16.msra.mxu0 %v20911_v22  ;;  %v7444_v26 = vpop.f32.mrf.mxu1 }
0x15fb   :  { %v7450_v11 = vpack.c.bf16 %v7444_v26, %v7444_v26  ;;  %17592 = vmatprep.subr.bf16.mxu0 %v18963_v34  ;;  %v14729_v26 = vld [vmem:[%s21504_s12 + $0x2] sm:$0x1] }
0x15fc   :  { %v17570_v52 = vpop.f32.mrf.mxu1 }
0x15fd   :  { %17581 = vmatmul.mubr.msk.bf16.vlgmr.msra.gmra.mxu1 %vm6679_vm4, %v7450_v11  ;;  %17589 = vmatmul.mubr.msk.bf16.vlgmr.msra.gmra.mxu0 %vm5399_vm2, %v7529_v38  ;;  %v14738_v38 = vld [vmem:[%s21504_s12 + $0x3] sm:$0x1]  ;;  %v18380_v52 = vld [vmem:[#allocation20 + $0x68] sm:$0xff]  }
0x15fe   :  { %17593 = vmatpush3.bf16.msra.mxu0 %v18358_v42  ;;  %v7447_v55 = vpop.f32.mrf.mxu1  ;;  %17600 = vmatprep.mubr.msk.bf16.mxu0 %vm18964_vm3, %v18963_v34  ;;  %v18377_v42 = vld [vmem:[#allocation20 + $0xb8] sm:$0xff]   ;;  %v18379_v11 = vld [vmem:[#allocation20 + $0xb0] sm:$0xff]  }
0x15ff   :  { %17594 = vmatprep.subr.bf16.mxu0 %v18963_v34  ;;  %17606 = vmatprep.mubr.msk.bf16.mxu1 %vm18964_vm3, %v18963_v34  ;;  %v18381_v55 = vld [vmem:[#allocation20 + $0xa8] sm:$0xff]  }
0x1600   :  { %v17571_v22 = vpop.f32.mrf.mxu1 }
0x1601   :  { %v18382_v22 = vld [vmem:[#allocation20 + $0x60] sm:$0xff]  }
0x1602   :  { %17595 = vmatpush3.bf16.msra.mxu0 %v18359_v36  ;;  %v18383_v36 = vld [vmem:[#allocation20 + $0xa0] sm:$0xff]  }
0x1603   :  { %17596 = vmatprep.subr.bf16.mxu0 %v18963_v34 }
0x1606   :  { %17597 = vmatpush3.bf16.msra.mxu0 %v18360_v56  ;;  %v18384_v56 = vld [vmem:[#allocation20 + $0x98] sm:$0xff]  }
0x1607   :  { %17598 = vmatprep.subr.bf16.mxu0 %v18963_v34 }
0x160a   :  { %17599 = vmatpush3.bf16.msra.mxu0 %v18361_v58  ;;  %v18385_v58 = vld [vmem:[#allocation20 + $0x90] sm:$0xff]  }
0x160b   :  { %17616 = vmatprep.subr.bf16.mxu0 %v18963_v34 }
0x16b5   :  { %v7398_v14 = vpop.f32.mrf.mxu0 }
0x16b6   :  { %v7404_v10 = vadd.f32 %v7398_v14, %v7281_v54 }
0x16b7   :  { %v17562_v49 = vpop.f32.mrf.mxu0 }
0x16b9   :  { %v7401_v18 = vpop.f32.mrf.mxu0 }
0x16bb   :  { %v17563_v46 = vpop.f32.mrf.mxu0 }
0x16bd   :  { %v7521_v51 = vpop.f32.mrf.mxu1  ;;  %v7567_v61 = vpop.f32.mrf.mxu0 }
0x16be   :  { %v7527_v28 = vadd.f32 %v7521_v51, %v7404_v10  ;;  %v7573_v3 = vpack.c.bf16 %v7567_v61, %v7567_v61 }
0x16bf   :  { %v17590_v23 = vpop.f32.mrf.mxu0  ;;  %v17582_v13 = vpop.f32.mrf.mxu1 }
0x16c0   :  { %17601 = vmatmul.mubr.msk.bf16.vlgmr.msra.gmra.mxu0 %vm6679_vm4, %v7573_v3 }
0x16c1   :  { %v7570_v7 = vpop.f32.mrf.mxu0  ;;  %v7524_v43 = vpop.f32.mrf.mxu1  ;;  %17628 = vmatprep.mubr.msk.bf16.mxu0 %vm18964_vm3, %v18963_v34  ;;  %17617 = vmatpush3.bf16.msra.mxu0 %v18362_v27  ;;  %v14747_v27 = vld [vmem:[%s21504_s12 + $0x4] sm:$0x1] }
0x16c2   :  { %17618 = vmatprep.subr.bf16.mxu0 %v18963_v34 }
0x16c3   :  { %v17591_v19 = vpop.f32.mrf.mxu0  ;;  %v17583_v24 = vpop.f32.mrf.mxu1 }
0x16c5   :  { %17619 = vmatpush3.bf16.msra.mxu0 %v18363_v48 }
0x16c6   :  { %17620 = vmatprep.subr.bf16.mxu0 %v18963_v34 }
0x16c9   :  { %17621 = vmatpush3.bf16.msra.mxu0 %v18364_v47  ;;  %v18386_v47 = vld [vmem:[#allocation20 + $0xe8] sm:$0xff]  }
0x16ca   :  { %17622 = vmatprep.subr.bf16.mxu0 %v18963_v34 }
0x16cd   :  { %17623 = vmatpush3.bf16.msra.mxu0 %v18365_v53 }
0x16ce   :  { %17624 = vmatprep.subr.bf16.mxu0 %v18963_v34 }
0x16d1   :  { %17625 = vmatpush3.bf16.msra.mxu0 %v18367_v17 }
0x16d2   :  { %17626 = vmatprep.subr.bf16.mxu0 %v18963_v34 }
0x16d5   :  { %17627 = vmatpush3.bf16.msra.mxu0 %v18369_v0 }
0x16d6   :  { %17648 = vmatprep.subr.bf16.mxu0 %v18963_v34 }
0x1780   :  { %v7644_v57 = vpop.f32.mrf.mxu0 }
0x1781   :  { %v7650_v21 = vadd.f32 %v7644_v57, %v7527_v28 }
0x1782   :  { %v17602_v2 = vpop.f32.mrf.mxu0 }
0x1783   :  { %v7658_v40 = vadd.f32 %v14711_v6, %v7650_v21  ;;  %v18387_v6 = vld [vmem:[#allocation20 + $0xe0] sm:$0xff]   ;;  %v14756_v2 = vld [vmem:[%s21504_s12 + $0x5] sm:$0x1] }
0x1784   :  { %v7647_v62 = vpop.f32.mrf.mxu0 }
0x1785   :  { %v7659_v31 = vmax.f32 %v7658_v40, 0.0  ;;  %v18389_v40 = vld [vmem:[#allocation20 + $0x118] sm:$0xff]  }
0x1786   :  { %v17603_v50 = vpop.f32.mrf.mxu0  ;;  %v18388_v62 = vld [vmem:[#allocation20 + $0xd8] sm:$0xff]  }
0x1787   :  { %v7660_v29 = vpack.c.bf16 %v7659_v31, %v7659_v31  ;;  %v18391_v31 = vld [vmem:[#allocation20 + $0x110] sm:$0xff]  }
0x1788   :  { %v18390_v50 = vld [vmem:[#allocation20 + $0xd0] sm:$0xff]  }
0x1789   :  { %v21039_v15 = vsel %vm7666_vm5, %v7660_v29, 0  ;;  %v18392_v29 = vld [vmem:[#allocation20 + $0xc8] sm:$0xff]  }
0x178a   :  { %17605 = vmatpush3.bf16.msra.mxu1 %v21039_v15 }
0x178b   :  { %17610 = vmatprep.subr.bf16.mxu1 %v18963_v34 }
0x178d   :  { %17607 = vmatmul.mubr.msk.bf16.vlgmr.msra.gmra.mxu1 %vm7662_vm6, %v7661_v25  ;;  %v18393_v25 = vld [vmem:[#allocation20 + $0x108] sm:$0xff]  }
0x178e   :  { %17611 = vmatpush3.bf16.msra.mxu1 %v21039_v15  ;;  %17612 = vmatprep.mubr.msk.bf16.mxu1 %vm18964_vm3, %v18963_v34 }
0x178f   :  { %17632 = vmatprep.subr.bf16.mxu1 %v18963_v34 }
0x1795   :  { %17613 = vmatmul.mubr.msk.bf16.vlgmr.msra.gmra.mxu1 %vm7662_vm6, %v14713_v4  ;;  %v18394_v4 = vld [vmem:[#allocation20 + $0xc0] sm:$0xff]  }
0x1796   :  { %17633 = vmatpush3.bf16.msra.mxu1 %v18366_v39  ;;  %17644 = vmatprep.mubr.msk.bf16.mxu1 %vm18964_vm3, %v18963_v34  ;;  %v18395_v39 = vld [vmem:[#allocation20 + $0x100] sm:$0xff]  }
0x1797   :  { %17634 = vmatprep.subr.bf16.mxu1 %v18963_v34 }
0x179a   :  { %17635 = vmatpush3.bf16.msra.mxu1 %v18368_v59  ;;  %v18396_v59 = vld [vmem:[#allocation20 + $0xf8] sm:$0xff]  }
0x179b   :  { %17636 = vmatprep.subr.bf16.mxu1 %v18963_v34 }
0x179e   :  { %17637 = vmatpush3.bf16.msra.mxu1 %v18370_v35  ;;  %v18397_v35 = vld [vmem:[#allocation20 + $0xf0] sm:$0xff]  }
0x179f   :  { %17638 = vmatprep.subr.bf16.mxu1 %v18963_v34 }
0x17a2   :  { %17639 = vmatpush3.bf16.msra.mxu1 %v18371_v41 }
0x17a3   :  { %17640 = vmatprep.subr.bf16.mxu1 %v18963_v34 }
0x17a6   :  { %17641 = vmatpush3.bf16.msra.mxu1 %v18372_v63 }
0x17a7   :  { %17642 = vmatprep.subr.bf16.mxu1 %v18963_v34 }
0x17aa   :  { %17643 = vmatpush3.bf16.msra.mxu1 %v18373_v1 }
0x17ab   :  { %17654 = vmatprep.subr.bf16.mxu1 %v18963_v34 }
0x184d   :  { %v7704_v9 = vpop.f32.mrf.mxu1 }
0x184e   :  { %v7710_v5 = vpack.c.bf16 %v7704_v9, %v7704_v9 }
0x184f   :  { %v17608_v20 = vpop.f32.mrf.mxu1 }
0x1850   :  { %17645 = vmatmul.mubr.msk.bf16.vlgmr.msra.gmra.mxu1 %vm7818_vm7, %v7710_v5 }
0x1851   :  { %v7707_v45 = vpop.f32.mrf.mxu1  ;;  %17655 = vmatpush3.bf16.msra.mxu1 %v18374_v30  ;;  %17666 = vmatprep.mubr.msk.bf16.mxu1 %vm18964_vm3, %v18963_v34 }
0x1852   :  { %17656 = vmatprep.subr.bf16.mxu1 %v18963_v34 }
0x1853   :  { %v17609_v54 = vpop.f32.mrf.mxu1 }
0x1855   :  { %v7762_v32 = vpop.f32.mrf.mxu1  ;;  %17657 = vmatpush3.bf16.msra.mxu1 %v18375_v12 }
0x1856   :  { %v7768_v8 = vpack.c.bf16 %v7762_v32, %v7762_v32  ;;  %17658 = vmatprep.subr.bf16.mxu1 %v18963_v34 }
0x1857   :  { %v17614_v60 = vpop.f32.mrf.mxu1 }
0x1858   :  { %17629 = vmatmul.mubr.msk.bf16.vlgmr.msra.gmra.mxu0 %vm7818_vm7, %v7768_v8 }
0x1859   :  { %17649 = vmatpush3.bf16.msra.mxu0 %v21039_v15  ;;  %17650 = vmatprep.mubr.msk.bf16.mxu0 %vm18964_vm3, %v18963_v34  ;;  %v7765_v16 = vpop.f32.mrf.mxu1 }
0x185a   :  { %17670 = vmatprep.subr.bf16.mxu0 %v18963_v34  ;;  %17659 = vmatpush3.bf16.msra.mxu1 %v18376_v33  ;;  %v14765_v16 = vld [vmem:[%s21504_s12 + $0x6] sm:$0x1] }
0x185b   :  { %v17615_v44 = vpop.f32.mrf.mxu1  ;;  %17660 = vmatprep.subr.bf16.mxu1 %v18963_v34 }
0x185c   :  { %v18398_v44 = vld [vmem:[#allocation20 + $0x148] sm:$0xff]  }
0x185e   :  { %17661 = vmatpush3.bf16.msra.mxu1 %v18378_v37 }
0x185f   :  { %17662 = vmatprep.subr.bf16.mxu1 %v18963_v34 }
0x1860   :  { %17651 = vmatmul.mubr.msk.bf16.vlgmr.msra.gmra.mxu0 %vm7662_vm6, %v14729_v26 }
0x1861   :  { %17671 = vmatpush3.bf16.msra.mxu0 %v21039_v15  ;;  %17672 = vmatprep.mubr.msk.bf16.mxu0 %vm18964_vm3, %v18963_v34 }
0x1862   :  { %17676 = vmatprep.subr.bf16.mxu0 %v18963_v34  ;;  %17663 = vmatpush3.bf16.msra.mxu1 %v18380_v52  ;;  %v14774_v52 = vld [vmem:[%s21504_s12 + $0x7] sm:$0x1] }
0x1863   :  { %17664 = vmatprep.subr.bf16.mxu1 %v18963_v34 }
0x1866   :  { %17665 = vmatpush3.bf16.msra.mxu1 %v18382_v22  ;;  %v18400_v22 = vld [vmem:[#allocation20 + $0x138] sm:$0xff]  }
0x1867   :  { %17692 = vmatprep.subr.bf16.mxu1 %v18963_v34 }
0x1868   :  { %17673 = vmatmul.mubr.msk.bf16.vlgmr.msra.gmra.mxu0 %vm7662_vm6, %v14738_v38 }
0x1869   :  { %17677 = vmatpush3.bf16.msra.mxu0 %v18377_v42  ;;  %17688 = vmatprep.mubr.msk.bf16.mxu0 %vm18964_vm3, %v18963_v34  ;;  %v18399_v42 = vld [vmem:[#allocation20 + $0x140] sm:$0xff]  }
0x186a   :  { %17678 = vmatprep.subr.bf16.mxu0 %v18963_v34 }
0x186d   :  { %17679 = vmatpush3.bf16.msra.mxu0 %v18379_v11 }
0x186e   :  { %17680 = vmatprep.subr.bf16.mxu0 %v18963_v34 }
0x1871   :  { %17681 = vmatpush3.bf16.msra.mxu0 %v18381_v55  ;;  %v18401_v55 = vld [vmem:[#allocation20 + $0x178] sm:$0xff]  }
0x1872   :  { %17682 = vmatprep.subr.bf16.mxu0 %v18963_v34 }
0x1875   :  { %17683 = vmatpush3.bf16.msra.mxu0 %v18383_v36  ;;  %v18403_v36 = vld [vmem:[#allocation20 + $0x170] sm:$0xff]  }
0x1876   :  { %17684 = vmatprep.subr.bf16.mxu0 %v18963_v34 }
0x1879   :  { %17685 = vmatpush3.bf16.msra.mxu0 %v18384_v56  ;;  %v18402_v56 = vld [vmem:[#allocation20 + $0x130] sm:$0xff]  }
0x187a   :  { %17686 = vmatprep.subr.bf16.mxu0 %v18963_v34 }
0x187d   :  { %17687 = vmatpush3.bf16.msra.mxu0 %v18385_v58  ;;  %v18404_v58 = vld [vmem:[#allocation20 + $0x128] sm:$0xff]  }
0x187e   :  { %17714 = vmatprep.subr.bf16.mxu0 %v18963_v34 }
0x1910   :  { %v7935_v14 = vpop.f32.mrf.mxu1 }
0x1912   :  { %v17646_v10 = vpop.f32.mrf.mxu1 }
0x1913   :  { %v18406_v10 = vld [vmem:[#allocation20 + $0x120] sm:$0xff]  }
0x1914   :  { %v7938_v49 = vpop.f32.mrf.mxu1 }
0x1915   :  { %v18407_v49 = vld [vmem:[#allocation20 + $0x160] sm:$0xff]  }
0x1916   :  { %v17647_v18 = vpop.f32.mrf.mxu1 }
0x1917   :  { %v18408_v18 = vld [vmem:[#allocation20 + $0x158] sm:$0xff]  }
0x1918   :  { %v7856_v46 = vpop.f32.mrf.mxu0 }
0x1919   :  { %v21099_v51 = vadd.f32 %v7935_v14, %v7856_v46  ;;  %v18405_v14 = vld [vmem:[#allocation20 + $0x168] sm:$0xff]   ;;  %v18409_v46 = vld [vmem:[#allocation20 + $0x150] sm:$0xff]  }
0x191a   :  { %v17630_v61 = vpop.f32.mrf.mxu0 }
0x191b   :  { %v9167_v61 = vld [vmem:[#allocation25 + $0x3c0] sm:$0xff] }
0x191c   :  { %v7859_v28 = vpop.f32.mrf.mxu0 }
0x191e   :  { %v17631_v3 = vpop.f32.mrf.mxu0 }
0x1920   :  { %v7980_v23 = vpop.f32.mrf.mxu0 }
0x1921   :  { %v7986_v13 = vpack.c.bf16 %v7980_v23, %v7980_v23  ;;  %v18965_v23 = vmov 1983009808  }
0x1922   :  { %v17652_v7 = vpop.f32.mrf.mxu0 }
0x1923   :  { %17667 = vmatmul.mubr.msk.bf16.vlgmr.msra.gmra.mxu1 %vm7818_vm7, %v7986_v13  ;;  %v9024_v13 = vunpack.c.l.s4 %v18965_v23  ;;  %v9026_v7 = vlaneseq  ;;  %v9279_v23 = vld [vmem:[#allocation25 + $0x740] sm:$0xff] }
0x1924   :  { %17693 = vmatpush3.bf16.msra.mxu1 %v21039_v15  ;;  %v7983_v43 = vpop.f32.mrf.mxu0  ;;  %17694 = vmatprep.mubr.msk.bf16.mxu1 %vm18964_vm3, %v18963_v34 }
0x1925   :  { %17698 = vmatprep.subr.bf16.mxu1 %v18963_v34 }
0x1926   :  { %v17653_v19 = vpop.f32.mrf.mxu0 }
0x1927   :  { %v9025_v19 = vunpack.c.0.s8 %v9024_v13 }
0x1928   :  { %v8119_v24 = vpop.f32.mrf.mxu0 }
0x1929   :  { %v8125_v48 = vpack.c.bf16 %v8119_v24, %v8119_v24  ;;  %v21171_v24 = vshrl.u32 %v9026_v7, 7 }
0x192a   :  { %v17674_v53 = vpop.f32.mrf.mxu0 }
0x192b   :  { %17689 = vmatmul.mubr.msk.bf16.vlgmr.msra.gmra.mxu0 %vm7818_vm7, %v8125_v48  ;;  %17695 = vmatmul.mubr.msk.bf16.vlgmr.msra.gmra.mxu1 %vm7662_vm6, %v14747_v27  ;;  %v21175_v53 = vsub.s32 %v9025_v19, %v21171_v24  ;;  %v9263_v19 = vld [vmem:[#allocation25 + $0x6c0] sm:$0xff] }
0x192c   :  { %17715 = vmatpush3.bf16.msra.mxu0 %v21039_v15  ;;  %17716 = vmatprep.mubr.msk.bf16.mxu0 %vm18964_vm3, %v18963_v34  ;;  %v8122_v57 = vpop.f32.mrf.mxu0 }
0x192d   :  { %17699 = vmatpush3.bf16.msra.mxu1 %v18386_v47  ;;  %17720 = vmatprep.subr.bf16.mxu0 %v18963_v34  ;;  %v21177_v57 = vld [vmem:[#allocation2] sm:$0xff] }
0x192e   :  { %17700 = vmatprep.subr.bf16.mxu1 %v18963_v34  ;;  %v17675_v21 = vpop.f32.mrf.mxu0  ;;  %17710 = vmatprep.mubr.msk.bf16.mxu1 %vm18964_vm3, %v18963_v34 }
0x1931   :  { %17701 = vmatpush3.bf16.msra.mxu1 %v18387_v6 }
0x1932   :  { %17702 = vmatprep.subr.bf16.mxu1 %v18963_v34 }
0x1933   :  { %17717 = vmatmul.mubr.msk.bf16.vlgmr.msra.gmra.mxu0 %vm7662_vm6, %v14756_v2 }
0x1934   :  { %17721 = vmatpush3.bf16.msra.mxu0 %v18389_v40  ;;  %17732 = vmatprep.mubr.msk.bf16.mxu0 %vm18964_vm3, %v18963_v34  ;;  %v21181_v40 = vrot.slane %v21177_v57, %v21175_v53 }
0x1935   :  { %17703 = vmatpush3.bf16.msra.mxu1 %v18388_v62  ;;  %17722 = vmatprep.subr.bf16.mxu0 %v18963_v34 }
0x1936   :  { %17704 = vmatprep.subr.bf16.mxu1 %v18963_v34 }
0x1938   :  { %17723 = vmatpush3.bf16.msra.mxu0 %v18391_v31 }
0x1939   :  { %17705 = vmatpush3.bf16.msra.mxu1 %v18390_v50  ;;  %17724 = vmatprep.subr.bf16.mxu0 %v18963_v34 }
0x193a   :  { %17706 = vmatprep.subr.bf16.mxu1 %v18963_v34 }
0x193c   :  { %17725 = vmatpush3.bf16.msra.mxu0 %v18393_v25 }
0x193d   :  { %17707 = vmatpush3.bf16.msra.mxu1 %v18392_v29  ;;  %17726 = vmatprep.subr.bf16.mxu0 %v18963_v34 }
0x193e   :  { %17708 = vmatprep.subr.bf16.mxu1 %v18963_v34 }
0x1940   :  { %17727 = vmatpush3.bf16.msra.mxu0 %v18395_v39  ;;  %v9037_v39 = vcombine.high %v21181_v40, %v21181_v40 }
0x1941   :  { %17709 = vmatpush3.bf16.msra.mxu1 %v18394_v4  ;;  %17728 = vmatprep.subr.bf16.mxu0 %v18963_v34 }
0x1942   :  { %17736 = vmatprep.subr.bf16.mxu1 %v18963_v34 }
0x1944   :  { %17729 = vmatpush3.bf16.msra.mxu0 %v18396_v59 }
0x1945   :  { %17730 = vmatprep.subr.bf16.mxu0 %v18963_v34 }
0x1948   :  { %17731 = vmatpush3.bf16.msra.mxu0 %v18397_v35  ;;  %v9143_v35 = vld [vmem:[#allocation25 + $0x300] sm:$0xff] }
0x1949   :  { %17758 = vmatprep.subr.bf16.mxu0 %v18963_v34 }
0x19e3   :  { %v8073_v41 = vpop.f32.mrf.mxu1 }
0x19e4   :  { %v8079_v63 = vadd.f32 %v8073_v41, %v21099_v51  ;;  %v9159_v51 = vld [vmem:[#allocation25 + $0x380] sm:$0xff] }
0x19e5   :  { %v17668_v1 = vpop.f32.mrf.mxu1  ;;  %v14905_v28 = vcombine.low %v9159_v51, %v9167_v61  ;;  %v14906_v3 = vcombine.high %v9159_v51, %v9167_v61  ;;  %v9151_v41 = vld [vmem:[#allocation25 + $0x340] sm:$0xff] }
0x19e6   :  { %v9295_v51 = vld [vmem:[#allocation25 + $0x7c0] sm:$0xff] }
0x19e7   :  { %v8076_v17 = vpop.f32.mrf.mxu1 }
0x19e8   :  { %v14783_v17 = vld [vmem:[%s21504_s12 + $0x8] sm:$0x1]  ;;  %s18967_s12 = smov [#allocation31]  }
0x19e9   :  { %v17669_v0 = vpop.f32.mrf.mxu1  ;;  %s14207_s2 = sshll.u32 %s18967_s12, 4  ;;  %s14208_s2 = int_to_ptr.vmem [resolvable:$true] %s14207_s2 }
0x19ea   :  { %s18874_s14 = scalar_lea.vmem %s14208_s2, 128  ;;  %p18879_p7 = scmp.lt.s32.totalorder %s14208_s2, %s14208_s2 }
0x19eb   :  { %v8212_v9 = vpop.f32.mrf.mxu0  ;;  %v8258_v30 = vpop.f32.mrf.mxu1  ;;  %p18875_p6 = scmp.ne.s32.totalorder %s14208_s2, %s18874_s14  ;;  %p18880_p8 = scmp.lt.s32.totalorder %s18874_s14, %s18874_s14 }
0x19ec   :  { %v21136_v5 = vadd.f32 %v8212_v9, %v8079_v63  ;;  %v8264_v20 = vpack.c.bf16 %v8258_v30, %v8258_v30  ;;  %v14890_v9 = vcombine.high %v9143_v35, %v9151_v41  ;;  %v9127_v30 = vld [vmem:[#allocation25 + $0x280] sm:$0xff] }
0x19ed   :  { %v17690_v45 = vpop.f32.mrf.mxu0  ;;  %v17696_v12 = vpop.f32.mrf.mxu1  ;;  %p18881_p9 = por %p18880_p8, %p18879_p7 }
0x19ee   :  { %17711 = vmatmul.mubr.msk.bf16.vlgmr.msra.gmra.mxu1 %vm7818_vm7, %v8264_v20  ;;  %v14889_v45 = vcombine.low %v9143_v35, %v9151_v41  ;;  %v18411_v41 = vld [vmem:[#allocation20 + $0x1a0] sm:$0xff]  }
0x19ef   :  { %17737 = vmatpush3.bf16.msra.mxu1 %v21039_v15  ;;  %v8215_v54 = vpop.f32.mrf.mxu0  ;;  %17738 = vmatprep.mubr.msk.bf16.mxu1 %vm18964_vm3, %v18963_v34  ;;  %v8261_v32 = vpop.f32.mrf.mxu1  ;;  %p18882_p10 = pnand %p18881_p9, %p18875_p6 }
0x19f0   :  { %17742 = vmatprep.subr.bf16.mxu1 %v18963_v34  ;;  %v9111_v32 = vld [vmem:[#allocation25 + $0x200] sm:$0xff] }
0x19f1   :  { %v17691_v8 = vpop.f32.mrf.mxu0  ;;  %v17697_v33 = vpop.f32.mrf.mxu1 }
0x19f2   :  { %v9119_v8 = vld [vmem:[#allocation25 + $0x240] sm:$0xff] }
0x19f3   :  { %v8397_v60 = vpop.f32.mrf.mxu0 }
0x19f4   :  { %v8403_v37 = vpack.c.bf16 %v8397_v60, %v8397_v60 }
0x19f5   :  { %v17718_v26 = vpop.f32.mrf.mxu0 }
0x19f6   :  { %17733 = vmatmul.mubr.msk.bf16.vlgmr.msra.gmra.mxu0 %vm7818_vm7, %v8403_v37  ;;  %17739 = vmatmul.mubr.msk.bf16.vlgmr.msra.gmra.mxu1 %vm7662_vm6, %v14765_v16  ;;  %v14858_v16 = vcombine.high %v9111_v32, %v9119_v8  ;;  %v9095_v37 = vld [vmem:[#allocation25 + $0x180] sm:$0xff]  ;;  %v14857_v26 = vcombine.low %v9111_v32, %v9119_v8  ;;  %v9160_v32 = vld [vmem:[#allocation25 + $0x388] sm:$0xff] }
0x19f7   :  { %17759 = vmatpush3.bf16.msra.mxu0 %v21039_v15  ;;  %17760 = vmatprep.mubr.msk.bf16.mxu0 %vm18964_vm3, %v18963_v34  ;;  %v8400_v38 = vpop.f32.mrf.mxu0  ;;  %v9168_v8 = vld [vmem:[#allocation25 + $0x3c8] sm:$0xff] }
0x19f8   :  { %17743 = vmatpush3.bf16.msra.mxu1 %v18398_v44  ;;  %17764 = vmatprep.subr.bf16.mxu0 %v18963_v34  ;;  %v9103_v44 = vld [vmem:[#allocation25 + $0x1c0] sm:$0xff] }
0x19f9   :  { %17744 = vmatprep.subr.bf16.mxu1 %v18963_v34  ;;  %v17719_v11 = vpop.f32.mrf.mxu0  ;;  %17754 = vmatprep.mubr.msk.bf16.mxu1 %vm18964_vm3, %v18963_v34  ;;  %v14842_v38 = vcombine.high %v9095_v37, %v9103_v44 }
0x19fa   :  { %v9087_v11 = vld [vmem:[#allocation25 + $0x140] sm:$0xff] }
0x19fc   :  { %17745 = vmatpush3.bf16.msra.mxu1 %v18399_v42  ;;  %v9079_v42 = vld [vmem:[#allocation25 + $0x100] sm:$0xff] }
0x19fd   :  { %17746 = vmatprep.subr.bf16.mxu1 %v18963_v34 }
0x19fe   :  { %17761 = vmatmul.mubr.msk.bf16.vlgmr.msra.gmra.mxu0 %vm7662_vm6, %v14774_v52  ;;  %v14841_v52 = vcombine.low %v9095_v37, %v9103_v44  ;;  %v9144_v37 = vld [vmem:[#allocation25 + $0x308] sm:$0xff] }
0x19ff   :  { %17765 = vmatpush3.bf16.msra.mxu0 %v18401_v55  ;;  %17776 = vmatprep.mubr.msk.bf16.mxu0 %vm18964_vm3, %v18963_v34  ;;  %v14826_v55 = vcombine.high %v9079_v42, %v9087_v11  ;;  %v9152_v44 = vld [vmem:[#allocation25 + $0x348] sm:$0xff] }
0x1a00   :  { %17747 = vmatpush3.bf16.msra.mxu1 %v18400_v22  ;;  %17766 = vmatprep.subr.bf16.mxu0 %v18963_v34  ;;  %v9063_v22 = vld [vmem:[#allocation25 + $0x80] sm:$0xff] }
0x1a01   :  { %17748 = vmatprep.subr.bf16.mxu1 %v18963_v34 }
0x1a03   :  { %17767 = vmatpush3.bf16.msra.mxu0 %v18403_v36  ;;  %v9071_v36 = vld [vmem:[#allocation25 + $0xc0] sm:$0xff] }
0x1a04   :  { %17749 = vmatpush3.bf16.msra.mxu1 %v18402_v56  ;;  %17768 = vmatprep.subr.bf16.mxu0 %v18963_v34  ;;  %v14825_v56 = vcombine.low %v9079_v42, %v9087_v11  ;;  %v14892_v42 = vcombine.high %v9144_v37, %v9152_v44  ;;  %v18415_v11 = vld [vmem:[#allocation20 + $0x180] sm:$0xff]  }
0x1a05   :  { %17750 = vmatprep.subr.bf16.mxu1 %v18963_v34 }
0x1a07   :  { %17769 = vmatpush3.bf16.msra.mxu0 %v18405_v14  ;;  %v9047_v14 = vld [vmem:[#allocation25] sm:$0xff] }
0x1a08   :  { %17751 = vmatpush3.bf16.msra.mxu1 %v18404_v58  ;;  %17770 = vmatprep.subr.bf16.mxu0 %v18963_v34  ;;  %v14810_v58 = vcombine.high %v9063_v22, %v9071_v36 }
0x1a09   :  { %17752 = vmatprep.subr.bf16.mxu1 %v18963_v34 }
0x1a0b   :  { %17771 = vmatpush3.bf16.msra.mxu0 %v18407_v49  ;;  %v14809_v49 = vcombine.low %v9063_v22, %v9071_v36  ;;  %v21212_v22 = vld [vmem:[#allocation25 + $0xb80] sm:$0xff] }
0x1a0c   :  { %17753 = vmatpush3.bf16.msra.mxu1 %v18406_v10  ;;  %17772 = vmatprep.subr.bf16.mxu0 %v18963_v34  ;;  %v9055_v10 = vld [vmem:[#allocation25 + $0x40] sm:$0xff] }
0x1a0d   :  { %17780 = vmatprep.subr.bf16.mxu1 %v18963_v34  ;;  %v14793_v61 = vcombine.low %v9047_v14, %v9055_v10  ;;  %v21214_v36 = vld [vmem:[#allocation25 + $0xbc0] sm:$0xff] }
0x1a0f   :  { %17773 = vmatpush3.bf16.msra.mxu0 %v18408_v18  ;;  %v14794_v18 = vcombine.high %v9047_v14, %v9055_v10  ;;  %v9112_v14 = vld [vmem:[#allocation25 + $0x208] sm:$0xff] }
0x1a10   :  { %17774 = vmatprep.subr.bf16.mxu0 %v18963_v34  ;;  %v9120_v10 = vld [vmem:[#allocation25 + $0x248] sm:$0xff] }
0x1a13   :  { %17775 = vmatpush3.bf16.msra.mxu0 %v18409_v46  ;;  %v9287_v46 = vld [vmem:[#allocation25 + $0x780] sm:$0xff] }
0x1a14   :  { %12119 = vmatprep.subr.bf16.mxu0 %v14906_v3  ;;  %v9271_v3 = vld [vmem:[#allocation25 + $0x700] sm:$0xff]  ;;  %v15033_v13 = vcombine.low %v9287_v46, %v9295_v51 }
0x1a15   :  { %v15018_v7 = vcombine.high %v9271_v3, %v9279_v23 }
0x1aae   :  { %v8351_v43 = vpop.f32.mrf.mxu1 }
0x1aaf   :  { %v8357_v27 = vadd.f32 %v8351_v43, %v21136_v5  ;;  %v9135_v5 = vld [vmem:[#allocation25 + $0x2c0] sm:$0xff] }
0x1ab0   :  { %v17712_v48 = vpop.f32.mrf.mxu1  ;;  %v14874_v54 = vcombine.high %v9127_v30, %v9135_v5  ;;  %v14873_v60 = vcombine.low %v9127_v30, %v9135_v5  ;;  %v9255_v43 = vld [vmem:[#allocation25 + $0x680] sm:$0xff] }
0x1ab1   :  { %v15002_v48 = vcombine.high %v9255_v43, %v9263_v19  ;;  %v9175_v5 = vld [vmem:[#allocation25 + $0x400] sm:$0xff] }
0x1ab2   :  { %v8354_v47 = vpop.f32.mrf.mxu1 }
0x1ab3   :  { %v9239_v47 = vld [vmem:[#allocation25 + $0x600] sm:$0xff] }
0x1ab4   :  { %v17713_v6 = vpop.f32.mrf.mxu1 }
0x1ab5   :  { %v9247_v6 = vld [vmem:[#allocation25 + $0x640] sm:$0xff] }
0x1ab6   :  { %v8490_v21 = vpop.f32.mrf.mxu0  ;;  %v8536_v2 = vpop.f32.mrf.mxu1 }
0x1ab7   :  { %v21183_v62 = vadd.f32 %v8490_v21, %v8357_v27  ;;  %v8542_v31 = vpack.c.bf16 %v8536_v2, %v8536_v2  ;;  %v15017_v27 = vcombine.low %v9271_v3, %v9279_v23  ;;  %v15001_v21 = vcombine.low %v9255_v43, %v9263_v19  ;;  %v9080_v3 = vld [vmem:[#allocation25 + $0x108] sm:$0xff] }
0x1ab8   :  { %v17734_v50 = vpop.f32.mrf.mxu0  ;;  %v17740_v29 = vpop.f32.mrf.mxu1  ;;  %v14986_v2 = vcombine.high %v9239_v47, %v9247_v6  ;;  %v9088_v23 = vld [vmem:[#allocation25 + $0x148] sm:$0xff] }
0x1ab9   :  { %17755 = vmatmul.mubr.msk.bf16.vlgmr.msra.gmra.mxu1 %vm7818_vm7, %v8542_v31  ;;  %v9223_v31 = vld [vmem:[#allocation25 + $0x580] sm:$0xff]  ;;  %v14985_v29 = vcombine.low %v9239_v47, %v9247_v6  ;;  %v9064_v43 = vld [vmem:[#allocation25 + $0x88] sm:$0xff] }
0x1aba   :  { %17781 = vmatpush3.bf16.msra.mxu1 %v21039_v15  ;;  %v8493_v25 = vpop.f32.mrf.mxu0  ;;  %17782 = vmatprep.mubr.msk.bf16.mxu1 %vm18964_vm3, %v18963_v34  ;;  %v8539_v4 = vpop.f32.mrf.mxu1  ;;  %v21195_v15 = vpack.c.bf16 %v9037_v39, %v9037_v39  ;;  %v9231_v50 = vld [vmem:[#allocation25 + $0x5c0] sm:$0xff]  ;;  %v9072_v19 = vld [vmem:[#allocation25 + $0xc8] sm:$0xff] }
0x1abb   :  { %17786 = vmatprep.subr.bf16.mxu1 %v18963_v34  ;;  %v18410_v25 = vld [vmem:[#allocation20 + $0x1a8] sm:$0xff]   ;;  %v14970_v4 = vcombine.high %v9223_v31, %v9231_v50  ;;  %v9207_v39 = vld [vmem:[#allocation25 + $0x500] sm:$0xff]  ;;  %v14969_v35 = vcombine.low %v9223_v31, %v9231_v50  ;;  %v9048_v47 = vld [vmem:[#allocation25 + $0x8] sm:$0xff] }
0x1abc   :  { %v17735_v59 = vpop.f32.mrf.mxu0  ;;  %v17741_v63 = vpop.f32.mrf.mxu1  ;;  %v9056_v6 = vld [vmem:[#allocation25 + $0x48] sm:$0xff] }
0x1abd   :  { %v9215_v59 = vld [vmem:[#allocation25 + $0x540] sm:$0xff]  ;;  %v9288_v31 = vld [vmem:[#allocation25 + $0x788] sm:$0xff] }
0x1abe   :  { %v8675_v1 = vpop.f32.mrf.mxu0  ;;  %v14954_v63 = vcombine.high %v9207_v39, %v9215_v59  ;;  %v9296_v50 = vld [vmem:[#allocation25 + $0x7c8] sm:$0xff] }
0x1abf   :  { %v8681_v0 = vpack.c.bf16 %v8675_v1, %v8675_v1  ;;  %v9191_v1 = vld [vmem:[#allocation25 + $0x480] sm:$0xff] }
0x1ac0   :  { %v17762_v20 = vpop.f32.mrf.mxu0 }
0x1ac1   :  { %17777 = vmatmul.mubr.msk.bf16.vlgmr.msra.gmra.mxu0 %vm7818_vm7, %v8681_v0  ;;  %17783 = vmatmul.mubr.msk.bf16.vlgmr.msra.gmra.mxu1 %vm7662_vm6, %v14783_v17  ;;  %v9199_v17 = vld [vmem:[#allocation25 + $0x4c0] sm:$0xff]  ;;  %v14953_v0 = vcombine.low %v9207_v39, %v9215_v59  ;;  %v9280_v39 = vld [vmem:[#allocation25 + $0x748] sm:$0xff]  ;;  %v15035_v59 = vcombine.low %v9288_v31, %v9296_v50 }
0x1ac2   :  { %12120 = vmatpush1.bf16.msra.mxu0 %v14905_v28  ;;  %12151 = vmatprep.mubr.bf16.mxu0 %v21195_v15  ;;  %v8678_v12 = vpop.f32.mrf.mxu0  ;;  %v15034_v28 = vcombine.high %v9287_v46, %v9295_v51  ;;  %v14938_v30 = vcombine.high %v9191_v1, %v9199_v17  ;;  %v9183_v20 = vld [vmem:[#allocation25 + $0x440] sm:$0xff]  ;;  %v9096_v46 = vld [vmem:[#allocation25 + $0x188] sm:$0xff] }
0x1ac3   :  { %12121 = vmatprep.subr.bf16.mxu0 %v14890_v9  ;;  %17798 = vmatprep.mubr.msk.bf16.mxu1 %vm18964_vm3, %v18963_v34  ;;  %v18412_v9 = vld [vmem:[#allocation20 + $0x198] sm:$0xff]   ;;  %v18413_v12 = vld [vmem:[#allocation20 + $0x190] sm:$0xff]  }
0x1ac4   :  { %v17763_v33 = vpop.f32.mrf.mxu0  ;;  %17787 = vmatpush3.bf16.msra.mxu1 %v18410_v25  ;;  %v9104_v51 = vld [vmem:[#allocation25 + $0x1c8] sm:$0xff]  ;;  %v15036_v25 = vcombine.high %v9288_v31, %v9296_v50  ;;  %v9065_v50 = vld [vmem:[#allocation25 + $0x90] sm:$0xff] }
0x1ac5   :  { %17788 = vmatprep.subr.bf16.mxu1 %v18963_v34  ;;  %v14921_v33 = vcombine.low %v9175_v5, %v9183_v20 }
0x1ac6   :  { %12122 = vmatpush1.bf16.msra.mxu0 %v14889_v45  ;;  %v14937_v45 = vcombine.low %v9191_v1, %v9199_v17 }
0x1ac7   :  { %12123 = vmatprep.subr.bf16.mxu0 %v14874_v54  ;;  %v14922_v54 = vcombine.high %v9175_v5, %v9183_v20  ;;  %v9224_v20 = vld [vmem:[#allocation25 + $0x588] sm:$0xff] }
0x1ac8   :  { %17789 = vmatpush3.bf16.msra.mxu1 %v18411_v41  ;;  %v9256_v41 = vld [vmem:[#allocation25 + $0x688] sm:$0xff] }
0x1ac9   :  { %17790 = vmatprep.subr.bf16.mxu1 %v18963_v34 }
0x1aca   :  { %12124 = vmatpush1.bf16.msra.mxu0 %v14873_v60  ;;  %v14908_v60 = vcombine.high %v9160_v32, %v9168_v8 }
0x1acb   :  { %12125 = vmatprep.subr.bf16.mxu0 %v14858_v16  ;;  %v18414_v16 = vld [vmem:[#allocation20 + $0x188] sm:$0xff]  }
0x1acc   :  { %17791 = vmatpush3.bf16.msra.mxu1 %v18412_v9  ;;  %v9248_v9 = vld [vmem:[#allocation25 + $0x648] sm:$0xff] }
0x1acd   :  { %17792 = vmatprep.subr.bf16.mxu1 %v18963_v34 }
0x1ace   :  { %12126 = vmatpush1.bf16.msra.mxu0 %v14857_v26  ;;  %v21208_v26 = vpack.c.bf16 %v21181_v40, %v21181_v40  ;;  %v14891_v40 = vcombine.low %v9144_v37, %v9152_v44  ;;  %v9200_v37 = vld [vmem:[#allocation25 + $0x4c8] sm:$0xff] }
0x1acf   :  { %12127 = vmatprep.subr.bf16.mxu0 %v14842_v38  ;;  %v14907_v38 = vcombine.low %v9160_v32, %v9168_v8  ;;  %v9208_v32 = vld [vmem:[#allocation25 + $0x508] sm:$0xff] }
0x1ad0   :  { %17793 = vmatpush3.bf16.msra.mxu1 %v18413_v12  ;;  %v9216_v8 = vld [vmem:[#allocation25 + $0x548] sm:$0xff] }
0x1ad1   :  { %17794 = vmatprep.subr.bf16.mxu1 %v18963_v34  ;;  %v14955_v44 = vcombine.low %v9208_v32, %v9216_v8 }
0x1ad2   :  { %12128 = vmatpush1.bf16.msra.mxu0 %v14841_v52  ;;  %v9128_v52 = vld [vmem:[#allocation25 + $0x288] sm:$0xff] }
0x1ad3   :  { %12129 = vmatprep.subr.bf16.mxu0 %v14826_v55  ;;  %v9136_v55 = vld [vmem:[#allocation25 + $0x2c8] sm:$0xff] }
0x1ad4   :  { %17795 = vmatpush3.bf16.msra.mxu1 %v18414_v16  ;;  %v9192_v16 = vld [vmem:[#allocation25 + $0x488] sm:$0xff] }
0x1ad5   :  { %17796 = vmatprep.subr.bf16.mxu1 %v18963_v34  ;;  %v15162_v34 = vcombine.high %v21212_v22, %v21214_v36 }
0x1ad6   :  { %12130 = vmatpush1.bf16.msra.mxu0 %v14825_v56  ;;  %v15161_v56 = vcombine.low %v21212_v22, %v21214_v36 }
0x1ad7   :  { %12131 = vmatprep.subr.bf16.mxu0 %v14810_v58  ;;  %v14876_v58 = vcombine.high %v9128_v52, %v9136_v55 }
0x1ad8   :  { %17797 = vmatpush3.bf16.msra.mxu1 %v18415_v11  ;;  %v9184_v11 = vld [vmem:[#allocation25 + $0x448] sm:$0xff] }
0x1ad9   :  { %12160 = vmatprep.subr.bf16.mxu1 %v15162_v34  ;;  %v9169_v34 = vld [vmem:[#allocation25 + $0x3d0] sm:$0xff] }
0x1ada   :  { %12132 = vmatpush1.bf16.msra.mxu0 %v14809_v49  ;;  %v14875_v49 = vcombine.low %v9128_v52, %v9136_v55  ;;  %v14939_v52 = vcombine.low %v9192_v16, %v9200_v37 }
0x1adb   :  { %12133 = vmatprep.subr.bf16.mxu0 %v14794_v18  ;;  %v14860_v18 = vcombine.high %v9112_v14, %v9120_v10 }
0x1ade   :  { %12134 = vmatpush1.bf16.msra.mxu0 %v14793_v61  ;;  %v14859_v61 = vcombine.low %v9112_v14, %v9120_v10  ;;  %v9145_v10 = vld [vmem:[#allocation25 + $0x310] sm:$0xff] }
0x1adf   :  { %12135 = vmatprep.subr.bf16.mxu0 %v15034_v28  ;;  %v14844_v28 = vcombine.high %v9096_v46, %v9104_v51 }
0x1ae2   :  { %12136 = vmatpush2.bf16.msra.mxu0 %v15033_v13  ;;  %v14843_v13 = vcombine.low %v9096_v46, %v9104_v51  ;;  %v9129_v51 = vld [vmem:[#allocation25 + $0x290] sm:$0xff] }
0x1ae3   :  { %12137 = vmatprep.subr.bf16.mxu0 %v15018_v7  ;;  %v14828_v7 = vcombine.high %v9080_v3, %v9088_v23 }
0x1ae6   :  { %12138 = vmatpush2.bf16.msra.mxu0 %v15017_v27  ;;  %v14827_v27 = vcombine.low %v9080_v3, %v9088_v23  ;;  %v9113_v23 = vld [vmem:[#allocation25 + $0x210] sm:$0xff] }
0x1ae7   :  { %12139 = vmatprep.subr.bf16.mxu0 %v15002_v48  ;;  %v14812_v48 = vcombine.high %v9064_v43, %v9072_v19 }
0x1aea   :  { %12140 = vmatpush2.bf16.msra.mxu0 %v15001_v21  ;;  %v14811_v21 = vcombine.low %v9064_v43, %v9072_v19  ;;  %v9097_v19 = vld [vmem:[#allocation25 + $0x190] sm:$0xff] }
0x1aeb   :  { %12141 = vmatprep.subr.bf16.mxu0 %v14986_v2  ;;  %v14796_v2 = vcombine.high %v9048_v47, %v9056_v6 }
0x1aee   :  { %12142 = vmatpush2.bf16.msra.mxu0 %v14985_v29  ;;  %v14795_v29 = vcombine.low %v9048_v47, %v9056_v6  ;;  %v9081_v6 = vld [vmem:[#allocation25 + $0x110] sm:$0xff] }
0x1aef   :  { %12143 = vmatprep.subr.bf16.mxu0 %v14970_v4  ;;  %v9272_v4 = vld [vmem:[#allocation25 + $0x708] sm:$0xff] }
0x1af0   :  { %v15019_v1 = vcombine.low %v9272_v4, %v9280_v39 }
0x1af2   :  { %12144 = vmatpush2.bf16.msra.mxu0 %v14969_v35  ;;  %v15020_v35 = vcombine.high %v9272_v4, %v9280_v39  ;;  %v9049_v39 = vld [vmem:[#allocation25 + $0x10] sm:$0xff] }
0x1af3   :  { %12145 = vmatprep.subr.bf16.mxu0 %v14954_v63  ;;  %v9264_v63 = vld [vmem:[#allocation25 + $0x6c8] sm:$0xff] }
0x1af4   :  { %v15004_v17 = vcombine.high %v9256_v41, %v9264_v63 }
0x1af6   :  { %12146 = vmatpush2.bf16.msra.mxu0 %v14953_v0  ;;  %v9240_v0 = vld [vmem:[#allocation25 + $0x608] sm:$0xff] }
0x1af7   :  { %12147 = vmatprep.subr.bf16.mxu0 %v14938_v30  ;;  %v15003_v30 = vcombine.low %v9256_v41, %v9264_v63  ;;  %v14988_v5 = vcombine.high %v9240_v0, %v9248_v9  ;;  %v14987_v12 = vcombine.low %v9240_v0, %v9248_v9  ;;  %v9289_v63 = vld [vmem:[#allocation25 + $0x790] sm:$0xff] }
0x1af8   :  { %v9273_v9 = vld [vmem:[#allocation25 + $0x710] sm:$0xff] }
0x1afa   :  { %12148 = vmatpush2.bf16.msra.mxu0 %v14937_v45  ;;  %v9232_v45 = vld [vmem:[#allocation25 + $0x5c8] sm:$0xff] }
0x1afb   :  { %12149 = vmatprep.subr.bf16.mxu0 %v14922_v54  ;;  %v14972_v54 = vcombine.high %v9224_v20, %v9232_v45 }
0x1afe   :  { %12150 = vmatpush2.bf16.msra.mxu0 %v14921_v33  ;;  %v14971_v33 = vcombine.low %v9224_v20, %v9232_v45  ;;  %v9257_v45 = vld [vmem:[#allocation25 + $0x690] sm:$0xff] }
0x1aff   :  { %12201 = vmatprep.subr.bf16.mxu0 %v14908_v60  ;;  %v14956_v60 = vcombine.high %v9208_v32, %v9216_v8  ;;  %v9241_v8 = vld [vmem:[#allocation25 + $0x610] sm:$0xff] }
0x1b01   :  { %12152 = vmatmul.mubr.bf16.vlgmr.msra.gmra.mxu0 %v21208_v26 }
0x1b02   :  { %12202 = vmatpush1.bf16.msra.mxu0 %v14907_v38  ;;  %12233 = vmatprep.mubr.bf16.mxu0 %v21195_v15  ;;  %v14940_v38 = vcombine.high %v9192_v16, %v9200_v37  ;;  %v9225_v37 = vld [vmem:[#allocation25 + $0x590] sm:$0xff] }
0x1b03   :  { %12203 = vmatprep.subr.bf16.mxu0 %v14892_v42  ;;  %v9176_v42 = vld [vmem:[#allocation25 + $0x408] sm:$0xff] }
0x1b04   :  { %v14924_v55 = vcombine.high %v9176_v42, %v9184_v11 }
0x1b06   :  { %12204 = vmatpush1.bf16.msra.mxu0 %v14891_v40  ;;  %v9161_v40 = vld [vmem:[#allocation25 + $0x390] sm:$0xff] }
0x1b07   :  { %12205 = vmatprep.subr.bf16.mxu0 %v14876_v58  ;;  %v14923_v58 = vcombine.low %v9176_v42, %v9184_v11  ;;  %v14910_v14 = vcombine.high %v9161_v40, %v9169_v34  ;;  %v9209_v11 = vld [vmem:[#allocation25 + $0x510] sm:$0xff] }
0x1b0a   :  { %12206 = vmatpush1.bf16.msra.mxu0 %v14875_v49  ;;  %v9153_v49 = vld [vmem:[#allocation25 + $0x350] sm:$0xff] }
0x1b0b   :  { %12207 = vmatprep.subr.bf16.mxu0 %v14860_v18  ;;  %v14909_v18 = vcombine.low %v9161_v40, %v9169_v34  ;;  %v14894_v46 = vcombine.high %v9145_v10, %v9153_v49  ;;  %v9193_v34 = vld [vmem:[#allocation25 + $0x490] sm:$0xff] }
0x1b0e   :  { %12208 = vmatpush1.bf16.msra.mxu0 %v14859_v61  ;;  %v9137_v61 = vld [vmem:[#allocation25 + $0x2d0] sm:$0xff] }
0x1b0f   :  { %12209 = vmatprep.subr.bf16.mxu0 %v14844_v28  ;;  %v14893_v28 = vcombine.low %v9145_v10, %v9153_v49  ;;  %v14878_v3 = vcombine.high %v9129_v51, %v9137_v61  ;;  %v9177_v49 = vld [vmem:[#allocation25 + $0x410] sm:$0xff] }
0x1b12   :  { %12210 = vmatpush1.bf16.msra.mxu0 %v14843_v13  ;;  %v9121_v13 = vld [vmem:[#allocation25 + $0x250] sm:$0xff] }
0x1b13   :  { %12211 = vmatprep.subr.bf16.mxu0 %v14828_v7  ;;  %v14877_v7 = vcombine.low %v9129_v51, %v9137_v61  ;;  %v14862_v43 = vcombine.high %v9113_v23, %v9121_v13 }
0x1b16   :  { %12212 = vmatpush1.bf16.msra.mxu0 %v14827_v27  ;;  %v9105_v27 = vld [vmem:[#allocation25 + $0x1d0] sm:$0xff] }
0x1b17   :  { %12213 = vmatprep.subr.bf16.mxu0 %v14812_v48  ;;  %v14861_v48 = vcombine.low %v9113_v23, %v9121_v13  ;;  %v14846_v47 = vcombine.high %v9097_v19, %v9105_v27 }
0x1b1a   :  { %12214 = vmatpush1.bf16.msra.mxu0 %v14811_v21  ;;  %v9089_v21 = vld [vmem:[#allocation25 + $0x150] sm:$0xff] }
0x1b1b   :  { %12215 = vmatprep.subr.bf16.mxu0 %v14796_v2  ;;  %v14845_v2 = vcombine.low %v9097_v19, %v9105_v27  ;;  %v14830_v31 = vcombine.high %v9081_v6, %v9089_v21 }
0x1b1e   :  { %12216 = vmatpush1.bf16.msra.mxu0 %v14795_v29  ;;  %v9073_v29 = vld [vmem:[#allocation25 + $0xd0] sm:$0xff] }
0x1b1f   :  { %12217 = vmatprep.subr.bf16.mxu0 %v15036_v25  ;;  %v14829_v25 = vcombine.low %v9081_v6, %v9089_v21  ;;  %v14814_v4 = vcombine.high %v9065_v50, %v9073_v29 }
0x1b22   :  { %12218 = vmatpush2.bf16.msra.mxu0 %v15035_v59  ;;  %v9057_v59 = vld [vmem:[#allocation25 + $0x50] sm:$0xff] }
0x1b23   :  { %12219 = vmatprep.subr.bf16.mxu0 %v15020_v35  ;;  %v14813_v35 = vcombine.low %v9065_v50, %v9073_v29  ;;  %v14798_v41 = vcombine.high %v9049_v39, %v9057_v59  ;;  %v9399_v50 = vld [vmem:[#allocation25 + $0xb00] sm:$0xff] }
0x1b24   :  { %v9407_v29 = vld [vmem:[#allocation25 + $0xb40] sm:$0xff] }
0x1b26   :  { %12220 = vmatpush2.bf16.msra.mxu0 %v15019_v1  ;;  %v9297_v1 = vld [vmem:[#allocation25 + $0x7d0] sm:$0xff] }
0x1b27   :  { %12221 = vmatprep.subr.bf16.mxu0 %v15004_v17  ;;  %v14797_v17 = vcombine.low %v9049_v39, %v9057_v59  ;;  %v15038_v0 = vcombine.high %v9289_v63, %v9297_v1 }
0x1b2a   :  { %12222 = vmatpush2.bf16.msra.mxu0 %v15003_v30  ;;  %v9281_v30 = vld [vmem:[#allocation25 + $0x750] sm:$0xff] }
0x1b2b   :  { %12223 = vmatprep.subr.bf16.mxu0 %v14988_v5  ;;  %v15037_v5 = vcombine.low %v9289_v63, %v9297_v1  ;;  %v15022_v20 = vcombine.high %v9273_v9, %v9281_v30  ;;  %v15146_v1 = vcombine.high %v9399_v50, %v9407_v29 }
0x1b2e   :  { %12224 = vmatpush2.bf16.msra.mxu0 %v14987_v12  ;;  %v9265_v12 = vld [vmem:[#allocation25 + $0x6d0] sm:$0xff] }
0x1b2f   :  { %12225 = vmatprep.subr.bf16.mxu0 %v14972_v54  ;;  %v15021_v54 = vcombine.low %v9273_v9, %v9281_v30  ;;  %v15006_v32 = vcombine.high %v9257_v45, %v9265_v12  ;;  %v9391_v9 = vld [vmem:[#allocation25 + $0xac0] sm:$0xff] }
0x1b32   :  { %12226 = vmatpush2.bf16.msra.mxu0 %v14971_v33  ;;  %v9249_v33 = vld [vmem:[#allocation25 + $0x650] sm:$0xff] }
0x1b33   :  { %12227 = vmatprep.subr.bf16.mxu0 %v14956_v60  ;;  %v15005_v60 = vcombine.low %v9257_v45, %v9265_v12  ;;  %v14990_v16 = vcombine.high %v9241_v8, %v9249_v33  ;;  %v9122_v45 = vld [vmem:[#allocation25 + $0x258] sm:$0xff]  ;;  %v15145_v12 = vcombine.low %v9399_v50, %v9407_v29  ;;  %v9311_v50 = vld [vmem:[#allocation25 + $0x840] sm:$0xff] }
0x1b34   :  { %v9290_v29 = vld [vmem:[#allocation25 + $0x798] sm:$0xff] }
0x1b36   :  { %12228 = vmatpush2.bf16.msra.mxu0 %v14955_v44  ;;  %v9233_v44 = vld [vmem:[#allocation25 + $0x5d0] sm:$0xff] }
0x1b37   :  { %12229 = vmatprep.subr.bf16.mxu0 %v14940_v38  ;;  %v14989_v38 = vcombine.low %v9241_v8, %v9249_v33  ;;  %v14974_v42 = vcombine.high %v9225_v37, %v9233_v44 }
0x1b3a   :  { %12230 = vmatpush2.bf16.msra.mxu0 %v14939_v52  ;;  %v9217_v52 = vld [vmem:[#allocation25 + $0x550] sm:$0xff] }
0x1b3b   :  { %12231 = vmatprep.subr.bf16.mxu0 %v14924_v55  ;;  %v14973_v55 = vcombine.low %v9225_v37, %v9233_v44  ;;  %v14958_v40 = vcombine.high %v9209_v11, %v9217_v52  ;;  %v9375_v37 = vld [vmem:[#allocation25 + $0xa40] sm:$0xff] }
0x1b3e   :  { %12232 = vmatpush2.bf16.msra.mxu0 %v14923_v58  ;;  %v9201_v58 = vld [vmem:[#allocation25 + $0x4d0] sm:$0xff] }
0x1b3f   :  { %12283 = vmatprep.subr.bf16.mxu0 %v14910_v14  ;;  %v14957_v14 = vcombine.low %v9209_v11, %v9217_v52  ;;  %v14942_v10 = vcombine.high %v9193_v34, %v9201_v58  ;;  %v14941_v51 = vcombine.low %v9193_v34, %v9201_v58  ;;  %v9106_v11 = vld [vmem:[#allocation25 + $0x1d8] sm:$0xff] }
0x1b40   :  { %v9082_v34 = vld [vmem:[#allocation25 + $0x118] sm:$0xff] }
0x1b41   :  { %12234 = vmatmul.mubr.bf16.vlgmr.msra.gmra.mxu0 %v21208_v26  ;;  %v9090_v58 = vld [vmem:[#allocation25 + $0x158] sm:$0xff] }
0x1b42   :  { %12284 = vmatpush1.bf16.msra.mxu0 %v14909_v18  ;;  %12315 = vmatprep.mubr.bf16.mxu0 %v21195_v15  ;;  %v9185_v18 = vld [vmem:[#allocation25 + $0x450] sm:$0xff] }
0x1b43   :  { %12285 = vmatprep.subr.bf16.mxu0 %v14894_v46  ;;  %v9022_v46 = vcombine.high %v21177_v57, %v21177_v57  ;;  %v14926_v61 = vcombine.high %v9177_v49, %v9185_v18 }
0x1b45   :  { %v21226_v13 = vrot.slane %v9022_v46, %v21175_v53  ;;  %v9335_v46 = vld [vmem:[#allocation25 + $0x900] sm:$0xff] }
0x1b46   :  { %12286 = vmatpush1.bf16.msra.mxu0 %v14893_v28  ;;  %v9162_v28 = vld [vmem:[#allocation25 + $0x398] sm:$0xff] }
0x1b47   :  { %12287 = vmatprep.subr.bf16.mxu0 %v14878_v3  ;;  %v9170_v3 = vld [vmem:[#allocation25 + $0x3d8] sm:$0xff]  ;;  %v9038_v6 = vcombine.high %v21226_v13, %v21226_v13 }
0x1b48   :  { %v14912_v27 = vcombine.high %v9162_v28, %v9170_v3  ;;  %v14911_v21 = vcombine.low %v9162_v28, %v9170_v3  ;;  %v9074_v28 = vld [vmem:[#allocation25 + $0xd8] sm:$0xff] }
0x1b4a   :  { %12288 = vmatpush1.bf16.msra.mxu0 %v14877_v7 }
0x1b4b   :  { %12289 = vmatprep.subr.bf16.mxu0 %v14862_v43  ;;  %v14925_v43 = vcombine.low %v9177_v49, %v9185_v18  ;;  %v14832_v18 = vcombine.high %v9082_v34, %v9090_v58 }
0x1b4e   :  { %12290 = vmatpush1.bf16.msra.mxu0 %v14861_v48  ;;  %v9146_v48 = vld [vmem:[#allocation25 + $0x318] sm:$0xff] }
0x1b4f   :  { %12291 = vmatprep.subr.bf16.mxu0 %v14846_v47  ;;  %v9154_v47 = vld [vmem:[#allocation25 + $0x358] sm:$0xff] }
0x1b50   :  { %v14895_v59 = vcombine.low %v9146_v48, %v9154_v47 }
0x1b52   :  { %12292 = vmatpush1.bf16.msra.mxu0 %v14845_v2 }
0x1b53   :  { %12293 = vmatprep.subr.bf16.mxu0 %v14830_v31  ;;  %v14896_v31 = vcombine.high %v9146_v48, %v9154_v47  ;;  %v9050_v48 = vld [vmem:[#allocation25 + $0x18] sm:$0xff] }
0x1b54   :  { %v9058_v47 = vld [vmem:[#allocation25 + $0x58] sm:$0xff] }
0x1b56   :  { %12294 = vmatpush1.bf16.msra.mxu0 %v14829_v25  ;;  %v9130_v25 = vld [vmem:[#allocation25 + $0x298] sm:$0xff] }
0x1b57   :  { %12295 = vmatprep.subr.bf16.mxu0 %v14814_v4 }
0x1b5a   :  { %12296 = vmatpush1.bf16.msra.mxu0 %v14813_v35  ;;  %v21232_v35 = vpack.c.bf16 %v9038_v6, %v9038_v6 }
0x1b5b   :  { %12297 = vmatprep.subr.bf16.mxu0 %v14798_v41 }
0x1b5e   :  { %12298 = vmatpush1.bf16.msra.mxu0 %v14797_v17 }
0x1b5f   :  { %12299 = vmatprep.subr.bf16.mxu0 %v15038_v0  ;;  %v9383_v0 = vld [vmem:[#allocation25 + $0xa80] sm:$0xff] }
0x1b60   :  { %v15130_v33 = vcombine.high %v9383_v0, %v9391_v9  ;;  %v15129_v22 = vcombine.low %v9383_v0, %v9391_v9  ;;  %v9282_v0 = vld [vmem:[#allocation25 + $0x758] sm:$0xff] }
0x1b62   :  { %12300 = vmatpush2.bf16.msra.mxu0 %v15037_v5 }
0x1b63   :  { %12301 = vmatprep.subr.bf16.mxu0 %v15022_v20  ;;  %v9114_v20 = vld [vmem:[#allocation25 + $0x218] sm:$0xff] }
0x1b64   :  { %v14863_v36 = vcombine.low %v9114_v20, %v9122_v45 }
0x1b66   :  { %12302 = vmatpush2.bf16.msra.mxu0 %v15021_v54 }
0x1b67   :  { %12303 = vmatprep.subr.bf16.mxu0 %v15006_v32 }
0x1b6a   :  { %12304 = vmatpush2.bf16.msra.mxu0 %v15005_v60  ;;  %v14864_v60 = vcombine.high %v9114_v20, %v9122_v45  ;;  %v9527_v45 = vld [vmem:[#allocation25 + $0xf00] sm:$0xff] }
0x1b6b   :  { %12305 = vmatprep.subr.bf16.mxu0 %v14990_v16  ;;  %v9367_v16 = vld [vmem:[#allocation25 + $0xa00] sm:$0xff] }
0x1b6e   :  { %12306 = vmatpush2.bf16.msra.mxu0 %v14989_v38 }
0x1b6f   :  { %12307 = vmatprep.subr.bf16.mxu0 %v14974_v42  ;;  %v9098_v42 = vld [vmem:[#allocation25 + $0x198] sm:$0xff] }
0x1b70   :  { %v14848_v52 = vcombine.high %v9098_v42, %v9106_v11 }
0x1b72   :  { %12308 = vmatpush2.bf16.msra.mxu0 %v14973_v55  ;;  %v9351_v55 = vld [vmem:[#allocation25 + $0x980] sm:$0xff] }
0x1b73   :  { %12309 = vmatprep.subr.bf16.mxu0 %v14958_v40  ;;  %v9359_v40 = vld [vmem:[#allocation25 + $0x9c0] sm:$0xff] }
0x1b74   :  { %v15098_v49 = vcombine.high %v9351_v55, %v9359_v40  ;;  %v15097_v3 = vcombine.low %v9351_v55, %v9359_v40  ;;  %v9503_v55 = vld [vmem:[#allocation25 + $0xe40] sm:$0xff]  ;;  %v9226_v40 = vld [vmem:[#allocation25 + $0x598] sm:$0xff] }
0x1b76   :  { %12310 = vmatpush2.bf16.msra.mxu0 %v14957_v14  ;;  %v15113_v14 = vcombine.low %v9367_v16, %v9375_v37 }
0x1b77   :  { %12311 = vmatprep.subr.bf16.mxu0 %v14942_v10  ;;  %v14847_v10 = vcombine.low %v9098_v42, %v9106_v11  ;;  %v9250_v42 = vld [vmem:[#allocation25 + $0x658] sm:$0xff] }
0x1b79   :  { %v8629_v23 = vpop.f32.mrf.mxu1 }
0x1b7a   :  { %v8635_v7 = vadd.f32 %v8629_v23, %v21183_v62  ;;  %12312 = vmatpush2.bf16.msra.mxu0 %v14941_v51  ;;  %v9138_v62 = vld [vmem:[#allocation25 + $0x2d8] sm:$0xff]  ;;  %v9343_v51 = vld [vmem:[#allocation25 + $0x940] sm:$0xff]  ;;  %v14831_v23 = vcombine.low %v9082_v34, %v9090_v58 }
0x1b7b   :  { %v17756_v19 = vpop.f32.mrf.mxu1  ;;  %12313 = vmatprep.subr.bf16.mxu0 %v14926_v61  ;;  %v14880_v17 = vcombine.high %v9130_v25, %v9138_v62  ;;  %v14879_v8 = vcombine.low %v9130_v25, %v9138_v62  ;;  %v9066_v61 = vld [vmem:[#allocation25 + $0x98] sm:$0xff] }
0x1b7c   :  { %v9319_v19 = vld [vmem:[#allocation25 + $0x880] sm:$0xff]  ;;  %v14815_v6 = vcombine.low %v9066_v61, %v9074_v28  ;;  %v9298_v25 = vld [vmem:[#allocation25 + $0x7d8] sm:$0xff] }
0x1b7d   :  { %v8632_v57 = vpop.f32.mrf.mxu1  ;;  %v9234_v34 = vld [vmem:[#allocation25 + $0x5d8] sm:$0xff] }
0x1b7e   :  { %12314 = vmatpush2.bf16.msra.mxu0 %v14925_v43  ;;  %v14816_v43 = vcombine.high %v9066_v61, %v9074_v28  ;;  %v15081_v57 = vcombine.low %v9335_v46, %v9343_v51  ;;  %v9218_v61 = vld [vmem:[#allocation25 + $0x558] sm:$0xff] }
0x1b7f   :  { %v17757_v2 = vpop.f32.mrf.mxu1  ;;  %12365 = vmatprep.subr.bf16.mxu0 %v14912_v27  ;;  %v9327_v27 = vld [vmem:[#allocation25 + $0x8c0] sm:$0xff] }
0x1b80   :  { %v14800_v2 = vcombine.high %v9050_v48, %v9058_v47  ;;  %v15065_v62 = vcombine.low %v9319_v19, %v9327_v27 }
0x1b81   :  { %v8768_v4 = vpop.f32.mrf.mxu0  ;;  %v8814_v39 = vpop.f32.mrf.mxu1  ;;  %12316 = vmatmul.mubr.bf16.vlgmr.msra.gmra.mxu0 %v21208_v26 }
0x1b82   :  { %v21234_v41 = vadd.f32 %v8768_v4, %v8635_v7  ;;  %v8820_v63 = vpack.c.bf16 %v8814_v39, %v8814_v39  ;;  %12366 = vmatpush1.bf16.msra.mxu0 %v14911_v21  ;;  %12397 = vmatprep.mubr.bf16.mxu0 %v21195_v15  ;;  %v15082_v7 = vcombine.high %v9335_v46, %v9343_v51  ;;  %v9487_v46 = vld [vmem:[#allocation25 + $0xdc0] sm:$0xff]  ;;  %v9210_v51 = vld [vmem:[#allocation25 + $0x518] sm:$0xff] }
0x1b83   :  { %12367 = vmatprep.subr.bf16.mxu0 %v14896_v31  ;;  %v17784_v30 = vpop.f32.mrf.mxu1  ;;  %v17778_v5 = vpop.f32.mrf.mxu0  ;;  %v15066_v21 = vcombine.high %v9319_v19, %v9327_v27  ;;  %v9303_v31 = vld [vmem:[#allocation25 + $0x800] sm:$0xff]  ;;  %v14799_v4 = vcombine.low %v9050_v48, %v9058_v47  ;;  %v9194_v27 = vld [vmem:[#allocation25 + $0x498] sm:$0xff] }
0x1b84   :  { %17799 = vmatmul.mubr.msk.bf16.vlgmr.msra.gmra.mxu1 %vm7818_vm7, %v8820_v63  ;;  %v15050_v39 = vcombine.high %v9303_v31, %v9311_v50  ;;  %v9543_v63 = vld [vmem:[#allocation25 + $0xf80] sm:$0xff]  ;;  %v15049_v9 = vcombine.low %v9303_v31, %v9311_v50  ;;  %v15039_v30 = vcombine.low %v9290_v29, %v9298_v25  ;;  %v9202_v48 = vld [vmem:[#allocation25 + $0x4d8] sm:$0xff] }
0x1b85   :  { %12161 = vmatpush1.bf16.msra.mxu1 %v15161_v56  ;;  %v8817_v54 = vpop.f32.mrf.mxu1  ;;  %12192 = vmatprep.mubr.bf16.mxu1 %v21232_v35  ;;  %v8771_v32 = vpop.f32.mrf.mxu0  ;;  %v15114_v56 = vcombine.high %v9367_v16, %v9375_v37  ;;  %v9511_v37 = vld [vmem:[#allocation25 + $0xe80] sm:$0xff]  ;;  %v9178_v50 = vld [vmem:[#allocation25 + $0x418] sm:$0xff] }
0x1b86   :  { %12368 = vmatpush1.bf16.msra.mxu0 %v14895_v59  ;;  %12162 = vmatprep.subr.bf16.mxu1 %v15146_v1  ;;  %v15040_v59 = vcombine.high %v9290_v29, %v9298_v25  ;;  %v9551_v1 = vld [vmem:[#allocation25 + $0xfc0] sm:$0xff]  ;;  %v9258_v54 = vld [vmem:[#allocation25 + $0x698] sm:$0xff] }
0x1b87   :  { %12369 = vmatprep.subr.bf16.mxu0 %v14880_v17  ;;  %v17785_v44 = vpop.f32.mrf.mxu1  ;;  %v17779_v38 = vpop.f32.mrf.mxu0  ;;  %v9274_v17 = vld [vmem:[#allocation25 + $0x718] sm:$0xff]  ;;  %v15290_v5 = vcombine.high %v9543_v63, %v9551_v1  ;;  %v9471_v19 = vld [vmem:[#allocation25 + $0xd40] sm:$0xff] }
0x1b88   :  { %v15024_v20 = vcombine.high %v9274_v17, %v9282_v0  ;;  %v9266_v32 = vld [vmem:[#allocation25 + $0x6d8] sm:$0xff]  ;;  %v9519_v44 = vld [vmem:[#allocation25 + $0xec0] sm:$0xff] }
0x1b89   :  { %12163 = vmatpush1.bf16.msra.mxu1 %v15145_v12  ;;  %v9535_v12 = vld [vmem:[#allocation25 + $0xf40] sm:$0xff]  ;;  %v15008_v16 = vcombine.high %v9258_v54, %v9266_v32  ;;  %v9242_v38 = vld [vmem:[#allocation25 + $0x618] sm:$0xff]  ;;  %v15257_v58 = vcombine.low %v9511_v37, %v9519_v44 }
0x1b8a   :  { %12370 = vmatpush1.bf16.msra.mxu0 %v14879_v8  ;;  %12164 = vmatprep.subr.bf16.mxu1 %v15130_v33  ;;  %v15289_v8 = vcombine.low %v9543_v63, %v9551_v1  ;;  %v15023_v33 = vcombine.low %v9274_v17, %v9282_v0  ;;  %v15273_v11 = vcombine.low %v9527_v45, %v9535_v12  ;;  %v9455_v31 = vld [vmem:[#allocation25 + $0xcc0] sm:$0xff]  ;;  %v9186_v29 = vld [vmem:[#allocation25 + $0x458] sm:$0xff] }
0x1b8b   :  { %12371 = vmatprep.subr.bf16.mxu0 %v14864_v60  ;;  %v15274_v60 = vcombine.high %v9527_v45, %v9535_v12  ;;  %v9439_v63 = vld [vmem:[#allocation25 + $0xc40] sm:$0xff]  ;;  %v9424_v45 = vld [vmem:[#allocation25 + $0xbc8] sm:$0xff] }
0x1b8c   :  { %v9163_v1 = vld [vmem:[#allocation25 + $0x3a0] sm:$0xff] }
0x1b8d   :  { %12165 = vmatpush1.bf16.msra.mxu1 %v15129_v22  ;;  %v15007_v22 = vcombine.low %v9258_v54, %v9266_v32  ;;  %v9171_v17 = vld [vmem:[#allocation25 + $0x3e0] sm:$0xff] }
0x1b8e   :  { %12372 = vmatpush1.bf16.msra.mxu0 %v14863_v36  ;;  %12166 = vmatprep.subr.bf16.mxu1 %v15114_v56  ;;  %v15258_v36 = vcombine.high %v9511_v37, %v9519_v44  ;;  %v14992_v56 = vcombine.high %v9242_v38, %v9250_v42  ;;  %v9147_v12 = vld [vmem:[#allocation25 + $0x320] sm:$0xff]  ;;  %v9408_v37 = vld [vmem:[#allocation25 + $0xb48] sm:$0xff]  ;;  %v21244_v44 = vpack.c.bf16 %v21226_v13, %v21226_v13 }
0x1b8f   :  { %12373 = vmatprep.subr.bf16.mxu0 %v14848_v52  ;;  %v9495_v52 = vld [vmem:[#allocation25 + $0xe00] sm:$0xff] }
0x1b90   :  { %v15241_v28 = vcombine.low %v9495_v52, %v9503_v55  ;;  %v9155_v54 = vld [vmem:[#allocation25 + $0x360] sm:$0xff] }
0x1b91   :  { %12167 = vmatpush1.bf16.msra.mxu1 %v15113_v14  ;;  %v14991_v14 = vcombine.low %v9242_v38, %v9250_v42  ;;  %v9131_v38 = vld [vmem:[#allocation25 + $0x2a0] sm:$0xff] }
0x1b92   :  { %12374 = vmatpush1.bf16.msra.mxu0 %v14847_v10  ;;  %12168 = vmatprep.subr.bf16.mxu1 %v15098_v49  ;;  %v15242_v10 = vcombine.high %v9495_v52, %v9503_v55  ;;  %v14976_v49 = vcombine.high %v9226_v40, %v9234_v34  ;;  %v9139_v42 = vld [vmem:[#allocation25 + $0x2e0] sm:$0xff]  ;;  %v9384_v52 = vld [vmem:[#allocation25 + $0xa88] sm:$0xff] }
0x1b93   :  { %12375 = vmatprep.subr.bf16.mxu0 %v14832_v18  ;;  %v9479_v18 = vld [vmem:[#allocation25 + $0xd80] sm:$0xff]  ;;  %v9392_v55 = vld [vmem:[#allocation25 + $0xac8] sm:$0xff] }
0x1b94   :  { %v15225_v47 = vcombine.low %v9479_v18, %v9487_v46  ;;  %v9115_v13 = vld [vmem:[#allocation25 + $0x220] sm:$0xff] }
0x1b95   :  { %12169 = vmatpush1.bf16.msra.mxu1 %v15097_v3  ;;  %v14975_v3 = vcombine.low %v9226_v40, %v9234_v34  ;;  %v9123_v40 = vld [vmem:[#allocation25 + $0x260] sm:$0xff] }
0x1b96   :  { %12376 = vmatpush1.bf16.msra.mxu0 %v14831_v23  ;;  %12170 = vmatprep.subr.bf16.mxu1 %v15082_v7  ;;  %v15226_v23 = vcombine.high %v9479_v18, %v9487_v46  ;;  %v14960_v7 = vcombine.high %v9210_v51, %v9218_v61  ;;  %v9376_v18 = vld [vmem:[#allocation25 + $0xa48] sm:$0xff]  ;;  %v9099_v46 = vld [vmem:[#allocation25 + $0x1a0] sm:$0xff] }
0x1b97   :  { %12377 = vmatprep.subr.bf16.mxu0 %v14816_v43  ;;  %v9463_v43 = vld [vmem:[#allocation25 + $0xd00] sm:$0xff] }
0x1b98   :  { %v15209_v25 = vcombine.low %v9463_v43, %v9471_v19 }
0x1b99   :  { %12171 = vmatpush1.bf16.msra.mxu1 %v15081_v57  ;;  %v14959_v57 = vcombine.low %v9210_v51, %v9218_v61  ;;  %v9107_v51 = vld [vmem:[#allocation25 + $0x1e0] sm:$0xff]  ;;  %v15131_v61 = vcombine.low %v9384_v52, %v9392_v55 }
0x1b9a   :  { %12378 = vmatpush1.bf16.msra.mxu0 %v14815_v6  ;;  %12172 = vmatprep.subr.bf16.mxu1 %v15066_v21  ;;  %v15210_v6 = vcombine.high %v9463_v43, %v9471_v19  ;;  %v14944_v21 = vcombine.high %v9194_v27, %v9202_v48  ;;  %v9360_v43 = vld [vmem:[#allocation25 + $0x9c8] sm:$0xff]  ;;  %v9083_v19 = vld [vmem:[#allocation25 + $0x120] sm:$0xff] }
0x1b9b   :  { %12379 = vmatprep.subr.bf16.mxu0 %v14800_v2  ;;  %v9447_v2 = vld [vmem:[#allocation25 + $0xc80] sm:$0xff] }
0x1b9c   :  { %v15193_v0 = vcombine.low %v9447_v2, %v9455_v31 }
0x1b9d   :  { %12173 = vmatpush1.bf16.msra.mxu1 %v15065_v62  ;;  %v14943_v62 = vcombine.low %v9194_v27, %v9202_v48  ;;  %v9091_v27 = vld [vmem:[#allocation25 + $0x160] sm:$0xff] }
0x1b9e   :  { %12380 = vmatpush1.bf16.msra.mxu0 %v14799_v4  ;;  %12174 = vmatprep.subr.bf16.mxu1 %v15050_v39  ;;  %v15194_v4 = vcombine.high %v9447_v2, %v9455_v31  ;;  %v14928_v39 = vcombine.high %v9178_v50, %v9186_v29  ;;  %v9344_v2 = vld [vmem:[#allocation25 + $0x948] sm:$0xff]  ;;  %v9067_v31 = vld [vmem:[#allocation25 + $0xa0] sm:$0xff] }
0x1b9f   :  { %12381 = vmatprep.subr.bf16.mxu0 %v15040_v59  ;;  %v9431_v59 = vld [vmem:[#allocation25 + $0xc00] sm:$0xff] }
0x1ba0   :  { %v15177_v32 = vcombine.low %v9431_v59, %v9439_v63 }
0x1ba1   :  { %12175 = vmatpush1.bf16.msra.mxu1 %v15049_v9  ;;  %v14927_v9 = vcombine.low %v9178_v50, %v9186_v29  ;;  %v9075_v50 = vld [vmem:[#allocation25 + $0xe0] sm:$0xff] }
0x1ba2   :  { %12382 = vmatpush2.bf16.msra.mxu0 %v15039_v30  ;;  %12176 = vmatprep.subr.bf16.mxu1 %v15290_v5  ;;  %v15178_v30 = vcombine.high %v9431_v59, %v9439_v63  ;;  %v14914_v5 = vcombine.high %v9163_v1, %v9171_v17  ;;  %v9328_v59 = vld [vmem:[#allocation25 + $0x8c8] sm:$0xff]  ;;  %v9051_v63 = vld [vmem:[#allocation25 + $0x20] sm:$0xff] }
0x1ba3   :  { %12383 = vmatprep.subr.bf16.mxu0 %v15024_v20  ;;  %v9416_v20 = vld [vmem:[#allocation25 + $0xb88] sm:$0xff] }
0x1ba5   :  { %12177 = vmatpush2.bf16.msra.mxu1 %v15289_v8  ;;  %v14913_v8 = vcombine.low %v9163_v1, %v9171_v17  ;;  %v9059_v1 = vld [vmem:[#allocation25 + $0x60] sm:$0xff] }
0x1ba6   :  { %12384 = vmatpush2.bf16.msra.mxu0 %v15023_v33  ;;  %12178 = vmatprep.subr.bf16.mxu1 %v15274_v60  ;;  %v15164_v33 = vcombine.high %v9416_v20, %v9424_v45  ;;  %v14898_v60 = vcombine.high %v9147_v12, %v9155_v54 }
0x1ba7   :  { %12385 = vmatprep.subr.bf16.mxu0 %v15008_v16  ;;  %v9400_v16 = vld [vmem:[#allocation25 + $0xb08] sm:$0xff] }
0x1ba8   :  { %v15147_v34 = vcombine.low %v9400_v16, %v9408_v37 }
0x1ba9   :  { %12179 = vmatpush2.bf16.msra.mxu1 %v15273_v11  ;;  %v15163_v11 = vcombine.low %v9416_v20, %v9424_v45  ;;  %v9312_v20 = vld [vmem:[#allocation25 + $0x848] sm:$0xff]  ;;  %v9291_v45 = vld [vmem:[#allocation25 + $0x7a0] sm:$0xff] }
0x1baa   :  { %12386 = vmatpush2.bf16.msra.mxu0 %v15007_v22  ;;  %12180 = vmatprep.subr.bf16.mxu1 %v15258_v36  ;;  %v14897_v22 = vcombine.low %v9147_v12, %v9155_v54  ;;  %v15148_v36 = vcombine.high %v9400_v16, %v9408_v37  ;;  %v9299_v12 = vld [vmem:[#allocation25 + $0x7e0] sm:$0xff]  ;;  %v9552_v16 = vld [vmem:[#allocation25 + $0xfc8] sm:$0xff] }
0x1bab   :  { %12387 = vmatprep.subr.bf16.mxu0 %v14992_v56  ;;  %v14882_v56 = vcombine.high %v9131_v38, %v9139_v42  ;;  %v9275_v37 = vld [vmem:[#allocation25 + $0x720] sm:$0xff] }
0x1bad   :  { %12181 = vmatpush2.bf16.msra.mxu1 %v15257_v58  ;;  %v14881_v58 = vcombine.low %v9131_v38, %v9139_v42  ;;  %v9283_v38 = vld [vmem:[#allocation25 + $0x760] sm:$0xff] }
0x1bae   :  { %12388 = vmatpush2.bf16.msra.mxu0 %v14991_v14  ;;  %12182 = vmatprep.subr.bf16.mxu1 %v15242_v10  ;;  %v15132_v14 = vcombine.high %v9384_v52, %v9392_v55  ;;  %v14866_v10 = vcombine.high %v9115_v13, %v9123_v40  ;;  %v9536_v52 = vld [vmem:[#allocation25 + $0xf48] sm:$0xff]  ;;  %v9259_v55 = vld [vmem:[#allocation25 + $0x6a0] sm:$0xff] }
0x1baf   :  { %12389 = vmatprep.subr.bf16.mxu0 %v14976_v49  ;;  %v9368_v49 = vld [vmem:[#allocation25 + $0xa08] sm:$0xff] }
0x1bb0   :  { %v15115_v48 = vcombine.low %v9368_v49, %v9376_v18 }
0x1bb1   :  { %12183 = vmatpush2.bf16.msra.mxu1 %v15241_v28  ;;  %v14865_v28 = vcombine.low %v9115_v13, %v9123_v40  ;;  %v9267_v13 = vld [vmem:[#allocation25 + $0x6e0] sm:$0xff] }
0x1bb2   :  { %12390 = vmatpush2.bf16.msra.mxu0 %v14975_v3  ;;  %12184 = vmatprep.subr.bf16.mxu1 %v15226_v23  ;;  %v15116_v3 = vcombine.high %v9368_v49, %v9376_v18  ;;  %v14850_v23 = vcombine.high %v9099_v46, %v9107_v51  ;;  %v9520_v49 = vld [vmem:[#allocation25 + $0xec8] sm:$0xff]  ;;  %v9243_v18 = vld [vmem:[#allocation25 + $0x620] sm:$0xff] }
0x1bb3   :  { %12391 = vmatprep.subr.bf16.mxu0 %v14960_v7  ;;  %v9352_v7 = vld [vmem:[#allocation25 + $0x988] sm:$0xff] }
0x1bb4   :  { %v15099_v29 = vcombine.low %v9352_v7, %v9360_v43 }
0x1bb5   :  { %12185 = vmatpush2.bf16.msra.mxu1 %v15225_v47  ;;  %v14849_v47 = vcombine.low %v9099_v46, %v9107_v51  ;;  %v9251_v46 = vld [vmem:[#allocation25 + $0x660] sm:$0xff] }
0x1bb6   :  { %12392 = vmatpush2.bf16.msra.mxu0 %v14959_v57  ;;  %12186 = vmatprep.subr.bf16.mxu1 %v15210_v6  ;;  %v15100_v57 = vcombine.high %v9352_v7, %v9360_v43  ;;  %v14834_v6 = vcombine.high %v9083_v19, %v9091_v27  ;;  %v9504_v7 = vld [vmem:[#allocation25 + $0xe48] sm:$0xff]  ;;  %v9227_v43 = vld [vmem:[#allocation25 + $0x5a0] sm:$0xff] }
0x1bb7   :  { %12393 = vmatprep.subr.bf16.mxu0 %v14944_v21  ;;  %v9336_v21 = vld [vmem:[#allocation25 + $0x908] sm:$0xff] }
0x1bb8   :  { %v15083_v17 = vcombine.low %v9336_v21, %v9344_v2 }
0x1bb9   :  { %12187 = vmatpush2.bf16.msra.mxu1 %v15209_v25  ;;  %v14833_v25 = vcombine.low %v9083_v19, %v9091_v27  ;;  %v9235_v19 = vld [vmem:[#allocation25 + $0x5e0] sm:$0xff] }
0x1bba   :  { %12394 = vmatpush2.bf16.msra.mxu0 %v14943_v62  ;;  %12188 = vmatprep.subr.bf16.mxu1 %v15194_v4  ;;  %v15084_v62 = vcombine.high %v9336_v21, %v9344_v2  ;;  %v14818_v4 = vcombine.high %v9067_v31, %v9075_v50  ;;  %v9488_v21 = vld [vmem:[#allocation25 + $0xdc8] sm:$0xff]  ;;  %v9211_v2 = vld [vmem:[#allocation25 + $0x520] sm:$0xff] }
0x1bbb   :  { %12395 = vmatprep.subr.bf16.mxu0 %v14928_v39  ;;  %v9320_v39 = vld [vmem:[#allocation25 + $0x888] sm:$0xff] }
0x1bbc   :  { %v15067_v54 = vcombine.low %v9320_v39, %v9328_v59 }
0x1bbd   :  { %12189 = vmatpush2.bf16.msra.mxu1 %v15193_v0  ;;  %v14817_v0 = vcombine.low %v9067_v31, %v9075_v50  ;;  %v9219_v31 = vld [vmem:[#allocation25 + $0x560] sm:$0xff] }
0x1bbe   :  { %12396 = vmatpush2.bf16.msra.mxu0 %v14927_v9  ;;  %12190 = vmatprep.subr.bf16.mxu1 %v15178_v30  ;;  %v15068_v9 = vcombine.high %v9320_v39, %v9328_v59  ;;  %v14802_v30 = vcombine.high %v9051_v63, %v9059_v1  ;;  %v9472_v39 = vld [vmem:[#allocation25 + $0xd48] sm:$0xff]  ;;  %v9195_v59 = vld [vmem:[#allocation25 + $0x4a0] sm:$0xff] }
0x1bbf   :  { %12447 = vmatprep.subr.bf16.mxu0 %v14914_v5  ;;  %v9304_v5 = vld [vmem:[#allocation25 + $0x808] sm:$0xff] }
0x1bc0   :  { %v15051_v42 = vcombine.low %v9304_v5, %v9312_v20 }
0x1bc1   :  { %12191 = vmatpush2.bf16.msra.mxu1 %v15177_v32  ;;  %12398 = vmatmul.mubr.bf16.vlgmr.msra.gmra.mxu0 %v21208_v26  ;;  %v14801_v32 = vcombine.low %v9051_v63, %v9059_v1  ;;  %v9203_v63 = vld [vmem:[#allocation25 + $0x4e0] sm:$0xff] }
0x1bc2   :  { %12448 = vmatpush1.bf16.msra.mxu0 %v14913_v8  ;;  %12242 = vmatprep.subr.bf16.mxu1 %v15164_v33  ;;  %v15052_v8 = vcombine.high %v9304_v5, %v9312_v20  ;;  %v15042_v33 = vcombine.high %v9291_v45, %v9299_v12  ;;  %v9456_v5 = vld [vmem:[#allocation25 + $0xcc8] sm:$0xff]  ;;  %v9179_v20 = vld [vmem:[#allocation25 + $0x420] sm:$0xff] }
0x1bc3   :  { %12449 = vmatprep.subr.bf16.mxu0 %v14898_v60  ;;  %12479 = vmatprep.mubr.bf16.mxu0 %v21195_v15  ;;  %v9544_v60 = vld [vmem:[#allocation25 + $0xf88] sm:$0xff] }
0x1bc4   :  { %12193 = vmatmul.mubr.bf16.vlgmr.msra.gmra.mxu1 %v21244_v44  ;;  %v15291_v40 = vcombine.low %v9544_v60, %v9552_v16 }
0x1bc5   :  { %12243 = vmatpush1.bf16.msra.mxu1 %v15163_v11  ;;  %12274 = vmatprep.mubr.bf16.mxu1 %v21232_v35  ;;  %v15041_v11 = vcombine.low %v9291_v45, %v9299_v12  ;;  %v9187_v45 = vld [vmem:[#allocation25 + $0x460] sm:$0xff] }
0x1bc6   :  { %12450 = vmatpush1.bf16.msra.mxu0 %v14897_v22  ;;  %12244 = vmatprep.subr.bf16.mxu1 %v15148_v36  ;;  %v15292_v22 = vcombine.high %v9544_v60, %v9552_v16  ;;  %v15026_v36 = vcombine.high %v9275_v37, %v9283_v38  ;;  %v9440_v60 = vld [vmem:[#allocation25 + $0xc48] sm:$0xff] }
0x1bc7   :  { %12451 = vmatprep.subr.bf16.mxu0 %v14882_v56  ;;  %v9528_v56 = vld [vmem:[#allocation25 + $0xf08] sm:$0xff] }
0x1bc8   :  { %v15275_v51 = vcombine.low %v9528_v56, %v9536_v52  ;;  %v9164_v16 = vld [vmem:[#allocation25 + $0x3a8] sm:$0xff] }
0x1bc9   :  { %12245 = vmatpush1.bf16.msra.mxu1 %v15147_v34  ;;  %v15025_v34 = vcombine.low %v9275_v37, %v9283_v38  ;;  %v9172_v37 = vld [vmem:[#allocation25 + $0x3e8] sm:$0xff] }
0x1bca   :  { %12452 = vmatpush1.bf16.msra.mxu0 %v14881_v58  ;;  %12246 = vmatprep.subr.bf16.mxu1 %v15132_v14  ;;  %v15276_v58 = vcombine.high %v9528_v56, %v9536_v52  ;;  %v15010_v14 = vcombine.high %v9259_v55, %v9267_v13  ;;  %v9425_v56 = vld [vmem:[#allocation25 + $0xbd0] sm:$0xff]  ;;  %v9148_v52 = vld [vmem:[#allocation25 + $0x328] sm:$0xff] }
0x1bcb   :  { %12453 = vmatprep.subr.bf16.mxu0 %v14866_v10  ;;  %v9512_v10 = vld [vmem:[#allocation25 + $0xe88] sm:$0xff] }
0x1bcc   :  { %v15259_v27 = vcombine.low %v9512_v10, %v9520_v49 }
0x1bcd   :  { %12247 = vmatpush1.bf16.msra.mxu1 %v15131_v61  ;;  %v15009_v61 = vcombine.low %v9259_v55, %v9267_v13  ;;  %v9156_v55 = vld [vmem:[#allocation25 + $0x368] sm:$0xff] }
0x1bce   :  { %12454 = vmatpush1.bf16.msra.mxu0 %v14865_v28  ;;  %12248 = vmatprep.subr.bf16.mxu1 %v15116_v3  ;;  %v15260_v28 = vcombine.high %v9512_v10, %v9520_v49  ;;  %v14994_v3 = vcombine.high %v9243_v18, %v9251_v46  ;;  %v9401_v10 = vld [vmem:[#allocation25 + $0xb10] sm:$0xff] }
0x1bcf   :  { %12455 = vmatprep.subr.bf16.mxu0 %v14850_v23  ;;  %v9496_v23 = vld [vmem:[#allocation25 + $0xe08] sm:$0xff]  ;;  %v9409_v49 = vld [vmem:[#allocation25 + $0xb50] sm:$0xff] }
0x1bd0   :  { %v15243_v50 = vcombine.low %v9496_v23, %v9504_v7 }
0x1bd1   :  { %12249 = vmatpush1.bf16.msra.mxu1 %v15115_v48  ;;  %v14993_v48 = vcombine.low %v9243_v18, %v9251_v46  ;;  %v9132_v46 = vld [vmem:[#allocation25 + $0x2a8] sm:$0xff] }
0x1bd2   :  { %12456 = vmatpush1.bf16.msra.mxu0 %v14849_v47  ;;  %12250 = vmatprep.subr.bf16.mxu1 %v15100_v57  ;;  %v15244_v47 = vcombine.high %v9496_v23, %v9504_v7  ;;  %v14978_v57 = vcombine.high %v9227_v43, %v9235_v19  ;;  %v15150_v23 = vcombine.high %v9401_v10, %v9409_v49 }
0x1bd3   :  { %12457 = vmatprep.subr.bf16.mxu0 %v14834_v6  ;;  %v9480_v6 = vld [vmem:[#allocation25 + $0xd88] sm:$0xff] }
0x1bd4   :  { %v15227_v1 = vcombine.low %v9480_v6, %v9488_v21 }
0x1bd5   :  { %12251 = vmatpush1.bf16.msra.mxu1 %v15099_v29  ;;  %v14977_v29 = vcombine.low %v9227_v43, %v9235_v19  ;;  %v9385_v43 = vld [vmem:[#allocation25 + $0xa90] sm:$0xff] }
0x1bd6   :  { %12458 = vmatpush1.bf16.msra.mxu0 %v14833_v25  ;;  %12252 = vmatprep.subr.bf16.mxu1 %v15084_v62  ;;  %v15228_v25 = vcombine.high %v9480_v6, %v9488_v21  ;;  %v14962_v62 = vcombine.high %v9211_v2, %v9219_v31  ;;  %v9393_v19 = vld [vmem:[#allocation25 + $0xad0] sm:$0xff] }
0x1bd7   :  { %12459 = vmatprep.subr.bf16.mxu0 %v14818_v4  ;;  %v9464_v4 = vld [vmem:[#allocation25 + $0xd08] sm:$0xff]  ;;  %v15134_v21 = vcombine.high %v9385_v43, %v9393_v19 }
0x1bd8   :  { %v15211_v12 = vcombine.low %v9464_v4, %v9472_v39 }
0x1bd9   :  { %12253 = vmatpush1.bf16.msra.mxu1 %v15083_v17  ;;  %v14961_v17 = vcombine.low %v9211_v2, %v9219_v31  ;;  %v9369_v31 = vld [vmem:[#allocation25 + $0xa10] sm:$0xff] }
0x1bda   :  { %12460 = vmatpush1.bf16.msra.mxu0 %v14817_v0  ;;  %12254 = vmatprep.subr.bf16.mxu1 %v15068_v9  ;;  %v15212_v0 = vcombine.high %v9464_v4, %v9472_v39  ;;  %v14946_v9 = vcombine.high %v9195_v59, %v9203_v63 }
0x1bdb   :  { %12461 = vmatprep.subr.bf16.mxu0 %v14802_v30  ;;  %v9448_v30 = vld [vmem:[#allocation25 + $0xc88] sm:$0xff] }
0x1bdc   :  { %v15195_v38 = vcombine.low %v9448_v30, %v9456_v5 }
0x1bdd   :  { %12255 = vmatpush1.bf16.msra.mxu1 %v15067_v54  ;;  %v14945_v54 = vcombine.low %v9195_v59, %v9203_v63  ;;  %v9353_v63 = vld [vmem:[#allocation25 + $0x990] sm:$0xff] }
0x1bde   :  { %12462 = vmatpush1.bf16.msra.mxu0 %v14801_v32  ;;  %12256 = vmatprep.subr.bf16.mxu1 %v15052_v8  ;;  %v15196_v32 = vcombine.high %v9448_v30, %v9456_v5  ;;  %v14930_v8 = vcombine.high %v9179_v20, %v9187_v45 }
0x1bdf   :  { %12463 = vmatprep.subr.bf16.mxu0 %v15042_v33  ;;  %v9432_v33 = vld [vmem:[#allocation25 + $0xc08] sm:$0xff] }
0x1be0   :  { %v15179_v13 = vcombine.low %v9432_v33, %v9440_v60 }
0x1be1   :  { %12257 = vmatpush1.bf16.msra.mxu1 %v15051_v42  ;;  %v14929_v42 = vcombine.low %v9179_v20, %v9187_v45  ;;  %v9337_v45 = vld [vmem:[#allocation25 + $0x910] sm:$0xff] }
0x1be2   :  { %12464 = vmatpush2.bf16.msra.mxu0 %v15041_v11  ;;  %12258 = vmatprep.subr.bf16.mxu1 %v15292_v22  ;;  %v15180_v11 = vcombine.high %v9432_v33, %v9440_v60  ;;  %v14916_v22 = vcombine.high %v9164_v16, %v9172_v37 }
0x1be3   :  { %12465 = vmatprep.subr.bf16.mxu0 %v15026_v36  ;;  %v9417_v36 = vld [vmem:[#allocation25 + $0xb90] sm:$0xff] }
0x1be5   :  { %12259 = vmatpush2.bf16.msra.mxu1 %v15291_v40  ;;  %v21250_v40 = vpop.f32.mrf.mxu0 }
0x1be6   :  { %12466 = vmatpush2.bf16.msra.mxu0 %v15025_v34  ;;  %12260 = vmatprep.subr.bf16.mxu1 %v15276_v58  ;;  %v14915_v34 = vcombine.low %v9164_v16, %v9172_v37  ;;  %v15166_v58 = vcombine.high %v9417_v36, %v9425_v56  ;;  %v9321_v37 = vld [vmem:[#allocation25 + $0x890] sm:$0xff] }
0x1be7   :  { %12467 = vmatprep.subr.bf16.mxu0 %v15010_v14  ;;  %v14900_v14 = vcombine.high %v9148_v52, %v9156_v55  ;;  %v21252_v18 = vpop.f32.mrf.mxu0 }
0x1be9   :  { %12261 = vmatpush2.bf16.msra.mxu1 %v15275_v51  ;;  %v9140_v51 = vld [vmem:[#allocation25 + $0x2e8] sm:$0xff] }
0x1bea   :  { %12468 = vmatpush2.bf16.msra.mxu0 %v15009_v61  ;;  %12262 = vmatprep.subr.bf16.mxu1 %v15260_v28  ;;  %v15165_v61 = vcombine.low %v9417_v36, %v9425_v56  ;;  %v12157_v28 = vpop.f32.mrf.mxu0  ;;  %v14884_v7 = vcombine.high %v9132_v46, %v9140_v51  ;;  %v14883_v6 = vcombine.low %v9132_v46, %v9140_v51  ;;  %v9545_v51 = vld [vmem:[#allocation25 + $0xf90] sm:$0xff] }
0x1beb   :  { %12469 = vmatprep.subr.bf16.mxu0 %v14994_v3  ;;  %v14899_v3 = vcombine.low %v9148_v52, %v9156_v55  ;;  %v9305_v55 = vld [vmem:[#allocation25 + $0x810] sm:$0xff]  ;;  %v9276_v28 = vld [vmem:[#allocation25 + $0x728] sm:$0xff] }
0x1bed   :  { %12263 = vmatpush2.bf16.msra.mxu1 %v15259_v27  ;;  %v12158_v27 = vpop.f32.mrf.mxu0 }
0x1bee   :  { %12470 = vmatpush2.bf16.msra.mxu0 %v14993_v48  ;;  %12264 = vmatprep.subr.bf16.mxu1 %v15244_v47  ;;  %v9116_v48 = vld [vmem:[#allocation25 + $0x228] sm:$0xff]  ;;  %v9529_v27 = vld [vmem:[#allocation25 + $0xf10] sm:$0xff] }
0x1bef   :  { %12471 = vmatprep.subr.bf16.mxu0 %v14978_v57  ;;  %v9124_v47 = vld [vmem:[#allocation25 + $0x268] sm:$0xff]  ;;  %v15149_v57 = vcombine.low %v9401_v10, %v9409_v49 }
0x1bf0   :  { %v14868_v2 = vcombine.high %v9116_v48, %v9124_v47  ;;  %v14867_v4 = vcombine.low %v9116_v48, %v9124_v47  ;;  %v9537_v48 = vld [vmem:[#allocation25 + $0xf50] sm:$0xff]  ;;  %v9260_v47 = vld [vmem:[#allocation25 + $0x6a8] sm:$0xff] }
0x1bf1   :  { %12265 = vmatpush2.bf16.msra.mxu1 %v15243_v50  ;;  %v9377_v50 = vld [vmem:[#allocation25 + $0xa50] sm:$0xff] }
0x1bf2   :  { %12472 = vmatpush2.bf16.msra.mxu0 %v14977_v29  ;;  %12266 = vmatprep.subr.bf16.mxu1 %v15228_v25  ;;  %v9100_v29 = vld [vmem:[#allocation25 + $0x1a8] sm:$0xff]  ;;  %v15118_v39 = vcombine.high %v9369_v31, %v9377_v50 }
0x1bf3   :  { %12473 = vmatprep.subr.bf16.mxu0 %v14962_v62  ;;  %v9108_v25 = vld [vmem:[#allocation25 + $0x1e8] sm:$0xff]  ;;  %v15133_v62 = vcombine.low %v9385_v43, %v9393_v19 }
0x1bf4   :  { %v14852_v59 = vcombine.high %v9100_v29, %v9108_v25  ;;  %v14851_v30 = vcombine.low %v9100_v29, %v9108_v25  ;;  %v9521_v29 = vld [vmem:[#allocation25 + $0xed0] sm:$0xff]  ;;  %v9244_v25 = vld [vmem:[#allocation25 + $0x628] sm:$0xff] }
0x1bf5   :  { %12267 = vmatpush2.bf16.msra.mxu1 %v15227_v1  ;;  %v9361_v1 = vld [vmem:[#allocation25 + $0x9d0] sm:$0xff] }
0x1bf6   :  { %12474 = vmatpush2.bf16.msra.mxu0 %v14961_v17  ;;  %12268 = vmatprep.subr.bf16.mxu1 %v15212_v0  ;;  %v9084_v17 = vld [vmem:[#allocation25 + $0x128] sm:$0xff]  ;;  %v15102_v5 = vcombine.high %v9353_v63, %v9361_v1 }
0x1bf7   :  { %12475 = vmatprep.subr.bf16.mxu0 %v14946_v9  ;;  %v9092_v0 = vld [vmem:[#allocation25 + $0x168] sm:$0xff]  ;;  %v15117_v9 = vcombine.low %v9369_v31, %v9377_v50  ;;  %v9513_v50 = vld [vmem:[#allocation25 + $0xe90] sm:$0xff] }
0x1bf8   :  { %v14836_v20 = vcombine.high %v9084_v17, %v9092_v0  ;;  %v14835_v33 = vcombine.low %v9084_v17, %v9092_v0  ;;  %v9505_v17 = vld [vmem:[#allocation25 + $0xe50] sm:$0xff]  ;;  %v9228_v0 = vld [vmem:[#allocation25 + $0x5a8] sm:$0xff] }
0x1bf9   :  { %12269 = vmatpush2.bf16.msra.mxu1 %v15211_v12  ;;  %v9345_v12 = vld [vmem:[#allocation25 + $0x950] sm:$0xff] }
0x1bfa   :  { %12476 = vmatpush2.bf16.msra.mxu0 %v14945_v54  ;;  %12270 = vmatprep.subr.bf16.mxu1 %v15196_v32  ;;  %v9068_v54 = vld [vmem:[#allocation25 + $0xa8] sm:$0xff]  ;;  %v15086_v60 = vcombine.high %v9337_v45, %v9345_v12 }
0x1bfb   :  { %12477 = vmatprep.subr.bf16.mxu0 %v14930_v8  ;;  %v9076_v32 = vld [vmem:[#allocation25 + $0xe8] sm:$0xff]  ;;  %v15101_v8 = vcombine.low %v9353_v63, %v9361_v1  ;;  %v9497_v1 = vld [vmem:[#allocation25 + $0xe10] sm:$0xff] }
0x1bfc   :  { %v14820_v16 = vcombine.high %v9068_v54, %v9076_v32  ;;  %v14819_v36 = vcombine.low %v9068_v54, %v9076_v32  ;;  %v9489_v54 = vld [vmem:[#allocation25 + $0xdd0] sm:$0xff]  ;;  %v9212_v32 = vld [vmem:[#allocation25 + $0x528] sm:$0xff] }
0x1bfd   :  { %12271 = vmatpush2.bf16.msra.mxu1 %v15195_v38  ;;  %v9329_v38 = vld [vmem:[#allocation25 + $0x8d0] sm:$0xff] }
0x1bfe   :  { %12478 = vmatpush2.bf16.msra.mxu0 %v14929_v42  ;;  %12272 = vmatprep.subr.bf16.mxu1 %v15180_v11  ;;  %v9052_v42 = vld [vmem:[#allocation25 + $0x28] sm:$0xff]  ;;  %v15070_v56 = vcombine.high %v9321_v37, %v9329_v38 }
0x1bff   :  { %12529 = vmatprep.subr.bf16.mxu0 %v14916_v22  ;;  %v9060_v11 = vld [vmem:[#allocation25 + $0x68] sm:$0xff]  ;;  %v15085_v22 = vcombine.low %v9337_v45, %v9345_v12  ;;  %v9481_v12 = vld [vmem:[#allocation25 + $0xd90] sm:$0xff] }
0x1c00   :  { %v14804_v52 = vcombine.high %v9052_v42, %v9060_v11  ;;  %v14803_v10 = vcombine.low %v9052_v42, %v9060_v11  ;;  %v9473_v42 = vld [vmem:[#allocation25 + $0xd50] sm:$0xff]  ;;  %v9196_v11 = vld [vmem:[#allocation25 + $0x4a8] sm:$0xff] }
0x1c01   :  { %12273 = vmatpush2.bf16.msra.mxu1 %v15179_v13  ;;  %12480 = vmatmul.mubr.bf16.vlgmr.msra.gmra.mxu0 %v21208_v26  ;;  %v9313_v13 = vld [vmem:[#allocation25 + $0x850] sm:$0xff] }
0x1c02   :  { %12530 = vmatpush1.bf16.msra.mxu0 %v14915_v34  ;;  %12324 = vmatprep.subr.bf16.mxu1 %v15166_v58  ;;  %v9292_v34 = vld [vmem:[#allocation25 + $0x7a8] sm:$0xff]  ;;  %v15054_v49 = vcombine.high %v9305_v55, %v9313_v13 }
0x1c03   :  { %12531 = vmatprep.subr.bf16.mxu0 %v14900_v14  ;;  %12561 = vmatprep.mubr.bf16.mxu0 %v21195_v15  ;;  %v9300_v58 = vld [vmem:[#allocation25 + $0x7e8] sm:$0xff]  ;;  %v15069_v14 = vcombine.low %v9321_v37, %v9329_v38  ;;  %v9465_v38 = vld [vmem:[#allocation25 + $0xd10] sm:$0xff] }
0x1c04   :  { %12275 = vmatmul.mubr.bf16.vlgmr.msra.gmra.mxu1 %v21244_v44  ;;  %v15044_v46 = vcombine.high %v9292_v34, %v9300_v58 }
0x1c05   :  { %12325 = vmatpush1.bf16.msra.mxu1 %v15165_v61  ;;  %12356 = vmatprep.mubr.bf16.mxu1 %v21232_v35  ;;  %v9553_v61 = vld [vmem:[#allocation25 + $0xfd0] sm:$0xff] }
0x1c06   :  { %12532 = vmatpush1.bf16.msra.mxu0 %v14899_v3  ;;  %12326 = vmatprep.subr.bf16.mxu1 %v15150_v23  ;;  %v9284_v3 = vld [vmem:[#allocation25 + $0x768] sm:$0xff]  ;;  %v15053_v23 = vcombine.low %v9305_v55, %v9313_v13  ;;  %v15294_v43 = vcombine.high %v9545_v51, %v9553_v61  ;;  %v9449_v13 = vld [vmem:[#allocation25 + $0xc90] sm:$0xff] }
0x1c07   :  { %12533 = vmatprep.subr.bf16.mxu0 %v14884_v7  ;;  %v15043_v7 = vcombine.low %v9292_v34, %v9300_v58  ;;  %v15028_v19 = vcombine.high %v9276_v28, %v9284_v3  ;;  %v9457_v34 = vld [vmem:[#allocation25 + $0xcd0] sm:$0xff]  ;;  %v9180_v58 = vld [vmem:[#allocation25 + $0x428] sm:$0xff] }
0x1c09   :  { %12327 = vmatpush1.bf16.msra.mxu1 %v15149_v57  ;;  %v9268_v57 = vld [vmem:[#allocation25 + $0x6e8] sm:$0xff] }
0x1c0a   :  { %12534 = vmatpush1.bf16.msra.mxu0 %v14883_v6  ;;  %12328 = vmatprep.subr.bf16.mxu1 %v15134_v21  ;;  %v15293_v6 = vcombine.low %v9545_v51, %v9553_v61  ;;  %v15027_v21 = vcombine.low %v9276_v28, %v9284_v3  ;;  %v15012_v31 = vcombine.high %v9260_v47, %v9268_v57  ;;  %v9433_v61 = vld [vmem:[#allocation25 + $0xc10] sm:$0xff] }
0x1c0b   :  { %12535 = vmatprep.subr.bf16.mxu0 %v14868_v2  ;;  %v15278_v2 = vcombine.high %v9529_v27, %v9537_v48  ;;  %v9441_v28 = vld [vmem:[#allocation25 + $0xc50] sm:$0xff] }
0x1c0c   :  { %v9165_v3 = vld [vmem:[#allocation25 + $0x3b0] sm:$0xff] }
0x1c0d   :  { %12329 = vmatpush1.bf16.msra.mxu1 %v15133_v62  ;;  %v9252_v62 = vld [vmem:[#allocation25 + $0x668] sm:$0xff] }
0x1c0e   :  { %12536 = vmatpush1.bf16.msra.mxu0 %v14867_v4  ;;  %12330 = vmatprep.subr.bf16.mxu1 %v15118_v39  ;;  %v15277_v4 = vcombine.low %v9529_v27, %v9537_v48  ;;  %v15011_v39 = vcombine.low %v9260_v47, %v9268_v57  ;;  %v14996_v63 = vcombine.high %v9244_v25, %v9252_v62  ;;  %v9418_v48 = vld [vmem:[#allocation25 + $0xb98] sm:$0xff]  ;;  %v9149_v57 = vld [vmem:[#allocation25 + $0x330] sm:$0xff] }
0x1c0f   :  { %12537 = vmatprep.subr.bf16.mxu0 %v14852_v59  ;;  %v15262_v59 = vcombine.high %v9513_v50, %v9521_v29  ;;  %v9426_v47 = vld [vmem:[#allocation25 + $0xbd8] sm:$0xff] }
0x1c11   :  { %12331 = vmatpush1.bf16.msra.mxu1 %v15117_v9  ;;  %v9236_v9 = vld [vmem:[#allocation25 + $0x5e8] sm:$0xff] }
0x1c12   :  { %12538 = vmatpush1.bf16.msra.mxu0 %v14851_v30  ;;  %12332 = vmatprep.subr.bf16.mxu1 %v15102_v5  ;;  %v15261_v30 = vcombine.low %v9513_v50, %v9521_v29  ;;  %v14995_v5 = vcombine.low %v9244_v25, %v9252_v62  ;;  %v14980_v45 = vcombine.high %v9228_v0, %v9236_v9  ;;  %v9402_v25 = vld [vmem:[#allocation25 + $0xb18] sm:$0xff] }
0x1c13   :  { %12539 = vmatprep.subr.bf16.mxu0 %v14836_v20  ;;  %v15246_v20 = vcombine.high %v9497_v1, %v9505_v17  ;;  %v15168_v50 = vcombine.high %v9418_v48, %v9426_v47  ;;  %v9410_v62 = vld [vmem:[#allocation25 + $0xb58] sm:$0xff] }
0x1c15   :  { %12333 = vmatpush1.bf16.msra.mxu1 %v15101_v8  ;;  %v9220_v8 = vld [vmem:[#allocation25 + $0x568] sm:$0xff] }
0x1c16   :  { %12540 = vmatpush1.bf16.msra.mxu0 %v14835_v33  ;;  %12334 = vmatprep.subr.bf16.mxu1 %v15086_v60  ;;  %v15245_v33 = vcombine.low %v9497_v1, %v9505_v17  ;;  %v14979_v60 = vcombine.low %v9228_v0, %v9236_v9  ;;  %v14964_v37 = vcombine.high %v9212_v32, %v9220_v8 }
0x1c17   :  { %12541 = vmatprep.subr.bf16.mxu0 %v14820_v16  ;;  %v15230_v16 = vcombine.high %v9481_v12, %v9489_v54  ;;  %v15152_v0 = vcombine.high %v9402_v25, %v9410_v62 }
0x1c19   :  { %12335 = vmatpush1.bf16.msra.mxu1 %v15085_v22  ;;  %v9204_v22 = vld [vmem:[#allocation25 + $0x4e8] sm:$0xff] }
0x1c1a   :  { %12542 = vmatpush1.bf16.msra.mxu0 %v14819_v36  ;;  %12336 = vmatprep.subr.bf16.mxu1 %v15070_v56  ;;  %v15229_v36 = vcombine.low %v9481_v12, %v9489_v54  ;;  %v14963_v56 = vcombine.low %v9212_v32, %v9220_v8  ;;  %v14948_v55 = vcombine.high %v9196_v11, %v9204_v22  ;;  %v9117_v12 = vld [vmem:[#allocation25 + $0x230] sm:$0xff] }
0x1c1b   :  { %12543 = vmatprep.subr.bf16.mxu0 %v14804_v52  ;;  %v15214_v52 = vcombine.high %v9465_v38, %v9473_v42  ;;  %v9125_v54 = vld [vmem:[#allocation25 + $0x270] sm:$0xff]  ;;  %v15151_v8 = vcombine.low %v9402_v25, %v9410_v62  ;;  %v9306_v62 = vld [vmem:[#allocation25 + $0x818] sm:$0xff] }
0x1c1d   :  { %12337 = vmatpush1.bf16.msra.mxu1 %v15069_v14  ;;  %v9188_v14 = vld [vmem:[#allocation25 + $0x468] sm:$0xff] }
0x1c1e   :  { %12544 = vmatpush1.bf16.msra.mxu0 %v14803_v10  ;;  %12338 = vmatprep.subr.bf16.mxu1 %v15054_v49  ;;  %v15213_v10 = vcombine.low %v9465_v38, %v9473_v42  ;;  %v14947_v49 = vcombine.low %v9196_v11, %v9204_v22  ;;  %v14932_v51 = vcombine.high %v9180_v58, %v9188_v14  ;;  %v9370_v38 = vld [vmem:[#allocation25 + $0xa18] sm:$0xff]  ;;  %v9101_v11 = vld [vmem:[#allocation25 + $0x1b0] sm:$0xff] }
0x1c1f   :  { %12545 = vmatprep.subr.bf16.mxu0 %v15044_v46  ;;  %v15198_v46 = vcombine.high %v9449_v13, %v9457_v34  ;;  %v9378_v42 = vld [vmem:[#allocation25 + $0xa58] sm:$0xff]  ;;  %v9109_v22 = vld [vmem:[#allocation25 + $0x1f0] sm:$0xff] }
0x1c21   :  { %12339 = vmatpush1.bf16.msra.mxu1 %v15053_v23  ;;  %v9173_v23 = vld [vmem:[#allocation25 + $0x3f0] sm:$0xff] }
0x1c22   :  { %12546 = vmatpush2.bf16.msra.mxu0 %v15043_v7  ;;  %12340 = vmatprep.subr.bf16.mxu1 %v15294_v43  ;;  %v15197_v7 = vcombine.low %v9449_v13, %v9457_v34  ;;  %v14931_v43 = vcombine.low %v9180_v58, %v9188_v14  ;;  %v14918_v27 = vcombine.high %v9165_v3, %v9173_v23  ;;  %v9354_v34 = vld [vmem:[#allocation25 + $0x998] sm:$0xff]  ;;  %v9085_v14 = vld [vmem:[#allocation25 + $0x130] sm:$0xff] }
0x1c23   :  { %12547 = vmatprep.subr.bf16.mxu0 %v15028_v19  ;;  %v15182_v19 = vcombine.high %v9433_v61, %v9441_v28  ;;  %v14854_v13 = vcombine.high %v9101_v11, %v9109_v22  ;;  %v9362_v58 = vld [vmem:[#allocation25 + $0x9d8] sm:$0xff] }
0x1c25   :  { %12341 = vmatpush2.bf16.msra.mxu1 %v15293_v6  ;;  %v9157_v6 = vld [vmem:[#allocation25 + $0x370] sm:$0xff] }
0x1c26   :  { %12548 = vmatpush2.bf16.msra.mxu0 %v15027_v21  ;;  %12342 = vmatprep.subr.bf16.mxu1 %v15278_v2  ;;  %v15181_v21 = vcombine.low %v9433_v61, %v9441_v28  ;;  %v21258_v2 = vpop.f32.mrf.mxu0  ;;  %v14902_v29 = vcombine.high %v9149_v57, %v9157_v6  ;;  %v14901_v17 = vcombine.low %v9149_v57, %v9157_v6  ;;  %v9338_v28 = vld [vmem:[#allocation25 + $0x918] sm:$0xff]  ;;  %v9053_v6 = vld [vmem:[#allocation25 + $0x30] sm:$0xff] }
0x1c27   :  { %12549 = vmatprep.subr.bf16.mxu0 %v15012_v31  ;;  %v14917_v31 = vcombine.low %v9165_v3, %v9173_v23  ;;  %v9346_v3 = vld [vmem:[#allocation25 + $0x958] sm:$0xff]  ;;  %v9069_v23 = vld [vmem:[#allocation25 + $0xb0] sm:$0xff] }
0x1c28   :  { %v9330_v57 = vld [vmem:[#allocation25 + $0x8d8] sm:$0xff] }
0x1c29   :  { %12343 = vmatpush2.bf16.msra.mxu1 %v15277_v4  ;;  %v21260_v4 = vpop.f32.mrf.mxu0 }
0x1c2a   :  { %12550 = vmatpush2.bf16.msra.mxu0 %v15011_v39  ;;  %12344 = vmatprep.subr.bf16.mxu1 %v15262_v59  ;;  %v9133_v39 = vld [vmem:[#allocation25 + $0x2b0] sm:$0xff] }
0x1c2b   :  { %12551 = vmatprep.subr.bf16.mxu0 %v14996_v63  ;;  %v9141_v59 = vld [vmem:[#allocation25 + $0x2f0] sm:$0xff]  ;;  %v15167_v63 = vcombine.low %v9418_v48, %v9426_v47  ;;  %v12239_v1 = vpop.f32.mrf.mxu0  ;;  %v9322_v47 = vld [vmem:[#allocation25 + $0x898] sm:$0xff] }
0x1c2c   :  { %v14886_v9 = vcombine.high %v9133_v39, %v9141_v59  ;;  %v15071_v1 = vcombine.low %v9322_v47, %v9330_v57 }
0x1c2d   :  { %12345 = vmatpush2.bf16.msra.mxu1 %v15261_v30  ;;  %v9386_v30 = vld [vmem:[#allocation25 + $0xa98] sm:$0xff] }
0x1c2e   :  { %12552 = vmatpush2.bf16.msra.mxu0 %v14995_v5  ;;  %12346 = vmatprep.subr.bf16.mxu1 %v15246_v20  ;;  %v9394_v5 = vld [vmem:[#allocation25 + $0xad8] sm:$0xff]  ;;  %v12240_v20 = vpop.f32.mrf.mxu0 }
0x1c2f   :  { %12553 = vmatprep.subr.bf16.mxu0 %v14980_v45  ;;  %v9277_v20 = vld [vmem:[#allocation25 + $0x730] sm:$0xff] }
0x1c31   :  { %12347 = vmatpush2.bf16.msra.mxu1 %v15245_v33  ;;  %v14885_v33 = vcombine.low %v9133_v39, %v9141_v59  ;;  %v9314_v39 = vld [vmem:[#allocation25 + $0x858] sm:$0xff]  ;;  %v9293_v59 = vld [vmem:[#allocation25 + $0x7b0] sm:$0xff] }
0x1c32   :  { %12554 = vmatpush2.bf16.msra.mxu0 %v14979_v60  ;;  %12348 = vmatprep.subr.bf16.mxu1 %v15230_v16  ;;  %v15136_v60 = vcombine.high %v9386_v30, %v9394_v5 }
0x1c33   :  { %12555 = vmatprep.subr.bf16.mxu0 %v14964_v37  ;;  %v14870_v37 = vcombine.high %v9117_v12, %v9125_v54 }
0x1c35   :  { %12349 = vmatpush2.bf16.msra.mxu1 %v15229_v36 }
0x1c36   :  { %12556 = vmatpush2.bf16.msra.mxu0 %v14963_v56  ;;  %12350 = vmatprep.subr.bf16.mxu1 %v15214_v52  ;;  %v15135_v56 = vcombine.low %v9386_v30, %v9394_v5  ;;  %v15120_v52 = vcombine.high %v9370_v38, %v9378_v42  ;;  %v9546_v30 = vld [vmem:[#allocation25 + $0xf98] sm:$0xff] }
0x1c37   :  { %12557 = vmatprep.subr.bf16.mxu0 %v14948_v55  ;;  %v9554_v5 = vld [vmem:[#allocation25 + $0xfd8] sm:$0xff] }
0x1c39   :  { %12351 = vmatpush2.bf16.msra.mxu1 %v15213_v10  ;;  %v9093_v10 = vld [vmem:[#allocation25 + $0x170] sm:$0xff] }
0x1c3a   :  { %12558 = vmatpush2.bf16.msra.mxu0 %v14947_v49  ;;  %12352 = vmatprep.subr.bf16.mxu1 %v15198_v46  ;;  %v15119_v49 = vcombine.low %v9370_v38, %v9378_v42  ;;  %v14853_v46 = vcombine.low %v9101_v11, %v9109_v22  ;;  %v14838_v61 = vcombine.high %v9085_v14, %v9093_v10  ;;  %v9269_v38 = vld [vmem:[#allocation25 + $0x6f0] sm:$0xff] }
0x1c3b   :  { %12559 = vmatprep.subr.bf16.mxu0 %v14932_v51  ;;  %v15104_v51 = vcombine.high %v9354_v34, %v9362_v58  ;;  %v15295_v42 = vcombine.low %v9546_v30, %v9554_v5 }
0x1c3d   :  { %12353 = vmatpush2.bf16.msra.mxu1 %v15197_v7  ;;  %v9077_v7 = vld [vmem:[#allocation25 + $0xf0] sm:$0xff] }
0x1c3e   :  { %12560 = vmatpush2.bf16.msra.mxu0 %v14931_v43  ;;  %12354 = vmatprep.subr.bf16.mxu1 %v15182_v19  ;;  %v15103_v43 = vcombine.low %v9354_v34, %v9362_v58  ;;  %v14837_v19 = vcombine.low %v9085_v14, %v9093_v10  ;;  %v14822_v48 = vcombine.high %v9069_v23, %v9077_v7  ;;  %v9498_v10 = vld [vmem:[#allocation25 + $0xe18] sm:$0xff] }
0x1c3f   :  { %12611 = vmatprep.subr.bf16.mxu0 %v14918_v27  ;;  %v15088_v27 = vcombine.high %v9338_v28, %v9346_v3 }
0x1c41   :  { %12355 = vmatpush2.bf16.msra.mxu1 %v15181_v21  ;;  %12562 = vmatmul.mubr.bf16.vlgmr.msra.gmra.mxu0 %v21208_v26  ;;  %v9061_v21 = vld [vmem:[#allocation25 + $0x70] sm:$0xff] }
0x1c42   :  { %12612 = vmatpush1.bf16.msra.mxu0 %v14917_v31  ;;  %12406 = vmatprep.subr.bf16.mxu1 %v15168_v50  ;;  %v15087_v31 = vcombine.low %v9338_v28, %v9346_v3  ;;  %v14821_v50 = vcombine.low %v9069_v23, %v9077_v7  ;;  %v14806_v25 = vcombine.high %v9053_v6, %v9061_v21  ;;  %v9482_v7 = vld [vmem:[#allocation25 + $0xd98] sm:$0xff] }
0x1c43   :  { %12613 = vmatprep.subr.bf16.mxu0 %v14902_v29  ;;  %12643 = vmatprep.mubr.bf16.mxu0 %v21195_v15  ;;  %v15072_v29 = vcombine.high %v9322_v47, %v9330_v57 }
0x1c44   :  { %v8907_v45 = vpop.f32.mrf.mxu1  ;;  %12357 = vmatmul.mubr.bf16.vlgmr.msra.gmra.mxu1 %v21244_v44 }
0x1c45   :  { %v21266_v32 = vadd.f32 %v8907_v45, %v21234_v41  ;;  %12407 = vmatpush1.bf16.msra.mxu1 %v15167_v63  ;;  %12438 = vmatprep.mubr.bf16.mxu1 %v21232_v35  ;;  %v14869_v41 = vcombine.low %v9117_v12, %v9125_v54  ;;  %v9301_v63 = vld [vmem:[#allocation25 + $0x7f0] sm:$0xff]  ;;  %v15055_v12 = vcombine.low %v9306_v62, %v9314_v39 }
0x1c46   :  { %12614 = vmatpush1.bf16.msra.mxu0 %v14901_v17  ;;  %12408 = vmatprep.subr.bf16.mxu1 %v15152_v0  ;;  %v17800_v16 = vpop.f32.mrf.mxu1  ;;  %v14805_v17 = vcombine.low %v9053_v6, %v9061_v21  ;;  %v15056_v0 = vcombine.high %v9306_v62, %v9314_v39  ;;  %v9285_v45 = vld [vmem:[#allocation25 + $0x770] sm:$0xff]  ;;  %v15045_v54 = vcombine.low %v9293_v59, %v9301_v63  ;;  %v9466_v21 = vld [vmem:[#allocation25 + $0xd18] sm:$0xff] }
0x1c47   :  { %12615 = vmatprep.subr.bf16.mxu0 %v14886_v9  ;;  %v15046_v9 = vcombine.high %v9293_v59, %v9301_v63  ;;  %v9538_v16 = vld [vmem:[#allocation25 + $0xf58] sm:$0xff]  ;;  %v15029_v11 = vcombine.low %v9277_v20, %v9285_v45 }
0x1c48   :  { %v8910_v36 = vpop.f32.mrf.mxu1  ;;  %v9450_v63 = vld [vmem:[#allocation25 + $0xc98] sm:$0xff] }
0x1c49   :  { %12409 = vmatpush1.bf16.msra.mxu1 %v15151_v8  ;;  %v15296_v8 = vcombine.high %v9546_v30, %v9554_v5 }
0x1c4a   :  { %12616 = vmatpush1.bf16.msra.mxu0 %v14885_v33  ;;  %12410 = vmatprep.subr.bf16.mxu1 %v15136_v60  ;;  %v17801_v55 = vpop.f32.mrf.mxu1  ;;  %v15030_v33 = vcombine.high %v9277_v20, %v9285_v45  ;;  %v9530_v60 = vld [vmem:[#allocation25 + $0xf18] sm:$0xff] }
0x1c4b   :  { %12617 = vmatprep.subr.bf16.mxu0 %v14870_v37  ;;  %v9261_v37 = vld [vmem:[#allocation25 + $0x6b0] sm:$0xff]  ;;  %v15280_v22 = vcombine.high %v9530_v60, %v9538_v16  ;;  %v9434_v45 = vld [vmem:[#allocation25 + $0xc18] sm:$0xff] }
0x1c4c   :  { %v15014_v36 = vcombine.high %v9261_v37, %v9269_v38  ;;  %v9253_v55 = vld [vmem:[#allocation25 + $0x670] sm:$0xff]  ;;  %v15013_v34 = vcombine.low %v9261_v37, %v9269_v38  ;;  %v9419_v38 = vld [vmem:[#allocation25 + $0xba0] sm:$0xff] }
0x1c4d   :  { %12411 = vmatpush1.bf16.msra.mxu1 %v15135_v56  ;;  %v9514_v56 = vld [vmem:[#allocation25 + $0xe98] sm:$0xff] }
0x1c4e   :  { %12618 = vmatpush1.bf16.msra.mxu0 %v14869_v41  ;;  %12412 = vmatprep.subr.bf16.mxu1 %v15120_v52  ;;  %v9522_v41 = vld [vmem:[#allocation25 + $0xed8] sm:$0xff]  ;;  %v9245_v52 = vld [vmem:[#allocation25 + $0x630] sm:$0xff] }
0x1c4f   :  { %12619 = vmatprep.subr.bf16.mxu0 %v14854_v13  ;;  %v15279_v13 = vcombine.low %v9530_v60, %v9538_v16  ;;  %v15264_v58 = vcombine.high %v9514_v56, %v9522_v41  ;;  %v14998_v14 = vcombine.high %v9245_v52, %v9253_v55  ;;  %v14997_v28 = vcombine.low %v9245_v52, %v9253_v55 }
0x1c51   :  { %12413 = vmatpush1.bf16.msra.mxu1 %v15119_v49  ;;  %v9506_v49 = vld [vmem:[#allocation25 + $0xe58] sm:$0xff] }
0x1c52   :  { %12620 = vmatpush1.bf16.msra.mxu0 %v14853_v46  ;;  %12414 = vmatprep.subr.bf16.mxu1 %v15104_v51  ;;  %v9229_v46 = vld [vmem:[#allocation25 + $0x5b0] sm:$0xff]  ;;  %v15248_v3 = vcombine.high %v9498_v10, %v9506_v49 }
0x1c53   :  { %12621 = vmatprep.subr.bf16.mxu0 %v14838_v61  ;;  %v9237_v51 = vld [vmem:[#allocation25 + $0x5f0] sm:$0xff]  ;;  %v15263_v61 = vcombine.low %v9514_v56, %v9522_v41  ;;  %v21269_v56 = vpop.f32.mrf.mxu0 }
0x1c54   :  { %v14982_v23 = vcombine.high %v9229_v46, %v9237_v51  ;;  %v14981_v47 = vcombine.low %v9229_v46, %v9237_v51 }
0x1c55   :  { %12415 = vmatpush1.bf16.msra.mxu1 %v15103_v43  ;;  %v9490_v43 = vld [vmem:[#allocation25 + $0xdd8] sm:$0xff] }
0x1c56   :  { %12622 = vmatpush1.bf16.msra.mxu0 %v14837_v19  ;;  %12416 = vmatprep.subr.bf16.mxu1 %v15088_v27  ;;  %v9213_v19 = vld [vmem:[#allocation25 + $0x530] sm:$0xff]  ;;  %v15232_v57 = vcombine.high %v9482_v7, %v9490_v43 }
0x1c57   :  { %12623 = vmatprep.subr.bf16.mxu0 %v14822_v48  ;;  %v9221_v27 = vld [vmem:[#allocation25 + $0x570] sm:$0xff]  ;;  %v15247_v48 = vcombine.low %v9498_v10, %v9506_v49  ;;  %v9142_v10 = vld [vmem:[#allocation25 + $0x2f8] sm:$0xff] }
0x1c58   :  { %v14966_v6 = vcombine.high %v9213_v19, %v9221_v27  ;;  %v14965_v62 = vcombine.low %v9213_v19, %v9221_v27  ;;  %v9126_v19 = vld [vmem:[#allocation25 + $0x278] sm:$0xff] }
0x1c59   :  { %12417 = vmatpush1.bf16.msra.mxu1 %v15087_v31  ;;  %v9474_v31 = vld [vmem:[#allocation25 + $0xd58] sm:$0xff] }
0x1c5a   :  { %12624 = vmatpush1.bf16.msra.mxu0 %v14821_v50  ;;  %12418 = vmatprep.subr.bf16.mxu1 %v15072_v29  ;;  %v9197_v50 = vld [vmem:[#allocation25 + $0x4b0] sm:$0xff]  ;;  %v15216_v39 = vcombine.high %v9466_v21, %v9474_v31 }
0x1c5b   :  { %12625 = vmatprep.subr.bf16.mxu0 %v14806_v25  ;;  %v9205_v29 = vld [vmem:[#allocation25 + $0x4f0] sm:$0xff]  ;;  %v15231_v25 = vcombine.low %v9482_v7, %v9490_v43  ;;  %v9118_v43 = vld [vmem:[#allocation25 + $0x238] sm:$0xff] }
0x1c5c   :  { %v14950_v59 = vcombine.high %v9197_v50, %v9205_v29  ;;  %v14949_v30 = vcombine.low %v9197_v50, %v9205_v29  ;;  %v9102_v50 = vld [vmem:[#allocation25 + $0x1b8] sm:$0xff] }
0x1c5d   :  { %12419 = vmatpush1.bf16.msra.mxu1 %v15071_v1  ;;  %v9458_v1 = vld [vmem:[#allocation25 + $0xcd8] sm:$0xff] }
0x1c5e   :  { %12626 = vmatpush1.bf16.msra.mxu0 %v14805_v17  ;;  %12420 = vmatprep.subr.bf16.mxu1 %v15056_v0  ;;  %v9181_v17 = vld [vmem:[#allocation25 + $0x430] sm:$0xff]  ;;  %v15200_v5 = vcombine.high %v9450_v63, %v9458_v1  ;;  %v9110_v29 = vld [vmem:[#allocation25 + $0x1f8] sm:$0xff] }
0x1c5f   :  { %12627 = vmatprep.subr.bf16.mxu0 %v15046_v9  ;;  %v9189_v0 = vld [vmem:[#allocation25 + $0x470] sm:$0xff]  ;;  %v15215_v9 = vcombine.low %v9466_v21, %v9474_v31  ;;  %v14872_v21 = vcombine.high %v9118_v43, %v9126_v19  ;;  %v9379_v31 = vld [vmem:[#allocation25 + $0xa60] sm:$0xff] }
0x1c60   :  { %v14934_v20 = vcombine.high %v9181_v17, %v9189_v0  ;;  %v14933_v60 = vcombine.low %v9181_v17, %v9189_v0  ;;  %v9355_v17 = vld [vmem:[#allocation25 + $0x9a0] sm:$0xff] }
0x1c61   :  { %12421 = vmatpush1.bf16.msra.mxu1 %v15055_v12  ;;  %v9442_v12 = vld [vmem:[#allocation25 + $0xc58] sm:$0xff]  ;;  %v9363_v0 = vld [vmem:[#allocation25 + $0x9e0] sm:$0xff] }
0x1c62   :  { %12628 = vmatpush2.bf16.msra.mxu0 %v15045_v54  ;;  %12422 = vmatprep.subr.bf16.mxu1 %v15296_v8  ;;  %v9166_v54 = vld [vmem:[#allocation25 + $0x3b8] sm:$0xff]  ;;  %v15184_v16 = vcombine.high %v9434_v45, %v9442_v12 }
0x1c63   :  { %12629 = vmatprep.subr.bf16.mxu0 %v15030_v33  ;;  %v9174_v8 = vld [vmem:[#allocation25 + $0x3f8] sm:$0xff]  ;;  %v15199_v33 = vcombine.low %v9450_v63, %v9458_v1  ;;  %v14856_v1 = vcombine.high %v9102_v50, %v9110_v29 }
0x1c64   :  { %v14920_v37 = vcombine.high %v9166_v54, %v9174_v8  ;;  %v14919_v41 = vcombine.low %v9166_v54, %v9174_v8  ;;  %v9339_v54 = vld [vmem:[#allocation25 + $0x920] sm:$0xff] }
0x1c65   :  { %12423 = vmatpush2.bf16.msra.mxu1 %v15295_v42  ;;  %v9427_v42 = vld [vmem:[#allocation25 + $0xbe0] sm:$0xff] }
0x1c66   :  { %12630 = vmatpush2.bf16.msra.mxu0 %v15029_v11  ;;  %12424 = vmatprep.subr.bf16.mxu1 %v15280_v22  ;;  %v9150_v11 = vld [vmem:[#allocation25 + $0x338] sm:$0xff]  ;;  %v15170_v52 = vcombine.high %v9419_v38, %v9427_v42  ;;  %v15169_v49 = vcombine.low %v9419_v38, %v9427_v42  ;;  %v9347_v8 = vld [vmem:[#allocation25 + $0x960] sm:$0xff] }
0x1c67   :  { %12631 = vmatprep.subr.bf16.mxu0 %v15014_v36  ;;  %v9158_v22 = vld [vmem:[#allocation25 + $0x378] sm:$0xff]  ;;  %v15183_v36 = vcombine.low %v9434_v45, %v9442_v12  ;;  %v15106_v45 = vcombine.high %v9355_v17, %v9363_v0  ;;  %v15090_v38 = vcombine.high %v9339_v54, %v9347_v8 }
0x1c68   :  { %v14904_v55 = vcombine.high %v9150_v11, %v9158_v22  ;;  %v14903_v51 = vcombine.low %v9150_v11, %v9158_v22  ;;  %v9323_v11 = vld [vmem:[#allocation25 + $0x8a0] sm:$0xff] }
0x1c69   :  { %12425 = vmatpush2.bf16.msra.mxu1 %v15279_v13  ;;  %v9403_v13 = vld [vmem:[#allocation25 + $0xb20] sm:$0xff] }
0x1c6a   :  { %12632 = vmatpush2.bf16.msra.mxu0 %v15013_v34  ;;  %12426 = vmatprep.subr.bf16.mxu1 %v15264_v58  ;;  %v9411_v34 = vld [vmem:[#allocation25 + $0xb60] sm:$0xff]  ;;  %v21271_v58 = vpop.f32.mrf.mxu0 }
0x1c6b   :  { %12633 = vmatprep.subr.bf16.mxu0 %v14998_v14  ;;  %v9134_v14 = vld [vmem:[#allocation25 + $0x2b8] sm:$0xff]  ;;  %v9331_v22 = vld [vmem:[#allocation25 + $0x8e0] sm:$0xff] }
0x1c6c   :  { %v12321_v46 = vpop.f32.mrf.mxu0 }
0x1c6d   :  { %12427 = vmatpush2.bf16.msra.mxu1 %v15263_v61  ;;  %v15154_v61 = vcombine.high %v9403_v13, %v9411_v34  ;;  %v9302_v46 = vld [vmem:[#allocation25 + $0x7f8] sm:$0xff] }
0x1c6e   :  { %12634 = vmatpush2.bf16.msra.mxu0 %v14997_v28  ;;  %12428 = vmatprep.subr.bf16.mxu1 %v15248_v3  ;;  %v14888_v28 = vcombine.high %v9134_v14, %v9142_v10  ;;  %v9387_v3 = vld [vmem:[#allocation25 + $0xaa0] sm:$0xff]  ;;  %v12322_v7 = vpop.f32.mrf.mxu0 }
0x1c6f   :  { %12635 = vmatprep.subr.bf16.mxu0 %v14982_v23  ;;  %v9395_v23 = vld [vmem:[#allocation25 + $0xae0] sm:$0xff] }
0x1c70   :  { %v9555_v7 = vld [vmem:[#allocation25 + $0xfe0] sm:$0xff] }
0x1c71   :  { %12429 = vmatpush2.bf16.msra.mxu1 %v15247_v48  ;;  %v15153_v48 = vcombine.low %v9403_v13, %v9411_v34  ;;  %v15074_v13 = vcombine.high %v9323_v11, %v9331_v22 }
0x1c72   :  { %12636 = vmatpush2.bf16.msra.mxu0 %v14981_v47  ;;  %12430 = vmatprep.subr.bf16.mxu1 %v15232_v57  ;;  %v14887_v47 = vcombine.low %v9134_v14, %v9142_v10  ;;  %v15138_v57 = vcombine.high %v9387_v3, %v9395_v23  ;;  %v9307_v14 = vld [vmem:[#allocation25 + $0x820] sm:$0xff] }
0x1c73   :  { %12637 = vmatprep.subr.bf16.mxu0 %v14966_v6  ;;  %v9315_v10 = vld [vmem:[#allocation25 + $0x860] sm:$0xff] }
0x1c75   :  { %12431 = vmatpush2.bf16.msra.mxu1 %v15231_v25 }
0x1c76   :  { %12638 = vmatpush2.bf16.msra.mxu0 %v14965_v62  ;;  %12432 = vmatprep.subr.bf16.mxu1 %v15216_v39  ;;  %v15137_v62 = vcombine.low %v9387_v3, %v9395_v23  ;;  %v14871_v39 = vcombine.low %v9118_v43, %v9126_v19  ;;  %v9547_v23 = vld [vmem:[#allocation25 + $0xfa0] sm:$0xff]  ;;  %v9278_v43 = vld [vmem:[#allocation25 + $0x738] sm:$0xff] }
0x1c77   :  { %12639 = vmatprep.subr.bf16.mxu0 %v14950_v59  ;;  %v9286_v19 = vld [vmem:[#allocation25 + $0x778] sm:$0xff] }
0x1c79   :  { %12433 = vmatpush2.bf16.msra.mxu1 %v15215_v9  ;;  %v9086_v9 = vld [vmem:[#allocation25 + $0x138] sm:$0xff] }
0x1c7a   :  { %12640 = vmatpush2.bf16.msra.mxu0 %v14949_v30  ;;  %12434 = vmatprep.subr.bf16.mxu1 %v15200_v5  ;;  %v9094_v30 = vld [vmem:[#allocation25 + $0x178] sm:$0xff] }
0x1c7b   :  { %12641 = vmatprep.subr.bf16.mxu0 %v14934_v20  ;;  %v14855_v20 = vcombine.low %v9102_v50, %v9110_v29  ;;  %v14840_v12 = vcombine.high %v9086_v9, %v9094_v30  ;;  %v9262_v50 = vld [vmem:[#allocation25 + $0x6b8] sm:$0xff] }
0x1c7c   :  { %v9270_v29 = vld [vmem:[#allocation25 + $0x6f8] sm:$0xff] }
0x1c7d   :  { %12435 = vmatpush2.bf16.msra.mxu1 %v15199_v33  ;;  %v9070_v33 = vld [vmem:[#allocation25 + $0xb8] sm:$0xff] }
0x1c7e   :  { %12642 = vmatpush2.bf16.msra.mxu0 %v14933_v60  ;;  %12436 = vmatprep.subr.bf16.mxu1 %v15184_v16  ;;  %v9078_v60 = vld [vmem:[#allocation25 + $0xf8] sm:$0xff]  ;;  %v15105_v16 = vcombine.low %v9355_v17, %v9363_v0 }
0x1c7f   :  { %12693 = vmatprep.subr.bf16.mxu0 %v14920_v37  ;;  %v14839_v37 = vcombine.low %v9086_v9, %v9094_v30  ;;  %v14824_v42 = vcombine.high %v9070_v33, %v9078_v60  ;;  %v9246_v17 = vld [vmem:[#allocation25 + $0x638] sm:$0xff]  ;;  %v15015_v30 = vcombine.low %v9262_v50, %v9270_v29 }
0x1c80   :  { %v9254_v0 = vld [vmem:[#allocation25 + $0x678] sm:$0xff] }
0x1c81   :  { %12437 = vmatpush2.bf16.msra.mxu1 %v15183_v36  ;;  %12644 = vmatmul.mubr.bf16.vlgmr.msra.gmra.mxu0 %v21208_v26  ;;  %v9054_v36 = vld [vmem:[#allocation25 + $0x38] sm:$0xff] }
0x1c82   :  { %12694 = vmatpush1.bf16.msra.mxu0 %v14919_v41  ;;  %12488 = vmatprep.subr.bf16.mxu1 %v15170_v52  ;;  %v9062_v41 = vld [vmem:[#allocation25 + $0x78] sm:$0xff]  ;;  %v15089_v52 = vcombine.low %v9339_v54, %v9347_v8 }
0x1c83   :  { %12695 = vmatprep.subr.bf16.mxu0 %v14904_v55  ;;  %12725 = vmatprep.mubr.bf16.mxu0 %v21195_v15  ;;  %v9371_v15 = vld [vmem:[#allocation25 + $0xa20] sm:$0xff]  ;;  %v14823_v55 = vcombine.low %v9070_v33, %v9078_v60  ;;  %v14808_v34 = vcombine.high %v9054_v36, %v9062_v41  ;;  %v9230_v54 = vld [vmem:[#allocation25 + $0x5b8] sm:$0xff]  ;;  %v14999_v60 = vcombine.low %v9246_v17, %v9254_v0 }
0x1c84   :  { %12439 = vmatmul.mubr.bf16.vlgmr.msra.gmra.mxu1 %v21244_v44  ;;  %v21276_v27 = vpop.f32.mrf.mxu1  ;;  %v15122_v59 = vcombine.high %v9371_v15, %v9379_v31  ;;  %v15121_v5 = vcombine.low %v9371_v15, %v9379_v31  ;;  %v9531_v15 = vld [vmem:[#allocation25 + $0xf20] sm:$0xff]  ;;  %v9238_v8 = vld [vmem:[#allocation25 + $0x5f8] sm:$0xff] }
0x1c85   :  { %12489 = vmatpush1.bf16.msra.mxu1 %v15169_v49  ;;  %12520 = vmatprep.mubr.bf16.mxu1 %v21232_v35  ;;  %v9294_v49 = vld [vmem:[#allocation25 + $0x7b8] sm:$0xff]  ;;  %v9539_v31 = vld [vmem:[#allocation25 + $0xf60] sm:$0xff] }
0x1c86   :  { %12696 = vmatpush1.bf16.msra.mxu0 %v14903_v51  ;;  %12490 = vmatprep.subr.bf16.mxu1 %v15154_v61  ;;  %v21279_v6 = vpop.f32.mrf.mxu1  ;;  %v15073_v51 = vcombine.low %v9323_v11, %v9331_v22  ;;  %v14807_v61 = vcombine.low %v9054_v36, %v9062_v41  ;;  %v15048_v3 = vcombine.high %v9294_v49, %v9302_v46  ;;  %v9214_v11 = vld [vmem:[#allocation25 + $0x538] sm:$0xff] }
0x1c87   :  { %12697 = vmatprep.subr.bf16.mxu0 %v14888_v28  ;;  %v15058_v28 = vcombine.high %v9307_v14, %v9315_v10  ;;  %v15281_v9 = vcombine.low %v9531_v15, %v9539_v31  ;;  %v9222_v22 = vld [vmem:[#allocation25 + $0x578] sm:$0xff]  ;;  %v14983_v41 = vcombine.low %v9230_v54, %v9238_v8 }
0x1c88   :  { %v12198_v25 = vpop.f32.mrf.mxu1 }
0x1c89   :  { %12491 = vmatpush1.bf16.msra.mxu1 %v15153_v48  ;;  %v15057_v48 = vcombine.low %v9307_v14, %v9315_v10  ;;  %v15297_v25 = vcombine.low %v9547_v23, %v9555_v7  ;;  %v9198_v14 = vld [vmem:[#allocation25 + $0x4b8] sm:$0xff] }
0x1c8a   :  { %12698 = vmatpush1.bf16.msra.mxu0 %v14887_v47  ;;  %12492 = vmatprep.subr.bf16.mxu1 %v15138_v57  ;;  %v12199_v63 = vpop.f32.mrf.mxu1  ;;  %v15047_v47 = vcombine.low %v9294_v49, %v9302_v46  ;;  %v15298_v57 = vcombine.high %v9547_v23, %v9555_v7  ;;  %v9206_v10 = vld [vmem:[#allocation25 + $0x4f8] sm:$0xff]  ;;  %v14967_v46 = vcombine.low %v9214_v11, %v9222_v22 }
0x1c8b   :  { %12699 = vmatprep.subr.bf16.mxu0 %v14872_v21  ;;  %v15032_v21 = vcombine.high %v9278_v43, %v9286_v19  ;;  %v9515_v63 = vld [vmem:[#allocation25 + $0xea0] sm:$0xff]  ;;  %v9182_v23 = vld [vmem:[#allocation25 + $0x438] sm:$0xff] }
0x1c8c   :  { %v9190_v7 = vld [vmem:[#allocation25 + $0x478] sm:$0xff] }
0x1c8d   :  { %12493 = vmatpush1.bf16.msra.mxu1 %v15137_v62  ;;  %v15031_v62 = vcombine.low %v9278_v43, %v9286_v19  ;;  %v14951_v19 = vcombine.low %v9198_v14, %v9206_v10 }
0x1c8e   :  { %12700 = vmatpush1.bf16.msra.mxu0 %v14871_v39  ;;  %12494 = vmatprep.subr.bf16.mxu1 %v15122_v59  ;;  %v15282_v39 = vcombine.high %v9531_v15, %v9539_v31  ;;  %v15016_v59 = vcombine.high %v9262_v50, %v9270_v29  ;;  %v9004_v15 = vld [vmem:[#allocation23 + $0x280] sm:$0xff]  ;;  %v14935_v29 = vcombine.low %v9182_v23, %v9190_v7 }
0x1c8f   :  { %12701 = vmatprep.subr.bf16.mxu0 %v14856_v1  ;;  %v9523_v1 = vld [vmem:[#allocation25 + $0xee0] sm:$0xff] }
0x1c90   :  { %v15265_v33 = vcombine.low %v9515_v63, %v9523_v1  ;;  %v9012_v31 = vld [vmem:[#allocation23 + $0x2c0] sm:$0xff] }
0x1c91   :  { %12495 = vmatpush1.bf16.msra.mxu1 %v15121_v5  ;;  %v15266_v5 = vcombine.high %v9515_v63, %v9523_v1  ;;  %v8988_v63 = vld [vmem:[#allocation23 + $0x200] sm:$0xff] }
0x1c92   :  { %12702 = vmatpush1.bf16.msra.mxu0 %v14855_v20  ;;  %12496 = vmatprep.subr.bf16.mxu1 %v15106_v45  ;;  %v15000_v20 = vcombine.high %v9246_v17, %v9254_v0  ;;  %v9499_v45 = vld [vmem:[#allocation25 + $0xe20] sm:$0xff]  ;;  %v21281_v0 = vpop.f32.mrf.mxu0 }
0x1c93   :  { %12703 = vmatprep.subr.bf16.mxu0 %v14840_v12  ;;  %v9507_v12 = vld [vmem:[#allocation25 + $0xe60] sm:$0xff] }
0x1c94   :  { %v15249_v36 = vcombine.low %v9499_v45, %v9507_v12  ;;  %v8996_v1 = vld [vmem:[#allocation23 + $0x240] sm:$0xff] }
0x1c95   :  { %12497 = vmatpush1.bf16.msra.mxu1 %v15105_v16  ;;  %v15250_v16 = vcombine.high %v9499_v45, %v9507_v12  ;;  %v9412_v45 = vld [vmem:[#allocation25 + $0xb68] sm:$0xff]  ;;  %v21283_v12 = vpop.f32.mrf.mxu0 }
0x1c96   :  { %12704 = vmatpush1.bf16.msra.mxu0 %v14839_v37  ;;  %12498 = vmatprep.subr.bf16.mxu1 %v15090_v38  ;;  %v14984_v37 = vcombine.high %v9230_v54, %v9238_v8  ;;  %v9483_v38 = vld [vmem:[#allocation25 + $0xda0] sm:$0xff] }
0x1c97   :  { %12705 = vmatprep.subr.bf16.mxu0 %v14824_v42  ;;  %v9491_v42 = vld [vmem:[#allocation25 + $0xde0] sm:$0xff] }
0x1c98   :  { %v15233_v49 = vcombine.low %v9483_v38, %v9491_v42  ;;  %v8972_v54 = vld [vmem:[#allocation23 + $0x180] sm:$0xff] }
0x1c99   :  { %12499 = vmatpush1.bf16.msra.mxu1 %v15089_v52  ;;  %v15234_v52 = vcombine.high %v9483_v38, %v9491_v42  ;;  %v8980_v8 = vld [vmem:[#allocation23 + $0x1c0] sm:$0xff]  ;;  %v9388_v42 = vld [vmem:[#allocation25 + $0xaa8] sm:$0xff] }
0x1c9a   :  { %12706 = vmatpush1.bf16.msra.mxu0 %v14823_v55  ;;  %12500 = vmatprep.subr.bf16.mxu1 %v15074_v13  ;;  %v14968_v55 = vcombine.high %v9214_v11, %v9222_v22  ;;  %v9467_v13 = vld [vmem:[#allocation25 + $0xd20] sm:$0xff]  ;;  %v15354_v38 = vcombine.high %v8972_v54, %v8980_v8  ;;  %v9396_v11 = vld [vmem:[#allocation25 + $0xae8] sm:$0xff]  ;;  %v18966_v22 = vmov 0  }
0x1c9b   :  { %12707 = vmatprep.subr.bf16.mxu0 %v14808_v34  ;;  %v9475_v34 = vld [vmem:[#allocation25 + $0xd60] sm:$0xff] }
0x1c9c   :  { %v15217_v43 = vcombine.low %v9467_v13, %v9475_v34 }
0x1c9d   :  { %12501 = vmatpush1.bf16.msra.mxu1 %v15073_v51  ;;  %v15218_v51 = vcombine.high %v9467_v13, %v9475_v34  ;;  %v15353_v13 = vcombine.low %v8972_v54, %v8980_v8  ;;  %v15140_v34 = vcombine.high %v9388_v42, %v9396_v11  ;;  %v9332_v54 = vld [vmem:[#allocation25 + $0x8e8] sm:$0xff]  ;;  %v8990_v8 = vld [vmem:[#allocation23 + $0x210] sm:$0xff] }
0x1c9e   :  { %12708 = vmatpush1.bf16.msra.mxu0 %v14807_v61  ;;  %12502 = vmatprep.subr.bf16.mxu1 %v15058_v28  ;;  %v14952_v61 = vcombine.high %v9198_v14, %v9206_v10  ;;  %v9451_v28 = vld [vmem:[#allocation25 + $0xca0] sm:$0xff] }
0x1c9f   :  { %12709 = vmatprep.subr.bf16.mxu0 %v15048_v3  ;;  %v9459_v3 = vld [vmem:[#allocation25 + $0xce0] sm:$0xff] }
0x1ca0   :  { %v15201_v50 = vcombine.low %v9451_v28, %v9459_v3 }
0x1ca1   :  { %12503 = vmatpush1.bf16.msra.mxu1 %v15057_v48  ;;  %v15202_v48 = vcombine.high %v9451_v28, %v9459_v3  ;;  %v15139_v3 = vcombine.low %v9388_v42, %v9396_v11  ;;  %v9308_v42 = vld [vmem:[#allocation25 + $0x828] sm:$0xff] }
0x1ca2   :  { %12710 = vmatpush2.bf16.msra.mxu0 %v15047_v47  ;;  %12504 = vmatprep.subr.bf16.mxu1 %v15298_v57  ;;  %v14936_v47 = vcombine.high %v9182_v23, %v9190_v7  ;;  %v9435_v57 = vld [vmem:[#allocation25 + $0xc20] sm:$0xff]  ;;  %v9316_v11 = vld [vmem:[#allocation25 + $0x868] sm:$0xff] }
0x1ca3   :  { %12711 = vmatprep.subr.bf16.mxu0 %v15032_v21  ;;  %v9443_v21 = vld [vmem:[#allocation25 + $0xc60] sm:$0xff] }
0x1ca4   :  { %v15185_v17 = vcombine.low %v9435_v57, %v9443_v21 }
0x1ca5   :  { %12505 = vmatpush2.bf16.msra.mxu1 %v15297_v25  ;;  %v15186_v25 = vcombine.high %v9435_v57, %v9443_v21  ;;  %v14792_v57 = vld [vmem:[#allocation22] ss:$0 sm:$0xff]  ;;  %v8924_v21 = vld [vmem:[#allocation23] sm:$0xff] }
0x1ca6   :  { %12712 = vmatpush2.bf16.msra.mxu0 %v15031_v62  ;;  %12506 = vmatprep.subr.bf16.mxu1 %v15282_v39  ;;  %v15386_v62 = vcombine.high %v9004_v15, %v9012_v31  ;;  %v9420_v39 = vld [vmem:[#allocation25 + $0xba8] sm:$0xff] }
0x1ca7   :  { %12713 = vmatprep.subr.bf16.mxu0 %v15016_v59  ;;  %v9428_v59 = vld [vmem:[#allocation25 + $0xbe8] sm:$0xff] }
0x1ca9   :  { %12507 = vmatpush2.bf16.msra.mxu1 %v15281_v9  ;;  %v15385_v9 = vcombine.low %v9004_v15, %v9012_v31  ;;  %v8932_v15 = vld [vmem:[#allocation23 + $0x40] sm:$0xff] }
0x1caa   :  { %12714 = vmatpush2.bf16.msra.mxu0 %v15015_v30  ;;  %12508 = vmatprep.subr.bf16.mxu1 %v15266_v5  ;;  %v15172_v30 = vcombine.high %v9420_v39, %v9428_v59  ;;  %v15370_v5 = vcombine.high %v8988_v63, %v8996_v1 }
0x1cab   :  { %12715 = vmatprep.subr.bf16.mxu0 %v15000_v20  ;;  %v9404_v20 = vld [vmem:[#allocation25 + $0xb28] sm:$0xff] }
0x1cad   :  { %12509 = vmatpush2.bf16.msra.mxu1 %v15265_v33  ;;  %v15171_v33 = vcombine.low %v9420_v39, %v9428_v59  ;;  %v9340_v39 = vld [vmem:[#allocation25 + $0x928] sm:$0xff] }
0x1cae   :  { %12716 = vmatpush2.bf16.msra.mxu0 %v14999_v60  ;;  %12510 = vmatprep.subr.bf16.mxu1 %v15250_v16  ;;  %v12403_v60 = vpop.f32.mrf.mxu0  ;;  %v15369_v16 = vcombine.low %v8988_v63, %v8996_v1  ;;  %v9348_v59 = vld [vmem:[#allocation25 + $0x968] sm:$0xff]  ;;  %v9006_v63 = vld [vmem:[#allocation23 + $0x290] sm:$0xff] }
0x1caf   :  { %12717 = vmatprep.subr.bf16.mxu0 %v14984_v37  ;;  %v15156_v37 = vcombine.high %v9404_v20, %v9412_v45  ;;  %v9014_v1 = vld [vmem:[#allocation23 + $0x2d0] sm:$0xff] }
0x1cb0   :  { %v15389_v60 = vcombine.low %v9006_v63, %v9014_v1 }
0x1cb1   :  { %12511 = vmatpush2.bf16.msra.mxu1 %v15249_v36  ;;  %v12404_v36 = vpop.f32.mrf.mxu0 }
0x1cb2   :  { %12718 = vmatpush2.bf16.msra.mxu0 %v14983_v41  ;;  %12512 = vmatprep.subr.bf16.mxu1 %v15234_v52  ;;  %v8956_v41 = vld [vmem:[#allocation23 + $0x100] sm:$0xff]  ;;  %v8974_v36 = vld [vmem:[#allocation23 + $0x190] sm:$0xff] }
0x1cb3   :  { %12719 = vmatprep.subr.bf16.mxu0 %v14968_v55  ;;  %v8964_v52 = vld [vmem:[#allocation23 + $0x140] sm:$0xff] }
0x1cb4   :  { %v15338_v10 = vcombine.high %v8956_v41, %v8964_v52  ;;  %v15337_v23 = vcombine.low %v8956_v41, %v8964_v52  ;;  %v8982_v41 = vld [vmem:[#allocation23 + $0x1d0] sm:$0xff] }
0x1cb5   :  { %12513 = vmatpush2.bf16.msra.mxu1 %v15233_v49  ;;  %v9372_v49 = vld [vmem:[#allocation25 + $0xa28] sm:$0xff] }
0x1cb6   :  { %12720 = vmatpush2.bf16.msra.mxu0 %v14967_v46  ;;  %12514 = vmatprep.subr.bf16.mxu1 %v15218_v51  ;;  %v9380_v46 = vld [vmem:[#allocation25 + $0xa68] sm:$0xff]  ;;  %v8940_v51 = vld [vmem:[#allocation23 + $0x80] sm:$0xff] }
0x1cb7   :  { %12721 = vmatprep.subr.bf16.mxu0 %v14952_v61  ;;  %v8948_v61 = vld [vmem:[#allocation23 + $0xc0] sm:$0xff]  ;;  %v15124_v7 = vcombine.high %v9372_v49, %v9380_v46  ;;  %v15123_v31 = vcombine.low %v9372_v49, %v9380_v46  ;;  %v9556_v49 = vld [vmem:[#allocation25 + $0xfe8] sm:$0xff]  ;;  %v8958_v46 = vld [vmem:[#allocation23 + $0x110] sm:$0xff] }
0x1cb9   :  { %12515 = vmatpush2.bf16.msra.mxu1 %v15217_v43 }
0x1cba   :  { %12722 = vmatpush2.bf16.msra.mxu0 %v14951_v19  ;;  %12516 = vmatprep.subr.bf16.mxu1 %v15202_v48  ;;  %v15322_v19 = vcombine.high %v8940_v51, %v8948_v61  ;;  %v9356_v48 = vld [vmem:[#allocation25 + $0x9a8] sm:$0xff] }
0x1cbb   :  { %12723 = vmatprep.subr.bf16.mxu0 %v14936_v47  ;;  %v9364_v47 = vld [vmem:[#allocation25 + $0x9e8] sm:$0xff] }
0x1cbd   :  { %12517 = vmatpush2.bf16.msra.mxu1 %v15201_v50  ;;  %v15321_v50 = vcombine.low %v8940_v51, %v8948_v61  ;;  %v8966_v51 = vld [vmem:[#allocation23 + $0x150] sm:$0xff]  ;;  %v15059_v61 = vcombine.low %v9308_v42, %v9316_v11 }
0x1cbe   :  { %12724 = vmatpush2.bf16.msra.mxu0 %v14935_v29  ;;  %12518 = vmatprep.subr.bf16.mxu1 %v15186_v25  ;;  %v15108_v29 = vcombine.high %v9356_v48, %v9364_v47  ;;  %v8921_v25 = vadd.f32 %v14792_v57, %v21266_v32  ;;  %v15091_v32 = vcombine.low %v9340_v39, %v9348_v59 }
0x1cbf   :  { %13262 = vmatprep.subr.bf16.mxu0 %v15386_v62  ;;  %v15306_v62 = vcombine.high %v8924_v21, %v8932_v15  ;;  %v15341_v57 = vcombine.low %v8958_v46, %v8966_v51 }
0x1cc1   :  { %12519 = vmatpush2.bf16.msra.mxu1 %v15185_v17  ;;  %12726 = vmatmul.mubr.bf16.vlgmr.msra.gmra.mxu0 %v21208_v26  ;;  %v15155_v26 = vcombine.low %v9404_v20, %v9412_v45  ;;  %v15107_v17 = vcombine.low %v9356_v48, %v9364_v47  ;;  %v15390_v20 = vcombine.high %v9006_v63, %v9014_v1  ;;  %v9324_v45 = vld [vmem:[#allocation25 + $0x8a8] sm:$0xff]  ;;  %v8950_v48 = vld [vmem:[#allocation23 + $0xd0] sm:$0xff] }
0x1cc2   :  { %13263 = vmatpush1.bf16.msra.mxu0 %v15385_v9  ;;  %12570 = vmatprep.subr.bf16.mxu1 %v15172_v30  ;;  %v15305_v9 = vcombine.low %v8924_v21, %v8932_v15  ;;  %v15092_v30 = vcombine.high %v9340_v39, %v9348_v59  ;;  %v15075_v52 = vcombine.low %v9324_v45, %v9332_v54  ;;  %v9500_v1 = vld [vmem:[#allocation25 + $0xe28] sm:$0xff] }
0x1cc3   :  { %13264 = vmatprep.subr.bf16.mxu0 %v15370_v5  ;;  %13290 = vmatprep.mubr.bf16.mxu0 %v18966_v22  ;;  %v8922_v5 = vmax.f32 %v8921_v25, 0.0  ;;  %v8934_v25 = vld [vmem:[#allocation23 + $0x50] sm:$0xff] }
0x1cc4   :  { %12521 = vmatmul.mubr.bf16.vlgmr.msra.gmra.mxu1 %v21244_v44  ;;  %v21288_v55 = vpop.f32.mrf.mxu1 }
0x1cc5   :  { %12571 = vmatpush1.bf16.msra.mxu1 %v15171_v33  ;;  %12602 = vmatprep.mubr.bf16.mxu1 %v21232_v35  ;;  %v8998_v33 = vld [vmem:[#allocation23 + $0x250] sm:$0xff] }
0x1cc6   :  { %13265 = vmatpush1.bf16.msra.mxu0 %v15369_v16  ;;  %12572 = vmatprep.subr.bf16.mxu1 %v15156_v37  ;;  %v21291_v14 = vpop.f32.mrf.mxu1  ;;  %v15076_v16 = vcombine.high %v9324_v45, %v9332_v54  ;;  %v21294_v37 = vpack.c.bf16 %v8922_v5, %v8922_v5 }
0x1cc7   :  { %13266 = vmatprep.subr.bf16.mxu0 %v15354_v38  ;;  %v15374_v38 = vcombine.high %v8990_v8, %v8998_v33 }
0x1cc8   :  { %v12280_v28 = vpop.f32.mrf.mxu1 }
0x1cc9   :  { %12573 = vmatpush1.bf16.msra.mxu1 %v15155_v26  ;;  %v15373_v26 = vcombine.low %v8990_v8, %v8998_v33  ;;  %v15357_v28 = vcombine.low %v8974_v36, %v8982_v41  ;;  %v9484_v8 = vld [vmem:[#allocation25 + $0xda8] sm:$0xff] }
0x1cca   :  { %13267 = vmatpush1.bf16.msra.mxu0 %v15353_v13  ;;  %12574 = vmatprep.subr.bf16.mxu1 %v15140_v34  ;;  %v12281_v43 = vpop.f32.mrf.mxu1  ;;  %v15060_v13 = vcombine.high %v9308_v42, %v9316_v11  ;;  %v15358_v34 = vcombine.high %v8974_v36, %v8982_v41  ;;  %v9492_v33 = vld [vmem:[#allocation25 + $0xde8] sm:$0xff] }
0x1ccb   :  { %13268 = vmatprep.subr.bf16.mxu0 %v15338_v10  ;;  %v9548_v10 = vld [vmem:[#allocation25 + $0xfa8] sm:$0xff]  ;;  %v15236_v42 = vcombine.high %v9484_v8, %v9492_v33 }
0x1ccc   :  { %v9540_v43 = vld [vmem:[#allocation25 + $0xf68] sm:$0xff]  ;;  %v15299_v47 = vcombine.low %v9548_v10, %v9556_v49 }
0x1ccd   :  { %12575 = vmatpush1.bf16.msra.mxu1 %v15139_v3  ;;  %v15300_v3 = vcombine.high %v9548_v10, %v9556_v49  ;;  %v9468_v36 = vld [vmem:[#allocation25 + $0xd28] sm:$0xff] }
0x1cce   :  { %13269 = vmatpush1.bf16.msra.mxu0 %v15337_v23  ;;  %12576 = vmatprep.subr.bf16.mxu1 %v15124_v7  ;;  %v15342_v23 = vcombine.high %v8958_v46, %v8966_v51  ;;  %v9532_v7 = vld [vmem:[#allocation25 + $0xf28] sm:$0xff] }
0x1ccf   :  { %13270 = vmatprep.subr.bf16.mxu0 %v15322_v19  ;;  %v8942_v19 = vld [vmem:[#allocation23 + $0x90] sm:$0xff]  ;;  %v15284_v21 = vcombine.high %v9532_v7, %v9540_v43  ;;  %v9476_v41 = vld [vmem:[#allocation25 + $0xd68] sm:$0xff] }
0x1cd0   :  { %v15326_v15 = vcombine.high %v8942_v19, %v8950_v48  ;;  %v15325_v39 = vcombine.low %v8942_v19, %v8950_v48  ;;  %v15220_v10 = vcombine.high %v9468_v36, %v9476_v41  ;;  %v9452_v46 = vld [vmem:[#allocation25 + $0xca8] sm:$0xff] }
0x1cd1   :  { %12577 = vmatpush1.bf16.msra.mxu1 %v15123_v31  ;;  %v9516_v31 = vld [vmem:[#allocation25 + $0xea8] sm:$0xff] }
0x1cd2   :  { %13271 = vmatpush1.bf16.msra.mxu0 %v15321_v50  ;;  %12578 = vmatprep.subr.bf16.mxu1 %v15108_v29  ;;  %v9524_v50 = vld [vmem:[#allocation25 + $0xee8] sm:$0xff]  ;;  %v8926_v29 = vld [vmem:[#allocation23 + $0x10] sm:$0xff] }
0x1cd3   :  { %13272 = vmatprep.subr.bf16.mxu0 %v15306_v62  ;;  %v15283_v62 = vcombine.low %v9532_v7, %v9540_v43  ;;  %v15268_v59 = vcombine.high %v9516_v31, %v9524_v50  ;;  %v15310_v63 = vcombine.high %v8926_v29, %v8934_v25  ;;  %v15267_v5 = vcombine.low %v9516_v31, %v9524_v50  ;;  %v9460_v51 = vld [vmem:[#allocation25 + $0xce8] sm:$0xff]  ;;  %v21302_v43 = vpop.f32.mrf.mxu0 }
0x1cd4   :  { %v15204_v7 = vcombine.high %v9452_v46, %v9460_v51  ;;  %v9436_v48 = vld [vmem:[#allocation25 + $0xc28] sm:$0xff] }
0x1cd5   :  { %12579 = vmatpush1.bf16.msra.mxu1 %v15107_v17  ;;  %v9508_v17 = vld [vmem:[#allocation25 + $0xe68] sm:$0xff]  ;;  %v21304_v31 = vpop.f32.mrf.mxu0 }
0x1cd6   :  { %13273 = vmatpush1.bf16.msra.mxu0 %v15305_v9  ;;  %12580 = vmatprep.subr.bf16.mxu1 %v15092_v30  ;;  %v9008_v9 = vld [vmem:[#allocation23 + $0x2a0] sm:$0xff]  ;;  %v15252_v45 = vcombine.high %v9500_v1, %v9508_v17 }
0x1cd7   :  { %13344 = vmatprep.subr.bf16.mxu0 %v15390_v20  ;;  %v9016_v30 = vld [vmem:[#allocation23 + $0x2e0] sm:$0xff]  ;;  %v15309_v20 = vcombine.low %v8926_v29, %v8934_v25 }
0x1cd8   :  { %v15394_v54 = vcombine.high %v9008_v9, %v9016_v30 }
0x1cd9   :  { %12581 = vmatpush1.bf16.msra.mxu1 %v15091_v32  ;;  %15401 = vmatmul.mubr.msk.bf16.vlgmr.msra.gmra.mxu0 %vm7818_vm7, %v21294_v37  ;;  %v8992_v32 = vld [vmem:[#allocation23 + $0x220] sm:$0xff] }
0x1cda   :  { %13345 = vmatpush1.bf16.msra.mxu0 %v15389_v60  ;;  %12582 = vmatprep.subr.bf16.mxu1 %v15076_v16  ;;  %v9000_v60 = vld [vmem:[#allocation23 + $0x260] sm:$0xff]  ;;  %v15251_v16 = vcombine.low %v9500_v1, %v9508_v17 }
0x1cdb   :  { %13346 = vmatprep.subr.bf16.mxu0 %v15374_v38  ;;  %13372 = vmatprep.mubr.bf16.mxu0 %v18966_v22  ;;  %v15393_v38 = vcombine.low %v9008_v9, %v9016_v30  ;;  %v15378_v11 = vcombine.high %v8992_v32, %v9000_v60  ;;  %v8936_v1 = vld [vmem:[#allocation23 + $0x60] sm:$0xff] }
0x1cdd   :  { %12583 = vmatpush1.bf16.msra.mxu1 %v15075_v52  ;;  %v8976_v52 = vld [vmem:[#allocation23 + $0x1a0] sm:$0xff] }
0x1cde   :  { %13347 = vmatpush1.bf16.msra.mxu0 %v15373_v26  ;;  %12584 = vmatprep.subr.bf16.mxu1 %v15060_v13  ;;  %v8984_v26 = vld [vmem:[#allocation23 + $0x1e0] sm:$0xff]  ;;  %v15235_v13 = vcombine.low %v9484_v8, %v9492_v33  ;;  %v9010_v8 = vld [vmem:[#allocation23 + $0x2b0] sm:$0xff] }
0x1cdf   :  { %13348 = vmatprep.subr.bf16.mxu0 %v15358_v34  ;;  %v15377_v34 = vcombine.low %v8992_v32, %v9000_v60  ;;  %v15362_v49 = vcombine.high %v8976_v52, %v8984_v26  ;;  %v9018_v33 = vld [vmem:[#allocation23 + $0x2f0] sm:$0xff] }
0x1ce1   :  { %12585 = vmatpush1.bf16.msra.mxu1 %v15059_v61  ;;  %v8960_v61 = vld [vmem:[#allocation23 + $0x120] sm:$0xff] }
0x1ce2   :  { %13349 = vmatpush1.bf16.msra.mxu0 %v15357_v28  ;;  %12586 = vmatprep.subr.bf16.mxu1 %v15300_v3  ;;  %v8968_v28 = vld [vmem:[#allocation23 + $0x160] sm:$0xff]  ;;  %v15219_v3 = vcombine.low %v9468_v36, %v9476_v41  ;;  %v9397_v36 = vld [vmem:[#allocation25 + $0xaf0] sm:$0xff] }
0x1ce3   :  { %13350 = vmatprep.subr.bf16.mxu0 %v15342_v23  ;;  %v15361_v23 = vcombine.low %v8976_v52, %v8984_v26  ;;  %v15346_v19 = vcombine.high %v8960_v61, %v8968_v28  ;;  %v15345_v50 = vcombine.low %v8960_v61, %v8968_v28  ;;  %v8994_v52 = vld [vmem:[#allocation23 + $0x230] sm:$0xff] }
0x1ce4   :  { %v9002_v26 = vld [vmem:[#allocation23 + $0x270] sm:$0xff] }
0x1ce5   :  { %12587 = vmatpush2.bf16.msra.mxu1 %v15299_v47  ;;  %v9444_v47 = vld [vmem:[#allocation25 + $0xc68] sm:$0xff]  ;;  %v15382_v61 = vcombine.high %v8994_v52, %v9002_v26  ;;  %v9373_v28 = vld [vmem:[#allocation25 + $0xa30] sm:$0xff] }
0x1ce6   :  { %13351 = vmatpush1.bf16.msra.mxu0 %v15341_v57  ;;  %12588 = vmatprep.subr.bf16.mxu1 %v15284_v21  ;;  %v8944_v57 = vld [vmem:[#allocation23 + $0xa0] sm:$0xff]  ;;  %v15188_v29 = vcombine.high %v9436_v48, %v9444_v47  ;;  %v15187_v17 = vcombine.low %v9436_v48, %v9444_v47 }
0x1ce7   :  { %13352 = vmatprep.subr.bf16.mxu0 %v15326_v15  ;;  %v8952_v21 = vld [vmem:[#allocation23 + $0xe0] sm:$0xff]  ;;  %v15203_v15 = vcombine.low %v9452_v46, %v9460_v51 }
0x1ce8   :  { %v15330_v25 = vcombine.high %v8944_v57, %v8952_v21  ;;  %v15329_v30 = vcombine.low %v8944_v57, %v8952_v21  ;;  %v15381_v57 = vcombine.low %v8994_v52, %v9002_v26 }
0x1ce9   :  { %12589 = vmatpush2.bf16.msra.mxu1 %v15283_v62  ;;  %v9421_v62 = vld [vmem:[#allocation25 + $0xbb0] sm:$0xff] }
0x1cea   :  { %13353 = vmatpush1.bf16.msra.mxu0 %v15325_v39  ;;  %12590 = vmatprep.subr.bf16.mxu1 %v15268_v59  ;;  %v9429_v39 = vld [vmem:[#allocation25 + $0xbf0] sm:$0xff]  ;;  %v12485_v59 = vpop.f32.mrf.mxu0 }
0x1ceb   :  { %13354 = vmatprep.subr.bf16.mxu0 %v15310_v63  ;;  %v8928_v63 = vld [vmem:[#allocation23 + $0x20] sm:$0xff]  ;;  %v15173_v32 = vcombine.low %v9421_v62, %v9429_v39 }
0x1cec   :  { %v12486_v9 = vpop.f32.mrf.mxu0 }
0x1ced   :  { %12591 = vmatpush2.bf16.msra.mxu1 %v15267_v5  ;;  %v15174_v5 = vcombine.high %v9421_v62, %v9429_v39  ;;  %v8962_v62 = vld [vmem:[#allocation23 + $0x130] sm:$0xff] }
0x1cee   :  { %13355 = vmatpush1.bf16.msra.mxu0 %v15309_v20  ;;  %12592 = vmatprep.subr.bf16.mxu1 %v15252_v45  ;;  %v15314_v20 = vcombine.high %v8928_v63, %v8936_v1  ;;  %v9405_v45 = vld [vmem:[#allocation25 + $0xb30] sm:$0xff] }
0x1cef   :  { %13426 = vmatprep.subr.bf16.mxu0 %v15394_v54  ;;  %v9413_v54 = vld [vmem:[#allocation25 + $0xb70] sm:$0xff] }
0x1cf0   :  { %v8970_v39 = vld [vmem:[#allocation23 + $0x170] sm:$0xff] }
0x1cf1   :  { %12593 = vmatpush2.bf16.msra.mxu1 %v15251_v16  ;;  %15403 = vmatmul.mubr.msk.bf16.vlgmr.msra.gmra.mxu0 %vm7818_vm7, %v21294_v37  ;;  %v15313_v16 = vcombine.low %v8928_v63, %v8936_v1  ;;  %v9341_v9 = vld [vmem:[#allocation25 + $0x930] sm:$0xff] }
0x1cf2   :  { %13427 = vmatpush1.bf16.msra.mxu0 %v15393_v38  ;;  %12594 = vmatprep.subr.bf16.mxu1 %v15236_v42  ;;  %v15158_v38 = vcombine.high %v9405_v45, %v9413_v54  ;;  %v15398_v42 = vcombine.high %v9010_v8, %v9018_v33 }
0x1cf3   :  { %13428 = vmatprep.subr.bf16.mxu0 %v15378_v11  ;;  %13454 = vmatprep.mubr.bf16.mxu0 %v18966_v22  ;;  %v9389_v11 = vld [vmem:[#allocation25 + $0xab0] sm:$0xff] }
0x1cf4   :  { %v15142_v46 = vcombine.high %v9389_v11, %v9397_v36  ;;  %v15141_v47 = vcombine.low %v9389_v11, %v9397_v36 }
0x1cf5   :  { %12595 = vmatpush2.bf16.msra.mxu1 %v15235_v13 }
0x1cf6   :  { %13429 = vmatpush1.bf16.msra.mxu0 %v15377_v34  ;;  %12596 = vmatprep.subr.bf16.mxu1 %v15220_v10  ;;  %v15157_v34 = vcombine.low %v9405_v45, %v9413_v54  ;;  %v15349_v54 = vcombine.low %v8962_v62, %v8970_v39 }
0x1cf7   :  { %13430 = vmatprep.subr.bf16.mxu0 %v15362_v49  ;;  %v15397_v49 = vcombine.low %v9010_v8, %v9018_v33 }
0x1cf9   :  { %12597 = vmatpush2.bf16.msra.mxu1 %v15219_v3  ;;  %v9381_v3 = vld [vmem:[#allocation25 + $0xa70] sm:$0xff] }
0x1cfa   :  { %13431 = vmatpush1.bf16.msra.mxu0 %v15361_v23  ;;  %12598 = vmatprep.subr.bf16.mxu1 %v15204_v7  ;;  %v8978_v7 = vld [vmem:[#allocation23 + $0x1b0] sm:$0xff]  ;;  %v15126_v21 = vcombine.high %v9373_v28, %v9381_v3  ;;  %v15125_v59 = vcombine.low %v9373_v28, %v9381_v3 }
0x1cfb   :  { %13432 = vmatprep.subr.bf16.mxu0 %v15346_v19  ;;  %v8986_v19 = vld [vmem:[#allocation23 + $0x1f0] sm:$0xff] }
0x1cfc   :  { %v15365_v63 = vcombine.low %v8978_v7, %v8986_v19  ;;  %v9549_v28 = vld [vmem:[#allocation25 + $0xfb0] sm:$0xff] }
0x1cfd   :  { %12599 = vmatpush2.bf16.msra.mxu1 %v15203_v15  ;;  %v9557_v3 = vld [vmem:[#allocation25 + $0xff0] sm:$0xff] }
0x1cfe   :  { %13433 = vmatpush1.bf16.msra.mxu0 %v15345_v50  ;;  %12600 = vmatprep.subr.bf16.mxu1 %v15188_v29  ;;  %v15366_v50 = vcombine.high %v8978_v7, %v8986_v19  ;;  %v9357_v29 = vld [vmem:[#allocation25 + $0x9b0] sm:$0xff]  ;;  %v15302_v7 = vcombine.high %v9549_v28, %v9557_v3 }
0x1cff   :  { %13434 = vmatprep.subr.bf16.mxu0 %v15330_v25  ;;  %v9365_v25 = vld [vmem:[#allocation25 + $0x9f0] sm:$0xff] }
0x1d00   :  { %v15110_v1 = vcombine.high %v9357_v29, %v9365_v25  ;;  %v15109_v45 = vcombine.low %v9357_v29, %v9365_v25  ;;  %v9533_v19 = vld [vmem:[#allocation25 + $0xf30] sm:$0xff] }
0x1d01   :  { %12601 = vmatpush2.bf16.msra.mxu1 %v15187_v17  ;;  %v21306_v60 = vpop.f32.mrf.mxu0  ;;  %v15350_v17 = vcombine.high %v8962_v62, %v8970_v39  ;;  %v9501_v25 = vld [vmem:[#allocation25 + $0xe30] sm:$0xff] }
0x1d02   :  { %13435 = vmatpush1.bf16.msra.mxu0 %v15329_v30  ;;  %12652 = vmatprep.subr.bf16.mxu1 %v15174_v5  ;;  %v9349_v30 = vld [vmem:[#allocation25 + $0x970] sm:$0xff] }
0x1d03   :  { %13436 = vmatprep.subr.bf16.mxu0 %v15314_v20  ;;  %v21308_v41 = vpop.f32.mrf.mxu0  ;;  %v8946_v5 = vld [vmem:[#allocation23 + $0xb0] sm:$0xff]  ;;  %v15094_v8 = vcombine.high %v9341_v9, %v9349_v30  ;;  %v15093_v11 = vcombine.low %v9341_v9, %v9349_v30 }
0x1d04   :  { %12603 = vmatmul.mubr.bf16.vlgmr.msra.gmra.mxu1 %v21244_v44  ;;  %v21311_v13 = vpop.f32.mrf.mxu1  ;;  %v8954_v20 = vld [vmem:[#allocation23 + $0xf0] sm:$0xff] }
0x1d05   :  { %12653 = vmatpush1.bf16.msra.mxu1 %v15173_v32  ;;  %12684 = vmatprep.mubr.bf16.mxu1 %v21232_v35  ;;  %v12567_v10 = vpop.f32.mrf.mxu0  ;;  %v15334_v33 = vcombine.high %v8946_v5, %v8954_v20  ;;  %v9325_v32 = vld [vmem:[#allocation25 + $0x8b0] sm:$0xff]  ;;  %v15333_v36 = vcombine.low %v8946_v5, %v8954_v20 }
0x1d06   :  { %13437 = vmatpush1.bf16.msra.mxu0 %v15313_v16  ;;  %12654 = vmatprep.subr.bf16.mxu1 %v15158_v38  ;;  %v21314_v51 = vpop.f32.mrf.mxu1  ;;  %v9333_v16 = vld [vmem:[#allocation25 + $0x8f0] sm:$0xff] }
0x1d07   :  { %13508 = vmatprep.subr.bf16.mxu0 %v15398_v42  ;;  %v12568_v23 = vpop.f32.mrf.mxu0  ;;  %v8930_v38 = vld [vmem:[#allocation23 + $0x30] sm:$0xff]  ;;  %v15078_v52 = vcombine.high %v9325_v32, %v9333_v16 }
0x1d08   :  { %v12362_v48 = vpop.f32.mrf.mxu1  ;;  %v8938_v42 = vld [vmem:[#allocation23 + $0x70] sm:$0xff] }
0x1d09   :  { %12655 = vmatpush1.bf16.msra.mxu1 %v15157_v34  ;;  %15405 = vmatmul.mubr.msk.bf16.vlgmr.msra.gmra.mxu0 %vm7818_vm7, %v21294_v37  ;;  %v15318_v26 = vcombine.high %v8930_v38, %v8938_v42  ;;  %v9309_v34 = vld [vmem:[#allocation25 + $0x830] sm:$0xff] }
0x1d0a   :  { %13509 = vmatpush1.bf16.msra.mxu0 %v15397_v49  ;;  %12656 = vmatprep.subr.bf16.mxu1 %v15142_v46  ;;  %v12363_v15 = vpop.f32.mrf.mxu1  ;;  %v9317_v10 = vld [vmem:[#allocation25 + $0x870] sm:$0xff]  ;;  %v15077_v49 = vcombine.low %v9325_v32, %v9333_v16  ;;  %v15317_v46 = vcombine.low %v8930_v38, %v8938_v42 }
0x1d0b   :  { %13510 = vmatprep.subr.bf16.mxu0 %v15382_v61  ;;  %13536 = vmatprep.mubr.bf16.mxu0 %v18966_v22  ;;  %v15062_v61 = vcombine.high %v9309_v34, %v9317_v10  ;;  %v15061_v23 = vcombine.low %v9309_v34, %v9317_v10  ;;  %v9541_v48 = vld [vmem:[#allocation25 + $0xf70] sm:$0xff]  ;;  %v9406_v10 = vld [vmem:[#allocation25 + $0xb38] sm:$0xff] }
0x1d0c   :  { %v9525_v15 = vld [vmem:[#allocation25 + $0xef0] sm:$0xff] }
0x1d0d   :  { %12657 = vmatpush1.bf16.msra.mxu1 %v15141_v47  ;;  %v15301_v47 = vcombine.low %v9549_v28, %v9557_v3  ;;  %v9509_v62 = vld [vmem:[#allocation25 + $0xe70] sm:$0xff]  ;;  %v9390_v3 = vld [vmem:[#allocation25 + $0xab8] sm:$0xff] }
0x1d0e   :  { %13511 = vmatpush1.bf16.msra.mxu0 %v15381_v57  ;;  %12658 = vmatprep.subr.bf16.mxu1 %v15126_v21  ;;  %v15286_v57 = vcombine.high %v9533_v19, %v9541_v48  ;;  %v9517_v21 = vld [vmem:[#allocation25 + $0xeb0] sm:$0xff] }
0x1d0f   :  { %13512 = vmatprep.subr.bf16.mxu0 %v15366_v50  ;;  %v15285_v50 = vcombine.low %v9533_v19, %v9541_v48  ;;  %v15270_v29 = vcombine.high %v9517_v21, %v9525_v15  ;;  %v15269_v39 = vcombine.low %v9517_v21, %v9525_v15  ;;  %v9469_v30 = vld [vmem:[#allocation25 + $0xd30] sm:$0xff]  ;;  %v9374_v15 = vld [vmem:[#allocation25 + $0xa38] sm:$0xff] }
0x1d10   :  { %v9477_v5 = vld [vmem:[#allocation25 + $0xd70] sm:$0xff] }
0x1d11   :  { %12659 = vmatpush1.bf16.msra.mxu1 %v15125_v59  ;;  %v15254_v59 = vcombine.high %v9501_v25, %v9509_v62  ;;  %v9437_v16 = vld [vmem:[#allocation25 + $0xc30] sm:$0xff] }
0x1d12   :  { %13513 = vmatpush1.bf16.msra.mxu0 %v15365_v63  ;;  %12660 = vmatprep.subr.bf16.mxu1 %v15110_v1  ;;  %v9485_v63 = vld [vmem:[#allocation25 + $0xdb0] sm:$0xff] }
0x1d13   :  { %13514 = vmatprep.subr.bf16.mxu0 %v15350_v17  ;;  %v9493_v1 = vld [vmem:[#allocation25 + $0xdf0] sm:$0xff]  ;;  %v15253_v17 = vcombine.low %v9501_v25, %v9509_v62 }
0x1d14   :  { %v15238_v9 = vcombine.high %v9485_v63, %v9493_v1  ;;  %v15237_v20 = vcombine.low %v9485_v63, %v9493_v1  ;;  %v9445_v38 = vld [vmem:[#allocation25 + $0xc70] sm:$0xff]  ;;  %v9358_v63 = vld [vmem:[#allocation25 + $0x9b8] sm:$0xff] }
0x1d15   :  { %12661 = vmatpush1.bf16.msra.mxu1 %v15109_v45  ;;  %v15222_v45 = vcombine.high %v9469_v30, %v9477_v5  ;;  %v9366_v1 = vld [vmem:[#allocation25 + $0x9f8] sm:$0xff] }
0x1d16   :  { %13515 = vmatpush1.bf16.msra.mxu0 %v15349_v54  ;;  %12662 = vmatprep.subr.bf16.mxu1 %v15094_v8  ;;  %v9453_v54 = vld [vmem:[#allocation25 + $0xcb0] sm:$0xff] }
0x1d17   :  { %13516 = vmatprep.subr.bf16.mxu0 %v15334_v33  ;;  %v9461_v8 = vld [vmem:[#allocation25 + $0xcf0] sm:$0xff]  ;;  %v15221_v33 = vcombine.low %v9469_v30, %v9477_v5  ;;  %v9350_v30 = vld [vmem:[#allocation25 + $0x978] sm:$0xff]  ;;  %v15111_v5 = vcombine.low %v9358_v63, %v9366_v1 }
0x1d18   :  { %v15206_v32 = vcombine.high %v9453_v54, %v9461_v8  ;;  %v15205_v42 = vcombine.low %v9453_v54, %v9461_v8  ;;  %v9334_v54 = vld [vmem:[#allocation25 + $0x8f8] sm:$0xff] }
0x1d19   :  { %12663 = vmatpush1.bf16.msra.mxu1 %v15093_v11  ;;  %v15190_v11 = vcombine.high %v9437_v16, %v9445_v38 }
0x1d1a   :  { %13517 = vmatpush1.bf16.msra.mxu0 %v15333_v36  ;;  %12664 = vmatprep.subr.bf16.mxu1 %v15078_v52  ;;  %v9422_v36 = vld [vmem:[#allocation25 + $0xbb8] sm:$0xff] }
0x1d1b   :  { %13518 = vmatprep.subr.bf16.mxu0 %v15318_v26  ;;  %v9430_v52 = vld [vmem:[#allocation25 + $0xbf8] sm:$0xff]  ;;  %v15189_v26 = vcombine.low %v9437_v16, %v9445_v38 }
0x1d1c   :  { %v15176_v34 = vcombine.high %v9422_v36, %v9430_v52  ;;  %v9318_v16 = vld [vmem:[#allocation25 + $0x878] sm:$0xff] }
0x1d1d   :  { %12665 = vmatpush1.bf16.msra.mxu1 %v15077_v49  ;;  %v9414_v49 = vld [vmem:[#allocation25 + $0xb78] sm:$0xff] }
0x1d1e   :  { %13519 = vmatpush1.bf16.msra.mxu0 %v15317_v46  ;;  %12666 = vmatprep.subr.bf16.mxu1 %v15062_v61  ;;  %v15175_v46 = vcombine.low %v9422_v36, %v9430_v52  ;;  %v15160_v28 = vcombine.high %v9406_v10, %v9414_v49  ;;  %v15159_v48 = vcombine.low %v9406_v10, %v9414_v49  ;;  %v9558_v36 = vld [vmem:[#allocation25 + $0xff8] sm:$0xff] }
0x1d1f   :  { %v9542_v10 = vld [vmem:[#allocation25 + $0xf78] sm:$0xff] }
0x1d21   :  { %12667 = vmatpush1.bf16.msra.mxu1 %v15061_v23  ;;  %15407 = vmatmul.mubr.msk.bf16.vlgmr.msra.gmra.mxu0 %vm7818_vm7, %v21294_v37  ;;  %v9398_v23 = vld [vmem:[#allocation25 + $0xaf8] sm:$0xff] }
0x1d22   :  { %12668 = vmatprep.subr.bf16.mxu1 %v15302_v7  ;;  %v15143_v62 = vcombine.low %v9390_v3, %v9398_v23 }
0x1d25   :  { %12669 = vmatpush2.bf16.msra.mxu1 %v15301_v47 }
0x1d26   :  { %12670 = vmatprep.subr.bf16.mxu1 %v15286_v57  ;;  %v15144_v57 = vcombine.high %v9390_v3, %v9398_v23  ;;  %v9526_v3 = vld [vmem:[#allocation25 + $0xef8] sm:$0xff] }
0x1d29   :  { %12671 = vmatpush2.bf16.msra.mxu1 %v15285_v50  ;;  %v9382_v50 = vld [vmem:[#allocation25 + $0xa78] sm:$0xff] }
0x1d2a   :  { %12672 = vmatprep.subr.bf16.mxu1 %v15270_v29 }
0x1d2d   :  { %12673 = vmatpush2.bf16.msra.mxu1 %v15269_v39  ;;  %v15128_v39 = vcombine.high %v9374_v15, %v9382_v50 }
0x1d2e   :  { %12674 = vmatprep.subr.bf16.mxu1 %v15254_v59 }
0x1d31   :  { %12675 = vmatpush2.bf16.msra.mxu1 %v15253_v17  ;;  %v15127_v17 = vcombine.low %v9374_v15, %v9382_v50 }
0x1d32   :  { %12676 = vmatprep.subr.bf16.mxu1 %v15238_v9  ;;  %v9342_v9 = vld [vmem:[#allocation25 + $0x938] sm:$0xff] }
0x1d33   :  { %v15095_v8 = vcombine.low %v9342_v9, %v9350_v30 }
0x1d35   :  { %12677 = vmatpush2.bf16.msra.mxu1 %v15237_v20  ;;  %v15096_v20 = vcombine.high %v9342_v9, %v9350_v30  ;;  %v9462_v9 = vld [vmem:[#allocation25 + $0xcf8] sm:$0xff] }
0x1d36   :  { %12678 = vmatprep.subr.bf16.mxu1 %v15222_v45  ;;  %v9326_v45 = vld [vmem:[#allocation25 + $0x8b8] sm:$0xff] }
0x1d37   :  { %v15079_v38 = vcombine.low %v9326_v45, %v9334_v54 }
0x1d39   :  { %12679 = vmatpush2.bf16.msra.mxu1 %v15221_v33  ;;  %v15080_v33 = vcombine.high %v9326_v45, %v9334_v54  ;;  %v9446_v45 = vld [vmem:[#allocation25 + $0xc78] sm:$0xff] }
0x1d3a   :  { %12680 = vmatprep.subr.bf16.mxu1 %v15206_v32  ;;  %v9310_v32 = vld [vmem:[#allocation25 + $0x838] sm:$0xff] }
0x1d3b   :  { %v15063_v52 = vcombine.low %v9310_v32, %v9318_v16 }
0x1d3d   :  { %12681 = vmatpush2.bf16.msra.mxu1 %v15205_v42  ;;  %v15064_v42 = vcombine.high %v9310_v32, %v9318_v16  ;;  %v9013_v32 = vld [vmem:[#allocation23 + $0x2c8] sm:$0xff] }
0x1d3e   :  { %12682 = vmatprep.subr.bf16.mxu1 %v15190_v11  ;;  %v9550_v11 = vld [vmem:[#allocation25 + $0xfb8] sm:$0xff] }
0x1d3f   :  { %v15303_v49 = vcombine.low %v9550_v11, %v9558_v36 }
0x1d41   :  { %12683 = vmatpush2.bf16.msra.mxu1 %v15189_v26  ;;  %v21321_v61 = vpop.f32.mrf.mxu0  ;;  %v15304_v26 = vcombine.high %v9550_v11, %v9558_v36  ;;  %v8997_v11 = vld [vmem:[#allocation23 + $0x248] sm:$0xff] }
0x1d42   :  { %12734 = vmatprep.subr.bf16.mxu1 %v15176_v34  ;;  %v9534_v34 = vld [vmem:[#allocation25 + $0xf38] sm:$0xff] }
0x1d43   :  { %v21323_v7 = vpop.f32.mrf.mxu0  ;;  %v15287_v23 = vcombine.low %v9534_v34, %v9542_v10 }
0x1d44   :  { %12685 = vmatmul.mubr.bf16.vlgmr.msra.gmra.mxu1 %v21244_v44  ;;  %v21326_v19 = vpop.f32.mrf.mxu1 }
0x1d45   :  { %12735 = vmatpush1.bf16.msra.mxu1 %v15175_v46  ;;  %12766 = vmatprep.mubr.bf16.mxu1 %v21232_v35  ;;  %v12649_v47 = vpop.f32.mrf.mxu0  ;;  %v15112_v35 = vcombine.high %v9358_v63, %v9366_v1  ;;  %v15288_v46 = vcombine.high %v9534_v34, %v9542_v10  ;;  %v9478_v63 = vld [vmem:[#allocation25 + $0xd78] sm:$0xff]  ;;  %v8973_v34 = vld [vmem:[#allocation23 + $0x188] sm:$0xff] }
0x1d46   :  { %12736 = vmatprep.subr.bf16.mxu1 %v15160_v28  ;;  %v21329_v21 = vpop.f32.mrf.mxu1  ;;  %v9518_v28 = vld [vmem:[#allocation25 + $0xeb8] sm:$0xff]  ;;  %v8981_v10 = vld [vmem:[#allocation23 + $0x1c8] sm:$0xff] }
0x1d47   :  { %v12650_v29 = vpop.f32.mrf.mxu0  ;;  %v9502_v47 = vld [vmem:[#allocation25 + $0xe38] sm:$0xff]  ;;  %v15271_v15 = vcombine.low %v9518_v28, %v9526_v3 }
0x1d48   :  { %v12444_v25 = vpop.f32.mrf.mxu1  ;;  %v9486_v29 = vld [vmem:[#allocation25 + $0xdb8] sm:$0xff] }
0x1d49   :  { %12737 = vmatpush1.bf16.msra.mxu1 %v15159_v48  ;;  %v15272_v48 = vcombine.high %v9518_v28, %v9526_v3  ;;  %v9494_v25 = vld [vmem:[#allocation25 + $0xdf8] sm:$0xff] }
0x1d4a   :  { %12738 = vmatprep.subr.bf16.mxu1 %v15144_v57  ;;  %v12445_v59 = vpop.f32.mrf.mxu1  ;;  %v9510_v57 = vld [vmem:[#allocation25 + $0xe78] sm:$0xff]  ;;  %v15239_v1 = vcombine.low %v9486_v29, %v9494_v25 }
0x1d4b   :  { %v15256_v50 = vcombine.high %v9502_v47, %v9510_v57  ;;  %v9470_v59 = vld [vmem:[#allocation25 + $0xd38] sm:$0xff] }
0x1d4c   :  { %v15223_v30 = vcombine.low %v9470_v59, %v9478_v63 }
0x1d4d   :  { %12739 = vmatpush1.bf16.msra.mxu1 %v15143_v62  ;;  %v15255_v62 = vcombine.low %v9502_v47, %v9510_v57  ;;  %v8957_v47 = vld [vmem:[#allocation23 + $0x108] sm:$0xff] }
0x1d4e   :  { %12740 = vmatprep.subr.bf16.mxu1 %v15128_v39  ;;  %v15240_v39 = vcombine.high %v9486_v29, %v9494_v25  ;;  %v8965_v57 = vld [vmem:[#allocation23 + $0x148] sm:$0xff]  ;;  %v15355_v29 = vcombine.low %v8973_v34, %v8981_v10 }
0x1d4f   :  { %v15340_v25 = vcombine.high %v8957_v47, %v8965_v57 }
0x1d51   :  { %12741 = vmatpush1.bf16.msra.mxu1 %v15127_v17  ;;  %v15224_v17 = vcombine.high %v9470_v59, %v9478_v63  ;;  %v15339_v59 = vcombine.low %v8957_v47, %v8965_v57  ;;  %v8975_v47 = vld [vmem:[#allocation23 + $0x198] sm:$0xff] }
0x1d52   :  { %12742 = vmatprep.subr.bf16.mxu1 %v15112_v35  ;;  %v9454_v35 = vld [vmem:[#allocation25 + $0xcb8] sm:$0xff] }
0x1d53   :  { %v15207_v54 = vcombine.low %v9454_v35, %v9462_v9  ;;  %v8983_v57 = vld [vmem:[#allocation23 + $0x1d8] sm:$0xff] }
0x1d55   :  { %12743 = vmatpush1.bf16.msra.mxu1 %v15111_v5  ;;  %v15208_v5 = vcombine.high %v9454_v35, %v9462_v9  ;;  %v18417_v35 = vld [vmem:[#allocation28 + $0x78] sm:$0xff]  }
0x1d56   :  { %12744 = vmatprep.subr.bf16.mxu1 %v15096_v20  ;;  %v9438_v20 = vld [vmem:[#allocation25 + $0xc38] sm:$0xff]  ;;  %16966 = vmatprep.subr.bf16.mxu0 %v18417_v35 }
0x1d57   :  { %v15191_v16 = vcombine.low %v9438_v20, %v9446_v45  ;;  %v8951_v35 = vld [vmem:[#allocation23 + $0xd8] sm:$0xff] }
0x1d59   :  { %12745 = vmatpush1.bf16.msra.mxu1 %v15095_v8  ;;  %v15192_v8 = vcombine.high %v9438_v20, %v9446_v45  ;;  %v9007_v20 = vld [vmem:[#allocation23 + $0x298] sm:$0xff] }
0x1d5a   :  { %12746 = vmatprep.subr.bf16.mxu1 %v15080_v33  ;;  %v9005_v33 = vld [vmem:[#allocation23 + $0x288] sm:$0xff]  ;;  %v9015_v45 = vld [vmem:[#allocation23 + $0x2d8] sm:$0xff] }
0x1d5b   :  { %v15387_v36 = vcombine.low %v9005_v33, %v9013_v32 }
0x1d5d   :  { %12747 = vmatpush1.bf16.msra.mxu1 %v15079_v38  ;;  %v15388_v38 = vcombine.high %v9005_v33, %v9013_v32  ;;  %v18420_v33 = vld [vmem:[#allocation28 + $0x30] sm:$0xff]   ;;  %v15392_v32 = vcombine.high %v9007_v20, %v9015_v45 }
0x1d5e   :  { %12748 = vmatprep.subr.bf16.mxu1 %v15064_v42  ;;  %v8989_v42 = vld [vmem:[#allocation23 + $0x208] sm:$0xff] }
0x1d5f   :  { %v15371_v28 = vcombine.low %v8989_v42, %v8997_v11 }
0x1d61   :  { %12749 = vmatpush1.bf16.msra.mxu1 %v15063_v52 }
0x1d62   :  { %12750 = vmatprep.subr.bf16.mxu1 %v15304_v26  ;;  %v15372_v26 = vcombine.high %v8989_v42, %v8997_v11  ;;  %v12195_v42 = vadd.f32 %v21276_v27, %v21250_v40  ;;  %v18421_v11 = vld [vmem:[#allocation28 + $0x68] sm:$0xff]   ;;  %v18423_v40 = vld [vmem:[#allocation28 + $0x60] sm:$0xff]  }
0x1d65   :  { %12751 = vmatpush2.bf16.msra.mxu1 %v15303_v49 }
0x1d66   :  { %12752 = vmatprep.subr.bf16.mxu1 %v15288_v46 }
0x1d69   :  { %12753 = vmatpush2.bf16.msra.mxu1 %v15287_v23  ;;  %v15356_v23 = vcombine.high %v8973_v34, %v8981_v10  ;;  %v18422_v34 = vld [vmem:[#allocation28 + $0x28] sm:$0xff]   ;;  %v12197_v10 = vadd.f32 %v21279_v6, %v21252_v18  ;;  %v18424_v18 = vld [vmem:[#allocation28 + $0x20] sm:$0xff]   ;;  %v15360_v6 = vcombine.high %v8975_v47, %v8983_v57 }
0x1d6a   :  { %12754 = vmatprep.subr.bf16.mxu1 %v15272_v48 }
0x1d6d   :  { %12755 = vmatpush2.bf16.msra.mxu1 %v15271_v15 }
0x1d6e   :  { %12756 = vmatprep.subr.bf16.mxu1 %v15256_v50 }
0x1d71   :  { %12757 = vmatpush2.bf16.msra.mxu1 %v15255_v62  ;;  %v8941_v62 = vld [vmem:[#allocation23 + $0x88] sm:$0xff] }
0x1d72   :  { %12758 = vmatprep.subr.bf16.mxu1 %v15240_v39  ;;  %v8949_v39 = vld [vmem:[#allocation23 + $0xc8] sm:$0xff] }
0x1d73   :  { %v15324_v63 = vcombine.high %v8941_v62, %v8949_v39  ;;  %v15323_v9 = vcombine.low %v8941_v62, %v8949_v39  ;;  %v18425_v62 = vld [vmem:[#allocation28 + $0x58] sm:$0xff]  }
0x1d74   :  { %v18426_v39 = vld [vmem:[#allocation28 + $0x18] sm:$0xff]  }
0x1d75   :  { %12759 = vmatpush2.bf16.msra.mxu1 %v15239_v1  ;;  %v8925_v1 = vld [vmem:[#allocation23 + $0x8] sm:$0xff] }
0x1d76   :  { %12760 = vmatprep.subr.bf16.mxu1 %v15224_v17  ;;  %v8933_v17 = vld [vmem:[#allocation23 + $0x48] sm:$0xff] }
0x1d79   :  { %12761 = vmatpush2.bf16.msra.mxu1 %v15223_v30  ;;  %v18418_v30 = vld [vmem:[#allocation28 + $0x38] sm:$0xff]  }
0x1d7a   :  { %12762 = vmatprep.subr.bf16.mxu1 %v15208_v5  ;;  %v15308_v5 = vcombine.high %v8925_v1, %v8933_v17  ;;  %16967 = vmatpush3.bf16.msra.mxu0 %v18418_v30  ;;  %v18429_v30 = vld [vmem:[#allocation28 + $0x48] sm:$0xff]  }
0x1d7d   :  { %12763 = vmatpush2.bf16.msra.mxu1 %v15207_v54  ;;  %v18419_v54 = vld [vmem:[#allocation28 + $0x70] sm:$0xff]  }
0x1d7e   :  { %12764 = vmatprep.subr.bf16.mxu1 %v15192_v8  ;;  %v15307_v8 = vcombine.low %v8925_v1, %v8933_v17  ;;  %16968 = vmatprep.subr.bf16.mxu0 %v18419_v54  ;;  %v8943_v17 = vld [vmem:[#allocation23 + $0x98] sm:$0xff] }
0x1d7f   :  { %16969 = vmatpush3.bf16.msra.mxu0 %v18420_v33  ;;  %v8927_v54 = vld [vmem:[#allocation23 + $0x18] sm:$0xff] }
0x1d80   :  { %16970 = vmatprep.subr.bf16.mxu0 %v18421_v11  ;;  %v18430_v33 = vld [vmem:[#allocation28 + $0x8] sm:$0xff]  }
0x1d81   :  { %12765 = vmatpush2.bf16.msra.mxu1 %v15191_v16  ;;  %v21331_v52 = vpop.f32.mrf.mxu0  ;;  %v8991_v16 = vld [vmem:[#allocation23 + $0x218] sm:$0xff] }
0x1d82   :  { %13303 = vmatprep.subr.bf16.mxu1 %v15388_v38  ;;  %v8999_v38 = vld [vmem:[#allocation23 + $0x258] sm:$0xff] }
0x1d83   :  { %v21333_v49 = vpop.f32.mrf.mxu0  ;;  %16971 = vmatpush3.bf16.msra.mxu0 %v18422_v34  ;;  %v9017_v34 = vld [vmem:[#allocation23 + $0x2e8] sm:$0xff] }
0x1d84   :  { %12767 = vmatmul.mubr.bf16.vlgmr.msra.gmra.mxu1 %v21244_v44  ;;  %v21336_v46 = vpop.f32.mrf.mxu1  ;;  %16972 = vmatprep.subr.bf16.mxu0 %v18423_v40 }
0x1d85   :  { %13304 = vmatpush1.bf16.msra.mxu1 %v15387_v36  ;;  %v12731_v3 = vpop.f32.mrf.mxu0  ;;  %13331 = vmatprep.mubr.bf16.mxu1 %v18966_v22 }
0x1d86   :  { %13305 = vmatprep.subr.bf16.mxu1 %v15372_v26  ;;  %v21339_v48 = vpop.f32.mrf.mxu1  ;;  %v15391_v26 = vcombine.low %v9007_v20, %v9015_v45  ;;  %v15376_v3 = vcombine.high %v8991_v16, %v8999_v38  ;;  %v15328_v20 = vcombine.high %v8943_v17, %v8951_v35  ;;  %v13592_v45 = vsub.s32 0, %v21171_v24 }
0x1d87   :  { %v12732_v15 = vpop.f32.mrf.mxu0  ;;  %16973 = vmatpush3.bf16.msra.mxu0 %v18424_v18  ;;  %v9001_v18 = vld [vmem:[#allocation23 + $0x268] sm:$0xff] }
0x1d88   :  { %v12526_v50 = vpop.f32.mrf.mxu1  ;;  %16974 = vmatprep.subr.bf16.mxu0 %v18425_v62 }
0x1d89   :  { %13306 = vmatpush1.bf16.msra.mxu1 %v15371_v28  ;;  %v15375_v50 = vcombine.low %v8991_v16, %v8999_v38  ;;  %v18431_v16 = vld [vmem:[#allocation28 + $0x40] sm:$0xff]   ;;  %v15327_v38 = vcombine.low %v8943_v17, %v8951_v35  ;;  %v8985_v17 = vld [vmem:[#allocation23 + $0x1e8] sm:$0xff] }
0x1d8a   :  { %13307 = vmatprep.subr.bf16.mxu1 %v15356_v23  ;;  %v12527_v44 = vpop.f32.mrf.mxu1 }
0x1d8b   :  { %v8967_v44 = vld [vmem:[#allocation23 + $0x158] sm:$0xff]  ;;  %16975 = vmatpush3.bf16.msra.mxu0 %v18426_v39 }
0x1d8d   :  { %13308 = vmatpush1.bf16.msra.mxu1 %v15355_v29  ;;  %v8959_v29 = vld [vmem:[#allocation23 + $0x118] sm:$0xff] }
0x1d8e   :  { %13309 = vmatprep.subr.bf16.mxu1 %v15340_v25  ;;  %v15344_v1 = vcombine.high %v8959_v29, %v8967_v44 }
0x1d91   :  { %13310 = vmatpush1.bf16.msra.mxu1 %v15339_v59  ;;  %v18427_v59 = vld [vmem:[#allocation28 + $0x50] sm:$0xff]  }
0x1d92   :  { %13311 = vmatprep.subr.bf16.mxu1 %v15324_v63  ;;  %v15359_v63 = vcombine.low %v8975_v47, %v8983_v57  ;;  %16976 = vmatprep.subr.bf16.mxu0 %v18427_v59  ;;  %v13612_v47 = vsub.s32 5, %v21171_v24 }
0x1d95   :  { %13312 = vmatpush1.bf16.msra.mxu1 %v15323_v9  ;;  %v18428_v9 = vld [vmem:[#allocation28 + $0x10] sm:$0xff]  }
0x1d96   :  { %13313 = vmatprep.subr.bf16.mxu1 %v15308_v5  ;;  %v15343_v5 = vcombine.low %v8959_v29, %v8967_v44  ;;  %16977 = vmatpush3.bf16.msra.mxu0 %v18428_v9 }
0x1d97   :  { %16978 = vmatprep.subr.bf16.mxu0 %v18429_v30 }
0x1d99   :  { %v13292_v36 = vpop.f32.mrf.mxu0  ;;  %13314 = vmatpush1.bf16.msra.mxu1 %v15307_v8  ;;  %v8935_v8 = vld [vmem:[#allocation23 + $0x58] sm:$0xff] }
0x1d9a   :  { %v21345_v28 = vadd.f32 %v13292_v36, %v12195_v42  ;;  %13385 = vmatprep.subr.bf16.mxu1 %v15392_v32  ;;  %v21353_v32 = vld [vmem:[#allocation26] sm:$0xff]  ;;  %v15312_v42 = vcombine.high %v8927_v54, %v8935_v8  ;;  %v13596_v36 = vsub.s32 1, %v21171_v24  ;;  %16979 = vmatpush3.bf16.msra.mxu0 %v18430_v33  ;;  %v8969_v33 = vld [vmem:[#allocation23 + $0x168] sm:$0xff] }
0x1d9b   :  { %v13294_v23 = vpop.f32.mrf.mxu0  ;;  %v13593_v11 = vrot.slane %v21353_v32, %v13592_v45  ;;  %16980 = vmatprep.subr.bf16.mxu0 %v18431_v16  ;;  %v13613_v39 = vrot.slane %v21353_v32, %v13612_v47 }
0x1d9c   :  { %v21347_v15 = vadd.f32 %v13294_v23, %v12197_v10  ;;  %15402 = vmatmul.mubr.msk.bf16.vlgmr.msra.gmra.mxu1 %vm7818_vm7, %v21294_v37  ;;  %v18432_v10 = vld [vmem:[#allocation28] sm:$0xff]   ;;  %v15311_v23 = vcombine.low %v8927_v54, %v8935_v8  ;;  %v8961_v8 = vld [vmem:[#allocation23 + $0x128] sm:$0xff] }
0x1d9d   :  { %v13296_v27 = vpop.f32.mrf.mxu0  ;;  %13386 = vmatpush1.bf16.msra.mxu1 %v15391_v26  ;;  %13413 = vmatprep.mubr.bf16.mxu1 %v18966_v22  ;;  %v9009_v26 = vld [vmem:[#allocation23 + $0x2a8] sm:$0xff]  ;;  %v13670_v40 = vadd.f32 %v13593_v11, %v21345_v28  ;;  %v12361_v28 = vadd.f32 %v21314_v51, %v21271_v58 }
0x1d9e   :  { %13387 = vmatprep.subr.bf16.mxu1 %v15376_v3  ;;  %v13608_v3 = vsub.s32 4, %v21171_v24  ;;  %v15396_v57 = vcombine.high %v9009_v26, %v9017_v34  ;;  %v13597_v27 = vrot.slane %v21353_v32, %v13596_v36  ;;  %16981 = vmatpush3.bf16.msra.mxu0 %v18432_v10  ;;  %v15395_v44 = vcombine.low %v9009_v26, %v9017_v34  ;;  %v8945_v11 = vld [vmem:[#allocation23 + $0xa8] sm:$0xff] }
0x1d9f   :  { %v13297_v25 = vpop.f32.mrf.mxu0  ;;  %v8953_v26 = vld [vmem:[#allocation23 + $0xe8] sm:$0xff]  ;;  %v15347_v34 = vcombine.low %v8961_v8, %v8969_v33 }
0x1da0   :  { %v13609_v29 = vrot.slane %v21353_v32, %v13608_v3  ;;  %v15332_v10 = vcombine.high %v8945_v11, %v8953_v26 }
0x1da1   :  { %13388 = vmatpush1.bf16.msra.mxu1 %v15375_v50  ;;  %v8993_v50 = vld [vmem:[#allocation23 + $0x228] sm:$0xff] }
0x1da2   :  { %13389 = vmatprep.subr.bf16.mxu1 %v15360_v6  ;;  %v12359_v6 = vadd.f32 %v21311_v13, %v21269_v56  ;;  %v15380_v59 = vcombine.high %v8993_v50, %v9001_v18  ;;  %v13671_v56 = vadd.f32 %v13597_v27, %v21347_v15  ;;  %v15379_v58 = vcombine.low %v8993_v50, %v9001_v18  ;;  %v9011_v50 = vld [vmem:[#allocation23 + $0x2b8] sm:$0xff] }
0x1da3   :  { %v9019_v18 = vld [vmem:[#allocation23 + $0x2f8] sm:$0xff] }
0x1da4   :  { %v15410_v54 = vmul.f32 -1.442695, %v13671_v56  ;;  %v8995_v56 = vld [vmem:[#allocation23 + $0x238] sm:$0xff] }
0x1da5   :  { %13390 = vmatpush1.bf16.msra.mxu1 %v15359_v63  ;;  %v15409_v63 = vmul.f32 -1.442695, %v13670_v40  ;;  %v15331_v40 = vcombine.low %v8945_v11, %v8953_v26 }
0x1da6   :  { %13391 = vmatprep.subr.bf16.mxu1 %v15344_v1  ;;  %v8977_v1 = vld [vmem:[#allocation23 + $0x1a8] sm:$0xff] }
0x1da7   :  { %18450 = vpow2.f32 %v15409_v63 }
0x1da9   :  { %13392 = vmatpush1.bf16.msra.mxu1 %v15343_v5 }
0x1daa   :  { %13393 = vmatprep.subr.bf16.mxu1 %v15328_v20  ;;  %v15364_v20 = vcombine.high %v8977_v1, %v8985_v17 }
0x1dad   :  { %13394 = vmatpush1.bf16.msra.mxu1 %v15327_v38  ;;  %v15363_v38 = vcombine.low %v8977_v1, %v8985_v17  ;;  %v12523_v17 = vadd.f32 %v21336_v46, %v21302_v43 }
0x1dae   :  { %13395 = vmatprep.subr.bf16.mxu1 %v15312_v42  ;;  %v15348_v42 = vcombine.high %v8961_v8, %v8969_v33 }
0x1db1   :  { %v13374_v25 = vpop.f32.mrf.mxu0  ;;  %13396 = vmatpush1.bf16.msra.mxu1 %v15311_v23  ;;  %v8929_v23 = vld [vmem:[#allocation23 + $0x28] sm:$0xff] }
0x1db2   :  { %v13375_v62 = vadd.f32 %v13374_v25, %v12359_v6  ;;  %13467 = vmatprep.subr.bf16.mxu1 %v15396_v57  ;;  %v8937_v57 = vld [vmem:[#allocation23 + $0x68] sm:$0xff] }
0x1db3   :  { %v13376_v13 = vpop.f32.mrf.mxu0  ;;  %v15316_v27 = vcombine.high %v8929_v23, %v8937_v57 }
0x1db4   :  { %v13674_v35 = vadd.f32 %v13609_v29, %v13375_v62  ;;  %v13377_v9 = vadd.f32 %v13376_v13, %v12361_v28  ;;  %15404 = vmatmul.mubr.msk.bf16.vlgmr.msra.gmra.mxu1 %vm7818_vm7, %v21294_v37  ;;  %v18451_v6 = vpop.eup %18450  ;;  %v21381_v28 = vld [vmem:[#allocation26 + $0x8] sm:$0xff]  ;;  %v15400_v62 = vcombine.high %v9011_v50, %v9019_v18  ;;  %v9003_v13 = vld [vmem:[#allocation23 + $0x278] sm:$0xff] }
0x1db5   :  { %v13378_v30 = vpop.f32.mrf.mxu0  ;;  %13468 = vmatpush1.bf16.msra.mxu1 %v15395_v44  ;;  %13495 = vmatprep.mubr.bf16.mxu1 %v18966_v22  ;;  %v15315_v44 = vcombine.low %v8929_v23, %v8937_v57  ;;  %v13698_v63 = vadd.f32 1.0, %v18451_v6  ;;  %v15384_v43 = vcombine.high %v8995_v56, %v9003_v13 }
0x1db6   :  { %v15413_v51 = vmul.f32 -1.442695, %v13674_v35  ;;  %v13675_v5 = vadd.f32 %v13613_v39, %v13377_v9  ;;  %13469 = vmatprep.subr.bf16.mxu1 %v15380_v59  ;;  %v13625_v9 = vrot.slane %v21381_v28, %v13592_v45  ;;  %v8979_v45 = vld [vmem:[#allocation23 + $0x1b8] sm:$0xff] }
0x1db7   :  { %v13379_v15 = vpop.f32.mrf.mxu0 }
0x1db8   :  { %18452 = vpow2.f32 %v15413_v51  ;;  %v15414_v16 = vmul.f32 -1.442695, %v13675_v5  ;;  %v15399_v5 = vcombine.low %v9011_v50, %v9019_v18  ;;  %v13629_v15 = vrot.slane %v21381_v28, %v13596_v36  ;;  %v8955_v50 = vld [vmem:[#allocation23 + $0xf8] sm:$0xff] }
0x1db9   :  { %13470 = vmatpush1.bf16.msra.mxu1 %v15379_v58 }
0x1dba   :  { %18454 = vpow2.f32 %v15414_v16  ;;  %13471 = vmatprep.subr.bf16.mxu1 %v15364_v20  ;;  %v12525_v20 = vadd.f32 %v21339_v48, %v21304_v31  ;;  %v8987_v16 = vld [vmem:[#allocation23 + $0x1f8] sm:$0xff]  ;;  %v15383_v48 = vcombine.low %v8995_v56, %v9003_v13 }
0x1dbb   :  { %18456 = vpow2.f32 %v15410_v54  ;;  %v15368_v11 = vcombine.high %v8979_v45, %v8987_v16  ;;  %v15367_v23 = vcombine.low %v8979_v45, %v8987_v16 }
0x1dbc   :  { %18458 = vrcp.f32 %v13698_v63 }
0x1dbd   :  { %13472 = vmatpush1.bf16.msra.mxu1 %v15363_v38 }
0x1dbe   :  { %13473 = vmatprep.subr.bf16.mxu1 %v15348_v42 }
0x1dc1   :  { %13474 = vmatpush1.bf16.msra.mxu1 %v15347_v34  ;;  %v8963_v34 = vld [vmem:[#allocation23 + $0x138] sm:$0xff] }
0x1dc2   :  { %13475 = vmatprep.subr.bf16.mxu1 %v15332_v10  ;;  %v8971_v10 = vld [vmem:[#allocation23 + $0x178] sm:$0xff] }
0x1dc3   :  { %v15352_v57 = vcombine.high %v8963_v34, %v8971_v10  ;;  %v15351_v18 = vcombine.low %v8963_v34, %v8971_v10 }
0x1dc4   :  { %v21379_v29 = vpop.f32.mrf.mxu1 }
0x1dc5   :  { %v18453_v25 = vpop.eup %18452  ;;  %13476 = vmatpush1.bf16.msra.mxu1 %v15331_v40  ;;  %v21398_v40 = vld [vmem:[#allocation5] sm:$0xff] }
0x1dc6   :  { %13477 = vmatprep.subr.bf16.mxu1 %v15316_v27  ;;  %v21383_v39 = vpop.f32.mrf.mxu1  ;;  %v13722_v35 = vadd.f32 1.0, %v18453_v25  ;;  %v8947_v27 = vld [vmem:[#allocation23 + $0xb8] sm:$0xff] }
0x1dc7   :  { %v18455_v59 = vpop.eup %18454  ;;  %v15336_v6 = vcombine.high %v8947_v27, %v8955_v50  ;;  %v8931_v25 = vld [vmem:[#allocation23 + $0x38] sm:$0xff]  ;;  %v15335_v63 = vcombine.low %v8947_v27, %v8955_v50 }
0x1dc8   :  { %v18457_v1 = vpop.eup %18456  ;;  %v12608_v30 = vpop.f32.mrf.mxu1  ;;  %v13723_v58 = vadd.f32 1.0, %v18455_v59  ;;  %18460 = vrcp.f32 %v13722_v35 }
0x1dc9   :  { %v13456_v51 = vpop.f32.mrf.mxu0  ;;  %13478 = vmatpush1.bf16.msra.mxu1 %v15315_v44  ;;  %v13699_v8 = vadd.f32 1.0, %v18457_v1  ;;  %v8939_v44 = vld [vmem:[#allocation23 + $0x78] sm:$0xff] }
0x1dca   :  { %v13457_v54 = vadd.f32 %v13456_v51, %v12523_v17  ;;  %13549 = vmatprep.subr.bf16.mxu1 %v15400_v62  ;;  %v12609_v46 = vpop.f32.mrf.mxu1  ;;  %18462 = vrcp.f32 %v13723_v58  ;;  %v18459_v62 = vpop.eup %18458  ;;  %v15320_v1 = vcombine.high %v8931_v25, %v8939_v44  ;;  %v15319_v51 = vcombine.low %v8931_v25, %v8939_v44 }
0x1dcb   :  { %v13458_v33 = vpop.f32.mrf.mxu0 }
0x1dcc   :  { %v13678_v38 = vadd.f32 %v13625_v9, %v13457_v54  ;;  %v13459_v42 = vadd.f32 %v13458_v33, %v12525_v20  ;;  %15406 = vmatmul.mubr.msk.bf16.vlgmr.msra.gmra.mxu1 %vm7818_vm7, %v21294_v37 }
0x1dcd   :  { %v13460_v31 = vpop.f32.mrf.mxu0  ;;  %13550 = vmatpush1.bf16.msra.mxu1 %v15399_v5  ;;  %13577 = vmatprep.mubr.bf16.mxu1 %v18966_v22  ;;  %v13771_v22 = vrot.slane %v21398_v40, %v21175_v53 }
0x1dce   :  { %18464 = vtanh.f32 %v13678_v38  ;;  %v13679_v36 = vadd.f32 %v13629_v15, %v13459_v42  ;;  %13551 = vmatprep.subr.bf16.mxu1 %v15384_v43  ;;  %v13641_v42 = vrot.slane %v21381_v28, %v13608_v3 }
0x1dcf   :  { %18466 = vrcp.f32 %v13699_v8  ;;  %v13461_v26 = vpop.f32.mrf.mxu0  ;;  %v13779_v13 = vcombine.high %v13771_v22, %v13771_v22 }
0x1dd0   :  { %18468 = vtanh.f32 %v13679_v36 }
0x1dd1   :  { %13552 = vmatpush1.bf16.msra.mxu1 %v15383_v48 }
0x1dd2   :  { %13553 = vmatprep.subr.bf16.mxu1 %v15368_v11  ;;  %v13645_v11 = vrot.slane %v21381_v28, %v13612_v47 }
0x1dd5   :  { %13554 = vmatpush1.bf16.msra.mxu1 %v15367_v23  ;;  %v18461_v59 = vpop.eup %18460 }
0x1dd6   :  { %13555 = vmatprep.subr.bf16.mxu1 %v15352_v57  ;;  %v13785_v9 = vmul.f32 %v18461_v59, %v13771_v22 }
0x1dd7   :  { %v18463_v56 = vpop.eup %18462 }
0x1dd8   :  { %v13786_v20 = vmul.f32 %v18463_v56, %v13779_v13 }
0x1dd9   :  { %13556 = vmatpush1.bf16.msra.mxu1 %v15351_v18 }
0x1dda   :  { %13557 = vmatprep.subr.bf16.mxu1 %v15336_v6 }
0x1ddb   :  { %v18465_v17 = vpop.eup %18464 }
0x1ddc   :  { %v18467_v35 = vpop.eup %18466  ;;  %v13789_v30 = vmul.f32 %v18465_v17, %v18459_v62  ;;  %v18434_v62 = vld [vmem:[#allocation28 + $0xf8] sm:$0xff]   ;;  %v18437_v17 = vld [vmem:[#allocation28 + $0xb0] sm:$0xff]  }
0x1ddd   :  { %v18469_v58 = vpop.eup %18468  ;;  %13558 = vmatpush1.bf16.msra.mxu1 %v15335_v63  ;;  %v18435_v63 = vld [vmem:[#allocation28 + $0xb8] sm:$0xff]  }
0x1dde   :  { %v21402_v5 = vadd.f32 %v13789_v30, %v13785_v9  ;;  %v13790_v54 = vmul.f32 %v18469_v58, %v18467_v35  ;;  %13559 = vmatprep.subr.bf16.mxu1 %v15320_v1  ;;  %v18436_v1 = vld [vmem:[#allocation28 + $0xf0] sm:$0xff]   ;;  %v18438_v35 = vld [vmem:[#allocation28 + $0xe8] sm:$0xff]   ;;  %v18440_v30 = vld [vmem:[#allocation28 + $0xe0] sm:$0xff]  }
0x1ddf   :  { %v18439_v9 = vld [vmem:[#allocation28 + $0xa8] sm:$0xff]   ;;  %v18441_v58 = vld [vmem:[#allocation28 + $0xa0] sm:$0xff]  }
0x1de0   :  { %v21404_v15 = vadd.f32 %v13790_v54, %v13786_v20  ;;  %v18443_v20 = vld [vmem:[#allocation28 + $0x98] sm:$0xff]   ;;  %v18444_v54 = vld [vmem:[#allocation28 + $0xd0] sm:$0xff]  }
0x1de1   :  { %v13538_v43 = vpop.f32.mrf.mxu0  ;;  %13560 = vmatpush1.bf16.msra.mxu1 %v15319_v51  ;;  %v18442_v51 = vld [vmem:[#allocation28 + $0xd8] sm:$0xff]  }
0x1de2   :  { %v13832_v46 = vcombine.low %v21402_v5, %v21404_v15  ;;  %16988 = vmatprep.subr.bf16.mxu1 %v18434_v62 }
0x1de3   :  { %v13540_v8 = vpop.f32.mrf.mxu0 }
0x1de4   :  { %15408 = vmatmul.mubr.msk.bf16.vlgmr.msra.gmra.mxu1 %vm7818_vm7, %v21294_v37 }
0x1de5   :  { %v13542_v33 = vpop.f32.mrf.mxu0  ;;  %16989 = vmatpush3.bf16.msra.mxu1 %v18435_v63 }
0x1de6   :  { %16990 = vmatprep.subr.bf16.mxu1 %v18436_v1 }
0x1de7   :  { %v13543_v45 = vpop.f32.mrf.mxu0 }
0x1de8   :  { %v18447_v45 = vld [vmem:[#allocation28 + $0x88] sm:$0xff]  }
0x1de9   :  { %16991 = vmatpush3.bf16.msra.mxu1 %v18437_v17 }
0x1dea   :  { %16992 = vmatprep.subr.bf16.mxu1 %v18438_v35 }
0x1ded   :  { %16993 = vmatpush3.bf16.msra.mxu1 %v18439_v9 }
0x1dee   :  { %16994 = vmatprep.subr.bf16.mxu1 %v18440_v30 }
0x1df1   :  { %16995 = vmatpush3.bf16.msra.mxu1 %v18441_v58 }
0x1df2   :  { %16996 = vmatprep.subr.bf16.mxu1 %v18442_v51 }
0x1df5   :  { %16997 = vmatpush3.bf16.msra.mxu1 %v18443_v20  ;;  %v12605_v20 = vadd.f32 %v21379_v29, %v21306_v60 }
0x1df6   :  { %16998 = vmatprep.subr.bf16.mxu1 %v18444_v54 }
0x1e04   :  { %v12686_v16 = vpop.f32.mrf.mxu1 }
0x1e05   :  { %v12687_v38 = vadd.f32 %v12686_v16, %v21321_v61 }
0x1e06   :  { %v12688_v31 = vpop.f32.mrf.mxu1 }
0x1e07   :  { %v13539_v48 = vadd.f32 %v13538_v43, %v12687_v38  ;;  %v12689_v36 = vadd.f32 %v12688_v31, %v21323_v7  ;;  %v18445_v43 = vld [vmem:[#allocation28 + $0x90] sm:$0xff]   ;;  %v18448_v38 = vld [vmem:[#allocation28 + $0xc0] sm:$0xff]  }
0x1e08   :  { %v12690_v26 = vpop.f32.mrf.mxu1  ;;  %16999 = vmatpush3.bf16.msra.mxu1 %v18445_v43  ;;  %v18449_v31 = vld [vmem:[#allocation28 + $0x80] sm:$0xff]  }
0x1e09   :  { %v13682_v34 = vadd.f32 %v13641_v42, %v13539_v48  ;;  %v13541_v37 = vadd.f32 %v13540_v8, %v12689_v36  ;;  %v18446_v8 = vld [vmem:[#allocation28 + $0xc8] sm:$0xff]  }
0x1e0a   :  { %v12691_v10 = vpop.f32.mrf.mxu1  ;;  %17000 = vmatprep.subr.bf16.mxu1 %v18446_v8 }
0x1e0b   :  { %v15417_v23 = vmul.f32 -1.442695, %v13682_v34  ;;  %v13683_v57 = vadd.f32 %v13645_v11, %v13541_v37  ;;  %v13600_v37 = vsub.s32 2, %v21171_v24  ;;  %v12277_v10 = vadd.f32 %v21288_v55, %v21258_v2 }
0x1e0c   :  { %17001 = vmatpush3.bf16.msra.mxu1 %v18447_v45 }
0x1e0d   :  { %18470 = vpow2.f32 %v15417_v23  ;;  %v15418_v61 = vmul.f32 -1.442695, %v13683_v57  ;;  %17002 = vmatprep.subr.bf16.mxu1 %v18448_v38  ;;  %v13601_v57 = vrot.slane %v21353_v32, %v13600_v37  ;;  %v13633_v43 = vrot.slane %v21381_v28, %v13600_v37 }
0x1e0e   :  { %v12607_v38 = vadd.f32 %v21383_v39, %v21308_v41  ;;  %v13764_v37 = vcombine.high %v21398_v40, %v21398_v40 }
0x1e0f   :  { %18472 = vpow2.f32 %v15418_v61  ;;  %v13604_v61 = vsub.s32 3, %v21171_v24 }
0x1e10   :  { %18474 = vtanh.f32 %v21402_v5  ;;  %17003 = vmatpush3.bf16.msra.mxu1 %v18449_v31  ;;  %v13778_v41 = vrot.slane %v13764_v37, %v21175_v53 }
0x1e11   :  { %v13637_v31 = vrot.slane %v21381_v28, %v13604_v61 }
0x1e1a   :  { %v18471_v27 = vpop.eup %18470 }
0x1e1b   :  { %v13750_v50 = vadd.f32 1.0, %v18471_v27  ;;  %v13616_v27 = vsub.s32 6, %v21171_v24 }
0x1e1c   :  { %v18473_v3 = vpop.eup %18472 }
0x1e1d   :  { %18476 = vrcp.f32 %v13750_v50  ;;  %v13751_v7 = vadd.f32 1.0, %v18473_v3  ;;  %v18475_v47 = vpop.eup %18474  ;;  %v12279_v50 = vadd.f32 %v21291_v14, %v21260_v4  ;;  %v13620_v3 = vsub.s32 7, %v21171_v24 }
0x1e1e   :  { %18478 = vtanh.f32 %v21404_v15  ;;  %v13617_v2 = vrot.slane %v21353_v32, %v13616_v27  ;;  %v13649_v40 = vrot.slane %v21381_v28, %v13616_v27 }
0x1e1f   :  { %18480 = vrcp.f32 %v13751_v7  ;;  %v13621_v4 = vrot.slane %v21353_v32, %v13620_v3 }
0x1e2a   :  { %v18477_v18 = vpop.eup %18476 }
0x1e2b   :  { %v18479_v22 = vpop.eup %18478  ;;  %v21420_v25 = vmul.f32 %v18477_v18, %v18475_v47  ;;  %v13605_v18 = vrot.slane %v21353_v32, %v13604_v61 }
0x1e2c   :  { %v18481_v6 = vpop.eup %18480 }
0x1e2d   :  { %v21422_v44 = vmul.f32 %v18481_v6, %v18479_v22  ;;  %v13851_v13 = vpack.c.bf16 %v21420_v25, %v21420_v25  ;;  %v12441_v22 = vadd.f32 %v21326_v19, %v21281_v0  ;;  %v12443_v6 = vadd.f32 %v21329_v21, %v21283_v12 }
0x1e2f   :  { %v13852_v59 = vpack.c.bf16 %v21422_v44, %v21422_v44  ;;  %v13809_v56 = vcombine.low %v21420_v25, %v21422_v44 }
0x1e31   :  { %14150 = vmatprep.mubr.bf16.mxu0 %v13852_v59 }
0x1e32   :  { %14151 = vmatmul.mubr.bf16.vlgmr.msra.gmra.mxu0 %v13851_v13 }
0x1e44   :  { %v21430_v33 = vpop.f32.mrf.mxu1 }
0x1e46   :  { %v21432_v16 = vpop.f32.mrf.mxu1 }
0x1e48   :  { %v12772_v42 = vpop.f32.mrf.mxu1 }
0x1e4a   :  { %v12773_v48 = vpop.f32.mrf.mxu1 }
0x1e5c   :  { %v13333_v36 = vpop.f32.mrf.mxu1 }
0x1e5d   :  { %v13334_v23 = vadd.f32 %v13333_v36, %v12277_v10 }
0x1e5e   :  { %v13335_v11 = vpop.f32.mrf.mxu1 }
0x1e5f   :  { %v13672_v7 = vadd.f32 %v13601_v57, %v13334_v23  ;;  %v13336_v47 = vadd.f32 %v13335_v11, %v12279_v50  ;;  %v13780_v57 = vcombine.high %v13778_v41, %v13778_v41 }
0x1e60   :  { %v13337_v26 = vpop.f32.mrf.mxu1 }
0x1e61   :  { %v15411_v14 = vmul.f32 -1.442695, %v13672_v7  ;;  %v13673_v59 = vadd.f32 %v13605_v18, %v13336_v47 }
0x1e62   :  { %v13338_v34 = vpop.f32.mrf.mxu1 }
0x1e63   :  { %18482 = vpow2.f32 %v15411_v14  ;;  %v15412_v35 = vmul.f32 -1.442695, %v13673_v59  ;;  %v12771_v14 = vadd.f32 %v21432_v16, %v21333_v49 }
0x1e70   :  { %v18483_v12 = vpop.eup %18482 }
0x1e71   :  { %v13700_v51 = vadd.f32 1.0, %v18483_v12 }
0x1e74   :  { %v13415_v55 = vpop.f32.mrf.mxu1 }
0x1e75   :  { %v13416_v62 = vadd.f32 %v13415_v55, %v12441_v22 }
0x1e76   :  { %v13417_v63 = vpop.f32.mrf.mxu1 }
0x1e77   :  { %v13676_v13 = vadd.f32 %v13617_v2, %v13416_v62  ;;  %v13418_v1 = vadd.f32 %v13417_v63, %v12443_v6  ;;  %v12769_v6 = vadd.f32 %v21430_v33, %v21331_v52  ;;  %v13653_v63 = vrot.slane %v21381_v28, %v13620_v3 }
0x1e78   :  { %v13419_v17 = vpop.f32.mrf.mxu1  ;;  %v13840_v52 = vrot.slane %v13832_v46, %v21175_v53 }
0x1e79   :  { %v15415_v0 = vmul.f32 -1.442695, %v13676_v13  ;;  %v13677_v19 = vadd.f32 %v13621_v4, %v13418_v1 }
0x1e7a   :  { %v13420_v9 = vpop.f32.mrf.mxu1 }
0x1e7b   :  { %18484 = vpow2.f32 %v15415_v0  ;;  %v15416_v30 = vmul.f32 -1.442695, %v13677_v19 }
0x1e7d   :  { %18486 = vpow2.f32 %v15416_v30 }
0x1e7e   :  { %18488 = vpow2.f32 %v15412_v35 }
0x1e7f   :  { %18490 = vrcp.f32 %v13700_v51 }
0x1e88   :  { %v18485_v21 = vpop.eup %18484 }
0x1e89   :  { %v13724_v54 = vadd.f32 1.0, %v18485_v21 }
0x1e8a   :  { %v18487_v58 = vpop.eup %18486 }
0x1e8b   :  { %v18489_v32 = vpop.eup %18488  ;;  %v13725_v8 = vadd.f32 1.0, %v18487_v58  ;;  %18492 = vrcp.f32 %v13724_v54  ;;  %v13817_v54 = vrot.slane %v13809_v56, %v21175_v53 }
0x1e8c   :  { %v13497_v45 = vpop.f32.mrf.mxu1  ;;  %v13701_v48 = vadd.f32 1.0, %v18489_v32  ;;  %v18491_v39 = vpop.eup %18490 }
0x1e8d   :  { %v13498_v42 = vadd.f32 %v13497_v45, %v12605_v20  ;;  %18494 = vrcp.f32 %v13725_v8 }
0x1e8e   :  { %v13499_v36 = vpop.f32.mrf.mxu1 }
0x1e8f   :  { %v13680_v11 = vadd.f32 %v13633_v43, %v13498_v42  ;;  %v13500_v26 = vadd.f32 %v13499_v36, %v12607_v38 }
0x1e90   :  { %v13501_v34 = vpop.f32.mrf.mxu1 }
0x1e91   :  { %18496 = vtanh.f32 %v13680_v11  ;;  %v13681_v60 = vadd.f32 %v13637_v31, %v13500_v26 }
0x1e92   :  { %18498 = vrcp.f32 %v13701_v48  ;;  %v13502_v29 = vpop.f32.mrf.mxu1 }
0x1e93   :  { %18500 = vtanh.f32 %v13681_v60 }
0x1e98   :  { %v18493_v10 = vpop.eup %18492 }
0x1e99   :  { %v13787_v7 = vmul.f32 %v18493_v10, %v13778_v41 }
0x1e9a   :  { %v18495_v23 = vpop.eup %18494 }
0x1e9b   :  { %v13788_v2 = vmul.f32 %v18495_v23, %v13780_v57 }
0x1e9e   :  { %v18497_v61 = vpop.eup %18496 }
0x1e9f   :  { %v18499_v50 = vpop.eup %18498  ;;  %v13791_v47 = vmul.f32 %v18497_v61, %v18491_v39 }
0x1ea0   :  { %v18501_v18 = vpop.eup %18500 }
0x1ea1   :  { %v13795_v22 = vadd.f32 %v13791_v47, %v13787_v7  ;;  %v13792_v55 = vmul.f32 %v18501_v18, %v18499_v50 }
0x1ea3   :  { %v13796_v62 = vadd.f32 %v13792_v55, %v13788_v2 }
0x1ea4   :  { %v13579_v4 = vpop.f32.mrf.mxu1 }
0x1ea5   :  { %v13580_v59 = vadd.f32 %v13579_v4, %v12769_v6  ;;  %v13833_v13 = vcombine.low %v13795_v22, %v13796_v62 }
0x1ea6   :  { %v13581_v1 = vpop.f32.mrf.mxu1 }
0x1ea7   :  { %v13684_v17 = vadd.f32 %v13649_v40, %v13580_v59  ;;  %v13582_v0 = vadd.f32 %v13581_v1, %v12771_v14  ;;  %v13847_v33 = vrot.slane %v13833_v13, %v21175_v53 }
0x1ea8   :  { %v13583_v27 = vpop.f32.mrf.mxu1 }
0x1ea9   :  { %v15419_v19 = vmul.f32 -1.442695, %v13684_v17  ;;  %v13685_v35 = vadd.f32 %v13653_v63, %v13582_v0  ;;  %v13848_v49 = vcombine.low %v13840_v52, %v13847_v33 }
0x1eaa   :  { %v13584_v16 = vpop.f32.mrf.mxu1 }
0x1eab   :  { %18502 = vpow2.f32 %v15419_v19  ;;  %v15420_v24 = vmul.f32 -1.442695, %v13685_v35  ;;  %13850 = vst [vmem:[#allocation32] sm:$0xff] %v13848_v49 }
0x1ead   :  { %18504 = vpow2.f32 %v15420_v24 }
0x1eae   :  { %18506 = vtanh.f32 %v13795_v22 }
0x1eb8   :  { %v18503_v28 = vpop.eup %18502 }
0x1eb9   :  { %v13752_v3 = vadd.f32 1.0, %v18503_v28 }
0x1eba   :  { %v18505_v9 = vpop.eup %18504 }
0x1ebb   :  { %18508 = vrcp.f32 %v13752_v3  ;;  %v13753_v30 = vadd.f32 1.0, %v18505_v9  ;;  %v18507_v5 = vpop.eup %18506 }
0x1ebc   :  { %18510 = vtanh.f32 %v13796_v62 }
0x1ebd   :  { %18512 = vrcp.f32 %v13753_v30 }
0x1ec8   :  { %v18509_v15 = vpop.eup %18508 }
0x1ec9   :  { %v18511_v46 = vpop.eup %18510  ;;  %v13803_v12 = vmul.f32 %v18509_v15, %v18507_v5 }
0x1eca   :  { %v18513_v21 = vpop.eup %18512 }
0x1ecb   :  { %v13804_v58 = vmul.f32 %v18513_v21, %v18511_v46  ;;  %v13853_v20 = vpack.c.bf16 %v13803_v12, %v13803_v12 }
0x1ecd   :  { %v13854_v51 = vpack.c.bf16 %v13804_v58, %v13804_v58  ;;  %v13810_v32 = vcombine.low %v13803_v12, %v13804_v58 }
0x1ecf   :  { %14190 = vmatprep.mubr.bf16.mxu1 %v13854_v51  ;;  %v13824_v43 = vrot.slane %v13810_v32, %v21175_v53 }
0x1ed0   :  { %14191 = vmatmul.mubr.bf16.vlgmr.msra.gmra.mxu1 %v13853_v20 }
0x1ed1   :  { %v13825_v8 = vcombine.low %v13817_v54, %v13824_v43 }
0x1ed3   :  { %13827 = vst [vmem:[#allocation31] sm:$0xff] %v13825_v8 }
0x1ef2   :  { %v16982_v45 = vpop.f32.mrf.mxu0 }
0x1ef4   :  { %v16983_v38 = vpop.f32.mrf.mxu0 }
0x1ef5   :  { %v16984_v42 = vadd.f32 %v16983_v38, %v16982_v45 }
0x1ef6   :  { %v16985_v31 = vpop.f32.mrf.mxu0 }
0x1ef8   :  { %v16986_v48 = vpop.f32.mrf.mxu0 }
0x1ef9   :  { %18885 = shalt.err (!%p18882_p10)
}
0x1efa   :  { %14210 = dma.vmem_to_hbm [thread:$0]  %s14208_s2, 128, %s21513_s21, [#allocation4]  }
0x1efb   :  { %s18894_s7 = scalar_lea.vmem %s14218_s29, 128  ;;  %p18899_p12 = scmp.lt.s32.totalorder %s14218_s29, %s14218_s29 }
0x1efc   :  { %p18895_p11 = scmp.ne.s32.totalorder %s14218_s29, %s18894_s7  ;;  %p18900_p13 = scmp.lt.s32.totalorder %s18894_s7, %s18894_s7 }
0x1efe   :  { %p18901_p0 = por %p18900_p13, %p18899_p12 }
0x1f00   :  { %p18902_p1 = pnand %p18901_p0, %p18895_p11 }
0x1f02   :  { %18905 = shalt.err (!%p18902_p1)
}
0x1f03   :  { %14220 = dma.vmem_to_hbm [thread:$0]  %s14218_s29, 128, %s21514_s22, [#allocation33]   ;;  %v15421_v53 = vld [vmem:[#allocation29] ss:$0 sm:$0xff] }
0x1f04   :  { %v14153_v56 = vadd.f32 %v16984_v42, %v15421_v53 }
0x1f90   :  { %v17004_v25 = vpop.f32.mrf.mxu1 }
0x1f92   :  { %v17005_v44 = vpop.f32.mrf.mxu1 }
0x1f93   :  { %v17006_v36 = vadd.f32 %v17005_v44, %v17004_v25 }
0x1f94   :  { %v17007_v11 = vpop.f32.mrf.mxu1 }
0x1f95   :  { %v14193_v26 = vadd.f32 %v17006_v36, %v14153_v56 }
0x1f96   :  { %v17008_v34 = vpop.f32.mrf.mxu1 }
0x1f97   :  { %14198 = vst [vmem:[%s21512_s20] sm:$0x3] %v14193_v26 }
0x1f98   :  { %18934 = dma.done.wait [#allocation4], 128  }
0x1f99   :  { %18935 = vsyncadd [#allocation4], 4294967168 }
0x1f9a   :  { %18936 = dma.done.wait [#allocation33], 128  }
0x1f9b   :  { %18937 = vsyncadd [#allocation33], 4294967168 }
0x1f9c   :  { %14229 = vsyncpa [#allocation3], 1 }
0x1f9d   :  { %14230 = vsyncpa [#allocation6], 1 }
0x1f9e   :  { %14231 = vsyncpa [#allocation9], 1 }
0x1f9f   :  { %14232 = vsyncpa [#allocation12], 1 }
0x1fa0   :  { %14233 = vsyncpa [#allocation15], 1 }
0x1fa1   :  { %14234 = vsyncpa [#allocation18], 1 }
0x1fa2   :  { %14235 = vsyncpa [#allocation21], 1 }
0x1fa3   :  { %14236 = vsyncpa [#allocation24], 1 }
0x1fa4   :  { %14237 = vsyncpa [#allocation27], 1 }
0x1fa5   :  { %14238 = vsyncpa [#allocation30], 1 }
0x1fa6   :  { %14239 = vsyncpa [#allocation4], 1 }
0x1fa7   :  { %14240 = vsyncpa [#allocation33], 1 }

</bundles_post_ra>
